<compile_context>
chip_gen: v5e
topology: v5e:2x2
jax: 0.10.0
libtpu: 0.0.40
codegen_flags: <defaults>
</compile_context>

<pallas_src>
import functools

import jax
import jax.numpy as jnp
from jax import lax
from jax.experimental import pallas as pl
from jax.experimental.pallas import tpu as pltpu

PAD = 0


def _pick_tile(n, preferred=(512, 256, 128, 64, 32, 16, 8), min_programs=1):
    """Largest preferred tile dividing n, preferring >= min_programs grid steps."""
    for mp in (min_programs, 1):
        for p in preferred:
            if p <= n and n % p == 0 and n // p >= mp:
                return p
    return n


def _vmem_limit(need_bytes):
    """Per-call VMEM limit: double-buffered blocks + headroom, clamped v7x-safe."""
    return int(min(max(2 * need_bytes + (8 << 20), 32 << 20), 56 << 20))


# --------------------------------------------------------------------------- #
# Kernel 1: LSTM (input projection + recurrence fused; time-tiled; batch-split)
# --------------------------------------------------------------------------- #

def _lstm_kernel(*refs, hidden_size, t_tile, bb, use_mask, emit_seq):
    pos = 0
    x_ref = refs[pos]; pos += 1                       # (t_tile*bb, H) bf16
    m_ref = None
    if use_mask:
        m_ref = refs[pos]; pos += 1                   # (t_tile*bb, 1) f32
    h0_ref, c0_ref, wih_ref, b_ref, whh_ref = refs[pos:pos + 5]; pos += 5
    seq_ref = None
    if emit_seq:
        seq_ref = refs[pos]; pos += 1                 # (t_tile*bb, H) f32
    hT_ref, cT_ref, xg_sc = refs[pos:pos + 3]

    H = hidden_size

    # hT/cT blocks have a constant index along the time axis -> VMEM-resident carry.
    @pl.when(pl.program_id(1) == 0)
    def _():
        hT_ref[...] = h0_ref[...]
        cT_ref[...] = c0_ref[...]

    # Input projection for the whole time tile: one healthy MXU matmul, off the serial
    # recurrence path; result parked in VMEM scratch (not vregs).
    xg_sc[...] = (jnp.dot(x_ref[...], wih_ref[...],
                          preferred_element_type=jnp.float32) + b_ref[...])

    def step(base, carry):
        h, c = carry
        # Only the recurrent matmul remains on the serial path.
        gates = xg_sc[pl.ds(base, bb), :] + jnp.dot(
            h.astype(jnp.bfloat16), whh_ref[...], preferred_element_type=jnp.float32)
        i = jax.nn.sigmoid(gates[:, 0 * H:1 * H])
        f = jax.nn.sigmoid(gates[:, 1 * H:2 * H])
        g = jnp.tanh(gates[:, 2 * H:3 * H])
        o = jax.nn.sigmoid(gates[:, 3 * H:4 * H])
        c_new = f * c + i * g
        h_new = o * jnp.tanh(c_new)
        if use_mask:
            # pack_padded semantics: freeze state on PAD steps (select, not blend).
            keep = m_ref[pl.ds(base, bb), :] > 0.0     # (bb, 1)
            h_new = jnp.where(keep, h_new, h)
            c_new = jnp.where(keep, c_new, c)
        if emit_seq:
            seq_ref[pl.ds(base, bb), :] = h_new        # f32 -> dense (8,128) store
        return (h_new, c_new)

    carry = (hT_ref[...], cT_ref[...])
    if t_tile <= 16:
        # Static unroll: lets the scheduler overlap gate VPU/EUP math and the next
        # step's x-gate loads with the MXU drain of the recurrent matmul.
        for t in range(t_tile):
            carry = step(t * bb, carry)
    else:
        def body(t, c):
            return step(pl.multiple_of(t * bb, bb), c)
        carry = lax.fori_loop(0, t_tile, body, carry, unroll=True)

    h_fin, c_fin = carry
    hT_ref[...] = h_fin
    cT_ref[...] = c_fin


def lstm(x_tbh, mask_tb1, h0, c0, w_ih, b, w_hh, *, emit_seq):
    """x_tbh: (T, B, H) bf16 embedded inputs. mask_tb1: (T, B, 1) f32 or None.

    Returns (seq or None, hT, cT); seq is (B, T, H) f32.
    """
    T, B, H = x_tbh.shape
    G = 4 * H
    t_tile = _pick_tile(T, preferred=(32, 16, 8))
    # Megacore / v7x: split the batch across a leading "parallel" grid axis when the
    # halves stay (8, 128)-tileable.
    nb = 2 if (B % 16 == 0) else 1
    bb = B // nb
    use_mask = mask_tb1 is not None

    # Re-pack activations so each (batch-block, time-tile) is a contiguous 2D slab:
    # (T, B, d) -> (nb, T*bb, d), rows ordered (time, batch-within-block).
    def to_blocks(a):
        d = a.shape[-1]
        return a.reshape(T, nb, bb, d).transpose(1, 0, 2, 3).reshape(nb, T * bb, d)

    inputs = [to_blocks(x_tbh)]
    in_specs = [pl.BlockSpec((None, t_tile * bb, H), lambda b_, t: (b_, t, 0))]
    if use_mask:
        inputs.append(to_blocks(mask_tb1))
        in_specs.append(pl.BlockSpec((None, t_tile * bb, 1), lambda b_, t: (b_, t, 0)))
    in_specs += [
        pl.BlockSpec((bb, H), lambda b_, t: (b_, 0)),     # h0
        pl.BlockSpec((bb, H), lambda b_, t: (b_, 0)),     # c0
        pl.BlockSpec((H, G), lambda b_, t: (0, 0)),       # W_ih
        pl.BlockSpec((1, G), lambda b_, t: (0, 0)),       # b (b_ih + b_hh)
        pl.BlockSpec((H, G), lambda b_, t: (0, 0)),       # W_hh
    ]
    inputs += [h0, c0, w_ih, b, w_hh]

    out_shapes, out_specs = [], []
    if emit_seq:
        out_shapes.append(jax.ShapeDtypeStruct((nb, T * bb, H), jnp.float32))
        out_specs.append(pl.BlockSpec((None, t_tile * bb, H), lambda b_, t: (b_, t, 0)))
    out_shapes += [jax.ShapeDtypeStruct((B, H), jnp.float32),
                   jax.ShapeDtypeStruct((B, H), jnp.float32)]
    out_specs += [pl.BlockSpec((bb, H), lambda b_, t: (b_, 0)),
                  pl.BlockSpec((bb, H), lambda b_, t: (b_, 0))]

    kernel = functools.partial(_lstm_kernel, hidden_size=H, t_tile=t_tile, bb=bb,
                               use_mask=use_mask, emit_seq=emit_seq)

    need = (t_tile * bb * H * 2                      # x block bf16
            + (t_tile * bb * 4 if use_mask else 0)   # mask block f32
            + 2 * bb * H * 4                         # h0, c0
            + 2 * H * G * 2 + G * 4                  # W_ih, W_hh bf16 + bias f32
            + (t_tile * bb * H * 4 if emit_seq else 0)
            + 2 * bb * H * 4                         # hT, cT
            + t_tile * bb * G * 4)                   # xg scratch

    outs = pl.pallas_call(
        kernel,
        out_shape=tuple(out_shapes),
        grid_spec=pltpu.PrefetchScalarGridSpec(
            num_scalar_prefetch=0,
            grid=(nb, T // t_tile),
            in_specs=in_specs,
            out_specs=tuple(out_specs),
            scratch_shapes=[pltpu.VMEM((t_tile * bb, G), jnp.float32)],
        ),
        compiler_params=pltpu.CompilerParams(
            dimension_semantics=("parallel", "arbitrary"),
            vmem_limit_bytes=_vmem_limit(need)),
    )(*inputs)

    if emit_seq:
        seq_blk, hT, cT = outs
        # (nb, T*bb, H) -> (B, T, H): the generator consumes batch-major rows directly.
        seq = seq_blk.reshape(nb, T, bb, H).transpose(0, 2, 1, 3).reshape(B, T, H)
    else:
        seq = None
        hT, cT = outs
    return seq, hT, cT


# --------------------------------------------------------------------------- #
# Kernel 2: generator (fc + log_softmax), fully fused; bf16-logits fallback
# --------------------------------------------------------------------------- #

def _generator_fused_kernel(x_ref, w_ref, b_ref, o_ref):
    logits = (jnp.dot(x_ref[...], w_ref[...],
                      preferred_element_type=jnp.float32) + b_ref[...])
    m = jnp.max(logits, axis=-1, keepdims=True)
    lse = m + jnp.log(jnp.sum(jnp.exp(logits - m), axis=-1, keepdims=True))
    o_ref[...] = logits - lse


def _gen_logits_lse_kernel(x_ref, w_ref, b_ref, logits_ref, lse_ref, m_sc, l_sc):
    j = pl.program_id(1)

    @pl.when(j == 0)
    def _():
        m_sc[...] = jnp.full_like(m_sc, -jnp.inf)
        l_sc[...] = jnp.zeros_like(l_sc)

    logits = (jnp.dot(x_ref[...], w_ref[...],
                      preferred_element_type=jnp.float32) + b_ref[...])
    logits_ref[...] = logits.astype(logits_ref.dtype)   # bf16 intermediate

    m_prev = m_sc[...]
    m_new = jnp.maximum(m_prev, jnp.max(logits, axis=-1, keepdims=True))
    l_sc[...] = (l_sc[...] * jnp.exp(m_prev - m_new)
                 + jnp.sum(jnp.exp(logits - m_new), axis=-1, keepdims=True))
    m_sc[...] = m_new

    @pl.when(j == pl.num_programs(1) - 1)
    def _():
        lse_ref[...] = m_sc[...] + jnp.log(l_sc[...])


def _sub_lse_kernel(logits_ref, lse_ref, o_ref):
    o_ref[...] = logits_ref[...].astype(jnp.float32) - lse_ref[...]


def generator(x, w, b):
    n, h = x.shape
    v = w.shape[1]
    tn = _pick_tile(n, preferred=(256, 128, 64, 32, 16, 8), min_programs=2)

    fused_need = tn * h * 2 + h * v * 2 + v * 4 + tn * v * 4
    if fused_need <= (20 << 20):
        # Whole vocab row resident in VMEM: one pass, no logits HBM roundtrip.
        return pl.pallas_call(
            _generator_fused_kernel,
            out_shape=jax.ShapeDtypeStruct((n, v), jnp.float32),
            grid_spec=pltpu.PrefetchScalarGridSpec(
                num_scalar_prefetch=0,
                grid=(n // tn,),
                in_specs=[pl.BlockSpec((tn, h), lambda i: (i, 0)),
                          pl.BlockSpec((h, v), lambda i: (0, 0)),
                          pl.BlockSpec((1, v), lambda i: (0, 0))],
                out_specs=pl.BlockSpec((tn, v), lambda i: (i, 0)),
            ),
            compiler_params=pltpu.CompilerParams(
                dimension_semantics=("parallel",),
                vmem_limit_bytes=_vmem_limit(fused_need)),
        )(x, w, b)

    # Large-vocab fallback: vocab-tiled online logsumexp; intermediate logits in bf16.
    tv = _pick_tile(v, preferred=(2048, 1024, 512, 256, 128))
    grid = (n // tn, v // tv)
    need1 = tn * h * 2 + h * tv * 2 + tv * 4 + tn * tv * 2 + tn * 4 + 2 * tn * 4
    logits, lse = pl.pallas_call(
        _gen_logits_lse_kernel,
        out_shape=(jax.ShapeDtypeStruct((n, v), jnp.bfloat16),
                   jax.ShapeDtypeStruct((n, 1), jnp.float32)),
        grid_spec=pltpu.PrefetchScalarGridSpec(
            num_scalar_prefetch=0,
            grid=grid,
            in_specs=[pl.BlockSpec((tn, h), lambda i, j: (i, 0)),
                      pl.BlockSpec((h, tv), lambda i, j: (0, j)),
                      pl.BlockSpec((1, tv), lambda i, j: (0, j))],
            out_specs=(pl.BlockSpec((tn, tv), lambda i, j: (i, j)),
                       pl.BlockSpec((tn, 1), lambda i, j: (i, 0))),
            scratch_shapes=[pltpu.VMEM((tn, 1), jnp.float32),
                            pltpu.VMEM((tn, 1), jnp.float32)],
        ),
        compiler_params=pltpu.CompilerParams(
            dimension_semantics=("parallel", "arbitrary"),
            vmem_limit_bytes=_vmem_limit(need1)),
    )(x, w, b)

    need2 = tn * tv * 2 + tn * 4 + tn * tv * 4
    return pl.pallas_call(
        _sub_lse_kernel,
        out_shape=jax.ShapeDtypeStruct((n, v), jnp.float32),
        grid_spec=pltpu.PrefetchScalarGridSpec(
            num_scalar_prefetch=0,
            grid=grid,
            in_specs=[pl.BlockSpec((tn, tv), lambda i, j: (i, j)),
                      pl.BlockSpec((tn, 1), lambda i, j: (i, 0))],
            out_specs=pl.BlockSpec((tn, tv), lambda i, j: (i, j)),
        ),
        compiler_params=pltpu.CompilerParams(
            dimension_semantics=("parallel", "parallel"),
            vmem_limit_bytes=_vmem_limit(need2)),
    )(logits, lse)


# ------------------------------- parameters -------------------------------- #

def init_params(key, vocab_size, emb_dim, hidden_size, output_size):
    ks = jax.random.split(key, 10)
    s = 0.1

    def rn(k, shape):
        return s * jax.random.normal(k, shape, dtype=jnp.float32)

    word_vectors = rn(ks[0], (vocab_size, emb_dim))
    emb_proj = rn(ks[1], (emb_dim, hidden_size))       # Linear(E->H), bias=False
    # Dropout(p=0) and the bias-free projection commute with the gather, so folding
    # the projection into the embedding table (one-time) is exact.
    emb_table = jnp.dot(word_vectors, emb_proj).astype(jnp.bfloat16)

    return {
        "emb_table": emb_table,                                            # (V, H) bf16
        "enc_wih": rn(ks[2], (hidden_size, 4 * hidden_size)).astype(jnp.bfloat16),
        "enc_whh": rn(ks[3], (hidden_size, 4 * hidden_size)).astype(jnp.bfloat16),
        "enc_b":   rn(ks[4], (1, 4 * hidden_size)),                        # b_ih + b_hh folded
        "dec_wih": rn(ks[5], (hidden_size, 4 * hidden_size)).astype(jnp.bfloat16),
        "dec_whh": rn(ks[6], (hidden_size, 4 * hidden_size)).astype(jnp.bfloat16),
        "dec_b":   rn(ks[7], (1, 4 * hidden_size)),
        "gen_w":   rn(ks[8], (hidden_size, output_size)).astype(jnp.bfloat16),
        "gen_b":   rn(ks[9], (1, output_size)),
    }


# ------------------------------ forward pass -------------------------------- #

def seq2seq_forward(params, cw_idxs, qw_idxs):
    emb_table = params["emb_table"]
    H = emb_table.shape[1]
    B, Tc = cw_idxs.shape
    Tq = qw_idxs.shape[1]

    # ---- encode(cw_idxs): only the final (h, c) is needed by forward() ----
    x_enc = jnp.take(emb_table, cw_idxs.T, axis=0)                   # (Tc, B, H) bf16
    m_enc = (cw_idxs.T != PAD).astype(jnp.float32)[:, :, None]       # (Tc, B, 1)
    h0 = jnp.zeros((B, H), jnp.float32)
    c0 = jnp.zeros((B, H), jnp.float32)
    _, h_enc, c_enc = lstm(x_enc, m_enc, h0, c0,
                           params["enc_wih"], params["enc_b"], params["enc_whh"],
                           emit_seq=False)

    # ---- decode(dec_init_state, qw_idxs): decoder runs every step (no packing) ----
    x_dec = jnp.take(emb_table, qw_idxs.T, axis=0)                   # (Tq, B, H) bf16
    dec_seq, _, _ = lstm(x_dec, None, h_enc, c_enc,
                         params["dec_wih"], params["dec_b"], params["dec_whh"],
                         emit_seq=True)                               # (B, Tq, H) f32

    # ---- generator: fc + log_softmax (single fused kernel) ----
    x_gen = dec_seq.astype(jnp.bfloat16).reshape(B * Tq, H)
    log_probs = generator(x_gen, params["gen_w"], params["gen_b"])
    return log_probs.reshape(B, Tq, -1)                              # (B, Tq, output_size)


# --------------------------- pure-JAX reference ------------------------------ #

def seq2seq_reference(params, cw_idxs, qw_idxs):
    emb_table = params["emb_table"]
    H = emb_table.shape[1]
    B = cw_idxs.shape[0]

    def run_lstm(x_tbh, mask_tb, h0, c0, w_ih, w_hh, b):
        T = x_tbh.shape[0]
        xg = (jnp.dot(x_tbh.reshape(T * B, H).astype(jnp.bfloat16), w_ih,
                      preferred_element_type=jnp.float32) + b).reshape(T, B, 4 * H)

        def step(carry, inp):
            h, c = carry
            xg_t, m_t = inp
            gates = xg_t + jnp.dot(h.astype(jnp.bfloat16), w_hh,
                                   preferred_element_type=jnp.float32)
            i = jax.nn.sigmoid(gates[:, 0 * H:1 * H])
            f = jax.nn.sigmoid(gates[:, 1 * H:2 * H])
            g = jnp.tanh(gates[:, 2 * H:3 * H])
            o = jax.nn.sigmoid(gates[:, 3 * H:4 * H])
            c_new = f * c + i * g
            h_new = o * jnp.tanh(c_new)
            keep = m_t[:, None] > 0.0
            h_new = jnp.where(keep, h_new, h)
            c_new = jnp.where(keep, c_new, c)
            return (h_new, c_new), h_new

        (hT, cT), hs = lax.scan(step, (h0, c0), (xg, mask_tb))
        return hs, hT, cT

    x_enc = jnp.take(emb_table, cw_idxs.T, axis=0)
    m_enc = (cw_idxs.T != PAD).astype(jnp.float32)
    h0 = jnp.zeros((B, H), jnp.float32)
    c0 = jnp.zeros((B, H), jnp.float32)
    _, h_enc, c_enc = run_lstm(x_enc, m_enc, h0, c0,
                               params["enc_wih"], params["enc_whh"], params["enc_b"])

    x_dec = jnp.take(emb_table, qw_idxs.T, axis=0)
    m_dec = jnp.ones(qw_idxs.T.shape, jnp.float32)
    dec_seq, _, _ = run_lstm(x_dec, m_dec, h_enc, c_enc,
                             params["dec_wih"], params["dec_whh"], params["dec_b"])
    dec_bth = jnp.transpose(dec_seq, (1, 0, 2))
    Tq = qw_idxs.shape[1]
    logits = (jnp.dot(dec_bth.reshape(B * Tq, H).astype(jnp.bfloat16), params["gen_w"],
                      preferred_element_type=jnp.float32) + params["gen_b"])
    return jax.nn.log_softmax(logits, axis=-1).reshape(B, Tq, -1)


# --------------------------------- driver ----------------------------------- #

if __name__ == "__main__":
    key = jax.random.PRNGKey(0)

    VOCAB = 256
    EMB_DIM = 64
    HIDDEN = 128      # multiple of 128: each LSTM gate slice = one full vreg lane width
    OUTPUT = 256      # multiple of 128: lane-dense generator output tiles
    B, C_LEN, Q_LEN = 16, 16, 8   # B=16 -> two (8, H) batch blocks feed both v7x cores

    params = init_params(key, VOCAB, EMB_DIM, HIDDEN, OUTPUT)

    k1, k2 = jax.random.split(jax.random.fold_in(key, 7))
    cw_idxs = jax.random.randint(k1, (B, C_LEN), 1, VOCAB, dtype=jnp.int32)
    qw_idxs = jax.random.randint(k2, (B, Q_LEN), 1, VOCAB, dtype=jnp.int32)
    # pad tails (PAD = 0) so the encoder's length-masking path is exercised in both blocks
    cw_idxs = cw_idxs.at[0, 12:].set(PAD)
    cw_idxs = cw_idxs.at[1, 14:].set(PAD)
    cw_idxs = cw_idxs.at[9, 10:].set(PAD)
    qw_idxs = qw_idxs.at[0, 6:].set(PAD)

    log_probs = jax.block_until_ready(jax.jit(seq2seq_forward)(params, cw_idxs, qw_idxs))

    assert log_probs.shape == (B, Q_LEN, OUTPUT)
    assert log_probs.dtype == jnp.float32
    # rows of log_probs should exp-sum to 1
    assert jnp.allclose(jnp.exp(log_probs).sum(-1), 1.0, atol=1e-4)

    # pure-JAX reference with matching bf16/f32 casts
    ref = jax.block_until_ready(jax.jit(seq2seq_reference)(params, cw_idxs, qw_idxs))
    assert jnp.allclose(log_probs, ref, atol=5e-2), float(jnp.max(jnp.abs(log_probs - ref)))

    print("KERNEL_OK")
</pallas_src>

<mosaic_0001>
module attributes {stable_mosaic.version = 11 : i64} {
  func.func @_lstm_kernel(%arg0: i32, %arg1: i32, %arg2: memref<1x128x128xbf16, #tpu.memory_space<vmem>>, %arg3: memref<1x128x1xf32, #tpu.memory_space<vmem>>, %arg4: memref<8x128xf32, #tpu.memory_space<vmem>>, %arg5: memref<8x128xf32, #tpu.memory_space<vmem>>, %arg6: memref<128x512xbf16, #tpu.memory_space<vmem>>, %arg7: memref<1x512xf32, #tpu.memory_space<vmem>>, %arg8: memref<128x512xbf16, #tpu.memory_space<vmem>>, %arg9: memref<8x128xf32, #tpu.memory_space<vmem>>, %arg10: memref<8x128xf32, #tpu.memory_space<vmem>>, %arg11: memref<128x512xf32, #tpu.memory_space<vmem>>) attributes {dimension_semantics = [#tpu.dimension_semantics<parallel>, #tpu.dimension_semantics<arbitrary>], iteration_bounds = array<i64: 2, 1>, scalar_prefetch = 0 : i64, scratch_operands = 1 : i64, tpu.core_type = #tpu.core_type<tc>, window_params = [{transform_indices = @transform_0, window_bounds = array<i64: 1, 128, 128>}, {transform_indices = @transform_1, window_bounds = array<i64: 1, 128, 1>}, {transform_indices = @transform_2, window_bounds = array<i64: 8, 128>}, {transform_indices = @transform_3, window_bounds = array<i64: 8, 128>}, {pipeline_mode = #tpu.pipeline_mode<synchronous>, transform_indices = @transform_4, window_bounds = array<i64: 128, 512>}, {pipeline_mode = #tpu.pipeline_mode<synchronous>, transform_indices = @transform_5, window_bounds = array<i64: 1, 512>}, {pipeline_mode = #tpu.pipeline_mode<synchronous>, transform_indices = @transform_6, window_bounds = array<i64: 128, 512>}, {transform_indices = @transform_7, window_bounds = array<i64: 8, 128>}, {transform_indices = @transform_8, window_bounds = array<i64: 8, 128>}]} {
    %c0_i32 = arith.constant 0 : i32
    %0 = arith.cmpi eq, %arg1, %c0_i32 : i32
    %1 = arith.extui %0 : i1 to i32
    %c0_i32_0 = arith.constant 0 : i32
    %2 = arith.cmpi ne, %1, %c0_i32_0 : i32
    scf.if %2 {
      %c0_194 = arith.constant 0 : index
      %c0_195 = arith.constant 0 : index
      %655 = vector.load %arg4[%c0_194, %c0_195] : memref<8x128xf32, #tpu.memory_space<vmem>>, vector<8x128xf32>
      %c0_196 = arith.constant 0 : index
      %c0_197 = arith.constant 0 : index
      %656 = vector.load %arg9[%c0_196, %c0_197] : memref<8x128xf32, #tpu.memory_space<vmem>>, vector<8x128xf32>
      tpu.vector_store %arg9[%c0_196, %c0_197], %655 {strides = array<i32>} : memref<8x128xf32, #tpu.memory_space<vmem>>, vector<8x128xf32>,
      %c0_198 = arith.constant 0 : index
      %c0_199 = arith.constant 0 : index
      %657 = vector.load %arg5[%c0_198, %c0_199] : memref<8x128xf32, #tpu.memory_space<vmem>>, vector<8x128xf32>
      %c0_200 = arith.constant 0 : index
      %c0_201 = arith.constant 0 : index
      %658 = vector.load %arg10[%c0_200, %c0_201] : memref<8x128xf32, #tpu.memory_space<vmem>>, vector<8x128xf32>
      tpu.vector_store %arg10[%c0_200, %c0_201], %657 {strides = array<i32>} : memref<8x128xf32, #tpu.memory_space<vmem>>, vector<8x128xf32>,
    } else {
    }
    %c0 = arith.constant 0 : index
    %c0_1 = arith.constant 0 : index
    %c0_2 = arith.constant 0 : index
    %3 = vector.load %arg2[%c0, %c0_1, %c0_2] : memref<1x128x128xbf16, #tpu.memory_space<vmem>>, vector<1x128x128xbf16>
    %4 = vector.shape_cast %3 : vector<1x128x128xbf16> to vector<128x128xbf16>
    %c0_3 = arith.constant 0 : index
    %c0_4 = arith.constant 0 : index
    %5 = vector.load %arg6[%c0_3, %c0_4] : memref<128x512xbf16, #tpu.memory_space<vmem>>, vector<128x512xbf16>
    %cst = arith.constant dense<0.000000e+00> : vector<128x512xf32>
    %6 = tpu.matmul %4, %5, %cst {dimension_numbers = #tpu.dot_dimension_numbers<[1], [0], [0], [1], [0, 0, 1, 1], [], []>} : vector<128x128xbf16>, vector<128x512xbf16>, vector<128x512xf32> -> vector<128x512xf32>
    %c0_5 = arith.constant 0 : index
    %c0_6 = arith.constant 0 : index
    %7 = vector.load %arg7[%c0_5, %c0_6] : memref<1x512xf32, #tpu.memory_space<vmem>>, vector<1x512xf32>
    %8 = vector.broadcast %7 : vector<1x512xf32> to vector<128x512xf32>
    %9 = arith.addf %6, %8 : vector<128x512xf32>
    %c0_7 = arith.constant 0 : index
    %c0_8 = arith.constant 0 : index
    %10 = vector.load %arg11[%c0_7, %c0_8] : memref<128x512xf32, #tpu.memory_space<vmem>>, vector<128x512xf32>
    tpu.vector_store %arg11[%c0_7, %c0_8], %9 {strides = array<i32>} : memref<128x512xf32, #tpu.memory_space<vmem>>, vector<128x512xf32>,
    %c0_9 = arith.constant 0 : index
    %c0_10 = arith.constant 0 : index
    %11 = vector.load %arg9[%c0_9, %c0_10] : memref<8x128xf32, #tpu.memory_space<vmem>>, vector<8x128xf32>
    %c0_11 = arith.constant 0 : index
    %c0_12 = arith.constant 0 : index
    %12 = vector.load %arg10[%c0_11, %c0_12] : memref<8x128xf32, #tpu.memory_space<vmem>>, vector<8x128xf32>
    %c0_13 = arith.constant 0 : index
    %c0_14 = arith.constant 0 : index
    %13 = vector.load %arg11[%c0_13, %c0_14] : memref<128x512xf32, #tpu.memory_space<vmem>>, vector<8x512xf32>
    %14 = arith.truncf %11 : vector<8x128xf32> to vector<8x128xbf16>
    %c0_15 = arith.constant 0 : index
    %c0_16 = arith.constant 0 : index
    %15 = vector.load %arg8[%c0_15, %c0_16] : memref<128x512xbf16, #tpu.memory_space<vmem>>, vector<128x512xbf16>
    %cst_17 = arith.constant dense<0.000000e+00> : vector<8x512xf32>
    %16 = tpu.matmul %14, %15, %cst_17 {dimension_numbers = #tpu.dot_dimension_numbers<[1], [0], [0], [1], [0, 0, 1, 1], [], []>} : vector<8x128xbf16>, vector<128x512xbf16>, vector<8x512xf32> -> vector<8x512xf32>
    %17 = arith.addf %13, %16 : vector<8x512xf32>
    %18 = vector.extract_strided_slice %17 {offsets = [0, 0], sizes = [8, 128], strides = [1, 1]} : vector<8x512xf32> to vector<8x128xf32>
    %19 = arith.negf %18 : vector<8x128xf32>
    %20 = math.exp %19 : vector<8x128xf32>
    %cst_18 = arith.constant 1.000000e+00 : f32
    %21 = vector.broadcast %cst_18 : f32 to vector<8x128xf32>
    %22 = arith.addf %21, %20 : vector<8x128xf32>
    %23 = arith.divf %21, %22 : vector<8x128xf32>
    %24 = vector.extract_strided_slice %17 {offsets = [0, 128], sizes = [8, 128], strides = [1, 1]} : vector<8x512xf32> to vector<8x128xf32>
    %25 = arith.negf %24 : vector<8x128xf32>
    %26 = math.exp %25 : vector<8x128xf32>
    %cst_19 = arith.constant 1.000000e+00 : f32
    %27 = vector.broadcast %cst_19 : f32 to vector<8x128xf32>
    %28 = arith.addf %27, %26 : vector<8x128xf32>
    %29 = arith.divf %27, %28 : vector<8x128xf32>
    %30 = vector.extract_strided_slice %17 {offsets = [0, 256], sizes = [8, 128], strides = [1, 1]} : vector<8x512xf32> to vector<8x128xf32>
    %31 = math.tanh %30 : vector<8x128xf32>
    %32 = vector.extract_strided_slice %17 {offsets = [0, 384], sizes = [8, 128], strides = [1, 1]} : vector<8x512xf32> to vector<8x128xf32>
    %33 = arith.negf %32 : vector<8x128xf32>
    %34 = math.exp %33 : vector<8x128xf32>
    %cst_20 = arith.constant 1.000000e+00 : f32
    %35 = vector.broadcast %cst_20 : f32 to vector<8x128xf32>
    %36 = arith.addf %35, %34 : vector<8x128xf32>
    %37 = arith.divf %35, %36 : vector<8x128xf32>
    %38 = arith.mulf %29, %12 : vector<8x128xf32>
    %39 = arith.mulf %23, %31 : vector<8x128xf32>
    %40 = arith.addf %38, %39 : vector<8x128xf32>
    %41 = math.tanh %40 : vector<8x128xf32>
    %42 = arith.mulf %37, %41 : vector<8x128xf32>
    %c0_21 = arith.constant 0 : index
    %c0_22 = arith.constant 0 : index
    %c0_23 = arith.constant 0 : index
    %43 = vector.load %arg3[%c0_21, %c0_22, %c0_23] : memref<1x128x1xf32, #tpu.memory_space<vmem>>, vector<1x8x1xf32>
    %44 = vector.shape_cast %43 : vector<1x8x1xf32> to vector<8x1xf32>
    %cst_24 = arith.constant 0.000000e+00 : f32
    %45 = vector.broadcast %cst_24 : f32 to vector<8x1xf32>
    %46 = arith.cmpf ogt, %44, %45 : vector<8x1xf32>
    %47 = vector.shape_cast %46 : vector<8x1xi1> to vector<8x1xi1>
    %48 = vector.broadcast %47 : vector<8x1xi1> to vector<8x128xi1>
    %49 = arith.select %48, %42, %11 : vector<8x128xi1>, vector<8x128xf32>
    %50 = vector.shape_cast %46 : vector<8x1xi1> to vector<8x1xi1>
    %51 = vector.broadcast %50 : vector<8x1xi1> to vector<8x128xi1>
    %52 = arith.select %51, %40, %12 : vector<8x128xi1>, vector<8x128xf32>
    %c8 = arith.constant 8 : index
    %c0_25 = arith.constant 0 : index
    %53 = vector.load %arg11[%c8, %c0_25] : memref<128x512xf32, #tpu.memory_space<vmem>>, vector<8x512xf32>
    %54 = arith.truncf %49 : vector<8x128xf32> to vector<8x128xbf16>
    %c0_26 = arith.constant 0 : index
    %c0_27 = arith.constant 0 : index
    %55 = vector.load %arg8[%c0_26, %c0_27] : memref<128x512xbf16, #tpu.memory_space<vmem>>, vector<128x512xbf16>
    %cst_28 = arith.constant dense<0.000000e+00> : vector<8x512xf32>
    %56 = tpu.matmul %54, %55, %cst_28 {dimension_numbers = #tpu.dot_dimension_numbers<[1], [0], [0], [1], [0, 0, 1, 1], [], []>} : vector<8x128xbf16>, vector<128x512xbf16>, vector<8x512xf32> -> vector<8x512xf32>
    %57 = arith.addf %53, %56 : vector<8x512xf32>
    %58 = vector.extract_strided_slice %57 {offsets = [0, 0], sizes = [8, 128], strides = [1, 1]} : vector<8x512xf32> to vector<8x128xf32>
    %59 = arith.negf %58 : vector<8x128xf32>
    %60 = math.exp %59 : vector<8x128xf32>
    %cst_29 = arith.constant 1.000000e+00 : f32
    %61 = vector.broadcast %cst_29 : f32 to vector<8x128xf32>
    %62 = arith.addf %61, %60 : vector<8x128xf32>
    %63 = arith.divf %61, %62 : vector<8x128xf32>
    %64 = vector.extract_strided_slice %57 {offsets = [0, 128], sizes = [8, 128], strides = [1, 1]} : vector<8x512xf32> to vector<8x128xf32>
    %65 = arith.negf %64 : vector<8x128xf32>
    %66 = math.exp %65 : vector<8x128xf32>
    %cst_30 = arith.constant 1.000000e+00 : f32
    %67 = vector.broadcast %cst_30 : f32 to vector<8x128xf32>
    %68 = arith.addf %67, %66 : vector<8x128xf32>
    %69 = arith.divf %67, %68 : vector<8x128xf32>
    %70 = vector.extract_strided_slice %57 {offsets = [0, 256], sizes = [8, 128], strides = [1, 1]} : vector<8x512xf32> to vector<8x128xf32>
    %71 = math.tanh %70 : vector<8x128xf32>
    %72 = vector.extract_strided_slice %57 {offsets = [0, 384], sizes = [8, 128], strides = [1, 1]} : vector<8x512xf32> to vector<8x128xf32>
    %73 = arith.negf %72 : vector<8x128xf32>
    %74 = math.exp %73 : vector<8x128xf32>
    %cst_31 = arith.constant 1.000000e+00 : f32
    %75 = vector.broadcast %cst_31 : f32 to vector<8x128xf32>
    %76 = arith.addf %75, %74 : vector<8x128xf32>
    %77 = arith.divf %75, %76 : vector<8x128xf32>
    %78 = arith.mulf %69, %52 : vector<8x128xf32>
    %79 = arith.mulf %63, %71 : vector<8x128xf32>
    %80 = arith.addf %78, %79 : vector<8x128xf32>
    %81 = math.tanh %80 : vector<8x128xf32>
    %82 = arith.mulf %77, %81 : vector<8x128xf32>
    %c0_32 = arith.constant 0 : index
    %c8_33 = arith.constant 8 : index
    %c0_34 = arith.constant 0 : index
    %83 = vector.load %arg3[%c0_32, %c8_33, %c0_34] : memref<1x128x1xf32, #tpu.memory_space<vmem>>, vector<1x8x1xf32>
    %84 = vector.shape_cast %83 : vector<1x8x1xf32> to vector<8x1xf32>
    %cst_35 = arith.constant 0.000000e+00 : f32
    %85 = vector.broadcast %cst_35 : f32 to vector<8x1xf32>
    %86 = arith.cmpf ogt, %84, %85 : vector<8x1xf32>
    %87 = vector.shape_cast %86 : vector<8x1xi1> to vector<8x1xi1>
    %88 = vector.broadcast %87 : vector<8x1xi1> to vector<8x128xi1>
    %89 = arith.select %88, %82, %49 : vector<8x128xi1>, vector<8x128xf32>
    %90 = vector.shape_cast %86 : vector<8x1xi1> to vector<8x1xi1>
    %91 = vector.broadcast %90 : vector<8x1xi1> to vector<8x128xi1>
    %92 = arith.select %91, %80, %52 : vector<8x128xi1>, vector<8x128xf32>
    %c16 = arith.constant 16 : index
    %c0_36 = arith.constant 0 : index
    %93 = vector.load %arg11[%c16, %c0_36] : memref<128x512xf32, #tpu.memory_space<vmem>>, vector<8x512xf32>
    %94 = arith.truncf %89 : vector<8x128xf32> to vector<8x128xbf16>
    %c0_37 = arith.constant 0 : index
    %c0_38 = arith.constant 0 : index
    %95 = vector.load %arg8[%c0_37, %c0_38] : memref<128x512xbf16, #tpu.memory_space<vmem>>, vector<128x512xbf16>
    %cst_39 = arith.constant dense<0.000000e+00> : vector<8x512xf32>
    %96 = tpu.matmul %94, %95, %cst_39 {dimension_numbers = #tpu.dot_dimension_numbers<[1], [0], [0], [1], [0, 0, 1, 1], [], []>} : vector<8x128xbf16>, vector<128x512xbf16>, vector<8x512xf32> -> vector<8x512xf32>
    %97 = arith.addf %93, %96 : vector<8x512xf32>
    %98 = vector.extract_strided_slice %97 {offsets = [0, 0], sizes = [8, 128], strides = [1, 1]} : vector<8x512xf32> to vector<8x128xf32>
    %99 = arith.negf %98 : vector<8x128xf32>
    %100 = math.exp %99 : vector<8x128xf32>
    %cst_40 = arith.constant 1.000000e+00 : f32
    %101 = vector.broadcast %cst_40 : f32 to vector<8x128xf32>
    %102 = arith.addf %101, %100 : vector<8x128xf32>
    %103 = arith.divf %101, %102 : vector<8x128xf32>
    %104 = vector.extract_strided_slice %97 {offsets = [0, 128], sizes = [8, 128], strides = [1, 1]} : vector<8x512xf32> to vector<8x128xf32>
    %105 = arith.negf %104 : vector<8x128xf32>
    %106 = math.exp %105 : vector<8x128xf32>
    %cst_41 = arith.constant 1.000000e+00 : f32
    %107 = vector.broadcast %cst_41 : f32 to vector<8x128xf32>
    %108 = arith.addf %107, %106 : vector<8x128xf32>
    %109 = arith.divf %107, %108 : vector<8x128xf32>
    %110 = vector.extract_strided_slice %97 {offsets = [0, 256], sizes = [8, 128], strides = [1, 1]} : vector<8x512xf32> to vector<8x128xf32>
    %111 = math.tanh %110 : vector<8x128xf32>
    %112 = vector.extract_strided_slice %97 {offsets = [0, 384], sizes = [8, 128], strides = [1, 1]} : vector<8x512xf32> to vector<8x128xf32>
    %113 = arith.negf %112 : vector<8x128xf32>
    %114 = math.exp %113 : vector<8x128xf32>
    %cst_42 = arith.constant 1.000000e+00 : f32
    %115 = vector.broadcast %cst_42 : f32 to vector<8x128xf32>
    %116 = arith.addf %115, %114 : vector<8x128xf32>
    %117 = arith.divf %115, %116 : vector<8x128xf32>
    %118 = arith.mulf %109, %92 : vector<8x128xf32>
    %119 = arith.mulf %103, %111 : vector<8x128xf32>
    %120 = arith.addf %118, %119 : vector<8x128xf32>
    %121 = math.tanh %120 : vector<8x128xf32>
    %122 = arith.mulf %117, %121 : vector<8x128xf32>
    %c0_43 = arith.constant 0 : index
    %c16_44 = arith.constant 16 : index
    %c0_45 = arith.constant 0 : index
    %123 = vector.load %arg3[%c0_43, %c16_44, %c0_45] : memref<1x128x1xf32, #tpu.memory_space<vmem>>, vector<1x8x1xf32>
    %124 = vector.shape_cast %123 : vector<1x8x1xf32> to vector<8x1xf32>
    %cst_46 = arith.constant 0.000000e+00 : f32
    %125 = vector.broadcast %cst_46 : f32 to vector<8x1xf32>
    %126 = arith.cmpf ogt, %124, %125 : vector<8x1xf32>
    %127 = vector.shape_cast %126 : vector<8x1xi1> to vector<8x1xi1>
    %128 = vector.broadcast %127 : vector<8x1xi1> to vector<8x128xi1>
    %129 = arith.select %128, %122, %89 : vector<8x128xi1>, vector<8x128xf32>
    %130 = vector.shape_cast %126 : vector<8x1xi1> to vector<8x1xi1>
    %131 = vector.broadcast %130 : vector<8x1xi1> to vector<8x128xi1>
    %132 = arith.select %131, %120, %92 : vector<8x128xi1>, vector<8x128xf32>
    %c24 = arith.constant 24 : index
    %c0_47 = arith.constant 0 : index
    %133 = vector.load %arg11[%c24, %c0_47] : memref<128x512xf32, #tpu.memory_space<vmem>>, vector<8x512xf32>
    %134 = arith.truncf %129 : vector<8x128xf32> to vector<8x128xbf16>
    %c0_48 = arith.constant 0 : index
    %c0_49 = arith.constant 0 : index
    %135 = vector.load %arg8[%c0_48, %c0_49] : memref<128x512xbf16, #tpu.memory_space<vmem>>, vector<128x512xbf16>
    %cst_50 = arith.constant dense<0.000000e+00> : vector<8x512xf32>
    %136 = tpu.matmul %134, %135, %cst_50 {dimension_numbers = #tpu.dot_dimension_numbers<[1], [0], [0], [1], [0, 0, 1, 1], [], []>} : vector<8x128xbf16>, vector<128x512xbf16>, vector<8x512xf32> -> vector<8x512xf32>
    %137 = arith.addf %133, %136 : vector<8x512xf32>
    %138 = vector.extract_strided_slice %137 {offsets = [0, 0], sizes = [8, 128], strides = [1, 1]} : vector<8x512xf32> to vector<8x128xf32>
    %139 = arith.negf %138 : vector<8x128xf32>
    %140 = math.exp %139 : vector<8x128xf32>
    %cst_51 = arith.constant 1.000000e+00 : f32
    %141 = vector.broadcast %cst_51 : f32 to vector<8x128xf32>
    %142 = arith.addf %141, %140 : vector<8x128xf32>
    %143 = arith.divf %141, %142 : vector<8x128xf32>
    %144 = vector.extract_strided_slice %137 {offsets = [0, 128], sizes = [8, 128], strides = [1, 1]} : vector<8x512xf32> to vector<8x128xf32>
    %145 = arith.negf %144 : vector<8x128xf32>
    %146 = math.exp %145 : vector<8x128xf32>
    %cst_52 = arith.constant 1.000000e+00 : f32
    %147 = vector.broadcast %cst_52 : f32 to vector<8x128xf32>
    %148 = arith.addf %147, %146 : vector<8x128xf32>
    %149 = arith.divf %147, %148 : vector<8x128xf32>
    %150 = vector.extract_strided_slice %137 {offsets = [0, 256], sizes = [8, 128], strides = [1, 1]} : vector<8x512xf32> to vector<8x128xf32>
    %151 = math.tanh %150 : vector<8x128xf32>
    %152 = vector.extract_strided_slice %137 {offsets = [0, 384], sizes = [8, 128], strides = [1, 1]} : vector<8x512xf32> to vector<8x128xf32>
    %153 = arith.negf %152 : vector<8x128xf32>
    %154 = math.exp %153 : vector<8x128xf32>
    %cst_53 = arith.constant 1.000000e+00 : f32
    %155 = vector.broadcast %cst_53 : f32 to vector<8x128xf32>
    %156 = arith.addf %155, %154 : vector<8x128xf32>
    %157 = arith.divf %155, %156 : vector<8x128xf32>
    %158 = arith.mulf %149, %132 : vector<8x128xf32>
    %159 = arith.mulf %143, %151 : vector<8x128xf32>
    %160 = arith.addf %158, %159 : vector<8x128xf32>
    %161 = math.tanh %160 : vector<8x128xf32>
    %162 = arith.mulf %157, %161 : vector<8x128xf32>
    %c0_54 = arith.constant 0 : index
    %c24_55 = arith.constant 24 : index
    %c0_56 = arith.constant 0 : index
    %163 = vector.load %arg3[%c0_54, %c24_55, %c0_56] : memref<1x128x1xf32, #tpu.memory_space<vmem>>, vector<1x8x1xf32>
    %164 = vector.shape_cast %163 : vector<1x8x1xf32> to vector<8x1xf32>
    %cst_57 = arith.constant 0.000000e+00 : f32
    %165 = vector.broadcast %cst_57 : f32 to vector<8x1xf32>
    %166 = arith.cmpf ogt, %164, %165 : vector<8x1xf32>
    %167 = vector.shape_cast %166 : vector<8x1xi1> to vector<8x1xi1>
    %168 = vector.broadcast %167 : vector<8x1xi1> to vector<8x128xi1>
    %169 = arith.select %168, %162, %129 : vector<8x128xi1>, vector<8x128xf32>
    %170 = vector.shape_cast %166 : vector<8x1xi1> to vector<8x1xi1>
    %171 = vector.broadcast %170 : vector<8x1xi1> to vector<8x128xi1>
    %172 = arith.select %171, %160, %132 : vector<8x128xi1>, vector<8x128xf32>
    %c32 = arith.constant 32 : index
    %c0_58 = arith.constant 0 : index
    %173 = vector.load %arg11[%c32, %c0_58] : memref<128x512xf32, #tpu.memory_space<vmem>>, vector<8x512xf32>
    %174 = arith.truncf %169 : vector<8x128xf32> to vector<8x128xbf16>
    %c0_59 = arith.constant 0 : index
    %c0_60 = arith.constant 0 : index
    %175 = vector.load %arg8[%c0_59, %c0_60] : memref<128x512xbf16, #tpu.memory_space<vmem>>, vector<128x512xbf16>
    %cst_61 = arith.constant dense<0.000000e+00> : vector<8x512xf32>
    %176 = tpu.matmul %174, %175, %cst_61 {dimension_numbers = #tpu.dot_dimension_numbers<[1], [0], [0], [1], [0, 0, 1, 1], [], []>} : vector<8x128xbf16>, vector<128x512xbf16>, vector<8x512xf32> -> vector<8x512xf32>
    %177 = arith.addf %173, %176 : vector<8x512xf32>
    %178 = vector.extract_strided_slice %177 {offsets = [0, 0], sizes = [8, 128], strides = [1, 1]} : vector<8x512xf32> to vector<8x128xf32>
    %179 = arith.negf %178 : vector<8x128xf32>
    %180 = math.exp %179 : vector<8x128xf32>
    %cst_62 = arith.constant 1.000000e+00 : f32
    %181 = vector.broadcast %cst_62 : f32 to vector<8x128xf32>
    %182 = arith.addf %181, %180 : vector<8x128xf32>
    %183 = arith.divf %181, %182 : vector<8x128xf32>
    %184 = vector.extract_strided_slice %177 {offsets = [0, 128], sizes = [8, 128], strides = [1, 1]} : vector<8x512xf32> to vector<8x128xf32>
    %185 = arith.negf %184 : vector<8x128xf32>
    %186 = math.exp %185 : vector<8x128xf32>
    %cst_63 = arith.constant 1.000000e+00 : f32
    %187 = vector.broadcast %cst_63 : f32 to vector<8x128xf32>
    %188 = arith.addf %187, %186 : vector<8x128xf32>
    %189 = arith.divf %187, %188 : vector<8x128xf32>
    %190 = vector.extract_strided_slice %177 {offsets = [0, 256], sizes = [8, 128], strides = [1, 1]} : vector<8x512xf32> to vector<8x128xf32>
    %191 = math.tanh %190 : vector<8x128xf32>
    %192 = vector.extract_strided_slice %177 {offsets = [0, 384], sizes = [8, 128], strides = [1, 1]} : vector<8x512xf32> to vector<8x128xf32>
    %193 = arith.negf %192 : vector<8x128xf32>
    %194 = math.exp %193 : vector<8x128xf32>
    %cst_64 = arith.constant 1.000000e+00 : f32
    %195 = vector.broadcast %cst_64 : f32 to vector<8x128xf32>
    %196 = arith.addf %195, %194 : vector<8x128xf32>
    %197 = arith.divf %195, %196 : vector<8x128xf32>
    %198 = arith.mulf %189, %172 : vector<8x128xf32>
    %199 = arith.mulf %183, %191 : vector<8x128xf32>
    %200 = arith.addf %198, %199 : vector<8x128xf32>
    %201 = math.tanh %200 : vector<8x128xf32>
    %202 = arith.mulf %197, %201 : vector<8x128xf32>
    %c0_65 = arith.constant 0 : index
    %c32_66 = arith.constant 32 : index
    %c0_67 = arith.constant 0 : index
    %203 = vector.load %arg3[%c0_65, %c32_66, %c0_67] : memref<1x128x1xf32, #tpu.memory_space<vmem>>, vector<1x8x1xf32>
    %204 = vector.shape_cast %203 : vector<1x8x1xf32> to vector<8x1xf32>
    %cst_68 = arith.constant 0.000000e+00 : f32
    %205 = vector.broadcast %cst_68 : f32 to vector<8x1xf32>
    %206 = arith.cmpf ogt, %204, %205 : vector<8x1xf32>
    %207 = vector.shape_cast %206 : vector<8x1xi1> to vector<8x1xi1>
    %208 = vector.broadcast %207 : vector<8x1xi1> to vector<8x128xi1>
    %209 = arith.select %208, %202, %169 : vector<8x128xi1>, vector<8x128xf32>
    %210 = vector.shape_cast %206 : vector<8x1xi1> to vector<8x1xi1>
    %211 = vector.broadcast %210 : vector<8x1xi1> to vector<8x128xi1>
    %212 = arith.select %211, %200, %172 : vector<8x128xi1>, vector<8x128xf32>
    %c40 = arith.constant 40 : index
    %c0_69 = arith.constant 0 : index
    %213 = vector.load %arg11[%c40, %c0_69] : memref<128x512xf32, #tpu.memory_space<vmem>>, vector<8x512xf32>
    %214 = arith.truncf %209 : vector<8x128xf32> to vector<8x128xbf16>
    %c0_70 = arith.constant 0 : index
    %c0_71 = arith.constant 0 : index
    %215 = vector.load %arg8[%c0_70, %c0_71] : memref<128x512xbf16, #tpu.memory_space<vmem>>, vector<128x512xbf16>
    %cst_72 = arith.constant dense<0.000000e+00> : vector<8x512xf32>
    %216 = tpu.matmul %214, %215, %cst_72 {dimension_numbers = #tpu.dot_dimension_numbers<[1], [0], [0], [1], [0, 0, 1, 1], [], []>} : vector<8x128xbf16>, vector<128x512xbf16>, vector<8x512xf32> -> vector<8x512xf32>
    %217 = arith.addf %213, %216 : vector<8x512xf32>
    %218 = vector.extract_strided_slice %217 {offsets = [0, 0], sizes = [8, 128], strides = [1, 1]} : vector<8x512xf32> to vector<8x128xf32>
    %219 = arith.negf %218 : vector<8x128xf32>
    %220 = math.exp %219 : vector<8x128xf32>
    %cst_73 = arith.constant 1.000000e+00 : f32
    %221 = vector.broadcast %cst_73 : f32 to vector<8x128xf32>
    %222 = arith.addf %221, %220 : vector<8x128xf32>
    %223 = arith.divf %221, %222 : vector<8x128xf32>
    %224 = vector.extract_strided_slice %217 {offsets = [0, 128], sizes = [8, 128], strides = [1, 1]} : vector<8x512xf32> to vector<8x128xf32>
    %225 = arith.negf %224 : vector<8x128xf32>
    %226 = math.exp %225 : vector<8x128xf32>
    %cst_74 = arith.constant 1.000000e+00 : f32
    %227 = vector.broadcast %cst_74 : f32 to vector<8x128xf32>
    %228 = arith.addf %227, %226 : vector<8x128xf32>
    %229 = arith.divf %227, %228 : vector<8x128xf32>
    %230 = vector.extract_strided_slice %217 {offsets = [0, 256], sizes = [8, 128], strides = [1, 1]} : vector<8x512xf32> to vector<8x128xf32>
    %231 = math.tanh %230 : vector<8x128xf32>
    %232 = vector.extract_strided_slice %217 {offsets = [0, 384], sizes = [8, 128], strides = [1, 1]} : vector<8x512xf32> to vector<8x128xf32>
    %233 = arith.negf %232 : vector<8x128xf32>
    %234 = math.exp %233 : vector<8x128xf32>
    %cst_75 = arith.constant 1.000000e+00 : f32
    %235 = vector.broadcast %cst_75 : f32 to vector<8x128xf32>
    %236 = arith.addf %235, %234 : vector<8x128xf32>
    %237 = arith.divf %235, %236 : vector<8x128xf32>
    %238 = arith.mulf %229, %212 : vector<8x128xf32>
    %239 = arith.mulf %223, %231 : vector<8x128xf32>
    %240 = arith.addf %238, %239 : vector<8x128xf32>
    %241 = math.tanh %240 : vector<8x128xf32>
    %242 = arith.mulf %237, %241 : vector<8x128xf32>
    %c0_76 = arith.constant 0 : index
    %c40_77 = arith.constant 40 : index
    %c0_78 = arith.constant 0 : index
    %243 = vector.load %arg3[%c0_76, %c40_77, %c0_78] : memref<1x128x1xf32, #tpu.memory_space<vmem>>, vector<1x8x1xf32>
    %244 = vector.shape_cast %243 : vector<1x8x1xf32> to vector<8x1xf32>
    %cst_79 = arith.constant 0.000000e+00 : f32
    %245 = vector.broadcast %cst_79 : f32 to vector<8x1xf32>
    %246 = arith.cmpf ogt, %244, %245 : vector<8x1xf32>
    %247 = vector.shape_cast %246 : vector<8x1xi1> to vector<8x1xi1>
    %248 = vector.broadcast %247 : vector<8x1xi1> to vector<8x128xi1>
    %249 = arith.select %248, %242, %209 : vector<8x128xi1>, vector<8x128xf32>
    %250 = vector.shape_cast %246 : vector<8x1xi1> to vector<8x1xi1>
    %251 = vector.broadcast %250 : vector<8x1xi1> to vector<8x128xi1>
    %252 = arith.select %251, %240, %212 : vector<8x128xi1>, vector<8x128xf32>
    %c48 = arith.constant 48 : index
    %c0_80 = arith.constant 0 : index
    %253 = vector.load %arg11[%c48, %c0_80] : memref<128x512xf32, #tpu.memory_space<vmem>>, vector<8x512xf32>
    %254 = arith.truncf %249 : vector<8x128xf32> to vector<8x128xbf16>
    %c0_81 = arith.constant 0 : index
    %c0_82 = arith.constant 0 : index
    %255 = vector.load %arg8[%c0_81, %c0_82] : memref<128x512xbf16, #tpu.memory_space<vmem>>, vector<128x512xbf16>
    %cst_83 = arith.constant dense<0.000000e+00> : vector<8x512xf32>
    %256 = tpu.matmul %254, %255, %cst_83 {dimension_numbers = #tpu.dot_dimension_numbers<[1], [0], [0], [1], [0, 0, 1, 1], [], []>} : vector<8x128xbf16>, vector<128x512xbf16>, vector<8x512xf32> -> vector<8x512xf32>
    %257 = arith.addf %253, %256 : vector<8x512xf32>
    %258 = vector.extract_strided_slice %257 {offsets = [0, 0], sizes = [8, 128], strides = [1, 1]} : vector<8x512xf32> to vector<8x128xf32>
    %259 = arith.negf %258 : vector<8x128xf32>
    %260 = math.exp %259 : vector<8x128xf32>
    %cst_84 = arith.constant 1.000000e+00 : f32
    %261 = vector.broadcast %cst_84 : f32 to vector<8x128xf32>
    %262 = arith.addf %261, %260 : vector<8x128xf32>
    %263 = arith.divf %261, %262 : vector<8x128xf32>
    %264 = vector.extract_strided_slice %257 {offsets = [0, 128], sizes = [8, 128], strides = [1, 1]} : vector<8x512xf32> to vector<8x128xf32>
    %265 = arith.negf %264 : vector<8x128xf32>
    %266 = math.exp %265 : vector<8x128xf32>
    %cst_85 = arith.constant 1.000000e+00 : f32
    %267 = vector.broadcast %cst_85 : f32 to vector<8x128xf32>
    %268 = arith.addf %267, %266 : vector<8x128xf32>
    %269 = arith.divf %267, %268 : vector<8x128xf32>
    %270 = vector.extract_strided_slice %257 {offsets = [0, 256], sizes = [8, 128], strides = [1, 1]} : vector<8x512xf32> to vector<8x128xf32>
    %271 = math.tanh %270 : vector<8x128xf32>
    %272 = vector.extract_strided_slice %257 {offsets = [0, 384], sizes = [8, 128], strides = [1, 1]} : vector<8x512xf32> to vector<8x128xf32>
    %273 = arith.negf %272 : vector<8x128xf32>
    %274 = math.exp %273 : vector<8x128xf32>
    %cst_86 = arith.constant 1.000000e+00 : f32
    %275 = vector.broadcast %cst_86 : f32 to vector<8x128xf32>
    %276 = arith.addf %275, %274 : vector<8x128xf32>
    %277 = arith.divf %275, %276 : vector<8x128xf32>
    %278 = arith.mulf %269, %252 : vector<8x128xf32>
    %279 = arith.mulf %263, %271 : vector<8x128xf32>
    %280 = arith.addf %278, %279 : vector<8x128xf32>
    %281 = math.tanh %280 : vector<8x128xf32>
    %282 = arith.mulf %277, %281 : vector<8x128xf32>
    %c0_87 = arith.constant 0 : index
    %c48_88 = arith.constant 48 : index
    %c0_89 = arith.constant 0 : index
    %283 = vector.load %arg3[%c0_87, %c48_88, %c0_89] : memref<1x128x1xf32, #tpu.memory_space<vmem>>, vector<1x8x1xf32>
    %284 = vector.shape_cast %283 : vector<1x8x1xf32> to vector<8x1xf32>
    %cst_90 = arith.constant 0.000000e+00 : f32
    %285 = vector.broadcast %cst_90 : f32 to vector<8x1xf32>
    %286 = arith.cmpf ogt, %284, %285 : vector<8x1xf32>
    %287 = vector.shape_cast %286 : vector<8x1xi1> to vector<8x1xi1>
    %288 = vector.broadcast %287 : vector<8x1xi1> to vector<8x128xi1>
    %289 = arith.select %288, %282, %249 : vector<8x128xi1>, vector<8x128xf32>
    %290 = vector.shape_cast %286 : vector<8x1xi1> to vector<8x1xi1>
    %291 = vector.broadcast %290 : vector<8x1xi1> to vector<8x128xi1>
    %292 = arith.select %291, %280, %252 : vector<8x128xi1>, vector<8x128xf32>
    %c56 = arith.constant 56 : index
    %c0_91 = arith.constant 0 : index
    %293 = vector.load %arg11[%c56, %c0_91] : memref<128x512xf32, #tpu.memory_space<vmem>>, vector<8x512xf32>
    %294 = arith.truncf %289 : vector<8x128xf32> to vector<8x128xbf16>
    %c0_92 = arith.constant 0 : index
    %c0_93 = arith.constant 0 : index
    %295 = vector.load %arg8[%c0_92, %c0_93] : memref<128x512xbf16, #tpu.memory_space<vmem>>, vector<128x512xbf16>
    %cst_94 = arith.constant dense<0.000000e+00> : vector<8x512xf32>
    %296 = tpu.matmul %294, %295, %cst_94 {dimension_numbers = #tpu.dot_dimension_numbers<[1], [0], [0], [1], [0, 0, 1, 1], [], []>} : vector<8x128xbf16>, vector<128x512xbf16>, vector<8x512xf32> -> vector<8x512xf32>
    %297 = arith.addf %293, %296 : vector<8x512xf32>
    %298 = vector.extract_strided_slice %297 {offsets = [0, 0], sizes = [8, 128], strides = [1, 1]} : vector<8x512xf32> to vector<8x128xf32>
    %299 = arith.negf %298 : vector<8x128xf32>
    %300 = math.exp %299 : vector<8x128xf32>
    %cst_95 = arith.constant 1.000000e+00 : f32
    %301 = vector.broadcast %cst_95 : f32 to vector<8x128xf32>
    %302 = arith.addf %301, %300 : vector<8x128xf32>
    %303 = arith.divf %301, %302 : vector<8x128xf32>
    %304 = vector.extract_strided_slice %297 {offsets = [0, 128], sizes = [8, 128], strides = [1, 1]} : vector<8x512xf32> to vector<8x128xf32>
    %305 = arith.negf %304 : vector<8x128xf32>
    %306 = math.exp %305 : vector<8x128xf32>
    %cst_96 = arith.constant 1.000000e+00 : f32
    %307 = vector.broadcast %cst_96 : f32 to vector<8x128xf32>
    %308 = arith.addf %307, %306 : vector<8x128xf32>
    %309 = arith.divf %307, %308 : vector<8x128xf32>
    %310 = vector.extract_strided_slice %297 {offsets = [0, 256], sizes = [8, 128], strides = [1, 1]} : vector<8x512xf32> to vector<8x128xf32>
    %311 = math.tanh %310 : vector<8x128xf32>
    %312 = vector.extract_strided_slice %297 {offsets = [0, 384], sizes = [8, 128], strides = [1, 1]} : vector<8x512xf32> to vector<8x128xf32>
    %313 = arith.negf %312 : vector<8x128xf32>
    %314 = math.exp %313 : vector<8x128xf32>
    %cst_97 = arith.constant 1.000000e+00 : f32
    %315 = vector.broadcast %cst_97 : f32 to vector<8x128xf32>
    %316 = arith.addf %315, %314 : vector<8x128xf32>
    %317 = arith.divf %315, %316 : vector<8x128xf32>
    %318 = arith.mulf %309, %292 : vector<8x128xf32>
    %319 = arith.mulf %303, %311 : vector<8x128xf32>
    %320 = arith.addf %318, %319 : vector<8x128xf32>
    %321 = math.tanh %320 : vector<8x128xf32>
    %322 = arith.mulf %317, %321 : vector<8x128xf32>
    %c0_98 = arith.constant 0 : index
    %c56_99 = arith.constant 56 : index
    %c0_100 = arith.constant 0 : index
    %323 = vector.load %arg3[%c0_98, %c56_99, %c0_100] : memref<1x128x1xf32, #tpu.memory_space<vmem>>, vector<1x8x1xf32>
    %324 = vector.shape_cast %323 : vector<1x8x1xf32> to vector<8x1xf32>
    %cst_101 = arith.constant 0.000000e+00 : f32
    %325 = vector.broadcast %cst_101 : f32 to vector<8x1xf32>
    %326 = arith.cmpf ogt, %324, %325 : vector<8x1xf32>
    %327 = vector.shape_cast %326 : vector<8x1xi1> to vector<8x1xi1>
    %328 = vector.broadcast %327 : vector<8x1xi1> to vector<8x128xi1>
    %329 = arith.select %328, %322, %289 : vector<8x128xi1>, vector<8x128xf32>
    %330 = vector.shape_cast %326 : vector<8x1xi1> to vector<8x1xi1>
    %331 = vector.broadcast %330 : vector<8x1xi1> to vector<8x128xi1>
    %332 = arith.select %331, %320, %292 : vector<8x128xi1>, vector<8x128xf32>
    %c64 = arith.constant 64 : index
    %c0_102 = arith.constant 0 : index
    %333 = vector.load %arg11[%c64, %c0_102] : memref<128x512xf32, #tpu.memory_space<vmem>>, vector<8x512xf32>
    %334 = arith.truncf %329 : vector<8x128xf32> to vector<8x128xbf16>
    %c0_103 = arith.constant 0 : index
    %c0_104 = arith.constant 0 : index
    %335 = vector.load %arg8[%c0_103, %c0_104] : memref<128x512xbf16, #tpu.memory_space<vmem>>, vector<128x512xbf16>
    %cst_105 = arith.constant dense<0.000000e+00> : vector<8x512xf32>
    %336 = tpu.matmul %334, %335, %cst_105 {dimension_numbers = #tpu.dot_dimension_numbers<[1], [0], [0], [1], [0, 0, 1, 1], [], []>} : vector<8x128xbf16>, vector<128x512xbf16>, vector<8x512xf32> -> vector<8x512xf32>
    %337 = arith.addf %333, %336 : vector<8x512xf32>
    %338 = vector.extract_strided_slice %337 {offsets = [0, 0], sizes = [8, 128], strides = [1, 1]} : vector<8x512xf32> to vector<8x128xf32>
    %339 = arith.negf %338 : vector<8x128xf32>
    %340 = math.exp %339 : vector<8x128xf32>
    %cst_106 = arith.constant 1.000000e+00 : f32
    %341 = vector.broadcast %cst_106 : f32 to vector<8x128xf32>
    %342 = arith.addf %341, %340 : vector<8x128xf32>
    %343 = arith.divf %341, %342 : vector<8x128xf32>
    %344 = vector.extract_strided_slice %337 {offsets = [0, 128], sizes = [8, 128], strides = [1, 1]} : vector<8x512xf32> to vector<8x128xf32>
    %345 = arith.negf %344 : vector<8x128xf32>
    %346 = math.exp %345 : vector<8x128xf32>
    %cst_107 = arith.constant 1.000000e+00 : f32
    %347 = vector.broadcast %cst_107 : f32 to vector<8x128xf32>
    %348 = arith.addf %347, %346 : vector<8x128xf32>
    %349 = arith.divf %347, %348 : vector<8x128xf32>
    %350 = vector.extract_strided_slice %337 {offsets = [0, 256], sizes = [8, 128], strides = [1, 1]} : vector<8x512xf32> to vector<8x128xf32>
    %351 = math.tanh %350 : vector<8x128xf32>
    %352 = vector.extract_strided_slice %337 {offsets = [0, 384], sizes = [8, 128], strides = [1, 1]} : vector<8x512xf32> to vector<8x128xf32>
    %353 = arith.negf %352 : vector<8x128xf32>
    %354 = math.exp %353 : vector<8x128xf32>
    %cst_108 = arith.constant 1.000000e+00 : f32
    %355 = vector.broadcast %cst_108 : f32 to vector<8x128xf32>
    %356 = arith.addf %355, %354 : vector<8x128xf32>
    %357 = arith.divf %355, %356 : vector<8x128xf32>
    %358 = arith.mulf %349, %332 : vector<8x128xf32>
    %359 = arith.mulf %343, %351 : vector<8x128xf32>
    %360 = arith.addf %358, %359 : vector<8x128xf32>
    %361 = math.tanh %360 : vector<8x128xf32>
    %362 = arith.mulf %357, %361 : vector<8x128xf32>
    %c0_109 = arith.constant 0 : index
    %c64_110 = arith.constant 64 : index
    %c0_111 = arith.constant 0 : index
    %363 = vector.load %arg3[%c0_109, %c64_110, %c0_111] : memref<1x128x1xf32, #tpu.memory_space<vmem>>, vector<1x8x1xf32>
    %364 = vector.shape_cast %363 : vector<1x8x1xf32> to vector<8x1xf32>
    %cst_112 = arith.constant 0.000000e+00 : f32
    %365 = vector.broadcast %cst_112 : f32 to vector<8x1xf32>
    %366 = arith.cmpf ogt, %364, %365 : vector<8x1xf32>
    %367 = vector.shape_cast %366 : vector<8x1xi1> to vector<8x1xi1>
    %368 = vector.broadcast %367 : vector<8x1xi1> to vector<8x128xi1>
    %369 = arith.select %368, %362, %329 : vector<8x128xi1>, vector<8x128xf32>
    %370 = vector.shape_cast %366 : vector<8x1xi1> to vector<8x1xi1>
    %371 = vector.broadcast %370 : vector<8x1xi1> to vector<8x128xi1>
    %372 = arith.select %371, %360, %332 : vector<8x128xi1>, vector<8x128xf32>
    %c72 = arith.constant 72 : index
    %c0_113 = arith.constant 0 : index
    %373 = vector.load %arg11[%c72, %c0_113] : memref<128x512xf32, #tpu.memory_space<vmem>>, vector<8x512xf32>
    %374 = arith.truncf %369 : vector<8x128xf32> to vector<8x128xbf16>
    %c0_114 = arith.constant 0 : index
    %c0_115 = arith.constant 0 : index
    %375 = vector.load %arg8[%c0_114, %c0_115] : memref<128x512xbf16, #tpu.memory_space<vmem>>, vector<128x512xbf16>
    %cst_116 = arith.constant dense<0.000000e+00> : vector<8x512xf32>
    %376 = tpu.matmul %374, %375, %cst_116 {dimension_numbers = #tpu.dot_dimension_numbers<[1], [0], [0], [1], [0, 0, 1, 1], [], []>} : vector<8x128xbf16>, vector<128x512xbf16>, vector<8x512xf32> -> vector<8x512xf32>
    %377 = arith.addf %373, %376 : vector<8x512xf32>
    %378 = vector.extract_strided_slice %377 {offsets = [0, 0], sizes = [8, 128], strides = [1, 1]} : vector<8x512xf32> to vector<8x128xf32>
    %379 = arith.negf %378 : vector<8x128xf32>
    %380 = math.exp %379 : vector<8x128xf32>
    %cst_117 = arith.constant 1.000000e+00 : f32
    %381 = vector.broadcast %cst_117 : f32 to vector<8x128xf32>
    %382 = arith.addf %381, %380 : vector<8x128xf32>
    %383 = arith.divf %381, %382 : vector<8x128xf32>
    %384 = vector.extract_strided_slice %377 {offsets = [0, 128], sizes = [8, 128], strides = [1, 1]} : vector<8x512xf32> to vector<8x128xf32>
    %385 = arith.negf %384 : vector<8x128xf32>
    %386 = math.exp %385 : vector<8x128xf32>
    %cst_118 = arith.constant 1.000000e+00 : f32
    %387 = vector.broadcast %cst_118 : f32 to vector<8x128xf32>
    %388 = arith.addf %387, %386 : vector<8x128xf32>
    %389 = arith.divf %387, %388 : vector<8x128xf32>
    %390 = vector.extract_strided_slice %377 {offsets = [0, 256], sizes = [8, 128], strides = [1, 1]} : vector<8x512xf32> to vector<8x128xf32>
    %391 = math.tanh %390 : vector<8x128xf32>
    %392 = vector.extract_strided_slice %377 {offsets = [0, 384], sizes = [8, 128], strides = [1, 1]} : vector<8x512xf32> to vector<8x128xf32>
    %393 = arith.negf %392 : vector<8x128xf32>
    %394 = math.exp %393 : vector<8x128xf32>
    %cst_119 = arith.constant 1.000000e+00 : f32
    %395 = vector.broadcast %cst_119 : f32 to vector<8x128xf32>
    %396 = arith.addf %395, %394 : vector<8x128xf32>
    %397 = arith.divf %395, %396 : vector<8x128xf32>
    %398 = arith.mulf %389, %372 : vector<8x128xf32>
    %399 = arith.mulf %383, %391 : vector<8x128xf32>
    %400 = arith.addf %398, %399 : vector<8x128xf32>
    %401 = math.tanh %400 : vector<8x128xf32>
    %402 = arith.mulf %397, %401 : vector<8x128xf32>
    %c0_120 = arith.constant 0 : index
    %c72_121 = arith.constant 72 : index
    %c0_122 = arith.constant 0 : index
    %403 = vector.load %arg3[%c0_120, %c72_121, %c0_122] : memref<1x128x1xf32, #tpu.memory_space<vmem>>, vector<1x8x1xf32>
    %404 = vector.shape_cast %403 : vector<1x8x1xf32> to vector<8x1xf32>
    %cst_123 = arith.constant 0.000000e+00 : f32
    %405 = vector.broadcast %cst_123 : f32 to vector<8x1xf32>
    %406 = arith.cmpf ogt, %404, %405 : vector<8x1xf32>
    %407 = vector.shape_cast %406 : vector<8x1xi1> to vector<8x1xi1>
    %408 = vector.broadcast %407 : vector<8x1xi1> to vector<8x128xi1>
    %409 = arith.select %408, %402, %369 : vector<8x128xi1>, vector<8x128xf32>
    %410 = vector.shape_cast %406 : vector<8x1xi1> to vector<8x1xi1>
    %411 = vector.broadcast %410 : vector<8x1xi1> to vector<8x128xi1>
    %412 = arith.select %411, %400, %372 : vector<8x128xi1>, vector<8x128xf32>
    %c80 = arith.constant 80 : index
    %c0_124 = arith.constant 0 : index
    %413 = vector.load %arg11[%c80, %c0_124] : memref<128x512xf32, #tpu.memory_space<vmem>>, vector<8x512xf32>
    %414 = arith.truncf %409 : vector<8x128xf32> to vector<8x128xbf16>
    %c0_125 = arith.constant 0 : index
    %c0_126 = arith.constant 0 : index
    %415 = vector.load %arg8[%c0_125, %c0_126] : memref<128x512xbf16, #tpu.memory_space<vmem>>, vector<128x512xbf16>
    %cst_127 = arith.constant dense<0.000000e+00> : vector<8x512xf32>
    %416 = tpu.matmul %414, %415, %cst_127 {dimension_numbers = #tpu.dot_dimension_numbers<[1], [0], [0], [1], [0, 0, 1, 1], [], []>} : vector<8x128xbf16>, vector<128x512xbf16>, vector<8x512xf32> -> vector<8x512xf32>
    %417 = arith.addf %413, %416 : vector<8x512xf32>
    %418 = vector.extract_strided_slice %417 {offsets = [0, 0], sizes = [8, 128], strides = [1, 1]} : vector<8x512xf32> to vector<8x128xf32>
    %419 = arith.negf %418 : vector<8x128xf32>
    %420 = math.exp %419 : vector<8x128xf32>
    %cst_128 = arith.constant 1.000000e+00 : f32
    %421 = vector.broadcast %cst_128 : f32 to vector<8x128xf32>
    %422 = arith.addf %421, %420 : vector<8x128xf32>
    %423 = arith.divf %421, %422 : vector<8x128xf32>
    %424 = vector.extract_strided_slice %417 {offsets = [0, 128], sizes = [8, 128], strides = [1, 1]} : vector<8x512xf32> to vector<8x128xf32>
    %425 = arith.negf %424 : vector<8x128xf32>
    %426 = math.exp %425 : vector<8x128xf32>
    %cst_129 = arith.constant 1.000000e+00 : f32
    %427 = vector.broadcast %cst_129 : f32 to vector<8x128xf32>
    %428 = arith.addf %427, %426 : vector<8x128xf32>
    %429 = arith.divf %427, %428 : vector<8x128xf32>
    %430 = vector.extract_strided_slice %417 {offsets = [0, 256], sizes = [8, 128], strides = [1, 1]} : vector<8x512xf32> to vector<8x128xf32>
    %431 = math.tanh %430 : vector<8x128xf32>
    %432 = vector.extract_strided_slice %417 {offsets = [0, 384], sizes = [8, 128], strides = [1, 1]} : vector<8x512xf32> to vector<8x128xf32>
    %433 = arith.negf %432 : vector<8x128xf32>
    %434 = math.exp %433 : vector<8x128xf32>
    %cst_130 = arith.constant 1.000000e+00 : f32
    %435 = vector.broadcast %cst_130 : f32 to vector<8x128xf32>
    %436 = arith.addf %435, %434 : vector<8x128xf32>
    %437 = arith.divf %435, %436 : vector<8x128xf32>
    %438 = arith.mulf %429, %412 : vector<8x128xf32>
    %439 = arith.mulf %423, %431 : vector<8x128xf32>
    %440 = arith.addf %438, %439 : vector<8x128xf32>
    %441 = math.tanh %440 : vector<8x128xf32>
    %442 = arith.mulf %437, %441 : vector<8x128xf32>
    %c0_131 = arith.constant 0 : index
    %c80_132 = arith.constant 80 : index
    %c0_133 = arith.constant 0 : index
    %443 = vector.load %arg3[%c0_131, %c80_132, %c0_133] : memref<1x128x1xf32, #tpu.memory_space<vmem>>, vector<1x8x1xf32>
    %444 = vector.shape_cast %443 : vector<1x8x1xf32> to vector<8x1xf32>
    %cst_134 = arith.constant 0.000000e+00 : f32
    %445 = vector.broadcast %cst_134 : f32 to vector<8x1xf32>
    %446 = arith.cmpf ogt, %444, %445 : vector<8x1xf32>
    %447 = vector.shape_cast %446 : vector<8x1xi1> to vector<8x1xi1>
    %448 = vector.broadcast %447 : vector<8x1xi1> to vector<8x128xi1>
    %449 = arith.select %448, %442, %409 : vector<8x128xi1>, vector<8x128xf32>
    %450 = vector.shape_cast %446 : vector<8x1xi1> to vector<8x1xi1>
    %451 = vector.broadcast %450 : vector<8x1xi1> to vector<8x128xi1>
    %452 = arith.select %451, %440, %412 : vector<8x128xi1>, vector<8x128xf32>
    %c88 = arith.constant 88 : index
    %c0_135 = arith.constant 0 : index
    %453 = vector.load %arg11[%c88, %c0_135] : memref<128x512xf32, #tpu.memory_space<vmem>>, vector<8x512xf32>
    %454 = arith.truncf %449 : vector<8x128xf32> to vector<8x128xbf16>
    %c0_136 = arith.constant 0 : index
    %c0_137 = arith.constant 0 : index
    %455 = vector.load %arg8[%c0_136, %c0_137] : memref<128x512xbf16, #tpu.memory_space<vmem>>, vector<128x512xbf16>
    %cst_138 = arith.constant dense<0.000000e+00> : vector<8x512xf32>
    %456 = tpu.matmul %454, %455, %cst_138 {dimension_numbers = #tpu.dot_dimension_numbers<[1], [0], [0], [1], [0, 0, 1, 1], [], []>} : vector<8x128xbf16>, vector<128x512xbf16>, vector<8x512xf32> -> vector<8x512xf32>
    %457 = arith.addf %453, %456 : vector<8x512xf32>
    %458 = vector.extract_strided_slice %457 {offsets = [0, 0], sizes = [8, 128], strides = [1, 1]} : vector<8x512xf32> to vector<8x128xf32>
    %459 = arith.negf %458 : vector<8x128xf32>
    %460 = math.exp %459 : vector<8x128xf32>
    %cst_139 = arith.constant 1.000000e+00 : f32
    %461 = vector.broadcast %cst_139 : f32 to vector<8x128xf32>
    %462 = arith.addf %461, %460 : vector<8x128xf32>
    %463 = arith.divf %461, %462 : vector<8x128xf32>
    %464 = vector.extract_strided_slice %457 {offsets = [0, 128], sizes = [8, 128], strides = [1, 1]} : vector<8x512xf32> to vector<8x128xf32>
    %465 = arith.negf %464 : vector<8x128xf32>
    %466 = math.exp %465 : vector<8x128xf32>
    %cst_140 = arith.constant 1.000000e+00 : f32
    %467 = vector.broadcast %cst_140 : f32 to vector<8x128xf32>
    %468 = arith.addf %467, %466 : vector<8x128xf32>
    %469 = arith.divf %467, %468 : vector<8x128xf32>
    %470 = vector.extract_strided_slice %457 {offsets = [0, 256], sizes = [8, 128], strides = [1, 1]} : vector<8x512xf32> to vector<8x128xf32>
    %471 = math.tanh %470 : vector<8x128xf32>
    %472 = vector.extract_strided_slice %457 {offsets = [0, 384], sizes = [8, 128], strides = [1, 1]} : vector<8x512xf32> to vector<8x128xf32>
    %473 = arith.negf %472 : vector<8x128xf32>
    %474 = math.exp %473 : vector<8x128xf32>
    %cst_141 = arith.constant 1.000000e+00 : f32
    %475 = vector.broadcast %cst_141 : f32 to vector<8x128xf32>
    %476 = arith.addf %475, %474 : vector<8x128xf32>
    %477 = arith.divf %475, %476 : vector<8x128xf32>
    %478 = arith.mulf %469, %452 : vector<8x128xf32>
    %479 = arith.mulf %463, %471 : vector<8x128xf32>
    %480 = arith.addf %478, %479 : vector<8x128xf32>
    %481 = math.tanh %480 : vector<8x128xf32>
    %482 = arith.mulf %477, %481 : vector<8x128xf32>
    %c0_142 = arith.constant 0 : index
    %c88_143 = arith.constant 88 : index
    %c0_144 = arith.constant 0 : index
    %483 = vector.load %arg3[%c0_142, %c88_143, %c0_144] : memref<1x128x1xf32, #tpu.memory_space<vmem>>, vector<1x8x1xf32>
    %484 = vector.shape_cast %483 : vector<1x8x1xf32> to vector<8x1xf32>
    %cst_145 = arith.constant 0.000000e+00 : f32
    %485 = vector.broadcast %cst_145 : f32 to vector<8x1xf32>
    %486 = arith.cmpf ogt, %484, %485 : vector<8x1xf32>
    %487 = vector.shape_cast %486 : vector<8x1xi1> to vector<8x1xi1>
    %488 = vector.broadcast %487 : vector<8x1xi1> to vector<8x128xi1>
    %489 = arith.select %488, %482, %449 : vector<8x128xi1>, vector<8x128xf32>
    %490 = vector.shape_cast %486 : vector<8x1xi1> to vector<8x1xi1>
    %491 = vector.broadcast %490 : vector<8x1xi1> to vector<8x128xi1>
    %492 = arith.select %491, %480, %452 : vector<8x128xi1>, vector<8x128xf32>
    %c96 = arith.constant 96 : index
    %c0_146 = arith.constant 0 : index
    %493 = vector.load %arg11[%c96, %c0_146] : memref<128x512xf32, #tpu.memory_space<vmem>>, vector<8x512xf32>
    %494 = arith.truncf %489 : vector<8x128xf32> to vector<8x128xbf16>
    %c0_147 = arith.constant 0 : index
    %c0_148 = arith.constant 0 : index
    %495 = vector.load %arg8[%c0_147, %c0_148] : memref<128x512xbf16, #tpu.memory_space<vmem>>, vector<128x512xbf16>
    %cst_149 = arith.constant dense<0.000000e+00> : vector<8x512xf32>
    %496 = tpu.matmul %494, %495, %cst_149 {dimension_numbers = #tpu.dot_dimension_numbers<[1], [0], [0], [1], [0, 0, 1, 1], [], []>} : vector<8x128xbf16>, vector<128x512xbf16>, vector<8x512xf32> -> vector<8x512xf32>
    %497 = arith.addf %493, %496 : vector<8x512xf32>
    %498 = vector.extract_strided_slice %497 {offsets = [0, 0], sizes = [8, 128], strides = [1, 1]} : vector<8x512xf32> to vector<8x128xf32>
    %499 = arith.negf %498 : vector<8x128xf32>
    %500 = math.exp %499 : vector<8x128xf32>
    %cst_150 = arith.constant 1.000000e+00 : f32
    %501 = vector.broadcast %cst_150 : f32 to vector<8x128xf32>
    %502 = arith.addf %501, %500 : vector<8x128xf32>
    %503 = arith.divf %501, %502 : vector<8x128xf32>
    %504 = vector.extract_strided_slice %497 {offsets = [0, 128], sizes = [8, 128], strides = [1, 1]} : vector<8x512xf32> to vector<8x128xf32>
    %505 = arith.negf %504 : vector<8x128xf32>
    %506 = math.exp %505 : vector<8x128xf32>
    %cst_151 = arith.constant 1.000000e+00 : f32
    %507 = vector.broadcast %cst_151 : f32 to vector<8x128xf32>
    %508 = arith.addf %507, %506 : vector<8x128xf32>
    %509 = arith.divf %507, %508 : vector<8x128xf32>
    %510 = vector.extract_strided_slice %497 {offsets = [0, 256], sizes = [8, 128], strides = [1, 1]} : vector<8x512xf32> to vector<8x128xf32>
    %511 = math.tanh %510 : vector<8x128xf32>
    %512 = vector.extract_strided_slice %497 {offsets = [0, 384], sizes = [8, 128], strides = [1, 1]} : vector<8x512xf32> to vector<8x128xf32>
    %513 = arith.negf %512 : vector<8x128xf32>
    %514 = math.exp %513 : vector<8x128xf32>
    %cst_152 = arith.constant 1.000000e+00 : f32
    %515 = vector.broadcast %cst_152 : f32 to vector<8x128xf32>
    %516 = arith.addf %515, %514 : vector<8x128xf32>
    %517 = arith.divf %515, %516 : vector<8x128xf32>
    %518 = arith.mulf %509, %492 : vector<8x128xf32>
    %519 = arith.mulf %503, %511 : vector<8x128xf32>
    %520 = arith.addf %518, %519 : vector<8x128xf32>
    %521 = math.tanh %520 : vector<8x128xf32>
    %522 = arith.mulf %517, %521 : vector<8x128xf32>
    %c0_153 = arith.constant 0 : index
    %c96_154 = arith.constant 96 : index
    %c0_155 = arith.constant 0 : index
    %523 = vector.load %arg3[%c0_153, %c96_154, %c0_155] : memref<1x128x1xf32, #tpu.memory_space<vmem>>, vector<1x8x1xf32>
    %524 = vector.shape_cast %523 : vector<1x8x1xf32> to vector<8x1xf32>
    %cst_156 = arith.constant 0.000000e+00 : f32
    %525 = vector.broadcast %cst_156 : f32 to vector<8x1xf32>
    %526 = arith.cmpf ogt, %524, %525 : vector<8x1xf32>
    %527 = vector.shape_cast %526 : vector<8x1xi1> to vector<8x1xi1>
    %528 = vector.broadcast %527 : vector<8x1xi1> to vector<8x128xi1>
    %529 = arith.select %528, %522, %489 : vector<8x128xi1>, vector<8x128xf32>
    %530 = vector.shape_cast %526 : vector<8x1xi1> to vector<8x1xi1>
    %531 = vector.broadcast %530 : vector<8x1xi1> to vector<8x128xi1>
    %532 = arith.select %531, %520, %492 : vector<8x128xi1>, vector<8x128xf32>
    %c104 = arith.constant 104 : index
    %c0_157 = arith.constant 0 : index
    %533 = vector.load %arg11[%c104, %c0_157] : memref<128x512xf32, #tpu.memory_space<vmem>>, vector<8x512xf32>
    %534 = arith.truncf %529 : vector<8x128xf32> to vector<8x128xbf16>
    %c0_158 = arith.constant 0 : index
    %c0_159 = arith.constant 0 : index
    %535 = vector.load %arg8[%c0_158, %c0_159] : memref<128x512xbf16, #tpu.memory_space<vmem>>, vector<128x512xbf16>
    %cst_160 = arith.constant dense<0.000000e+00> : vector<8x512xf32>
    %536 = tpu.matmul %534, %535, %cst_160 {dimension_numbers = #tpu.dot_dimension_numbers<[1], [0], [0], [1], [0, 0, 1, 1], [], []>} : vector<8x128xbf16>, vector<128x512xbf16>, vector<8x512xf32> -> vector<8x512xf32>
    %537 = arith.addf %533, %536 : vector<8x512xf32>
    %538 = vector.extract_strided_slice %537 {offsets = [0, 0], sizes = [8, 128], strides = [1, 1]} : vector<8x512xf32> to vector<8x128xf32>
    %539 = arith.negf %538 : vector<8x128xf32>
    %540 = math.exp %539 : vector<8x128xf32>
    %cst_161 = arith.constant 1.000000e+00 : f32
    %541 = vector.broadcast %cst_161 : f32 to vector<8x128xf32>
    %542 = arith.addf %541, %540 : vector<8x128xf32>
    %543 = arith.divf %541, %542 : vector<8x128xf32>
    %544 = vector.extract_strided_slice %537 {offsets = [0, 128], sizes = [8, 128], strides = [1, 1]} : vector<8x512xf32> to vector<8x128xf32>
    %545 = arith.negf %544 : vector<8x128xf32>
    %546 = math.exp %545 : vector<8x128xf32>
    %cst_162 = arith.constant 1.000000e+00 : f32
    %547 = vector.broadcast %cst_162 : f32 to vector<8x128xf32>
    %548 = arith.addf %547, %546 : vector<8x128xf32>
    %549 = arith.divf %547, %548 : vector<8x128xf32>
    %550 = vector.extract_strided_slice %537 {offsets = [0, 256], sizes = [8, 128], strides = [1, 1]} : vector<8x512xf32> to vector<8x128xf32>
    %551 = math.tanh %550 : vector<8x128xf32>
    %552 = vector.extract_strided_slice %537 {offsets = [0, 384], sizes = [8, 128], strides = [1, 1]} : vector<8x512xf32> to vector<8x128xf32>
    %553 = arith.negf %552 : vector<8x128xf32>
    %554 = math.exp %553 : vector<8x128xf32>
    %cst_163 = arith.constant 1.000000e+00 : f32
    %555 = vector.broadcast %cst_163 : f32 to vector<8x128xf32>
    %556 = arith.addf %555, %554 : vector<8x128xf32>
    %557 = arith.divf %555, %556 : vector<8x128xf32>
    %558 = arith.mulf %549, %532 : vector<8x128xf32>
    %559 = arith.mulf %543, %551 : vector<8x128xf32>
    %560 = arith.addf %558, %559 : vector<8x128xf32>
    %561 = math.tanh %560 : vector<8x128xf32>
    %562 = arith.mulf %557, %561 : vector<8x128xf32>
    %c0_164 = arith.constant 0 : index
    %c104_165 = arith.constant 104 : index
    %c0_166 = arith.constant 0 : index
    %563 = vector.load %arg3[%c0_164, %c104_165, %c0_166] : memref<1x128x1xf32, #tpu.memory_space<vmem>>, vector<1x8x1xf32>
    %564 = vector.shape_cast %563 : vector<1x8x1xf32> to vector<8x1xf32>
    %cst_167 = arith.constant 0.000000e+00 : f32
    %565 = vector.broadcast %cst_167 : f32 to vector<8x1xf32>
    %566 = arith.cmpf ogt, %564, %565 : vector<8x1xf32>
    %567 = vector.shape_cast %566 : vector<8x1xi1> to vector<8x1xi1>
    %568 = vector.broadcast %567 : vector<8x1xi1> to vector<8x128xi1>
    %569 = arith.select %568, %562, %529 : vector<8x128xi1>, vector<8x128xf32>
    %570 = vector.shape_cast %566 : vector<8x1xi1> to vector<8x1xi1>
    %571 = vector.broadcast %570 : vector<8x1xi1> to vector<8x128xi1>
    %572 = arith.select %571, %560, %532 : vector<8x128xi1>, vector<8x128xf32>
    %c112 = arith.constant 112 : index
    %c0_168 = arith.constant 0 : index
    %573 = vector.load %arg11[%c112, %c0_168] : memref<128x512xf32, #tpu.memory_space<vmem>>, vector<8x512xf32>
    %574 = arith.truncf %569 : vector<8x128xf32> to vector<8x128xbf16>
    %c0_169 = arith.constant 0 : index
    %c0_170 = arith.constant 0 : index
    %575 = vector.load %arg8[%c0_169, %c0_170] : memref<128x512xbf16, #tpu.memory_space<vmem>>, vector<128x512xbf16>
    %cst_171 = arith.constant dense<0.000000e+00> : vector<8x512xf32>
    %576 = tpu.matmul %574, %575, %cst_171 {dimension_numbers = #tpu.dot_dimension_numbers<[1], [0], [0], [1], [0, 0, 1, 1], [], []>} : vector<8x128xbf16>, vector<128x512xbf16>, vector<8x512xf32> -> vector<8x512xf32>
    %577 = arith.addf %573, %576 : vector<8x512xf32>
    %578 = vector.extract_strided_slice %577 {offsets = [0, 0], sizes = [8, 128], strides = [1, 1]} : vector<8x512xf32> to vector<8x128xf32>
    %579 = arith.negf %578 : vector<8x128xf32>
    %580 = math.exp %579 : vector<8x128xf32>
    %cst_172 = arith.constant 1.000000e+00 : f32
    %581 = vector.broadcast %cst_172 : f32 to vector<8x128xf32>
    %582 = arith.addf %581, %580 : vector<8x128xf32>
    %583 = arith.divf %581, %582 : vector<8x128xf32>
    %584 = vector.extract_strided_slice %577 {offsets = [0, 128], sizes = [8, 128], strides = [1, 1]} : vector<8x512xf32> to vector<8x128xf32>
    %585 = arith.negf %584 : vector<8x128xf32>
    %586 = math.exp %585 : vector<8x128xf32>
    %cst_173 = arith.constant 1.000000e+00 : f32
    %587 = vector.broadcast %cst_173 : f32 to vector<8x128xf32>
    %588 = arith.addf %587, %586 : vector<8x128xf32>
    %589 = arith.divf %587, %588 : vector<8x128xf32>
    %590 = vector.extract_strided_slice %577 {offsets = [0, 256], sizes = [8, 128], strides = [1, 1]} : vector<8x512xf32> to vector<8x128xf32>
    %591 = math.tanh %590 : vector<8x128xf32>
    %592 = vector.extract_strided_slice %577 {offsets = [0, 384], sizes = [8, 128], strides = [1, 1]} : vector<8x512xf32> to vector<8x128xf32>
    %593 = arith.negf %592 : vector<8x128xf32>
    %594 = math.exp %593 : vector<8x128xf32>
    %cst_174 = arith.constant 1.000000e+00 : f32
    %595 = vector.broadcast %cst_174 : f32 to vector<8x128xf32>
    %596 = arith.addf %595, %594 : vector<8x128xf32>
    %597 = arith.divf %595, %596 : vector<8x128xf32>
    %598 = arith.mulf %589, %572 : vector<8x128xf32>
    %599 = arith.mulf %583, %591 : vector<8x128xf32>
    %600 = arith.addf %598, %599 : vector<8x128xf32>
    %601 = math.tanh %600 : vector<8x128xf32>
    %602 = arith.mulf %597, %601 : vector<8x128xf32>
    %c0_175 = arith.constant 0 : index
    %c112_176 = arith.constant 112 : index
    %c0_177 = arith.constant 0 : index
    %603 = vector.load %arg3[%c0_175, %c112_176, %c0_177] : memref<1x128x1xf32, #tpu.memory_space<vmem>>, vector<1x8x1xf32>
    %604 = vector.shape_cast %603 : vector<1x8x1xf32> to vector<8x1xf32>
    %cst_178 = arith.constant 0.000000e+00 : f32
    %605 = vector.broadcast %cst_178 : f32 to vector<8x1xf32>
    %606 = arith.cmpf ogt, %604, %605 : vector<8x1xf32>
    %607 = vector.shape_cast %606 : vector<8x1xi1> to vector<8x1xi1>
    %608 = vector.broadcast %607 : vector<8x1xi1> to vector<8x128xi1>
    %609 = arith.select %608, %602, %569 : vector<8x128xi1>, vector<8x128xf32>
    %610 = vector.shape_cast %606 : vector<8x1xi1> to vector<8x1xi1>
    %611 = vector.broadcast %610 : vector<8x1xi1> to vector<8x128xi1>
    %612 = arith.select %611, %600, %572 : vector<8x128xi1>, vector<8x128xf32>
    %c120 = arith.constant 120 : index
    %c0_179 = arith.constant 0 : index
    %613 = vector.load %arg11[%c120, %c0_179] : memref<128x512xf32, #tpu.memory_space<vmem>>, vector<8x512xf32>
    %614 = arith.truncf %609 : vector<8x128xf32> to vector<8x128xbf16>
    %c0_180 = arith.constant 0 : index
    %c0_181 = arith.constant 0 : index
    %615 = vector.load %arg8[%c0_180, %c0_181] : memref<128x512xbf16, #tpu.memory_space<vmem>>, vector<128x512xbf16>
    %cst_182 = arith.constant dense<0.000000e+00> : vector<8x512xf32>
    %616 = tpu.matmul %614, %615, %cst_182 {dimension_numbers = #tpu.dot_dimension_numbers<[1], [0], [0], [1], [0, 0, 1, 1], [], []>} : vector<8x128xbf16>, vector<128x512xbf16>, vector<8x512xf32> -> vector<8x512xf32>
    %617 = arith.addf %613, %616 : vector<8x512xf32>
    %618 = vector.extract_strided_slice %617 {offsets = [0, 0], sizes = [8, 128], strides = [1, 1]} : vector<8x512xf32> to vector<8x128xf32>
    %619 = arith.negf %618 : vector<8x128xf32>
    %620 = math.exp %619 : vector<8x128xf32>
    %cst_183 = arith.constant 1.000000e+00 : f32
    %621 = vector.broadcast %cst_183 : f32 to vector<8x128xf32>
    %622 = arith.addf %621, %620 : vector<8x128xf32>
    %623 = arith.divf %621, %622 : vector<8x128xf32>
    %624 = vector.extract_strided_slice %617 {offsets = [0, 128], sizes = [8, 128], strides = [1, 1]} : vector<8x512xf32> to vector<8x128xf32>
    %625 = arith.negf %624 : vector<8x128xf32>
    %626 = math.exp %625 : vector<8x128xf32>
    %cst_184 = arith.constant 1.000000e+00 : f32
    %627 = vector.broadcast %cst_184 : f32 to vector<8x128xf32>
    %628 = arith.addf %627, %626 : vector<8x128xf32>
    %629 = arith.divf %627, %628 : vector<8x128xf32>
    %630 = vector.extract_strided_slice %617 {offsets = [0, 256], sizes = [8, 128], strides = [1, 1]} : vector<8x512xf32> to vector<8x128xf32>
    %631 = math.tanh %630 : vector<8x128xf32>
    %632 = vector.extract_strided_slice %617 {offsets = [0, 384], sizes = [8, 128], strides = [1, 1]} : vector<8x512xf32> to vector<8x128xf32>
    %633 = arith.negf %632 : vector<8x128xf32>
    %634 = math.exp %633 : vector<8x128xf32>
    %cst_185 = arith.constant 1.000000e+00 : f32
    %635 = vector.broadcast %cst_185 : f32 to vector<8x128xf32>
    %636 = arith.addf %635, %634 : vector<8x128xf32>
    %637 = arith.divf %635, %636 : vector<8x128xf32>
    %638 = arith.mulf %629, %612 : vector<8x128xf32>
    %639 = arith.mulf %623, %631 : vector<8x128xf32>
    %640 = arith.addf %638, %639 : vector<8x128xf32>
    %641 = math.tanh %640 : vector<8x128xf32>
    %642 = arith.mulf %637, %641 : vector<8x128xf32>
    %c0_186 = arith.constant 0 : index
    %c120_187 = arith.constant 120 : index
    %c0_188 = arith.constant 0 : index
    %643 = vector.load %arg3[%c0_186, %c120_187, %c0_188] : memref<1x128x1xf32, #tpu.memory_space<vmem>>, vector<1x8x1xf32>
    %644 = vector.shape_cast %643 : vector<1x8x1xf32> to vector<8x1xf32>
    %cst_189 = arith.constant 0.000000e+00 : f32
    %645 = vector.broadcast %cst_189 : f32 to vector<8x1xf32>
    %646 = arith.cmpf ogt, %644, %645 : vector<8x1xf32>
    %647 = vector.shape_cast %646 : vector<8x1xi1> to vector<8x1xi1>
    %648 = vector.broadcast %647 : vector<8x1xi1> to vector<8x128xi1>
    %649 = arith.select %648, %642, %609 : vector<8x128xi1>, vector<8x128xf32>
    %650 = vector.shape_cast %646 : vector<8x1xi1> to vector<8x1xi1>
    %651 = vector.broadcast %650 : vector<8x1xi1> to vector<8x128xi1>
    %652 = arith.select %651, %640, %612 : vector<8x128xi1>, vector<8x128xf32>
    %c0_190 = arith.constant 0 : index
    %c0_191 = arith.constant 0 : index
    %653 = vector.load %arg9[%c0_190, %c0_191] : memref<8x128xf32, #tpu.memory_space<vmem>>, vector<8x128xf32>
    tpu.vector_store %arg9[%c0_190, %c0_191], %649 {strides = array<i32>} : memref<8x128xf32, #tpu.memory_space<vmem>>, vector<8x128xf32>,
    %c0_192 = arith.constant 0 : index
    %c0_193 = arith.constant 0 : index
    %654 = vector.load %arg10[%c0_192, %c0_193] : memref<8x128xf32, #tpu.memory_space<vmem>>, vector<8x128xf32>
    tpu.vector_store %arg10[%c0_192, %c0_193], %652 {strides = array<i32>} : memref<8x128xf32, #tpu.memory_space<vmem>>, vector<8x128xf32>,
    return
  }
  func.func @transform_0(%arg0: i32, %arg1: i32) -> (i32, i32, i32) {
    %c0_i32 = arith.constant 0 : i32
    %c0_i32_0 = arith.constant 0 : i32
    return %arg0, %arg1, %c0_i32 : i32, i32, i32
  }
  func.func @transform_1(%arg0: i32, %arg1: i32) -> (i32, i32, i32) {
    %c0_i32 = arith.constant 0 : i32
    %c0_i32_0 = arith.constant 0 : i32
    return %arg0, %arg1, %c0_i32 : i32, i32, i32
  }
  func.func @transform_2(%arg0: i32, %arg1: i32) -> (i32, i32) {
    %c0_i32 = arith.constant 0 : i32
    %c0_i32_0 = arith.constant 0 : i32
    return %arg0, %c0_i32 : i32, i32
  }
  func.func @transform_3(%arg0: i32, %arg1: i32) -> (i32, i32) {
    %c0_i32 = arith.constant 0 : i32
    %c0_i32_0 = arith.constant 0 : i32
    return %arg0, %c0_i32 : i32, i32
  }
  func.func @transform_4(%arg0: i32, %arg1: i32) -> (i32, i32) {
    %c0_i32 = arith.constant 0 : i32
    %c0_i32_0 = arith.constant 0 : i32
    %c0_i32_1 = arith.constant 0 : i32
    return %c0_i32, %c0_i32_0 : i32, i32
  }
  func.func @transform_5(%arg0: i32, %arg1: i32) -> (i32, i32) {
    %c0_i32 = arith.constant 0 : i32
    %c0_i32_0 = arith.constant 0 : i32
    %c0_i32_1 = arith.constant 0 : i32
    return %c0_i32, %c0_i32_0 : i32, i32
  }
  func.func @transform_6(%arg0: i32, %arg1: i32) -> (i32, i32) {
    %c0_i32 = arith.constant 0 : i32
    %c0_i32_0 = arith.constant 0 : i32
    %c0_i32_1 = arith.constant 0 : i32
    return %c0_i32, %c0_i32_0 : i32, i32
  }
  func.func @transform_7(%arg0: i32, %arg1: i32) -> (i32, i32) {
    %c0_i32 = arith.constant 0 : i32
    %c0_i32_0 = arith.constant 0 : i32
    return %arg0, %c0_i32 : i32, i32
  }
  func.func @transform_8(%arg0: i32, %arg1: i32) -> (i32, i32) {
    %c0_i32 = arith.constant 0 : i32
    %c0_i32_0 = arith.constant 0 : i32
    return %arg0, %c0_i32 : i32, i32
  }
}

module attributes {stable_mosaic.version = 11 : i64} {
  func.func @_lstm_kernel(%arg0: i32, %arg1: i32, %arg2: memref<1x64x128xbf16, #tpu.memory_space<vmem>>, %arg3: memref<8x128xf32, #tpu.memory_space<vmem>>, %arg4: memref<8x128xf32, #tpu.memory_space<vmem>>, %arg5: memref<128x512xbf16, #tpu.memory_space<vmem>>, %arg6: memref<1x512xf32, #tpu.memory_space<vmem>>, %arg7: memref<128x512xbf16, #tpu.memory_space<vmem>>, %arg8: memref<1x64x128xf32, #tpu.memory_space<vmem>>, %arg9: memref<8x128xf32, #tpu.memory_space<vmem>>, %arg10: memref<8x128xf32, #tpu.memory_space<vmem>>, %arg11: memref<64x512xf32, #tpu.memory_space<vmem>>) attributes {dimension_semantics = [#tpu.dimension_semantics<parallel>, #tpu.dimension_semantics<arbitrary>], iteration_bounds = array<i64: 2, 1>, scalar_prefetch = 0 : i64, scratch_operands = 1 : i64, tpu.core_type = #tpu.core_type<tc>, window_params = [{transform_indices = @transform_0, window_bounds = array<i64: 1, 64, 128>}, {transform_indices = @transform_1, window_bounds = array<i64: 8, 128>}, {transform_indices = @transform_2, window_bounds = array<i64: 8, 128>}, {pipeline_mode = #tpu.pipeline_mode<synchronous>, transform_indices = @transform_3, window_bounds = array<i64: 128, 512>}, {pipeline_mode = #tpu.pipeline_mode<synchronous>, transform_indices = @transform_4, window_bounds = array<i64: 1, 512>}, {pipeline_mode = #tpu.pipeline_mode<synchronous>, transform_indices = @transform_5, window_bounds = array<i64: 128, 512>}, {transform_indices = @transform_6, window_bounds = array<i64: 1, 64, 128>}, {transform_indices = @transform_7, window_bounds = array<i64: 8, 128>}, {transform_indices = @transform_8, window_bounds = array<i64: 8, 128>}]} {
    %c0_i32 = arith.constant 0 : i32
    %0 = arith.cmpi eq, %arg1, %c0_i32 : i32
    %1 = arith.extui %0 : i1 to i32
    %c0_i32_0 = arith.constant 0 : i32
    %2 = arith.cmpi ne, %1, %c0_i32_0 : i32
    scf.if %2 {
      %c0_98 = arith.constant 0 : index
      %c0_99 = arith.constant 0 : index
      %279 = vector.load %arg3[%c0_98, %c0_99] : memref<8x128xf32, #tpu.memory_space<vmem>>, vector<8x128xf32>
      %c0_100 = arith.constant 0 : index
      %c0_101 = arith.constant 0 : index
      %280 = vector.load %arg9[%c0_100, %c0_101] : memref<8x128xf32, #tpu.memory_space<vmem>>, vector<8x128xf32>
      tpu.vector_store %arg9[%c0_100, %c0_101], %279 {strides = array<i32>} : memref<8x128xf32, #tpu.memory_space<vmem>>, vector<8x128xf32>,
      %c0_102 = arith.constant 0 : index
      %c0_103 = arith.constant 0 : index
      %281 = vector.load %arg4[%c0_102, %c0_103] : memref<8x128xf32, #tpu.memory_space<vmem>>, vector<8x128xf32>
      %c0_104 = arith.constant 0 : index
      %c0_105 = arith.constant 0 : index
      %282 = vector.load %arg10[%c0_104, %c0_105] : memref<8x128xf32, #tpu.memory_space<vmem>>, vector<8x128xf32>
      tpu.vector_store %arg10[%c0_104, %c0_105], %281 {strides = array<i32>} : memref<8x128xf32, #tpu.memory_space<vmem>>, vector<8x128xf32>,
    } else {
    }
    %c0 = arith.constant 0 : index
    %c0_1 = arith.constant 0 : index
    %c0_2 = arith.constant 0 : index
    %3 = vector.load %arg2[%c0, %c0_1, %c0_2] : memref<1x64x128xbf16, #tpu.memory_space<vmem>>, vector<1x64x128xbf16>
    %4 = vector.shape_cast %3 : vector<1x64x128xbf16> to vector<64x128xbf16>
    %c0_3 = arith.constant 0 : index
    %c0_4 = arith.constant 0 : index
    %5 = vector.load %arg5[%c0_3, %c0_4] : memref<128x512xbf16, #tpu.memory_space<vmem>>, vector<128x512xbf16>
    %cst = arith.constant dense<0.000000e+00> : vector<64x512xf32>
    %6 = tpu.matmul %4, %5, %cst {dimension_numbers = #tpu.dot_dimension_numbers<[1], [0], [0], [1], [0, 0, 1, 1], [], []>} : vector<64x128xbf16>, vector<128x512xbf16>, vector<64x512xf32> -> vector<64x512xf32>
    %c0_5 = arith.constant 0 : index
    %c0_6 = arith.constant 0 : index
    %7 = vector.load %arg6[%c0_5, %c0_6] : memref<1x512xf32, #tpu.memory_space<vmem>>, vector<1x512xf32>
    %8 = vector.broadcast %7 : vector<1x512xf32> to vector<64x512xf32>
    %9 = arith.addf %6, %8 : vector<64x512xf32>
    %c0_7 = arith.constant 0 : index
    %c0_8 = arith.constant 0 : index
    %10 = vector.load %arg11[%c0_7, %c0_8] : memref<64x512xf32, #tpu.memory_space<vmem>>, vector<64x512xf32>
    tpu.vector_store %arg11[%c0_7, %c0_8], %9 {strides = array<i32>} : memref<64x512xf32, #tpu.memory_space<vmem>>, vector<64x512xf32>,
    %c0_9 = arith.constant 0 : index
    %c0_10 = arith.constant 0 : index
    %11 = vector.load %arg9[%c0_9, %c0_10] : memref<8x128xf32, #tpu.memory_space<vmem>>, vector<8x128xf32>
    %c0_11 = arith.constant 0 : index
    %c0_12 = arith.constant 0 : index
    %12 = vector.load %arg10[%c0_11, %c0_12] : memref<8x128xf32, #tpu.memory_space<vmem>>, vector<8x128xf32>
    %c0_13 = arith.constant 0 : index
    %c0_14 = arith.constant 0 : index
    %13 = vector.load %arg11[%c0_13, %c0_14] : memref<64x512xf32, #tpu.memory_space<vmem>>, vector<8x512xf32>
    %14 = arith.truncf %11 : vector<8x128xf32> to vector<8x128xbf16>
    %c0_15 = arith.constant 0 : index
    %c0_16 = arith.constant 0 : index
    %15 = vector.load %arg7[%c0_15, %c0_16] : memref<128x512xbf16, #tpu.memory_space<vmem>>, vector<128x512xbf16>
    %cst_17 = arith.constant dense<0.000000e+00> : vector<8x512xf32>
    %16 = tpu.matmul %14, %15, %cst_17 {dimension_numbers = #tpu.dot_dimension_numbers<[1], [0], [0], [1], [0, 0, 1, 1], [], []>} : vector<8x128xbf16>, vector<128x512xbf16>, vector<8x512xf32> -> vector<8x512xf32>
    %17 = arith.addf %13, %16 : vector<8x512xf32>
    %18 = vector.extract_strided_slice %17 {offsets = [0, 0], sizes = [8, 128], strides = [1, 1]} : vector<8x512xf32> to vector<8x128xf32>
    %19 = arith.negf %18 : vector<8x128xf32>
    %20 = math.exp %19 : vector<8x128xf32>
    %cst_18 = arith.constant 1.000000e+00 : f32
    %21 = vector.broadcast %cst_18 : f32 to vector<8x128xf32>
    %22 = arith.addf %21, %20 : vector<8x128xf32>
    %23 = arith.divf %21, %22 : vector<8x128xf32>
    %24 = vector.extract_strided_slice %17 {offsets = [0, 128], sizes = [8, 128], strides = [1, 1]} : vector<8x512xf32> to vector<8x128xf32>
    %25 = arith.negf %24 : vector<8x128xf32>
    %26 = math.exp %25 : vector<8x128xf32>
    %cst_19 = arith.constant 1.000000e+00 : f32
    %27 = vector.broadcast %cst_19 : f32 to vector<8x128xf32>
    %28 = arith.addf %27, %26 : vector<8x128xf32>
    %29 = arith.divf %27, %28 : vector<8x128xf32>
    %30 = vector.extract_strided_slice %17 {offsets = [0, 256], sizes = [8, 128], strides = [1, 1]} : vector<8x512xf32> to vector<8x128xf32>
    %31 = math.tanh %30 : vector<8x128xf32>
    %32 = vector.extract_strided_slice %17 {offsets = [0, 384], sizes = [8, 128], strides = [1, 1]} : vector<8x512xf32> to vector<8x128xf32>
    %33 = arith.negf %32 : vector<8x128xf32>
    %34 = math.exp %33 : vector<8x128xf32>
    %cst_20 = arith.constant 1.000000e+00 : f32
    %35 = vector.broadcast %cst_20 : f32 to vector<8x128xf32>
    %36 = arith.addf %35, %34 : vector<8x128xf32>
    %37 = arith.divf %35, %36 : vector<8x128xf32>
    %38 = arith.mulf %29, %12 : vector<8x128xf32>
    %39 = arith.mulf %23, %31 : vector<8x128xf32>
    %40 = arith.addf %38, %39 : vector<8x128xf32>
    %41 = math.tanh %40 : vector<8x128xf32>
    %42 = arith.mulf %37, %41 : vector<8x128xf32>
    %c0_21 = arith.constant 0 : index
    %c0_22 = arith.constant 0 : index
    %c0_23 = arith.constant 0 : index
    %43 = vector.load %arg8[%c0_21, %c0_22, %c0_23] : memref<1x64x128xf32, #tpu.memory_space<vmem>>, vector<1x8x128xf32>
    %44 = vector.shape_cast %43 : vector<1x8x128xf32> to vector<8x128xf32>
    %45 = vector.shape_cast %42 : vector<8x128xf32> to vector<1x8x128xf32>
    tpu.vector_store %arg8[%c0_21, %c0_22, %c0_23], %45 {strides = array<i32>} : memref<1x64x128xf32, #tpu.memory_space<vmem>>, vector<1x8x128xf32>,
    %c8 = arith.constant 8 : index
    %c0_24 = arith.constant 0 : index
    %46 = vector.load %arg11[%c8, %c0_24] : memref<64x512xf32, #tpu.memory_space<vmem>>, vector<8x512xf32>
    %47 = arith.truncf %42 : vector<8x128xf32> to vector<8x128xbf16>
    %c0_25 = arith.constant 0 : index
    %c0_26 = arith.constant 0 : index
    %48 = vector.load %arg7[%c0_25, %c0_26] : memref<128x512xbf16, #tpu.memory_space<vmem>>, vector<128x512xbf16>
    %cst_27 = arith.constant dense<0.000000e+00> : vector<8x512xf32>
    %49 = tpu.matmul %47, %48, %cst_27 {dimension_numbers = #tpu.dot_dimension_numbers<[1], [0], [0], [1], [0, 0, 1, 1], [], []>} : vector<8x128xbf16>, vector<128x512xbf16>, vector<8x512xf32> -> vector<8x512xf32>
    %50 = arith.addf %46, %49 : vector<8x512xf32>
    %51 = vector.extract_strided_slice %50 {offsets = [0, 0], sizes = [8, 128], strides = [1, 1]} : vector<8x512xf32> to vector<8x128xf32>
    %52 = arith.negf %51 : vector<8x128xf32>
    %53 = math.exp %52 : vector<8x128xf32>
    %cst_28 = arith.constant 1.000000e+00 : f32
    %54 = vector.broadcast %cst_28 : f32 to vector<8x128xf32>
    %55 = arith.addf %54, %53 : vector<8x128xf32>
    %56 = arith.divf %54, %55 : vector<8x128xf32>
    %57 = vector.extract_strided_slice %50 {offsets = [0, 128], sizes = [8, 128], strides = [1, 1]} : vector<8x512xf32> to vector<8x128xf32>
    %58 = arith.negf %57 : vector<8x128xf32>
    %59 = math.exp %58 : vector<8x128xf32>
    %cst_29 = arith.constant 1.000000e+00 : f32
    %60 = vector.broadcast %cst_29 : f32 to vector<8x128xf32>
    %61 = arith.addf %60, %59 : vector<8x128xf32>
    %62 = arith.divf %60, %61 : vector<8x128xf32>
    %63 = vector.extract_strided_slice %50 {offsets = [0, 256], sizes = [8, 128], strides = [1, 1]} : vector<8x512xf32> to vector<8x128xf32>
    %64 = math.tanh %63 : vector<8x128xf32>
    %65 = vector.extract_strided_slice %50 {offsets = [0, 384], sizes = [8, 128], strides = [1, 1]} : vector<8x512xf32> to vector<8x128xf32>
    %66 = arith.negf %65 : vector<8x128xf32>
    %67 = math.exp %66 : vector<8x128xf32>
    %cst_30 = arith.constant 1.000000e+00 : f32
    %68 = vector.broadcast %cst_30 : f32 to vector<8x128xf32>
    %69 = arith.addf %68, %67 : vector<8x128xf32>
    %70 = arith.divf %68, %69 : vector<8x128xf32>
    %71 = arith.mulf %62, %40 : vector<8x128xf32>
    %72 = arith.mulf %56, %64 : vector<8x128xf32>
    %73 = arith.addf %71, %72 : vector<8x128xf32>
    %74 = math.tanh %73 : vector<8x128xf32>
    %75 = arith.mulf %70, %74 : vector<8x128xf32>
    %c0_31 = arith.constant 0 : index
    %c8_32 = arith.constant 8 : index
    %c0_33 = arith.constant 0 : index
    %76 = vector.load %arg8[%c0_31, %c8_32, %c0_33] : memref<1x64x128xf32, #tpu.memory_space<vmem>>, vector<1x8x128xf32>
    %77 = vector.shape_cast %76 : vector<1x8x128xf32> to vector<8x128xf32>
    %78 = vector.shape_cast %75 : vector<8x128xf32> to vector<1x8x128xf32>
    tpu.vector_store %arg8[%c0_31, %c8_32, %c0_33], %78 {strides = array<i32>} : memref<1x64x128xf32, #tpu.memory_space<vmem>>, vector<1x8x128xf32>,
    %c16 = arith.constant 16 : index
    %c0_34 = arith.constant 0 : index
    %79 = vector.load %arg11[%c16, %c0_34] : memref<64x512xf32, #tpu.memory_space<vmem>>, vector<8x512xf32>
    %80 = arith.truncf %75 : vector<8x128xf32> to vector<8x128xbf16>
    %c0_35 = arith.constant 0 : index
    %c0_36 = arith.constant 0 : index
    %81 = vector.load %arg7[%c0_35, %c0_36] : memref<128x512xbf16, #tpu.memory_space<vmem>>, vector<128x512xbf16>
    %cst_37 = arith.constant dense<0.000000e+00> : vector<8x512xf32>
    %82 = tpu.matmul %80, %81, %cst_37 {dimension_numbers = #tpu.dot_dimension_numbers<[1], [0], [0], [1], [0, 0, 1, 1], [], []>} : vector<8x128xbf16>, vector<128x512xbf16>, vector<8x512xf32> -> vector<8x512xf32>
    %83 = arith.addf %79, %82 : vector<8x512xf32>
    %84 = vector.extract_strided_slice %83 {offsets = [0, 0], sizes = [8, 128], strides = [1, 1]} : vector<8x512xf32> to vector<8x128xf32>
    %85 = arith.negf %84 : vector<8x128xf32>
    %86 = math.exp %85 : vector<8x128xf32>
    %cst_38 = arith.constant 1.000000e+00 : f32
    %87 = vector.broadcast %cst_38 : f32 to vector<8x128xf32>
    %88 = arith.addf %87, %86 : vector<8x128xf32>
    %89 = arith.divf %87, %88 : vector<8x128xf32>
    %90 = vector.extract_strided_slice %83 {offsets = [0, 128], sizes = [8, 128], strides = [1, 1]} : vector<8x512xf32> to vector<8x128xf32>
    %91 = arith.negf %90 : vector<8x128xf32>
    %92 = math.exp %91 : vector<8x128xf32>
    %cst_39 = arith.constant 1.000000e+00 : f32
    %93 = vector.broadcast %cst_39 : f32 to vector<8x128xf32>
    %94 = arith.addf %93, %92 : vector<8x128xf32>
    %95 = arith.divf %93, %94 : vector<8x128xf32>
    %96 = vector.extract_strided_slice %83 {offsets = [0, 256], sizes = [8, 128], strides = [1, 1]} : vector<8x512xf32> to vector<8x128xf32>
    %97 = math.tanh %96 : vector<8x128xf32>
    %98 = vector.extract_strided_slice %83 {offsets = [0, 384], sizes = [8, 128], strides = [1, 1]} : vector<8x512xf32> to vector<8x128xf32>
    %99 = arith.negf %98 : vector<8x128xf32>
    %100 = math.exp %99 : vector<8x128xf32>
    %cst_40 = arith.constant 1.000000e+00 : f32
    %101 = vector.broadcast %cst_40 : f32 to vector<8x128xf32>
    %102 = arith.addf %101, %100 : vector<8x128xf32>
    %103 = arith.divf %101, %102 : vector<8x128xf32>
    %104 = arith.mulf %95, %73 : vector<8x128xf32>
    %105 = arith.mulf %89, %97 : vector<8x128xf32>
    %106 = arith.addf %104, %105 : vector<8x128xf32>
    %107 = math.tanh %106 : vector<8x128xf32>
    %108 = arith.mulf %103, %107 : vector<8x128xf32>
    %c0_41 = arith.constant 0 : index
    %c16_42 = arith.constant 16 : index
    %c0_43 = arith.constant 0 : index
    %109 = vector.load %arg8[%c0_41, %c16_42, %c0_43] : memref<1x64x128xf32, #tpu.memory_space<vmem>>, vector<1x8x128xf32>
    %110 = vector.shape_cast %109 : vector<1x8x128xf32> to vector<8x128xf32>
    %111 = vector.shape_cast %108 : vector<8x128xf32> to vector<1x8x128xf32>
    tpu.vector_store %arg8[%c0_41, %c16_42, %c0_43], %111 {strides = array<i32>} : memref<1x64x128xf32, #tpu.memory_space<vmem>>, vector<1x8x128xf32>,
    %c24 = arith.constant 24 : index
    %c0_44 = arith.constant 0 : index
    %112 = vector.load %arg11[%c24, %c0_44] : memref<64x512xf32, #tpu.memory_space<vmem>>, vector<8x512xf32>
    %113 = arith.truncf %108 : vector<8x128xf32> to vector<8x128xbf16>
    %c0_45 = arith.constant 0 : index
    %c0_46 = arith.constant 0 : index
    %114 = vector.load %arg7[%c0_45, %c0_46] : memref<128x512xbf16, #tpu.memory_space<vmem>>, vector<128x512xbf16>
    %cst_47 = arith.constant dense<0.000000e+00> : vector<8x512xf32>
    %115 = tpu.matmul %113, %114, %cst_47 {dimension_numbers = #tpu.dot_dimension_numbers<[1], [0], [0], [1], [0, 0, 1, 1], [], []>} : vector<8x128xbf16>, vector<128x512xbf16>, vector<8x512xf32> -> vector<8x512xf32>
    %116 = arith.addf %112, %115 : vector<8x512xf32>
    %117 = vector.extract_strided_slice %116 {offsets = [0, 0], sizes = [8, 128], strides = [1, 1]} : vector<8x512xf32> to vector<8x128xf32>
    %118 = arith.negf %117 : vector<8x128xf32>
    %119 = math.exp %118 : vector<8x128xf32>
    %cst_48 = arith.constant 1.000000e+00 : f32
    %120 = vector.broadcast %cst_48 : f32 to vector<8x128xf32>
    %121 = arith.addf %120, %119 : vector<8x128xf32>
    %122 = arith.divf %120, %121 : vector<8x128xf32>
    %123 = vector.extract_strided_slice %116 {offsets = [0, 128], sizes = [8, 128], strides = [1, 1]} : vector<8x512xf32> to vector<8x128xf32>
    %124 = arith.negf %123 : vector<8x128xf32>
    %125 = math.exp %124 : vector<8x128xf32>
    %cst_49 = arith.constant 1.000000e+00 : f32
    %126 = vector.broadcast %cst_49 : f32 to vector<8x128xf32>
    %127 = arith.addf %126, %125 : vector<8x128xf32>
    %128 = arith.divf %126, %127 : vector<8x128xf32>
    %129 = vector.extract_strided_slice %116 {offsets = [0, 256], sizes = [8, 128], strides = [1, 1]} : vector<8x512xf32> to vector<8x128xf32>
    %130 = math.tanh %129 : vector<8x128xf32>
    %131 = vector.extract_strided_slice %116 {offsets = [0, 384], sizes = [8, 128], strides = [1, 1]} : vector<8x512xf32> to vector<8x128xf32>
    %132 = arith.negf %131 : vector<8x128xf32>
    %133 = math.exp %132 : vector<8x128xf32>
    %cst_50 = arith.constant 1.000000e+00 : f32
    %134 = vector.broadcast %cst_50 : f32 to vector<8x128xf32>
    %135 = arith.addf %134, %133 : vector<8x128xf32>
    %136 = arith.divf %134, %135 : vector<8x128xf32>
    %137 = arith.mulf %128, %106 : vector<8x128xf32>
    %138 = arith.mulf %122, %130 : vector<8x128xf32>
    %139 = arith.addf %137, %138 : vector<8x128xf32>
    %140 = math.tanh %139 : vector<8x128xf32>
    %141 = arith.mulf %136, %140 : vector<8x128xf32>
    %c0_51 = arith.constant 0 : index
    %c24_52 = arith.constant 24 : index
    %c0_53 = arith.constant 0 : index
    %142 = vector.load %arg8[%c0_51, %c24_52, %c0_53] : memref<1x64x128xf32, #tpu.memory_space<vmem>>, vector<1x8x128xf32>
    %143 = vector.shape_cast %142 : vector<1x8x128xf32> to vector<8x128xf32>
    %144 = vector.shape_cast %141 : vector<8x128xf32> to vector<1x8x128xf32>
    tpu.vector_store %arg8[%c0_51, %c24_52, %c0_53], %144 {strides = array<i32>} : memref<1x64x128xf32, #tpu.memory_space<vmem>>, vector<1x8x128xf32>,
    %c32 = arith.constant 32 : index
    %c0_54 = arith.constant 0 : index
    %145 = vector.load %arg11[%c32, %c0_54] : memref<64x512xf32, #tpu.memory_space<vmem>>, vector<8x512xf32>
    %146 = arith.truncf %141 : vector<8x128xf32> to vector<8x128xbf16>
    %c0_55 = arith.constant 0 : index
    %c0_56 = arith.constant 0 : index
    %147 = vector.load %arg7[%c0_55, %c0_56] : memref<128x512xbf16, #tpu.memory_space<vmem>>, vector<128x512xbf16>
    %cst_57 = arith.constant dense<0.000000e+00> : vector<8x512xf32>
    %148 = tpu.matmul %146, %147, %cst_57 {dimension_numbers = #tpu.dot_dimension_numbers<[1], [0], [0], [1], [0, 0, 1, 1], [], []>} : vector<8x128xbf16>, vector<128x512xbf16>, vector<8x512xf32> -> vector<8x512xf32>
    %149 = arith.addf %145, %148 : vector<8x512xf32>
    %150 = vector.extract_strided_slice %149 {offsets = [0, 0], sizes = [8, 128], strides = [1, 1]} : vector<8x512xf32> to vector<8x128xf32>
    %151 = arith.negf %150 : vector<8x128xf32>
    %152 = math.exp %151 : vector<8x128xf32>
    %cst_58 = arith.constant 1.000000e+00 : f32
    %153 = vector.broadcast %cst_58 : f32 to vector<8x128xf32>
    %154 = arith.addf %153, %152 : vector<8x128xf32>
    %155 = arith.divf %153, %154 : vector<8x128xf32>
    %156 = vector.extract_strided_slice %149 {offsets = [0, 128], sizes = [8, 128], strides = [1, 1]} : vector<8x512xf32> to vector<8x128xf32>
    %157 = arith.negf %156 : vector<8x128xf32>
    %158 = math.exp %157 : vector<8x128xf32>
    %cst_59 = arith.constant 1.000000e+00 : f32
    %159 = vector.broadcast %cst_59 : f32 to vector<8x128xf32>
    %160 = arith.addf %159, %158 : vector<8x128xf32>
    %161 = arith.divf %159, %160 : vector<8x128xf32>
    %162 = vector.extract_strided_slice %149 {offsets = [0, 256], sizes = [8, 128], strides = [1, 1]} : vector<8x512xf32> to vector<8x128xf32>
    %163 = math.tanh %162 : vector<8x128xf32>
    %164 = vector.extract_strided_slice %149 {offsets = [0, 384], sizes = [8, 128], strides = [1, 1]} : vector<8x512xf32> to vector<8x128xf32>
    %165 = arith.negf %164 : vector<8x128xf32>
    %166 = math.exp %165 : vector<8x128xf32>
    %cst_60 = arith.constant 1.000000e+00 : f32
    %167 = vector.broadcast %cst_60 : f32 to vector<8x128xf32>
    %168 = arith.addf %167, %166 : vector<8x128xf32>
    %169 = arith.divf %167, %168 : vector<8x128xf32>
    %170 = arith.mulf %161, %139 : vector<8x128xf32>
    %171 = arith.mulf %155, %163 : vector<8x128xf32>
    %172 = arith.addf %170, %171 : vector<8x128xf32>
    %173 = math.tanh %172 : vector<8x128xf32>
    %174 = arith.mulf %169, %173 : vector<8x128xf32>
    %c0_61 = arith.constant 0 : index
    %c32_62 = arith.constant 32 : index
    %c0_63 = arith.constant 0 : index
    %175 = vector.load %arg8[%c0_61, %c32_62, %c0_63] : memref<1x64x128xf32, #tpu.memory_space<vmem>>, vector<1x8x128xf32>
    %176 = vector.shape_cast %175 : vector<1x8x128xf32> to vector<8x128xf32>
    %177 = vector.shape_cast %174 : vector<8x128xf32> to vector<1x8x128xf32>
    tpu.vector_store %arg8[%c0_61, %c32_62, %c0_63], %177 {strides = array<i32>} : memref<1x64x128xf32, #tpu.memory_space<vmem>>, vector<1x8x128xf32>,
    %c40 = arith.constant 40 : index
    %c0_64 = arith.constant 0 : index
    %178 = vector.load %arg11[%c40, %c0_64] : memref<64x512xf32, #tpu.memory_space<vmem>>, vector<8x512xf32>
    %179 = arith.truncf %174 : vector<8x128xf32> to vector<8x128xbf16>
    %c0_65 = arith.constant 0 : index
    %c0_66 = arith.constant 0 : index
    %180 = vector.load %arg7[%c0_65, %c0_66] : memref<128x512xbf16, #tpu.memory_space<vmem>>, vector<128x512xbf16>
    %cst_67 = arith.constant dense<0.000000e+00> : vector<8x512xf32>
    %181 = tpu.matmul %179, %180, %cst_67 {dimension_numbers = #tpu.dot_dimension_numbers<[1], [0], [0], [1], [0, 0, 1, 1], [], []>} : vector<8x128xbf16>, vector<128x512xbf16>, vector<8x512xf32> -> vector<8x512xf32>
    %182 = arith.addf %178, %181 : vector<8x512xf32>
    %183 = vector.extract_strided_slice %182 {offsets = [0, 0], sizes = [8, 128], strides = [1, 1]} : vector<8x512xf32> to vector<8x128xf32>
    %184 = arith.negf %183 : vector<8x128xf32>
    %185 = math.exp %184 : vector<8x128xf32>
    %cst_68 = arith.constant 1.000000e+00 : f32
    %186 = vector.broadcast %cst_68 : f32 to vector<8x128xf32>
    %187 = arith.addf %186, %185 : vector<8x128xf32>
    %188 = arith.divf %186, %187 : vector<8x128xf32>
    %189 = vector.extract_strided_slice %182 {offsets = [0, 128], sizes = [8, 128], strides = [1, 1]} : vector<8x512xf32> to vector<8x128xf32>
    %190 = arith.negf %189 : vector<8x128xf32>
    %191 = math.exp %190 : vector<8x128xf32>
    %cst_69 = arith.constant 1.000000e+00 : f32
    %192 = vector.broadcast %cst_69 : f32 to vector<8x128xf32>
    %193 = arith.addf %192, %191 : vector<8x128xf32>
    %194 = arith.divf %192, %193 : vector<8x128xf32>
    %195 = vector.extract_strided_slice %182 {offsets = [0, 256], sizes = [8, 128], strides = [1, 1]} : vector<8x512xf32> to vector<8x128xf32>
    %196 = math.tanh %195 : vector<8x128xf32>
    %197 = vector.extract_strided_slice %182 {offsets = [0, 384], sizes = [8, 128], strides = [1, 1]} : vector<8x512xf32> to vector<8x128xf32>
    %198 = arith.negf %197 : vector<8x128xf32>
    %199 = math.exp %198 : vector<8x128xf32>
    %cst_70 = arith.constant 1.000000e+00 : f32
    %200 = vector.broadcast %cst_70 : f32 to vector<8x128xf32>
    %201 = arith.addf %200, %199 : vector<8x128xf32>
    %202 = arith.divf %200, %201 : vector<8x128xf32>
    %203 = arith.mulf %194, %172 : vector<8x128xf32>
    %204 = arith.mulf %188, %196 : vector<8x128xf32>
    %205 = arith.addf %203, %204 : vector<8x128xf32>
    %206 = math.tanh %205 : vector<8x128xf32>
    %207 = arith.mulf %202, %206 : vector<8x128xf32>
    %c0_71 = arith.constant 0 : index
    %c40_72 = arith.constant 40 : index
    %c0_73 = arith.constant 0 : index
    %208 = vector.load %arg8[%c0_71, %c40_72, %c0_73] : memref<1x64x128xf32, #tpu.memory_space<vmem>>, vector<1x8x128xf32>
    %209 = vector.shape_cast %208 : vector<1x8x128xf32> to vector<8x128xf32>
    %210 = vector.shape_cast %207 : vector<8x128xf32> to vector<1x8x128xf32>
    tpu.vector_store %arg8[%c0_71, %c40_72, %c0_73], %210 {strides = array<i32>} : memref<1x64x128xf32, #tpu.memory_space<vmem>>, vector<1x8x128xf32>,
    %c48 = arith.constant 48 : index
    %c0_74 = arith.constant 0 : index
    %211 = vector.load %arg11[%c48, %c0_74] : memref<64x512xf32, #tpu.memory_space<vmem>>, vector<8x512xf32>
    %212 = arith.truncf %207 : vector<8x128xf32> to vector<8x128xbf16>
    %c0_75 = arith.constant 0 : index
    %c0_76 = arith.constant 0 : index
    %213 = vector.load %arg7[%c0_75, %c0_76] : memref<128x512xbf16, #tpu.memory_space<vmem>>, vector<128x512xbf16>
    %cst_77 = arith.constant dense<0.000000e+00> : vector<8x512xf32>
    %214 = tpu.matmul %212, %213, %cst_77 {dimension_numbers = #tpu.dot_dimension_numbers<[1], [0], [0], [1], [0, 0, 1, 1], [], []>} : vector<8x128xbf16>, vector<128x512xbf16>, vector<8x512xf32> -> vector<8x512xf32>
    %215 = arith.addf %211, %214 : vector<8x512xf32>
    %216 = vector.extract_strided_slice %215 {offsets = [0, 0], sizes = [8, 128], strides = [1, 1]} : vector<8x512xf32> to vector<8x128xf32>
    %217 = arith.negf %216 : vector<8x128xf32>
    %218 = math.exp %217 : vector<8x128xf32>
    %cst_78 = arith.constant 1.000000e+00 : f32
    %219 = vector.broadcast %cst_78 : f32 to vector<8x128xf32>
    %220 = arith.addf %219, %218 : vector<8x128xf32>
    %221 = arith.divf %219, %220 : vector<8x128xf32>
    %222 = vector.extract_strided_slice %215 {offsets = [0, 128], sizes = [8, 128], strides = [1, 1]} : vector<8x512xf32> to vector<8x128xf32>
    %223 = arith.negf %222 : vector<8x128xf32>
    %224 = math.exp %223 : vector<8x128xf32>
    %cst_79 = arith.constant 1.000000e+00 : f32
    %225 = vector.broadcast %cst_79 : f32 to vector<8x128xf32>
    %226 = arith.addf %225, %224 : vector<8x128xf32>
    %227 = arith.divf %225, %226 : vector<8x128xf32>
    %228 = vector.extract_strided_slice %215 {offsets = [0, 256], sizes = [8, 128], strides = [1, 1]} : vector<8x512xf32> to vector<8x128xf32>
    %229 = math.tanh %228 : vector<8x128xf32>
    %230 = vector.extract_strided_slice %215 {offsets = [0, 384], sizes = [8, 128], strides = [1, 1]} : vector<8x512xf32> to vector<8x128xf32>
    %231 = arith.negf %230 : vector<8x128xf32>
    %232 = math.exp %231 : vector<8x128xf32>
    %cst_80 = arith.constant 1.000000e+00 : f32
    %233 = vector.broadcast %cst_80 : f32 to vector<8x128xf32>
    %234 = arith.addf %233, %232 : vector<8x128xf32>
    %235 = arith.divf %233, %234 : vector<8x128xf32>
    %236 = arith.mulf %227, %205 : vector<8x128xf32>
    %237 = arith.mulf %221, %229 : vector<8x128xf32>
    %238 = arith.addf %236, %237 : vector<8x128xf32>
    %239 = math.tanh %238 : vector<8x128xf32>
    %240 = arith.mulf %235, %239 : vector<8x128xf32>
    %c0_81 = arith.constant 0 : index
    %c48_82 = arith.constant 48 : index
    %c0_83 = arith.constant 0 : index
    %241 = vector.load %arg8[%c0_81, %c48_82, %c0_83] : memref<1x64x128xf32, #tpu.memory_space<vmem>>, vector<1x8x128xf32>
    %242 = vector.shape_cast %241 : vector<1x8x128xf32> to vector<8x128xf32>
    %243 = vector.shape_cast %240 : vector<8x128xf32> to vector<1x8x128xf32>
    tpu.vector_store %arg8[%c0_81, %c48_82, %c0_83], %243 {strides = array<i32>} : memref<1x64x128xf32, #tpu.memory_space<vmem>>, vector<1x8x128xf32>,
    %c56 = arith.constant 56 : index
    %c0_84 = arith.constant 0 : index
    %244 = vector.load %arg11[%c56, %c0_84] : memref<64x512xf32, #tpu.memory_space<vmem>>, vector<8x512xf32>
    %245 = arith.truncf %240 : vector<8x128xf32> to vector<8x128xbf16>
    %c0_85 = arith.constant 0 : index
    %c0_86 = arith.constant 0 : index
    %246 = vector.load %arg7[%c0_85, %c0_86] : memref<128x512xbf16, #tpu.memory_space<vmem>>, vector<128x512xbf16>
    %cst_87 = arith.constant dense<0.000000e+00> : vector<8x512xf32>
    %247 = tpu.matmul %245, %246, %cst_87 {dimension_numbers = #tpu.dot_dimension_numbers<[1], [0], [0], [1], [0, 0, 1, 1], [], []>} : vector<8x128xbf16>, vector<128x512xbf16>, vector<8x512xf32> -> vector<8x512xf32>
    %248 = arith.addf %244, %247 : vector<8x512xf32>
    %249 = vector.extract_strided_slice %248 {offsets = [0, 0], sizes = [8, 128], strides = [1, 1]} : vector<8x512xf32> to vector<8x128xf32>
    %250 = arith.negf %249 : vector<8x128xf32>
    %251 = math.exp %250 : vector<8x128xf32>
    %cst_88 = arith.constant 1.000000e+00 : f32
    %252 = vector.broadcast %cst_88 : f32 to vector<8x128xf32>
    %253 = arith.addf %252, %251 : vector<8x128xf32>
    %254 = arith.divf %252, %253 : vector<8x128xf32>
    %255 = vector.extract_strided_slice %248 {offsets = [0, 128], sizes = [8, 128], strides = [1, 1]} : vector<8x512xf32> to vector<8x128xf32>
    %256 = arith.negf %255 : vector<8x128xf32>
    %257 = math.exp %256 : vector<8x128xf32>
    %cst_89 = arith.constant 1.000000e+00 : f32
    %258 = vector.broadcast %cst_89 : f32 to vector<8x128xf32>
    %259 = arith.addf %258, %257 : vector<8x128xf32>
    %260 = arith.divf %258, %259 : vector<8x128xf32>
    %261 = vector.extract_strided_slice %248 {offsets = [0, 256], sizes = [8, 128], strides = [1, 1]} : vector<8x512xf32> to vector<8x128xf32>
    %262 = math.tanh %261 : vector<8x128xf32>
    %263 = vector.extract_strided_slice %248 {offsets = [0, 384], sizes = [8, 128], strides = [1, 1]} : vector<8x512xf32> to vector<8x128xf32>
    %264 = arith.negf %263 : vector<8x128xf32>
    %265 = math.exp %264 : vector<8x128xf32>
    %cst_90 = arith.constant 1.000000e+00 : f32
    %266 = vector.broadcast %cst_90 : f32 to vector<8x128xf32>
    %267 = arith.addf %266, %265 : vector<8x128xf32>
    %268 = arith.divf %266, %267 : vector<8x128xf32>
    %269 = arith.mulf %260, %238 : vector<8x128xf32>
    %270 = arith.mulf %254, %262 : vector<8x128xf32>
    %271 = arith.addf %269, %270 : vector<8x128xf32>
    %272 = math.tanh %271 : vector<8x128xf32>
    %273 = arith.mulf %268, %272 : vector<8x128xf32>
    %c0_91 = arith.constant 0 : index
    %c56_92 = arith.constant 56 : index
    %c0_93 = arith.constant 0 : index
    %274 = vector.load %arg8[%c0_91, %c56_92, %c0_93] : memref<1x64x128xf32, #tpu.memory_space<vmem>>, vector<1x8x128xf32>
    %275 = vector.shape_cast %274 : vector<1x8x128xf32> to vector<8x128xf32>
    %276 = vector.shape_cast %273 : vector<8x128xf32> to vector<1x8x128xf32>
    tpu.vector_store %arg8[%c0_91, %c56_92, %c0_93], %276 {strides = array<i32>} : memref<1x64x128xf32, #tpu.memory_space<vmem>>, vector<1x8x128xf32>,
    %c0_94 = arith.constant 0 : index
    %c0_95 = arith.constant 0 : index
    %277 = vector.load %arg9[%c0_94, %c0_95] : memref<8x128xf32, #tpu.memory_space<vmem>>, vector<8x128xf32>
    tpu.vector_store %arg9[%c0_94, %c0_95], %273 {strides = array<i32>} : memref<8x128xf32, #tpu.memory_space<vmem>>, vector<8x128xf32>,
    %c0_96 = arith.constant 0 : index
    %c0_97 = arith.constant 0 : index
    %278 = vector.load %arg10[%c0_96, %c0_97] : memref<8x128xf32, #tpu.memory_space<vmem>>, vector<8x128xf32>
    tpu.vector_store %arg10[%c0_96, %c0_97], %271 {strides = array<i32>} : memref<8x128xf32, #tpu.memory_space<vmem>>, vector<8x128xf32>,
    return
  }
  func.func @transform_0(%arg0: i32, %arg1: i32) -> (i32, i32, i32) {
    %c0_i32 = arith.constant 0 : i32
    %c0_i32_0 = arith.constant 0 : i32
    return %arg0, %arg1, %c0_i32 : i32, i32, i32
  }
  func.func @transform_1(%arg0: i32, %arg1: i32) -> (i32, i32) {
    %c0_i32 = arith.constant 0 : i32
    %c0_i32_0 = arith.constant 0 : i32
    return %arg0, %c0_i32 : i32, i32
  }
  func.func @transform_2(%arg0: i32, %arg1: i32) -> (i32, i32) {
    %c0_i32 = arith.constant 0 : i32
    %c0_i32_0 = arith.constant 0 : i32
    return %arg0, %c0_i32 : i32, i32
  }
  func.func @transform_3(%arg0: i32, %arg1: i32) -> (i32, i32) {
    %c0_i32 = arith.constant 0 : i32
    %c0_i32_0 = arith.constant 0 : i32
    %c0_i32_1 = arith.constant 0 : i32
    return %c0_i32, %c0_i32_0 : i32, i32
  }
  func.func @transform_4(%arg0: i32, %arg1: i32) -> (i32, i32) {
    %c0_i32 = arith.constant 0 : i32
    %c0_i32_0 = arith.constant 0 : i32
    %c0_i32_1 = arith.constant 0 : i32
    return %c0_i32, %c0_i32_0 : i32, i32
  }
  func.func @transform_5(%arg0: i32, %arg1: i32) -> (i32, i32) {
    %c0_i32 = arith.constant 0 : i32
    %c0_i32_0 = arith.constant 0 : i32
    %c0_i32_1 = arith.constant 0 : i32
    return %c0_i32, %c0_i32_0 : i32, i32
  }
  func.func @transform_6(%arg0: i32, %arg1: i32) -> (i32, i32, i32) {
    %c0_i32 = arith.constant 0 : i32
    %c0_i32_0 = arith.constant 0 : i32
    return %arg0, %arg1, %c0_i32 : i32, i32, i32
  }
  func.func @transform_7(%arg0: i32, %arg1: i32) -> (i32, i32) {
    %c0_i32 = arith.constant 0 : i32
    %c0_i32_0 = arith.constant 0 : i32
    return %arg0, %c0_i32 : i32, i32
  }
  func.func @transform_8(%arg0: i32, %arg1: i32) -> (i32, i32) {
    %c0_i32 = arith.constant 0 : i32
    %c0_i32_0 = arith.constant 0 : i32
    return %arg0, %c0_i32 : i32, i32
  }
}

module attributes {stable_mosaic.version = 11 : i64} {
  func.func @_generator_fused_kernel(%arg0: i32, %arg1: memref<64x128xbf16, #tpu.memory_space<vmem>>, %arg2: memref<128x256xbf16, #tpu.memory_space<vmem>>, %arg3: memref<1x256xf32, #tpu.memory_space<vmem>>, %arg4: memref<64x256xf32, #tpu.memory_space<vmem>>) attributes {dimension_semantics = [#tpu.dimension_semantics<parallel>], iteration_bounds = array<i64: 2>, scalar_prefetch = 0 : i64, scratch_operands = 0 : i64, tpu.core_type = #tpu.core_type<tc>, window_params = [{transform_indices = @transform_0, window_bounds = array<i64: 64, 128>}, {pipeline_mode = #tpu.pipeline_mode<synchronous>, transform_indices = @transform_1, window_bounds = array<i64: 128, 256>}, {pipeline_mode = #tpu.pipeline_mode<synchronous>, transform_indices = @transform_2, window_bounds = array<i64: 1, 256>}, {transform_indices = @transform_3, window_bounds = array<i64: 64, 256>}]} {
    %c0 = arith.constant 0 : index
    %c0_0 = arith.constant 0 : index
    %0 = vector.load %arg1[%c0, %c0_0] : memref<64x128xbf16, #tpu.memory_space<vmem>>, vector<64x128xbf16>
    %c0_1 = arith.constant 0 : index
    %c0_2 = arith.constant 0 : index
    %1 = vector.load %arg2[%c0_1, %c0_2] : memref<128x256xbf16, #tpu.memory_space<vmem>>, vector<128x256xbf16>
    %cst = arith.constant dense<0.000000e+00> : vector<64x256xf32>
    %2 = tpu.matmul %0, %1, %cst {dimension_numbers = #tpu.dot_dimension_numbers<[1], [0], [0], [1], [0, 0, 1, 1], [], []>} : vector<64x128xbf16>, vector<128x256xbf16>, vector<64x256xf32> -> vector<64x256xf32>
    %c0_3 = arith.constant 0 : index
    %c0_4 = arith.constant 0 : index
    %3 = vector.load %arg3[%c0_3, %c0_4] : memref<1x256xf32, #tpu.memory_space<vmem>>, vector<1x256xf32>
    %4 = vector.broadcast %3 : vector<1x256xf32> to vector<64x256xf32>
    %5 = arith.addf %2, %4 : vector<64x256xf32>
    %cst_5 = arith.constant dense<0xFF800000> : vector<64xf32>
    %6 = vector.multi_reduction <maximumf>, %5, %cst_5 [1] : vector<64x256xf32> to vector<64xf32>
    %7 = vector.shape_cast %6 : vector<64xf32> to vector<64x1xf32>
    %8 = vector.broadcast %7 : vector<64x1xf32> to vector<64x256xf32>
    %9 = arith.subf %5, %8 : vector<64x256xf32>
    %10 = math.exp %9 : vector<64x256xf32>
    %cst_6 = arith.constant dense<0.000000e+00> : vector<64xf32>
    %11 = vector.multi_reduction <add>, %10, %cst_6 [1] : vector<64x256xf32> to vector<64xf32>
    %12 = vector.shape_cast %11 : vector<64xf32> to vector<64x1xf32>
    %13 = math.log %12 : vector<64x1xf32>
    %14 = arith.addf %7, %13 : vector<64x1xf32>
    %15 = vector.broadcast %14 : vector<64x1xf32> to vector<64x256xf32>
    %16 = arith.subf %5, %15 : vector<64x256xf32>
    %c0_7 = arith.constant 0 : index
    %c0_8 = arith.constant 0 : index
    %17 = vector.load %arg4[%c0_7, %c0_8] : memref<64x256xf32, #tpu.memory_space<vmem>>, vector<64x256xf32>
    tpu.vector_store %arg4[%c0_7, %c0_8], %16 {strides = array<i32>} : memref<64x256xf32, #tpu.memory_space<vmem>>, vector<64x256xf32>,
    return
  }
  func.func @transform_0(%arg0: i32) -> (i32, i32) {
    %c0_i32 = arith.constant 0 : i32
    %c0_i32_0 = arith.constant 0 : i32
    return %arg0, %c0_i32 : i32, i32
  }
  func.func @transform_1(%arg0: i32) -> (i32, i32) {
    %c0_i32 = arith.constant 0 : i32
    %c0_i32_0 = arith.constant 0 : i32
    %c0_i32_1 = arith.constant 0 : i32
    return %c0_i32, %c0_i32_0 : i32, i32
  }
  func.func @transform_2(%arg0: i32) -> (i32, i32) {
    %c0_i32 = arith.constant 0 : i32
    %c0_i32_0 = arith.constant 0 : i32
    %c0_i32_1 = arith.constant 0 : i32
    return %c0_i32, %c0_i32_0 : i32, i32
  }
  func.func @transform_3(%arg0: i32) -> (i32, i32) {
    %c0_i32 = arith.constant 0 : i32
    %c0_i32_0 = arith.constant 0 : i32
    return %arg0, %c0_i32 : i32, i32
  }
}

</mosaic_0001>

<bundles_post_ra>
// kernel: seq2seq_forward.5
= control target key start
LH: loop header
LB: loop body
LE: loop exit
PB: predicated region body
PF: predicated region fallthrough
CT: control target
= control target key end

     0   :  { %8 = vsyncpa [#allocation3], 0  ;;  %s1227_s0 = inlined_call_operand.vmem [shape: bf16[128,128], index: 0, kind: input, shape index: {}]   ;;  %s1228_s1 = inlined_call_operand.vmem [shape: bf16[128,256], index: 1, kind: input, shape index: {}]   ;;  %s1229_s2 = inlined_call_operand.vmem [shape: f32[1,256], index: 2, kind: input, shape index: {}]   ;;  %s1230_s3 = inlined_call_operand.hbm [shape: f32[128,256], index: 3, kind: output, shape index: {}]  }
   0x1   :  { %10 = vsyncpa [#allocation3 + $0x1], 0  ;;  %s901_s12 = smov 0   ;;  %s903_s13 = smov 0  }
   0x2   :  { %s905_s14 = smov 0   ;;  %s907_s15 = smov 0  }
   0x3 LB: > { %s922_s16 = sadd.s32 4294967295, %s877_s15   ;;  %s595_s17 = sadd.s32 4294967294, %s877_s15   ;;  %s877_s15 = sphi %s907_s15, %s1236_s15   ;;  %s873_s14 = sphi %s905_s14, %s1235_s14   ;;  %s869_s13 = sphi %s903_s13, %s1234_s13   ;;  %s865_s12 = sphi %s901_s12, %s1233_s12  }
   0x4   : > { %s926_s18 = sadd.s32 1, %s877_s15   ;;  %s91_s19 = sadd.s32 1, %s873_s14 }
   0x5   : > { %s88_s20 = ssub.s32 %s877_s15, %s926_s18  ;;  %p101_p0 = scmp.ne.s32.totalorder %s873_s14, %s869_s13 }
   0x6   : > { %p89_p1 = scmp.eq.s32.totalorder %s88_s20, 0  ;;  %p102_p2 = scmp.eq.s32.totalorder %s922_s16, 1 }
   0x7   : > { %p107_p3 = scmp.ne.s32.totalorder %s869_s13, %s865_s12  ;;  %p108_p4 = scmp.eq.s32.totalorder %s595_s17, 1 }
   0x8   : > { %s937_s21 = scalar_select %p89_p1, %s873_s14, %s91_s19  }
   0x9   : > { %p939_p5 = por %p102_p2, %p101_p0  ;;  %p943_p6 = por %p108_p4, %p107_p3 }
   0xa   : > { %p598_p7 = scmp.ge.s32.totalorder %s877_s15, 1  ;;  %p141_p8 = scmp.lt.s32.totalorder %s877_s15, 3 }
   0xc   : > { %p142_p9 = pnand %p598_p7, %p141_p8 }
   0xd   : > { %s600_s28 = sshll.u32 (!%p142_p9), %s922_s16, 3  ;;  %s162_s20 = sand.u32 (!%p142_p9), 1, %s869_s13  }
   0xe   : > { %145 = sbr.rel (%p142_p9) target bundleno = 482 (0x1e2), region = 32  ;;  %p166_p10 = scmp.lt.s32.totalorder (!%p142_p9), %s600_s28, 15 }
   0xf   : > { %s599_s24 = sshll.u32 (!%p142_p9), %s162_s20, 7  ;;  %s709_s26 = sshll.u32 (!%p142_p9), %s922_s16, 7 }
  0x10   : > { %s1154_s25 = scalar_lea.vmem (!%p142_p9), [#allocation2], %s599_s24  ;;  %s529_s30 = scalar_lea.hbm (!%p142_p9), %s1230_s3, %s709_s26 }
  0x11   : > { %s530_s16 = sshll.u32 (!%p142_p9), %s1154_s25, 4  ;;  %s532_s4 = sshll.u32 (!%p142_p9), %s529_s30, 4  ;;  %s531_s16 = int_to_ptr.vmem [resolvable:$true] %s530_s16  ;;  %s533_s4 = int_to_ptr.hbm [resolvable:$true] %s532_s4 }
  0x12   : > { %s829_s6 = sshra.s32 (!%p142_p9), %s533_s4, 4  ;;  %s835_s10 = scalar_lea.hbm (!%p142_p9), %s1230_s3, 256  ;;  %s830_s6 = int_to_ptr.hbm [resolvable:$true] %s829_s6 }
  0x13   : > { %v676_v0 = vld [vmem:[%s1228_s1 + $0x70] sm:$0xf]  ;;  %v707_v1 = vld [vmem:[%s1228_s1 + $0x74] sm:$0xf0]  ;;  %v706_v2 = vld [vmem:[%s1228_s1 + $0x74] sm:$0xf]  ;;  %p836_p0 = scmp.lt.s32.totalorder %s830_s6, %s1230_s3 }
  0x14   : > { %v677_v3 = vor.u32 %v707_v1, %v676_v0  ;;  %v678_v4 = vld [vmem:[%s1228_s1 + $0x78] sm:$0xf0]  ;;  %v668_v5 = vld [vmem:[%s1228_s1 + $0x60] sm:$0xf]  ;;  %v705_v6 = vld [vmem:[%s1228_s1 + $0x64] sm:$0xf0] }
  0x15   : > { %v681_v7 = vor.u32 %v706_v2, %v678_v4  ;;  %v704_v8 = vld [vmem:[%s1228_s1 + $0x64] sm:$0xf]  ;;  %v670_v9 = vld [vmem:[%s1228_s1 + $0x68] sm:$0xf0]  ;;  %v669_v10 = vor.u32 %v705_v6, %v668_v5  ;;  %v660_v12 = vld [vmem:[%s1228_s1 + $0x50] sm:$0xf] }
  0x16   : > { %306 = vmatpush.bf16.msra.mxu0 %v677_v3  ;;  %710 = vmatpush.bf16.msra.mxu2 %v677_v3  ;;  %v673_v11 = vor.u32 %v704_v8, %v670_v9  ;;  %v703_v13 = vld [vmem:[%s1228_s1 + $0x54] sm:$0xf0]  ;;  %v702_v14 = vld [vmem:[%s1228_s1 + $0x54] sm:$0xf]  ;;  %v662_v15 = vld [vmem:[%s1228_s1 + $0x58] sm:$0xf0] }
  0x17   : > { %335 = vmatpush.bf16.msra.mxu1 %v681_v7  ;;  %718 = vmatpush.bf16.msra.mxu3 %v681_v7  ;;  %v661_v16 = vor.u32 %v703_v13, %v660_v12  ;;  %v665_v17 = vor.u32 %v702_v14, %v662_v15  ;;  %v652_v18 = vld [vmem:[%s1228_s1 + $0x40] sm:$0xf]  ;;  %v701_v19 = vld [vmem:[%s1228_s1 + $0x44] sm:$0xf0]  ;;  %v700_v20 = vld [vmem:[%s1228_s1 + $0x44] sm:$0xf] }
  0x18   : > { %v654_v21 = vld [vmem:[%s1228_s1 + $0x48] sm:$0xf0]  ;;  %v653_v22 = vor.u32 %v701_v19, %v652_v18  ;;  %v644_v24 = vld [vmem:[%s1228_s1 + $0x30] sm:$0xf]  ;;  %v699_v25 = vld [vmem:[%s1228_s1 + $0x34] sm:$0xf0] }
  0x19   : > { %v657_v23 = vor.u32 %v700_v20, %v654_v21  ;;  %v698_v26 = vld [vmem:[%s1228_s1 + $0x34] sm:$0xf]  ;;  %v646_v27 = vld [vmem:[%s1228_s1 + $0x38] sm:$0xf0]  ;;  %v645_v28 = vor.u32 %v699_v25, %v644_v24  ;;  %v636_v30 = vld [vmem:[%s1228_s1 + $0x20] sm:$0xf] }
  0x1a   : > { %307 = vmatpush.bf16.msra.mxu0 %v669_v10  ;;  %711 = vmatpush.bf16.msra.mxu2 %v669_v10  ;;  %v649_v29 = vor.u32 %v698_v26, %v646_v27  ;;  %v697_v31 = vld [vmem:[%s1228_s1 + $0x24] sm:$0xf0]  ;;  %v696_v32 = vld [vmem:[%s1228_s1 + $0x24] sm:$0xf]  ;;  %v638_v33 = vld [vmem:[%s1228_s1 + $0x28] sm:$0xf0] }
  0x1b   : > { %336 = vmatpush.bf16.msra.mxu1 %v673_v11  ;;  %719 = vmatpush.bf16.msra.mxu3 %v673_v11  ;;  %v637_v34 = vor.u32 %v697_v31, %v636_v30  ;;  %v641_v35 = vor.u32 %v696_v32, %v638_v33  ;;  %v628_v36 = vld [vmem:[%s1228_s1 + $0x10] sm:$0xf]  ;;  %v695_v37 = vld [vmem:[%s1228_s1 + $0x14] sm:$0xf0]  ;;  %s1238_s28 = smov (!%p166_p10, %s600_s28), 15  ;;  %s831_s7 = scalar_lea.hbm %s830_s6, 128 }
  0x1c   : > { %v694_v38 = vld [vmem:[%s1228_s1 + $0x14] sm:$0xf]  ;;  %v630_v39 = vld [vmem:[%s1228_s1 + $0x18] sm:$0xf0]  ;;  %v629_v40 = vor.u32 %v695_v37, %v628_v36  ;;  %v620_v42 = vld [vmem:[%s1228_s1] sm:$0xf]  ;;  %p832_p11 = scmp.ne.s32.totalorder %s830_s6, %s831_s7  ;;  %p837_p1 = scmp.lt.s32.totalorder %s835_s10, %s831_s7 }
  0x1d   : > { %v633_v41 = vor.u32 %v694_v38, %v630_v39  ;;  %v693_v43 = vld [vmem:[%s1228_s1 + $0x4] sm:$0xf0]  ;;  %s601_s5 = sshll.u32 %s1238_s28, 2  ;;  %v692_v44 = vld [vmem:[%s1228_s1 + $0x4] sm:$0xf] }
  0x1e   : > { %308 = vmatpush.bf16.msra.mxu0 %v661_v16  ;;  %712 = vmatpush.bf16.msra.mxu2 %v661_v16  ;;  %v622_v45 = vld [vmem:[%s1228_s1 + $0x8] sm:$0xf0]  ;;  %v621_v46 = vor.u32 %v693_v43, %v620_v42  ;;  %s169_s17 = scalar_lea.vmem %s1227_s0, %s601_s5  ;;  %v196_v52 = vld [vmem:[%s1229_s2] sm:$0x3]  ;;  %s517_s5 = scalar_lea.sflag [#allocation3], %s162_s20 }
  0x1f   : > { %337 = vmatpush.bf16.msra.mxu1 %v665_v17  ;;  %720 = vmatpush.bf16.msra.mxu3 %v665_v17  ;;  %v625_v47 = vor.u32 %v692_v44, %v622_v45  ;;  %v688_v48 = vld [vmem:[%s169_s17] sm:$0xff]  ;;  %v690_v49 = vld [vmem:[%s169_s17 + $0x10] sm:$0xff]  ;;  %v689_v50 = vld [vmem:[%s169_s17 + $0x8] sm:$0xff]  ;;  %v198_v53 = vperm.slane %v196_v52, 0  ;;  %v199_v54 = vperm.slane %v196_v52, 1  ;;  %p833_p12 = pnand %p832_p11, %p939_p5  ;;  %p838_p2 = por %p837_p1, %p836_p0 }
  0x20   : > { %v691_v51 = vld [vmem:[%s169_s17 + $0x18] sm:$0xff] }
  0x21   : > { %p834_p13 = pneg %p833_p12 }
  0x22   : > { %309 = vmatpush.bf16.msra.mxu0 %v653_v22  ;;  %713 = vmatpush.bf16.msra.mxu2 %v653_v22 }
  0x23   : > { %338 = vmatpush.bf16.msra.mxu1 %v657_v23  ;;  %721 = vmatpush.bf16.msra.mxu3 %v657_v23  ;;  %p839_p3 = pnand %p838_p2, %p834_p13 }
  0x26   : > { %310 = vmatpush.bf16.msra.mxu0 %v645_v28  ;;  %714 = vmatpush.bf16.msra.mxu2 %v645_v28 }
  0x27   : > { %339 = vmatpush.bf16.msra.mxu1 %v649_v29  ;;  %722 = vmatpush.bf16.msra.mxu3 %v649_v29 }
  0x2a   : > { %311 = vmatpush.bf16.msra.mxu0 %v637_v34  ;;  %715 = vmatpush.bf16.msra.mxu2 %v637_v34 }
  0x2b   : > { %340 = vmatpush.bf16.msra.mxu1 %v641_v35  ;;  %723 = vmatpush.bf16.msra.mxu3 %v641_v35 }
  0x2e   : > { %312 = vmatpush.bf16.msra.mxu0 %v629_v40  ;;  %716 = vmatpush.bf16.msra.mxu2 %v629_v40 }
  0x2f   : > { %341 = vmatpush.bf16.msra.mxu1 %v633_v41  ;;  %724 = vmatpush.bf16.msra.mxu3 %v633_v41 }
  0x32   : > { %313 = vmatpush.bf16.msra.mxu0 %v621_v46  ;;  %717 = vmatpush.bf16.msra.mxu2 %v621_v46 }
  0x33   : > { %342 = vmatpush.bf16.msra.mxu1 %v625_v47  ;;  %725 = vmatpush.bf16.msra.mxu3 %v625_v47 }
  0x35   : > { %314 = vmatmul.bf16.vlgmr.msra.gmra.mxu0 %v688_v48  ;;  %324 = vmatmul.bf16.vlgmr.msra.gmra.mxu2 %v690_v49 }
  0x36   : > { %343 = vmatmul.bf16.vlgmr.msra.gmra.mxu1 %v688_v48  ;;  %353 = vmatmul.bf16.vlgmr.msra.gmra.mxu3 %v690_v49 }
  0x45   : > { %319 = vmatmul.bf16.gmra.mxu0 %v689_v50  ;;  %329 = vmatmul.bf16.gmra.mxu2 %v691_v51 }
  0x46   : > { %348 = vmatmul.bf16.gmra.mxu1 %v689_v50  ;;  %358 = vmatmul.bf16.gmra.mxu3 %v691_v51 }
  0xb2   : > { %v315_v55 = vpop.f32.mrf.mxu0 }
  0xb3   : > { %v1052_v56 = vadd.f32 %v315_v55, %v198_v53  ;;  %v344_v57 = vpop.f32.mrf.mxu1 }
  0xb4   : > { %v1054_v58 = vadd.f32 %v344_v57, %v199_v54 }
  0xb6   : > { %v364_v59 = vmax.f32 %v1052_v56, %v1054_v58 }
  0xb8   : > { %365 = vmax.xlane.f32.xlu0 %v364_v59  ;;  %v325_v60 = vpop.f32.mrf.mxu2 }
  0xb9   : > { %v1058_v61 = vadd.f32 %v325_v60, %v198_v53  ;;  %v354_v62 = vpop.f32.mrf.mxu3 }
  0xba   : > { %v1060_v63 = vadd.f32 %v354_v62, %v199_v54  ;;  %v317_v0 = vpop.f32.mrf.mxu0 }
  0xbb   : > { %v1062_v1 = vadd.f32 %v317_v0, %v198_v53  ;;  %v346_v2 = vpop.f32.mrf.mxu1 }
  0xbc   : > { %v1064_v3 = vadd.f32 %v346_v2, %v199_v54  ;;  %v376_v4 = vmax.f32 %v1058_v61, %v1060_v63 }
  0xbe   : > { %377 = vmax.xlane.f32.xlu2 %v376_v4  ;;  %v367_v5 = vmax.f32 %v1062_v1, %v1064_v3 }
  0xc0   : > { %368 = vmax.xlane.f32.xlu0 %v367_v5  ;;  %v327_v6 = vpop.f32.mrf.mxu2 }
  0xc1   : > { %v1070_v7 = vadd.f32 %v327_v6, %v198_v53  ;;  %v356_v8 = vpop.f32.mrf.mxu3 }
  0xc2   : > { %v1072_v9 = vadd.f32 %v356_v8, %v199_v54  ;;  %v320_v10 = vpop.f32.mrf.mxu0 }
  0xc3   : > { %v1074_v11 = vadd.f32 %v320_v10, %v198_v53  ;;  %v349_v12 = vpop.f32.mrf.mxu1 }
  0xc4   : > { %v1076_v13 = vadd.f32 %v349_v12, %v199_v54  ;;  %v379_v14 = vmax.f32 %v1070_v7, %v1072_v9 }
  0xc6   : > { %380 = vmax.xlane.f32.xlu2 %v379_v14  ;;  %v370_v15 = vmax.f32 %v1074_v11, %v1076_v13 }
  0xc8   : > { %371 = vmax.xlane.f32.xlu1 %v370_v15  ;;  %v330_v16 = vpop.f32.mrf.mxu2 }
  0xc9   : > { %v1082_v17 = vadd.f32 %v330_v16, %v198_v53  ;;  %v359_v18 = vpop.f32.mrf.mxu3 }
  0xca   : > { %v1084_v19 = vadd.f32 %v359_v18, %v199_v54  ;;  %v322_v20 = vpop.f32.mrf.mxu0 }
  0xcb   : > { %v1086_v21 = vadd.f32 %v322_v20, %v198_v53  ;;  %v351_v22 = vpop.f32.mrf.mxu1 }
  0xcc   : > { %v1088_v23 = vadd.f32 %v351_v22, %v199_v54  ;;  %v382_v24 = vmax.f32 %v1082_v17, %v1084_v19 }
  0xce   : > { %383 = vmax.xlane.f32.xlu0 %v382_v24  ;;  %v373_v25 = vmax.f32 %v1086_v21, %v1088_v23 }
  0xd0   : > { %374 = vmax.xlane.f32.xlu1 %v373_v25  ;;  %v332_v26 = vpop.f32.mrf.mxu2 }
  0xd1   : > { %v361_v27 = vpop.f32.mrf.mxu3  ;;  %v1094_v28 = vadd.f32 %v332_v26, %v198_v53 }
  0xd2   : > { %v1096_v29 = vadd.f32 %v361_v27, %v199_v54 }
  0xd4   : > { %v385_v30 = vmax.f32 %v1094_v28, %v1096_v29 }
  0xd8   : > { %386 = vmax.xlane.f32.xlu1 %v385_v30 }
 0x12b   : > { %v1100_v31 = vpop.xlane.xlu0 %365 }
 0x12c   : > { %v388_v32 = vsub.f32 %v1052_v56, %v1100_v31  ;;  %v389_v33 = vsub.f32 %v1054_v58, %v1100_v31 }
 0x12e   : > { %v404_v34 = vmul.f32 1.442695, %v388_v32  ;;  %v406_v35 = vmul.f32 1.442695, %v389_v33 }
 0x130   : > { %767 = vpow2.f32 %v404_v34 }
 0x131   : > { %769 = vpow2.f32 %v406_v35  ;;  %v1106_v36 = vpop.xlane.xlu2 %377 }
 0x132   : > { %v396_v37 = vsub.f32 %v1058_v61, %v1106_v36  ;;  %v397_v38 = vsub.f32 %v1060_v63, %v1106_v36 }
 0x133   : > { %v1112_v39 = vpop.xlane.xlu0 %368 }
 0x134   : > { %v420_v40 = vmul.f32 1.442695, %v396_v37  ;;  %v422_v41 = vmul.f32 1.442695, %v397_v38  ;;  %v390_v42 = vsub.f32 %v1062_v1, %v1112_v39  ;;  %v391_v43 = vsub.f32 %v1064_v3, %v1112_v39 }
 0x136   : > { %v768_v44 = vpop.eup %767  ;;  %771 = vpow2.f32 %v420_v40  ;;  %v408_v46 = vmul.f32 1.442695, %v390_v42  ;;  %v410_v48 = vmul.f32 1.442695, %v391_v43 }
 0x137   : > { %v770_v45 = vpop.eup %769  ;;  %773 = vpow2.f32 %v422_v41 }
 0x138   : > { %v436_v47 = vadd.f32 %v770_v45, %v768_v44  ;;  %775 = vpow2.f32 %v408_v46 }
 0x139   : > { %v1118_v49 = vpop.xlane.xlu2 %380  ;;  %777 = vpow2.f32 %v410_v48 }
 0x13a   : > { %437 = vadd.xlane.f32.xlu2 %v436_v47  ;;  %v398_v55 = vsub.f32 %v1070_v7, %v1118_v49  ;;  %v399_v62 = vsub.f32 %v1072_v9, %v1118_v49 }
 0x13b   : > { %v1120_v50 = vpop.xlane.xlu1 %371 }
 0x13c   : > { %v772_v51 = vpop.eup %771  ;;  %v392_v52 = vsub.f32 %v1074_v11, %v1120_v50  ;;  %v393_v53 = vsub.f32 %v1076_v13, %v1120_v50  ;;  %v424_v0 = vmul.f32 1.442695, %v398_v55  ;;  %v426_v5 = vmul.f32 1.442695, %v399_v62 }
 0x13d   : > { %v774_v54 = vpop.eup %773 }
 0x13e   : > { %v412_v57 = vmul.f32 1.442695, %v392_v52  ;;  %v414_v59 = vmul.f32 1.442695, %v393_v53  ;;  %v448_v60 = vadd.f32 %v774_v54, %v772_v51  ;;  %v776_v2 = vpop.eup %775 }
 0x13f   : > { %v778_v4 = vpop.eup %777 }
 0x140   : > { %779 = vpow2.f32 %v412_v57  ;;  %449 = vadd.xlane.f32.xlu0 %v448_v60  ;;  %v439_v20 = vadd.f32 %v778_v4, %v776_v2 }
 0x141   : > { %781 = vpow2.f32 %v414_v59  ;;  %v1130_v6 = vpop.xlane.xlu0 %383 }
 0x142   : > { %783 = vpow2.f32 %v424_v0  ;;  %v400_v15 = vsub.f32 %v1082_v17, %v1130_v6  ;;  %v401_v24 = vsub.f32 %v1084_v19, %v1130_v6 }
 0x143   : > { %v1132_v8 = vpop.xlane.xlu1 %374  ;;  %785 = vpow2.f32 %v426_v5 }
 0x144   : > { %v394_v10 = vsub.f32 %v1086_v21, %v1132_v8  ;;  %v395_v12 = vsub.f32 %v1088_v23, %v1132_v8  ;;  %v428_v26 = vmul.f32 1.442695, %v400_v15  ;;  %v430_v30 = vmul.f32 1.442695, %v401_v24 }
 0x146   : > { %v780_v14 = vpop.eup %779  ;;  %v416_v16 = vmul.f32 1.442695, %v394_v10  ;;  %v418_v18 = vmul.f32 1.442695, %v395_v12 }
 0x147   : > { %v782_v22 = vpop.eup %781 }
 0x148   : > { %787 = vpow2.f32 %v416_v16  ;;  %440 = vadd.xlane.f32.xlu0 %v439_v20  ;;  %v442_v25 = vadd.f32 %v782_v22, %v780_v14  ;;  %v784_v27 = vpop.eup %783 }
 0x149   : > { %789 = vpow2.f32 %v418_v18  ;;  %v786_v35 = vpop.eup %785 }
 0x14a   : > { %443 = vadd.xlane.f32.xlu1 %v442_v25  ;;  %791 = vpow2.f32 %v428_v26  ;;  %v451_v42 = vadd.f32 %v786_v35, %v784_v27 }
 0x14b   : > { %v1142_v32 = vpop.xlane.xlu1 %386  ;;  %793 = vpow2.f32 %v430_v30 }
 0x14c   : > { %v402_v33 = vsub.f32 %v1094_v28, %v1142_v32  ;;  %v403_v34 = vsub.f32 %v1096_v29, %v1142_v32 }
 0x14e   : > { %v788_v37 = vpop.eup %787  ;;  %v432_v38 = vmul.f32 1.442695, %v402_v33  ;;  %v434_v40 = vmul.f32 1.442695, %v403_v34 }
 0x14f   : > { %v790_v41 = vpop.eup %789 }
 0x150   : > { %795 = vpow2.f32 %v432_v38  ;;  %v445_v43 = vadd.f32 %v790_v41, %v788_v37  ;;  %v792_v44 = vpop.eup %791 }
 0x151   : > { %797 = vpow2.f32 %v434_v40  ;;  %v794_v45 = vpop.eup %793 }
 0x152   : > { %452 = vadd.xlane.f32.xlu1 %v451_v42  ;;  %446 = vadd.xlane.f32.xlu2 %v445_v43  ;;  %v454_v51 = vadd.f32 %v794_v45, %v792_v44 }
 0x156   : > { %v796_v46 = vpop.eup %795 }
 0x157   : > { %v798_v47 = vpop.eup %797 }
 0x158   : > { %v457_v48 = vadd.f32 %v798_v47, %v796_v46 }
 0x15a   : > { %458 = vadd.xlane.f32.xlu0 %v457_v48  ;;  %455 = vadd.xlane.f32.xlu2 %v454_v51 }
 0x1ad   : > { %v438_v52 = vpop.xlane.xlu2 %437 }
 0x1ae   : > { %799 = vlog2.f32 %v438_v52 }
 0x1b3   : > { %v450_v53 = vpop.xlane.xlu0 %449 }
 0x1b4   : > { %v800_v54 = vpop.eup %799  ;;  %801 = vlog2.f32 %v450_v53 }
 0x1b5   : > { %v461_v55 = vmul.f32 0.6931472, %v800_v54 }
 0x1b7   : > { %v476_v57 = vadd.f32 %v461_v55, %v1100_v31 }
 0x1b9   : > { %v484_v59 = vsub.f32 %v1052_v56, %v476_v57  ;;  %v485_v60 = vsub.f32 %v1054_v58, %v476_v57 }
 0x1ba   : > { %v802_v62 = vpop.eup %801 }
 0x1bb   : > { %500 = vst [vmem:[%s1154_s25] sm:$0xff] %v484_v59  ;;  %v469_v0 = vmul.f32 0.6931472, %v802_v62  ;;  %v441_v2 = vpop.xlane.xlu0 %440 }
 0x1bc   : > { %501 = vst [vmem:[%s1154_s25 + $0x8] sm:$0xff] %v485_v60  ;;  %803 = vlog2.f32 %v441_v2 }
 0x1bd   : > { %v480_v4 = vadd.f32 %v469_v0, %v1106_v36  ;;  %v444_v5 = vpop.xlane.xlu1 %443 }
 0x1be   : > { %805 = vlog2.f32 %v444_v5 }
 0x1bf   : > { %v492_v56 = vsub.f32 %v1058_v61, %v480_v4  ;;  %v493_v58 = vsub.f32 %v1060_v63, %v480_v4 }
 0x1c1   : > { %508 = vst [vmem:[%s1154_s25 + $0x40] sm:$0xff] %v492_v56 }
 0x1c2   : > { %v804_v31 = vpop.eup %803  ;;  %509 = vst [vmem:[%s1154_s25 + $0x48] sm:$0xff] %v493_v58 }
 0x1c3   : > { %v463_v10 = vmul.f32 0.6931472, %v804_v31 }
 0x1c4   : > { %v806_v12 = vpop.eup %805 }
 0x1c5   : > { %v477_v14 = vadd.f32 %v463_v10, %v1112_v39  ;;  %v465_v15 = vmul.f32 0.6931472, %v806_v12  ;;  %v453_v16 = vpop.xlane.xlu1 %452  ;;  %v447_v36 = vpop.xlane.xlu2 %446 }
 0x1c6   : > { %807 = vlog2.f32 %v453_v16 }
 0x1c7   : > { %v486_v18 = vsub.f32 %v1062_v1, %v477_v14  ;;  %v487_v61 = vsub.f32 %v1064_v3, %v477_v14  ;;  %v478_v63 = vadd.f32 %v465_v15, %v1120_v50  ;;  %809 = vlog2.f32 %v447_v36 }
 0x1c9   : > { %502 = vst [vmem:[%s1154_s25 + $0x10] sm:$0xff] %v486_v18  ;;  %v488_v20 = vsub.f32 %v1074_v11, %v478_v63  ;;  %v489_v22 = vsub.f32 %v1076_v13, %v478_v63 }
 0x1ca   : > { %503 = vst [vmem:[%s1154_s25 + $0x18] sm:$0xff] %v487_v61 }
 0x1cb   : > { %504 = vst [vmem:[%s1154_s25 + $0x20] sm:$0xff] %v488_v20 }
 0x1cc   : > { %v808_v39 = vpop.eup %807  ;;  %505 = vst [vmem:[%s1154_s25 + $0x28] sm:$0xff] %v489_v22 }
 0x1cd   : > { %v810_v24 = vpop.eup %809  ;;  %v471_v25 = vmul.f32 0.6931472, %v808_v39  ;;  %v456_v1 = vpop.xlane.xlu2 %455 }
 0x1ce   : > { %v459_v3 = vpop.xlane.xlu0 %458  ;;  %v467_v26 = vmul.f32 0.6931472, %v810_v24  ;;  %811 = vlog2.f32 %v456_v1 }
 0x1cf   : > { %v481_v50 = vadd.f32 %v471_v25, %v1118_v49  ;;  %813 = vlog2.f32 %v459_v3 }
 0x1d0   : > { %v479_v11 = vadd.f32 %v467_v26, %v1132_v8 }
 0x1d1   : > { %v494_v13 = vsub.f32 %v1070_v7, %v481_v50  ;;  %v495_v27 = vsub.f32 %v1072_v9, %v481_v50 }
 0x1d2   : > { %v490_v30 = vsub.f32 %v1086_v21, %v479_v11  ;;  %v491_v33 = vsub.f32 %v1088_v23, %v479_v11 }
 0x1d3   : > { %510 = vst [vmem:[%s1154_s25 + $0x50] sm:$0xff] %v494_v13 }
 0x1d4   : > { %v812_v34 = vpop.eup %811  ;;  %511 = vst [vmem:[%s1154_s25 + $0x58] sm:$0xff] %v495_v27 }
 0x1d5   : > { %v814_v35 = vpop.eup %813  ;;  %506 = vst [vmem:[%s1154_s25 + $0x30] sm:$0xff] %v490_v30  ;;  %v473_v49 = vmul.f32 0.6931472, %v812_v34 }
 0x1d6   : > { %507 = vst [vmem:[%s1154_s25 + $0x38] sm:$0xff] %v491_v33  ;;  %v475_v7 = vmul.f32 0.6931472, %v814_v35 }
 0x1d7   : > { %v482_v9 = vadd.f32 %v473_v49, %v1130_v6 }
 0x1d8   : > { %v483_v21 = vadd.f32 %v475_v7, %v1142_v32 }
 0x1d9   : > { %v496_v23 = vsub.f32 %v1082_v17, %v482_v9  ;;  %v497_v8 = vsub.f32 %v1084_v19, %v482_v9 }
 0x1da   : > { %v498_v37 = vsub.f32 %v1094_v28, %v483_v21  ;;  %v499_v38 = vsub.f32 %v1096_v29, %v483_v21 }
 0x1db   : > { %512 = vst [vmem:[%s1154_s25 + $0x60] sm:$0xff] %v496_v23 }
 0x1dc   : > { %513 = vst [vmem:[%s1154_s25 + $0x68] sm:$0xff] %v497_v8 }
 0x1dd   : > { %514 = vst [vmem:[%s1154_s25 + $0x70] sm:$0xff] %v498_v37 }
 0x1de   : > { %515 = vst [vmem:[%s1154_s25 + $0x78] sm:$0xff] %v499_v38 }
 0x1df   : > { %842 = shalt.err (!%p839_p3)
}
 0x1e0   : > { %s879_s28 = smov 256   ;;  %s880_s19 = smov 16  }
 0x1e1   : > { %726 = dma.vmem_to_hbm [thread:$0]  (%p939_p5), %s531_s16, 2048, %s533_s4, %s517_s5, %s879_s28, %s879_s28, %s880_s19  }
 0x1e2 PF: > { %p732_p4 = scmp.ge.s32.totalorder %s877_s15, 2  ;;  %s547_s20 = sand.u32 1, %s865_s12  }
 0x1e3   : > { %s548_s24 = scalar_lea.sflag [#allocation3], %s547_s20 }
 0x1e4   : > { %p729_p7 = pnand %p732_p4, %p943_p6 }
 0x1e6   : > { %p730_p8 = pneg %p729_p7 }
 0x1e8   : > { %860 = dma.done.wait (%p730_p8), %s548_s24, 2048  }
 0x1e9   : > { %862 = vsyncadd (%p730_p8), %s548_s24, 4294965248  ;;  %p13_p9 = scmp.ge.s32.totalorder %s926_s18, 4   ;;  %s1233_s12 = smov %s869_s13 }
 0x1ea   : > { %s1234_s13 = smov %s873_s14  ;;  %s1235_s14 = smov %s937_s21 }
 0x1eb   : > { %s1236_s15 = smov %s926_s18  ;;  %15 = sbr.rel (!%p13_p9) target bundleno = 3 (0x3), region = 67 }
 0x1f0   :  { %554 = vsyncpa [#allocation3], 1 }
 0x1f1   :  { %556 = vsyncpa [#allocation3 + $0x1], 1 }

// kernel: seq2seq_forward.3
= control target key start
LH: loop header
LB: loop body
LE: loop exit
PB: predicated region body
PF: predicated region fallthrough
CT: control target
= control target key end

     0   :  { %s4190_s27 = smov 0   ;;  %s4192_s28 = smov 0   ;;  %s5690_s0 = inlined_call_operand.vmem [shape: bf16[2,128,128], index: 0, kind: input, shape index: {}]   ;;  %s5691_s1 = inlined_call_operand.vmem [shape: f32[2,128,1], index: 1, kind: input, shape index: {}]   ;;  %s5692_s2 = inlined_call_operand.vmem [shape: f32[16,128], index: 2, kind: input, shape index: {}, may-alias: {2,3}]   ;;  %s5693_s3 = inlined_call_operand.vmem [shape: f32[16,128], index: 3, kind: input, shape index: {}, may-alias: {2,3}]   ;;  %s5694_s4 = inlined_call_operand.vmem [shape: bf16[128,512], index: 4, kind: input, shape index: {}]   ;;  %s5695_s5 = inlined_call_operand.vmem [shape: f32[1,512], index: 5, kind: input, shape index: {}]   ;;  %s5696_s6 = inlined_call_operand.vmem [shape: bf16[128,512], index: 6, kind: input, shape index: {}]   ;;  %s5697_s7 = inlined_call_operand.vmem [shape: f32[16,128], index: 7, kind: output, shape index: {0}]   ;;  %s5698_s8 = inlined_call_operand.vmem [shape: f32[16,128], index: 8, kind: output, shape index: {1}]  }
   0x1   :  { %s4194_s29 = smov 0  }
   0x2 LB: > { %s31_s30 = sadd.s32 1, %s4138_s28  ;;  %p3415_p0 = scmp.ge.s32.totalorder %s4142_s29, 1  ;;  %s4142_s29 = sphi %s4194_s29, %s19_s29   ;;  %s4138_s28 = sphi %s4192_s28, %s5828_s28   ;;  %s4134_s27 = sphi %s4190_s27, %s5827_s27  }
   0x3   : > { %p33_p1 = scmp.ge.s32.totalorder %s31_s30, 2  ;;  %p319_p2 = scmp.lt.s32.totalorder %s4142_s29, 3 }
   0x5   : > { %s5830_s30 = smov (%p33_p1, %s31_s30), 0  ;;  %p320_p3 = pnand %p3415_p0, %p319_p2 }
   0x7   : > { %323 = sbr.rel (%p320_p3) target bundleno = 2942 (0xb7e), region = 48 }
   0xc   : > { %v3570_v0 = vld [vmem:[%s5694_s4 + $0xe0] sm:$0xf]  ;;  %v3802_v1 = vld [vmem:[%s5694_s4 + $0xec] sm:$0xf0]  ;;  %v3800_v2 = vld [vmem:[%s5694_s4 + $0xe4] sm:$0xf] }
   0xd   : > { %v3571_v3 = vor.u32 %v3802_v1, %v3570_v0  ;;  %v3572_v4 = vld [vmem:[%s5694_s4 + $0xf0] sm:$0xf0]  ;;  %v3578_v5 = vld [vmem:[%s5694_s4 + $0xe8] sm:$0xf]  ;;  %v3803_v6 = vld [vmem:[%s5694_s4 + $0xf4] sm:$0xf0] }
   0xe   : > { %v3575_v7 = vor.u32 %v3800_v2, %v3572_v4  ;;  %v3579_v8 = vor.u32 %v3803_v6, %v3578_v5  ;;  %v3801_v9 = vld [vmem:[%s5694_s4 + $0xec] sm:$0xf]  ;;  %v3580_v10 = vld [vmem:[%s5694_s4 + $0xf8] sm:$0xf0]  ;;  %v3554_v11 = vld [vmem:[%s5694_s4 + $0xc0] sm:$0xf] }
   0xf   : > { %687 = vmatpush.bf16.msra.mxu0 %v3571_v3  ;;  %v3583_v12 = vor.u32 %v3801_v9, %v3580_v10  ;;  %v3798_v13 = vld [vmem:[%s5694_s4 + $0xcc] sm:$0xf0]  ;;  %v3796_v14 = vld [vmem:[%s5694_s4 + $0xc4] sm:$0xf]  ;;  %v3556_v15 = vld [vmem:[%s5694_s4 + $0xd0] sm:$0xf0] }
  0x10   : > { %736 = vmatpush.bf16.msra.mxu1 %v3575_v7  ;;  %785 = vmatpush.bf16.msra.mxu2 %v3579_v8  ;;  %v3555_v16 = vor.u32 %v3798_v13, %v3554_v11  ;;  %v3559_v17 = vor.u32 %v3796_v14, %v3556_v15  ;;  %v3562_v18 = vld [vmem:[%s5694_s4 + $0xc8] sm:$0xf]  ;;  %v3799_v19 = vld [vmem:[%s5694_s4 + $0xd4] sm:$0xf0]  ;;  %v3797_v20 = vld [vmem:[%s5694_s4 + $0xcc] sm:$0xf] }
  0x11   : > { %834 = vmatpush.bf16.msra.mxu3 %v3583_v12  ;;  %v3563_v21 = vor.u32 %v3799_v19, %v3562_v18  ;;  %v3564_v22 = vld [vmem:[%s5694_s4 + $0xd8] sm:$0xf0]  ;;  %v3538_v23 = vld [vmem:[%s5694_s4 + $0xa0] sm:$0xf]  ;;  %v3794_v24 = vld [vmem:[%s5694_s4 + $0xac] sm:$0xf0] }
  0x12   : > { %v3567_v25 = vor.u32 %v3797_v20, %v3564_v22  ;;  %v3792_v26 = vld [vmem:[%s5694_s4 + $0xa4] sm:$0xf]  ;;  %v3540_v27 = vld [vmem:[%s5694_s4 + $0xb0] sm:$0xf0]  ;;  %v3546_v28 = vld [vmem:[%s5694_s4 + $0xa8] sm:$0xf]  ;;  %v3539_v29 = vor.u32 %v3794_v24, %v3538_v23 }
  0x13   : > { %688 = vmatpush.bf16.msra.mxu0 %v3555_v16  ;;  %v3795_v30 = vld [vmem:[%s5694_s4 + $0xb4] sm:$0xf0]  ;;  %v3793_v31 = vld [vmem:[%s5694_s4 + $0xac] sm:$0xf]  ;;  %v3548_v32 = vld [vmem:[%s5694_s4 + $0xb8] sm:$0xf0]  ;;  %v3543_v33 = vor.u32 %v3792_v26, %v3540_v27 }
  0x14   : > { %737 = vmatpush.bf16.msra.mxu1 %v3559_v17  ;;  %786 = vmatpush.bf16.msra.mxu2 %v3563_v21  ;;  %v3547_v34 = vor.u32 %v3795_v30, %v3546_v28  ;;  %v3522_v35 = vld [vmem:[%s5694_s4 + $0x80] sm:$0xf]  ;;  %v3790_v36 = vld [vmem:[%s5694_s4 + $0x8c] sm:$0xf0]  ;;  %v3788_v37 = vld [vmem:[%s5694_s4 + $0x84] sm:$0xf]  ;;  %v3551_v38 = vor.u32 %v3793_v31, %v3548_v32 }
  0x15   : > { %835 = vmatpush.bf16.msra.mxu3 %v3567_v25  ;;  %v3524_v39 = vld [vmem:[%s5694_s4 + $0x90] sm:$0xf0]  ;;  %v3530_v40 = vld [vmem:[%s5694_s4 + $0x88] sm:$0xf]  ;;  %v3791_v41 = vld [vmem:[%s5694_s4 + $0x94] sm:$0xf0]  ;;  %v3523_v44 = vor.u32 %v3790_v36, %v3522_v35 }
  0x16   : > { %v3789_v42 = vld [vmem:[%s5694_s4 + $0x8c] sm:$0xf]  ;;  %v3532_v43 = vld [vmem:[%s5694_s4 + $0x98] sm:$0xf0]  ;;  %v3527_v45 = vor.u32 %v3788_v37, %v3524_v39  ;;  %v3531_v46 = vor.u32 %v3791_v41, %v3530_v40  ;;  %v3506_v47 = vld [vmem:[%s5694_s4 + $0x60] sm:$0xf] }
  0x17   : > { %689 = vmatpush.bf16.msra.mxu0 %v3539_v29  ;;  %v3786_v48 = vld [vmem:[%s5694_s4 + $0x6c] sm:$0xf0]  ;;  %v3784_v49 = vld [vmem:[%s5694_s4 + $0x64] sm:$0xf]  ;;  %v3535_v50 = vor.u32 %v3789_v42, %v3532_v43  ;;  %v3508_v51 = vld [vmem:[%s5694_s4 + $0x70] sm:$0xf0] }
  0x18   : > { %738 = vmatpush.bf16.msra.mxu1 %v3543_v33  ;;  %787 = vmatpush.bf16.msra.mxu2 %v3547_v34  ;;  %v3514_v52 = vld [vmem:[%s5694_s4 + $0x68] sm:$0xf]  ;;  %v3787_v53 = vld [vmem:[%s5694_s4 + $0x74] sm:$0xf0]  ;;  %v3785_v54 = vld [vmem:[%s5694_s4 + $0x6c] sm:$0xf]  ;;  %v3507_v56 = vor.u32 %v3786_v48, %v3506_v47  ;;  %v3511_v57 = vor.u32 %v3784_v49, %v3508_v51 }
  0x19   : > { %836 = vmatpush.bf16.msra.mxu3 %v3551_v38  ;;  %v3516_v55 = vld [vmem:[%s5694_s4 + $0x78] sm:$0xf0]  ;;  %v3515_v58 = vor.u32 %v3787_v53, %v3514_v52  ;;  %v3490_v59 = vld [vmem:[%s5694_s4 + $0x40] sm:$0xf]  ;;  %v3782_v60 = vld [vmem:[%s5694_s4 + $0x4c] sm:$0xf0] }
  0x1a   : > { %v3780_v61 = vld [vmem:[%s5694_s4 + $0x44] sm:$0xf]  ;;  %v3519_v62 = vor.u32 %v3785_v54, %v3516_v55  ;;  %v3492_v63 = vld [vmem:[%s5694_s4 + $0x50] sm:$0xf0]  ;;  %v3498_v0 = vld [vmem:[%s5694_s4 + $0x48] sm:$0xf]  ;;  %v3491_v4 = vor.u32 %v3782_v60, %v3490_v59 }
  0x1b   : > { %690 = vmatpush.bf16.msra.mxu0 %v3523_v44  ;;  %v3783_v1 = vld [vmem:[%s5694_s4 + $0x54] sm:$0xf0]  ;;  %v3781_v2 = vld [vmem:[%s5694_s4 + $0x4c] sm:$0xf]  ;;  %v3500_v3 = vld [vmem:[%s5694_s4 + $0x58] sm:$0xf0]  ;;  %v3495_v6 = vor.u32 %v3780_v61, %v3492_v63 }
  0x1c   : > { %739 = vmatpush.bf16.msra.mxu1 %v3527_v45  ;;  %788 = vmatpush.bf16.msra.mxu2 %v3531_v46  ;;  %v3474_v5 = vld [vmem:[%s5694_s4 + $0x20] sm:$0xf]  ;;  %v3499_v7 = vor.u32 %v3783_v1, %v3498_v0  ;;  %v3778_v8 = vld [vmem:[%s5694_s4 + $0x2c] sm:$0xf0]  ;;  %v3776_v9 = vld [vmem:[%s5694_s4 + $0x24] sm:$0xf]  ;;  %v3503_v11 = vor.u32 %v3781_v2, %v3500_v3 }
  0x1d   : > { %837 = vmatpush.bf16.msra.mxu3 %v3535_v50  ;;  %v3476_v10 = vld [vmem:[%s5694_s4 + $0x30] sm:$0xf0]  ;;  %v3482_v12 = vld [vmem:[%s5694_s4 + $0x28] sm:$0xf]  ;;  %v3779_v13 = vld [vmem:[%s5694_s4 + $0x34] sm:$0xf0]  ;;  %v3475_v16 = vor.u32 %v3778_v8, %v3474_v5 }
  0x1e   : > { %p378_p4 = scmp.lt.s32.totalorder %s4134_s27, 1  ;;  %v3777_v14 = vld [vmem:[%s5694_s4 + $0x2c] sm:$0xf]  ;;  %v3484_v15 = vld [vmem:[%s5694_s4 + $0x38] sm:$0xf0]  ;;  %v3479_v19 = vor.u32 %v3776_v9, %v3476_v10  ;;  %v3483_v20 = vor.u32 %v3779_v13, %v3482_v12 }
  0x1f   : > { %691 = vmatpush.bf16.msra.mxu0 %v3507_v56  ;;  %v3458_v17 = vld [vmem:[%s5694_s4] sm:$0xf]  ;;  %v3774_v18 = vld [vmem:[%s5694_s4 + $0xc] sm:$0xf0]  ;;  %v3772_v21 = vld [vmem:[%s5694_s4 + $0x4] sm:$0xf]  ;;  %v3487_v24 = vor.u32 %v3777_v14, %v3484_v15 }
  0x20   : > { %740 = vmatpush.bf16.msra.mxu1 %v3511_v57  ;;  %789 = vmatpush.bf16.msra.mxu2 %v3515_v58  ;;  %s5832_s27 = smov (!%p378_p4, %s4134_s27), 1  ;;  %v3460_v22 = vld [vmem:[%s5694_s4 + $0x10] sm:$0xf0]  ;;  %v3466_v23 = vld [vmem:[%s5694_s4 + $0x8] sm:$0xf]  ;;  %v3459_v30 = vor.u32 %v3774_v18, %v3458_v17 }
  0x21   : > { %838 = vmatpush.bf16.msra.mxu3 %v3519_v62  ;;  %v3775_v25 = vld [vmem:[%s5694_s4 + $0x14] sm:$0xf0]  ;;  %v3773_v26 = vld [vmem:[%s5694_s4 + $0xc] sm:$0xf]  ;;  %s3762_s9 = sshll.u32 %s5832_s27, 6  ;;  %v3463_v33 = vor.u32 %v3772_v21, %v3460_v22  ;;  %s3763_s24 = sshll.u32 %s5832_s27, 7 }
  0x22   : > { %v3468_v27 = vld [vmem:[%s5694_s4 + $0x18] sm:$0xf0]  ;;  %v3698_v28 = vld [vmem:[%s5696_s6 + $0xe0] sm:$0xf]  ;;  %v3834_v29 = vld [vmem:[%s5696_s6 + $0xec] sm:$0xf0]  ;;  %s4416_s18 = scalar_lea.vmem %s5690_s0, %s3762_s9  ;;  %v3467_v34 = vor.u32 %v3775_v25, %v3466_v23  ;;  %s4727_s9 = scalar_lea.vmem %s5691_s1, %s3763_s24 }
  0x23   : > { %692 = vmatpush.bf16.msra.mxu0 %v3491_v4  ;;  %v3832_v31 = vld [vmem:[%s5696_s6 + $0xe4] sm:$0xf]  ;;  %v3700_v32 = vld [vmem:[%s5696_s6 + $0xf0] sm:$0xf0]  ;;  %v3833_v35 = vld [vmem:[%s5696_s6 + $0xec] sm:$0xf]  ;;  %v3471_v36 = vor.u32 %v3773_v26, %v3468_v27  ;;  %v4427_v37 = vor.u32 %v3834_v29, %v3698_v28 }
  0x24   : > { %741 = vmatpush.bf16.msra.mxu1 %v3495_v6  ;;  %790 = vmatpush.bf16.msra.mxu2 %v3499_v7  ;;  %v3708_v38 = vld [vmem:[%s5696_s6 + $0xf8] sm:$0xf0]  ;;  %v3706_v39 = vld [vmem:[%s5696_s6 + $0xe8] sm:$0xf]  ;;  %v3835_v40 = vld [vmem:[%s5696_s6 + $0xf4] sm:$0xf0]  ;;  %v4439_v42 = vor.u32 %v3832_v31, %v3700_v32 }
  0x25   : > { %839 = vmatpush.bf16.msra.mxu3 %v3503_v11  ;;  %v3764_v41 = vld [vmem:[%s4416_s18] sm:$0xff]  ;;  %v3830_v44 = vld [vmem:[%s5696_s6 + $0xcc] sm:$0xf0]  ;;  %v3684_v46 = vld [vmem:[%s5696_s6 + $0xd0] sm:$0xf0]  ;;  %v4453_v47 = vor.u32 %v3835_v40, %v3706_v39  ;;  %v4456_v48 = vor.u32 %v3833_v35, %v3708_v38 }
  0x26   : > { %v3682_v43 = vld [vmem:[%s5696_s6 + $0xc0] sm:$0xf]  ;;  %v3828_v45 = vld [vmem:[%s5696_s6 + $0xc4] sm:$0xf]  ;;  %v3690_v50 = vld [vmem:[%s5696_s6 + $0xc8] sm:$0xf] }
  0x27   : > { %693 = vmatpush.bf16.msra.mxu0 %v3475_v16  ;;  %v4458_v49 = vor.u32 %v3830_v44, %v3682_v43  ;;  %v3831_v51 = vld [vmem:[%s5696_s6 + $0xd4] sm:$0xf0]  ;;  %v4467_v52 = vor.u32 %v3828_v45, %v3684_v46  ;;  %v3829_v53 = vld [vmem:[%s5696_s6 + $0xcc] sm:$0xf]  ;;  %v3692_v54 = vld [vmem:[%s5696_s6 + $0xd8] sm:$0xf0] }
  0x28   : > { %742 = vmatpush.bf16.msra.mxu1 %v3479_v19  ;;  %791 = vmatpush.bf16.msra.mxu2 %v3483_v20  ;;  %v4476_v55 = vor.u32 %v3831_v51, %v3690_v50  ;;  %v3666_v56 = vld [vmem:[%s5696_s6 + $0xa0] sm:$0xf]  ;;  %v3826_v57 = vld [vmem:[%s5696_s6 + $0xac] sm:$0xf0]  ;;  %v3824_v58 = vld [vmem:[%s5696_s6 + $0xa4] sm:$0xf]  ;;  %v4489_v59 = vor.u32 %v3829_v53, %v3692_v54 }
  0x29   : > { %840 = vmatpush.bf16.msra.mxu3 %v3487_v24  ;;  %v4491_v60 = vor.u32 %v3826_v57, %v3666_v56  ;;  %v3668_v61 = vld [vmem:[%s5696_s6 + $0xb0] sm:$0xf0]  ;;  %v3825_v62 = vld [vmem:[%s5696_s6 + $0xac] sm:$0xf]  ;;  %v3676_v0 = vld [vmem:[%s5696_s6 + $0xb8] sm:$0xf0] }
  0x2a   : > { %v4500_v63 = vor.u32 %v3824_v58, %v3668_v61  ;;  %v3674_v1 = vld [vmem:[%s5696_s6 + $0xa8] sm:$0xf]  ;;  %v3827_v2 = vld [vmem:[%s5696_s6 + $0xb4] sm:$0xf0]  ;;  %v4516_v4 = vor.u32 %v3825_v62, %v3676_v0  ;;  %v3650_v6 = vld [vmem:[%s5696_s6 + $0x80] sm:$0xf] }
  0x2b   : > { %694 = vmatpush.bf16.msra.mxu0 %v3459_v30  ;;  %v4512_v3 = vor.u32 %v3827_v2, %v3674_v1  ;;  %v3765_v5 = vld [vmem:[%s4416_s18 + $0x8] sm:$0xff]  ;;  %v3822_v7 = vld [vmem:[%s5696_s6 + $0x8c] sm:$0xf0]  ;;  %v3820_v8 = vld [vmem:[%s5696_s6 + $0x84] sm:$0xf] }
  0x2c   : > { %743 = vmatpush.bf16.msra.mxu1 %v3463_v33  ;;  %792 = vmatpush.bf16.msra.mxu2 %v3467_v34  ;;  %v4531_v9 = vor.u32 %v3822_v7, %v3650_v6  ;;  %v3652_v10 = vld [vmem:[%s5696_s6 + $0x90] sm:$0xf0]  ;;  %v3821_v11 = vld [vmem:[%s5696_s6 + $0x8c] sm:$0xf]  ;;  %v3660_v12 = vld [vmem:[%s5696_s6 + $0x98] sm:$0xf0] }
  0x2d   : > { %841 = vmatpush.bf16.msra.mxu3 %v3471_v36  ;;  %v4542_v13 = vor.u32 %v3820_v8, %v3652_v10  ;;  %v4544_v14 = vor.u32 %v3821_v11, %v3660_v12  ;;  %v3658_v15 = vld [vmem:[%s5696_s6 + $0x88] sm:$0xf]  ;;  %v3823_v16 = vld [vmem:[%s5696_s6 + $0x94] sm:$0xf0]  ;;  %v3766_v18 = vld [vmem:[%s4416_s18 + $0x10] sm:$0xff] }
  0x2e   : > { %695 = vmatmul.bf16.vlgmr.msra.gmra.mxu0 %v3764_v41  ;;  %v4553_v17 = vor.u32 %v3823_v16, %v3658_v15  ;;  %v3634_v19 = vld [vmem:[%s5696_s6 + $0x60] sm:$0xf]  ;;  %v3818_v20 = vld [vmem:[%s5696_s6 + $0x6c] sm:$0xf0]  ;;  %v3816_v21 = vld [vmem:[%s5696_s6 + $0x64] sm:$0xf] }
  0x2f   : > { %1146 = vmatpush.bf16.msrb.mxu0 %v4427_v37  ;;  %744 = vmatmul.bf16.vlgmr.msra.gmra.mxu1 %v3764_v41  ;;  %v4568_v22 = vor.u32 %v3818_v20, %v3634_v19  ;;  %v3636_v23 = vld [vmem:[%s5696_s6 + $0x70] sm:$0xf0]  ;;  %v3817_v24 = vld [vmem:[%s5696_s6 + $0x6c] sm:$0xf]  ;;  %v3644_v25 = vld [vmem:[%s5696_s6 + $0x78] sm:$0xf0] }
  0x30   : > { %1159 = vmatpush.bf16.msrb.mxu1 %v4439_v42  ;;  %793 = vmatmul.bf16.vlgmr.msra.gmra.mxu2 %v3764_v41  ;;  %v4579_v26 = vor.u32 %v3816_v21, %v3636_v23  ;;  %v4581_v27 = vor.u32 %v3817_v24, %v3644_v25  ;;  %v3642_v28 = vld [vmem:[%s5696_s6 + $0x68] sm:$0xf]  ;;  %v3819_v29 = vld [vmem:[%s5696_s6 + $0x74] sm:$0xf0]  ;;  %v3618_v32 = vld [vmem:[%s5696_s6 + $0x40] sm:$0xf] }
  0x31   : > { %842 = vmatmul.bf16.vlgmr.msra.gmra.mxu3 %v3764_v41  ;;  %1172 = vmatpush.bf16.msrb.mxu2 %v4453_v47  ;;  %v4590_v30 = vor.u32 %v3819_v29, %v3642_v28  ;;  %v3767_v31 = vld [vmem:[%s4416_s18 + $0x18] sm:$0xff]  ;;  %v3814_v33 = vld [vmem:[%s5696_s6 + $0x4c] sm:$0xf0]  ;;  %v3812_v34 = vld [vmem:[%s5696_s6 + $0x44] sm:$0xf]  ;;  %v5699_v28 = vmov 0  }
  0x32   : > { %1185 = vmatpush.bf16.msrb.mxu3 %v4456_v48  ;;  %v4605_v35 = vor.u32 %v3814_v33, %v3618_v32  ;;  %v3620_v36 = vld [vmem:[%s5696_s6 + $0x50] sm:$0xf0]  ;;  %v3813_v38 = vld [vmem:[%s5696_s6 + $0x4c] sm:$0xf]  ;;  %v3628_v39 = vld [vmem:[%s5696_s6 + $0x58] sm:$0xf0]  ;;  %3861 = vset.pattern.permute.xlu0 %v5699_v28 }
  0x33   : > { %1147 = vmatpush.bf16.msrb.mxu0 %v4458_v49  ;;  %v4616_v40 = vor.u32 %v3812_v34, %v3620_v36  ;;  %v4618_v41 = vor.u32 %v3813_v38, %v3628_v39  ;;  %v3626_v43 = vld [vmem:[%s5696_s6 + $0x48] sm:$0xf]  ;;  %v3815_v44 = vld [vmem:[%s5696_s6 + $0x54] sm:$0xf0]  ;;  %v3768_v46 = vld [vmem:[%s4416_s18 + $0x20] sm:$0xff]  ;;  %3862 = vset.pattern.permute.xlu1 %v5699_v28 }
  0x34   : > { %1160 = vmatpush.bf16.msrb.mxu1 %v4467_v52  ;;  %v4627_v45 = vor.u32 %v3815_v44, %v3626_v43  ;;  %v3602_v50 = vld [vmem:[%s5696_s6 + $0x20] sm:$0xf]  ;;  %v3810_v51 = vld [vmem:[%s5696_s6 + $0x2c] sm:$0xf0]  ;;  %v3808_v53 = vld [vmem:[%s5696_s6 + $0x24] sm:$0xf]  ;;  %3863 = vset.pattern.permute.xlu2 %v5699_v28 }
  0x35   : > { %1173 = vmatpush.bf16.msrb.mxu2 %v4476_v55  ;;  %v4642_v54 = vor.u32 %v3810_v51, %v3602_v50  ;;  %v3604_v56 = vld [vmem:[%s5696_s6 + $0x30] sm:$0xf0]  ;;  %v3809_v57 = vld [vmem:[%s5696_s6 + $0x2c] sm:$0xf]  ;;  %v3612_v58 = vld [vmem:[%s5696_s6 + $0x38] sm:$0xf0] }
  0x36   : > { %1186 = vmatpush.bf16.msrb.mxu3 %v4489_v59  ;;  %v4653_v61 = vor.u32 %v3808_v53, %v3604_v56  ;;  %v4655_v62 = vor.u32 %v3809_v57, %v3612_v58  ;;  %v3610_v0 = vld [vmem:[%s5696_s6 + $0x28] sm:$0xf]  ;;  %v3811_v1 = vld [vmem:[%s5696_s6 + $0x34] sm:$0xf0]  ;;  %v3586_v6 = vld [vmem:[%s5696_s6] sm:$0xf] }
  0x37   : > { %1148 = vmatpush.bf16.msrb.mxu0 %v4491_v60  ;;  %v4664_v2 = vor.u32 %v3811_v1, %v3610_v0  ;;  %v3806_v7 = vld [vmem:[%s5696_s6 + $0xc] sm:$0xf0]  ;;  %v3804_v8 = vld [vmem:[%s5696_s6 + $0x4] sm:$0xf]  ;;  %v3588_v11 = vld [vmem:[%s5696_s6 + $0x10] sm:$0xf0] }
  0x38   : > { %1161 = vmatpush.bf16.msrb.mxu1 %v4500_v63  ;;  %v4679_v10 = vor.u32 %v3806_v7, %v3586_v6  ;;  %v3805_v12 = vld [vmem:[%s5696_s6 + $0xc] sm:$0xf]  ;;  %v3596_v15 = vld [vmem:[%s5696_s6 + $0x18] sm:$0xf0]  ;;  %v4690_v16 = vor.u32 %v3804_v8, %v3588_v11  ;;  %v3770_v19 = vld [vmem:[%s4416_s18 + $0x30] sm:$0xff] }
  0x39   : > { %1174 = vmatpush.bf16.msrb.mxu2 %v4512_v3  ;;  %v3594_v20 = vld [vmem:[%s5696_s6 + $0x8] sm:$0xf]  ;;  %v3807_v21 = vld [vmem:[%s5696_s6 + $0x14] sm:$0xf0]  ;;  %v1265_v25 = vld [vmem:[%s4727_s9] sm:$0xff] }
  0x3a   : > { %1187 = vmatpush.bf16.msrb.mxu3 %v4516_v4  ;;  %v4710_v23 = vor.u32 %v3807_v21, %v3594_v20  ;;  %v3771_v24 = vld [vmem:[%s4416_s18 + $0x38] sm:$0xff]  ;;  %vm1266_vm0 = vcmp.gt.f32.partialorder %v1265_v25, 0.0  ;;  %v2063_v36 = vld [vmem:[%s4727_s9 + $0x30] sm:$0xff]  ;;  %v2861_v58 = vld [vmem:[%s4727_s9 + $0x60] sm:$0xff] }
  0x3b   : > { %1149 = vmatpush.bf16.msrb.mxu0 %v4531_v9  ;;  %v1267_v29 = vsel %vm1266_vm0, 1, %v5699_v28  ;;  %vm2064_vm2 = vcmp.gt.f32.partialorder %v2063_v36, 0.0  ;;  %vm2862_vm4 = vcmp.gt.f32.partialorder %v2861_v58, 0.0  ;;  %v3260_v8 = vld [vmem:[%s4727_s9 + $0x78] sm:$0xff] }
  0x3c   : > { %1162 = vmatpush.bf16.msrb.mxu1 %v4542_v13  ;;  %1269 = vperm.xlu0 %3861, %v1267_v29   ;;  %v2065_v43 = vsel %vm2064_vm2, 1, %v5699_v28  ;;  %v2863_v6 = vsel %vm2862_vm4, 1, %v5699_v28  ;;  %vm3261_vm5 = vcmp.gt.f32.partialorder %v3260_v8, 0.0 }
  0x3d   : > { %1175 = vmatpush.bf16.msrb.mxu2 %v4553_v17 }
  0x3e   : > { %700 = vmatmul.bf16.gmra.mxu0 %v3765_v5  ;;  %1188 = vmatpush.bf16.msrb.mxu3 %v4544_v14 }
  0x3f   : > { %749 = vmatmul.bf16.gmra.mxu1 %v3765_v5  ;;  %1150 = vmatpush.bf16.msrb.mxu0 %v4568_v22 }
  0x40   : > { %798 = vmatmul.bf16.gmra.mxu2 %v3765_v5  ;;  %1163 = vmatpush.bf16.msrb.mxu1 %v4579_v26 }
  0x41   : > { %847 = vmatmul.bf16.gmra.mxu3 %v3765_v5  ;;  %1176 = vmatpush.bf16.msrb.mxu2 %v4590_v30  ;;  %v3769_v5 = vld [vmem:[%s4416_s18 + $0x28] sm:$0xff]  ;;  %s4742_s18 = sshll.u32 %s5832_s27, 3 }
  0x42   : > { %1189 = vmatpush.bf16.msrb.mxu3 %v4581_v27  ;;  %s400_s12 = scalar_lea.vmem %s5692_s2, %s4742_s18  ;;  %s404_s16 = scalar_lea.vmem %s5693_s3, %s4742_s18 }
  0x43   : > { %1151 = vmatpush.bf16.msrb.mxu0 %v4605_v35  ;;  %v4759_v33 = vld [vmem:[%s400_s12] sm:$0xff]  ;;  %s412_s20 = scalar_lea.vmem %s5698_s8, %s4742_s18  ;;  %s408_s23 = scalar_lea.vmem %s5697_s7, %s4742_s18 }
  0x44   : > { %1164 = vmatpush.bf16.msrb.mxu1 %v4616_v40  ;;  %v953_v34 = vpack.c.bf16 %v4759_v33, %v4759_v33 }
  0x45   : > { %1177 = vmatpush.bf16.msrb.mxu2 %v4627_v45 }
  0x46   : > { %1190 = vmatpush.bf16.msrb.mxu3 %v4618_v41 }
  0x47   : > { %1152 = vmatpush.bf16.msrb.mxu0 %v4642_v54 }
  0x48   : > { %1165 = vmatpush.bf16.msrb.mxu1 %v4653_v61 }
  0x49   : > { %1178 = vmatpush.bf16.msrb.mxu2 %v4664_v2 }
  0x4a   : > { %1191 = vmatpush.bf16.msrb.mxu3 %v4655_v62 }
  0x4b   : > { %1153 = vmatpush.bf16.msrb.mxu0 %v4679_v10 }
  0x4c   : > { %1166 = vmatpush.bf16.msrb.mxu1 %v4690_v16 }
  0x4d   : > { %1179 = vmatpush.bf16.msrb.mxu2 %v4710_v23 }
  0x4e   : > { %705 = vmatmul.bf16.gmra.mxu0 %v3766_v18 }
  0x4f   : > { %754 = vmatmul.bf16.gmra.mxu1 %v3766_v18  ;;  %1279 = vmatpush.bf16.msra.mxu0 %v4427_v37 }
  0x50   : > { %803 = vmatmul.bf16.gmra.mxu2 %v3766_v18  ;;  %1292 = vmatpush.bf16.msra.mxu1 %v4439_v42 }
  0x51   : > { %852 = vmatmul.bf16.gmra.mxu3 %v3766_v18  ;;  %v4692_v18 = vor.u32 %v3805_v12, %v3596_v15  ;;  %1305 = vmatpush.bf16.msra.mxu2 %v4453_v47 }
  0x53   : > { %1192 = vmatpush.bf16.msrb.mxu3 %v4692_v18  ;;  %1280 = vmatpush.bf16.msra.mxu0 %v4458_v49 }
  0x54   : > { %1293 = vmatpush.bf16.msra.mxu1 %v4467_v52 }
  0x55   : > { %1306 = vmatpush.bf16.msra.mxu2 %v4476_v55 }
  0x57   : > { %1318 = vmatpush.bf16.msra.mxu3 %v4456_v48  ;;  %1281 = vmatpush.bf16.msra.mxu0 %v4491_v60 }
  0x58   : > { %1294 = vmatpush.bf16.msra.mxu1 %v4500_v63 }
  0x59   : > { %1307 = vmatpush.bf16.msra.mxu2 %v4512_v3 }
  0x5b   : > { %1319 = vmatpush.bf16.msra.mxu3 %v4489_v59  ;;  %1282 = vmatpush.bf16.msra.mxu0 %v4531_v9 }
  0x5c   : > { %1295 = vmatpush.bf16.msra.mxu1 %v4542_v13 }
  0x5d   : > { %1308 = vmatpush.bf16.msra.mxu2 %v4553_v17 }
  0x5e   : > { %710 = vmatmul.bf16.gmra.mxu0 %v3767_v31 }
  0x5f   : > { %759 = vmatmul.bf16.gmra.mxu1 %v3767_v31  ;;  %1320 = vmatpush.bf16.msra.mxu3 %v4516_v4 }
  0x60   : > { %808 = vmatmul.bf16.gmra.mxu2 %v3767_v31  ;;  %1283 = vmatpush.bf16.msra.mxu0 %v4568_v22 }
  0x61   : > { %857 = vmatmul.bf16.gmra.mxu3 %v3767_v31  ;;  %1296 = vmatpush.bf16.msra.mxu1 %v4579_v26  ;;  %v1398_v31 = vld [vmem:[%s4727_s9 + $0x8] sm:$0xff] }
  0x62   : > { %1309 = vmatpush.bf16.msra.mxu2 %v4590_v30  ;;  %vm1399_vm1 = vcmp.gt.f32.partialorder %v1398_v31, 0.0 }
  0x63   : > { %1321 = vmatpush.bf16.msra.mxu3 %v4544_v14  ;;  %v1400_v32 = vsel %vm1399_vm1, 1, %v5699_v28 }
  0x64   : > { %1284 = vmatpush.bf16.msra.mxu0 %v4605_v35  ;;  %1402 = vperm.xlu0 %3861, %v1400_v32  }
  0x65   : > { %1297 = vmatpush.bf16.msra.mxu1 %v4616_v40 }
  0x66   : > { %1310 = vmatpush.bf16.msra.mxu2 %v4627_v45 }
  0x67   : > { %1322 = vmatpush.bf16.msra.mxu3 %v4581_v27 }
  0x68   : > { %1285 = vmatpush.bf16.msra.mxu0 %v4642_v54 }
  0x69   : > { %1298 = vmatpush.bf16.msra.mxu1 %v4653_v61 }
  0x6a   : > { %1311 = vmatpush.bf16.msra.mxu2 %v4664_v2 }
  0x6b   : > { %1323 = vmatpush.bf16.msra.mxu3 %v4618_v41 }
  0x6c   : > { %1286 = vmatpush.bf16.msra.mxu0 %v4679_v10  ;;  %2067 = vperm.xlu0 %3861, %v2065_v43  }
  0x6d   : > { %1299 = vmatpush.bf16.msra.mxu1 %v4690_v16 }
  0x6e   : > { %715 = vmatmul.bf16.gmra.mxu0 %v3768_v46  ;;  %1312 = vmatpush.bf16.msra.mxu2 %v4710_v23 }
  0x6f   : > { %764 = vmatmul.bf16.gmra.mxu1 %v3768_v46  ;;  %1324 = vmatpush.bf16.msra.mxu3 %v4655_v62 }
  0x70   : > { %813 = vmatmul.bf16.gmra.mxu2 %v3768_v46 }
  0x71   : > { %862 = vmatmul.bf16.gmra.mxu3 %v3768_v46  ;;  %v2462_v46 = vld [vmem:[%s4727_s9 + $0x48] sm:$0xff] }
  0x72   : > { %vm2463_vm3 = vcmp.gt.f32.partialorder %v2462_v46, 0.0 }
  0x73   : > { %1325 = vmatpush.bf16.msra.mxu3 %v4692_v18  ;;  %v2464_v56 = vsel %vm2463_vm3, 1, %v5699_v28 }
  0x74   : > { %2466 = vperm.xlu0 %3861, %v2464_v56  }
  0x7c   : > { %2865 = vperm.xlu0 %3861, %v2863_v6  }
  0x7e   : > { %720 = vmatmul.bf16.gmra.mxu0 %v3769_v5 }
  0x7f   : > { %769 = vmatmul.bf16.gmra.mxu1 %v3769_v5 }
  0x80   : > { %818 = vmatmul.bf16.gmra.mxu2 %v3769_v5 }
  0x81   : > { %867 = vmatmul.bf16.gmra.mxu3 %v3769_v5 }
  0x8e   : > { %725 = vmatmul.bf16.gmra.mxu0 %v3770_v19 }
  0x8f   : > { %774 = vmatmul.bf16.gmra.mxu1 %v3770_v19 }
  0x90   : > { %823 = vmatmul.bf16.gmra.mxu2 %v3770_v19 }
  0x91   : > { %872 = vmatmul.bf16.gmra.mxu3 %v3770_v19  ;;  %v3262_v19 = vsel %vm3261_vm5, 1, %v5699_v28 }
  0x92   : > { %3264 = vperm.xlu0 %3861, %v3262_v19  }
  0x9e   : > { %730 = vmatmul.bf16.gmra.mxu0 %v3771_v24 }
  0x9f   : > { %779 = vmatmul.bf16.gmra.mxu1 %v3771_v24 }
  0xa0   : > { %828 = vmatmul.bf16.gmra.mxu2 %v3771_v24 }
  0xa1   : > { %877 = vmatmul.bf16.gmra.mxu3 %v3771_v24 }
  0xab   : > { %v4765_v38 = vpop.f32.mrf.mxu0 }
  0xac   : > { %v4767_v39 = vpop.f32.mrf.mxu1 }
  0xae   : > { %1154 = vmatmul.bf16.vlgmr.msrb.gmra.mxu0 %v953_v34 }
  0xaf   : > { %1167 = vmatmul.bf16.vlgmr.msrb.gmra.mxu1 %v953_v34  ;;  %1412 = vmatpush.bf16.msrb.mxu0 %v4427_v37 }
  0xb0   : > { %1180 = vmatmul.bf16.vlgmr.msrb.gmra.mxu2 %v953_v34  ;;  %1425 = vmatpush.bf16.msrb.mxu1 %v4439_v42 }
  0xb1   : > { %1193 = vmatmul.bf16.vlgmr.msrb.gmra.mxu3 %v953_v34  ;;  %1438 = vmatpush.bf16.msrb.mxu2 %v4453_v47 }
  0xb2   : > { %1451 = vmatpush.bf16.msrb.mxu3 %v4456_v48 }
  0xb3   : > { %v4773_v44 = vpop.f32.mrf.mxu2  ;;  %v4779_v51 = vpop.f32.mrf.mxu0  ;;  %1413 = vmatpush.bf16.msrb.mxu0 %v4458_v49 }
  0xb4   : > { %v4777_v50 = vpop.f32.mrf.mxu3  ;;  %v4781_v53 = vpop.f32.mrf.mxu1  ;;  %1426 = vmatpush.bf16.msrb.mxu1 %v4467_v52 }
  0xb5   : > { %1439 = vmatpush.bf16.msrb.mxu2 %v4476_v55 }
  0xb6   : > { %1452 = vmatpush.bf16.msrb.mxu3 %v4489_v59 }
  0xb7   : > { %1414 = vmatpush.bf16.msrb.mxu0 %v4491_v60 }
  0xb8   : > { %1427 = vmatpush.bf16.msrb.mxu1 %v4500_v63 }
  0xb9   : > { %1440 = vmatpush.bf16.msrb.mxu2 %v4512_v3 }
  0xba   : > { %1453 = vmatpush.bf16.msrb.mxu3 %v4516_v4 }
  0xbb   : > { %v4790_v57 = vpop.f32.mrf.mxu2  ;;  %v4797_v1 = vpop.f32.mrf.mxu0  ;;  %1415 = vmatpush.bf16.msrb.mxu0 %v4531_v9 }
  0xbc   : > { %5705 = vst [vmem:[#allocation3_spill] sm:$0xff] %v4790_v57  ;;  %v4795_v0 = vpop.f32.mrf.mxu3  ;;  %v4799_v5 = vpop.f32.mrf.mxu1  ;;  %1428 = vmatpush.bf16.msrb.mxu1 %v4542_v13 }
  0xbd   : > { %5706 = vst [vmem:[#allocation4_spill] sm:$0xff] %v4795_v0  ;;  %1441 = vmatpush.bf16.msrb.mxu2 %v4553_v17 }
  0xbe   : > { %5707 = vst [vmem:[#allocation5_spill] sm:$0xff] %v4797_v1  ;;  %1454 = vmatpush.bf16.msrb.mxu3 %v4544_v14 }
  0xbf   : > { %5708 = vst [vmem:[#allocation6_spill] sm:$0xff] %v4799_v5  ;;  %1416 = vmatpush.bf16.msrb.mxu0 %v4568_v22 }
  0xc0   : > { %1429 = vmatpush.bf16.msrb.mxu1 %v4579_v26 }
  0xc1   : > { %1442 = vmatpush.bf16.msrb.mxu2 %v4590_v30 }
  0xc2   : > { %1455 = vmatpush.bf16.msrb.mxu3 %v4581_v27 }
  0xc3   : > { %v4808_v7 = vpop.f32.mrf.mxu2  ;;  %v4815_v12 = vpop.f32.mrf.mxu0  ;;  %1417 = vmatpush.bf16.msrb.mxu0 %v4605_v35 }
  0xc4   : > { %5709 = vst [vmem:[#allocation7_spill] sm:$0xff] %v4808_v7  ;;  %v4813_v11 = vpop.f32.mrf.mxu3  ;;  %v4817_v15 = vpop.f32.mrf.mxu1  ;;  %1430 = vmatpush.bf16.msrb.mxu1 %v4616_v40 }
  0xc5   : > { %5710 = vst [vmem:[#allocation8_spill] sm:$0xff] %v4813_v11  ;;  %1443 = vmatpush.bf16.msrb.mxu2 %v4627_v45 }
  0xc6   : > { %5711 = vst [vmem:[#allocation9_spill] sm:$0xff] %v4815_v12  ;;  %1456 = vmatpush.bf16.msrb.mxu3 %v4618_v41 }
  0xc7   : > { %5712 = vst [vmem:[#allocation10_spill] sm:$0xff] %v4817_v15  ;;  %1418 = vmatpush.bf16.msrb.mxu0 %v4642_v54 }
  0xc8   : > { %1431 = vmatpush.bf16.msrb.mxu1 %v4653_v61 }
  0xc9   : > { %1444 = vmatpush.bf16.msrb.mxu2 %v4664_v2 }
  0xca   : > { %1457 = vmatpush.bf16.msrb.mxu3 %v4655_v62 }
  0xcb   : > { %v4826_v20 = vpop.f32.mrf.mxu2  ;;  %v4832_v24 = vpop.f32.mrf.mxu0  ;;  %1419 = vmatpush.bf16.msrb.mxu0 %v4679_v10 }
  0xcc   : > { %5713 = vst [vmem:[#allocation11_spill] sm:$0xff] %v4826_v20  ;;  %v4830_v21 = vpop.f32.mrf.mxu3  ;;  %v4834_v25 = vpop.f32.mrf.mxu1  ;;  %1432 = vmatpush.bf16.msrb.mxu1 %v4690_v16 }
  0xcd   : > { %5714 = vst [vmem:[#allocation12_spill] sm:$0xff] %v4830_v21  ;;  %1445 = vmatpush.bf16.msrb.mxu2 %v4710_v23 }
  0xce   : > { %5715 = vst [vmem:[#allocation13_spill] sm:$0xff] %v4832_v24  ;;  %1458 = vmatpush.bf16.msrb.mxu3 %v4692_v18 }
  0xcf   : > { %5716 = vst [vmem:[#allocation14_spill] sm:$0xff] %v4834_v25 }
  0xd3   : > { %v4840_v29 = vpop.f32.mrf.mxu2  ;;  %v4844_v32 = vpop.f32.mrf.mxu0 }
  0xd4   : > { %5717 = vst [vmem:[#allocation15_spill] sm:$0xff] %v4840_v29  ;;  %v4842_v31 = vpop.f32.mrf.mxu3  ;;  %v4846_v34 = vpop.f32.mrf.mxu1 }
  0xd5   : > { %5718 = vst [vmem:[#allocation16_spill] sm:$0xff] %v4842_v31 }
  0xd6   : > { %5719 = vst [vmem:[#allocation17_spill] sm:$0xff] %v4844_v32 }
  0xd7   : > { %5720 = vst [vmem:[#allocation18_spill] sm:$0xff] %v4846_v34 }
  0xdb   : > { %v4848_v36 = vpop.f32.mrf.mxu2  ;;  %v4852_v46 = vpop.f32.mrf.mxu0 }
  0xdc   : > { %5721 = vst [vmem:[#allocation19_spill] sm:$0xff] %v4848_v36  ;;  %v4850_v43 = vpop.f32.mrf.mxu3  ;;  %v4854_v56 = vpop.f32.mrf.mxu1 }
  0xdd   : > { %5722 = vst [vmem:[#allocation20_spill] sm:$0xff] %v4850_v43 }
  0xde   : > { %5723 = vst [vmem:[#allocation21_spill] sm:$0xff] %v4852_v46 }
  0xdf   : > { %5724 = vst [vmem:[#allocation22_spill] sm:$0xff] %v4854_v56 }
  0xe3   : > { %v4856_v58 = vpop.f32.mrf.mxu2  ;;  %v4860_v8 = vpop.f32.mrf.mxu0 }
  0xe4   : > { %5725 = vst [vmem:[#allocation23_spill] sm:$0xff] %v4856_v58  ;;  %v4858_v6 = vpop.f32.mrf.mxu3  ;;  %v4862_v19 = vpop.f32.mrf.mxu1 }
  0xe5   : > { %5726 = vst [vmem:[#allocation24_spill] sm:$0xff] %v4858_v6 }
  0xe6   : > { %5727 = vst [vmem:[#allocation25_spill] sm:$0xff] %v4860_v8 }
  0xe7   : > { %5728 = vst [vmem:[#allocation26_spill] sm:$0xff] %v4862_v19 }
  0xeb   : > { %v4864_v28 = vpop.f32.mrf.mxu2  ;;  %v4868_v34 = vpop.f32.mrf.mxu0 }
  0xec   : > { %5729 = vst [vmem:[#allocation27_spill] sm:$0xff] %v4864_v28  ;;  %v4866_v32 = vpop.f32.mrf.mxu3  ;;  %v4870_v36 = vpop.f32.mrf.mxu1 }
  0xed   : > { %5730 = vst [vmem:[#allocation28_spill] sm:$0xff] %v4866_v32 }
  0xee   : > { %5731 = vst [vmem:[#allocation29_spill] sm:$0xff] %v4868_v34 }
  0xef   : > { %5732 = vst [vmem:[#allocation30_spill] sm:$0xff] %v4870_v36 }
  0xf3   : > { %v4872_v43 = vpop.f32.mrf.mxu2  ;;  %v4876_v56 = vpop.f32.mrf.mxu0 }
  0xf4   : > { %5733 = vst [vmem:[#allocation31_spill] sm:$0xff] %v4872_v43  ;;  %v4874_v46 = vpop.f32.mrf.mxu3  ;;  %v4878_v58 = vpop.f32.mrf.mxu1 }
  0xf5   : > { %5734 = vst [vmem:[#allocation32_spill] sm:$0xff] %v4874_v46 }
  0xf6   : > { %5735 = vst [vmem:[#allocation33_spill] sm:$0xff] %v4876_v56 }
  0xf7   : > { %5736 = vst [vmem:[#allocation34_spill] sm:$0xff] %v4878_v58 }
  0xfb   : > { %v4880_v6 = vpop.f32.mrf.mxu2  ;;  %v4884_v19 = vpop.f32.mrf.mxu0 }
  0xfc   : > { %5737 = vst [vmem:[#allocation35_spill] sm:$0xff] %v4880_v6  ;;  %v4882_v8 = vpop.f32.mrf.mxu3  ;;  %v4886_v28 = vpop.f32.mrf.mxu1 }
  0xfd   : > { %5738 = vst [vmem:[#allocation36_spill] sm:$0xff] %v4882_v8 }
  0xfe   : > { %5739 = vst [vmem:[#allocation37_spill] sm:$0xff] %v4884_v19 }
  0xff   : > { %5740 = vst [vmem:[#allocation38_spill] sm:$0xff] %v4886_v28 }
 0x103   : > { %v4888_v32 = vpop.f32.mrf.mxu2  ;;  %v4892_v36 = vpop.f32.mrf.mxu0 }
 0x104   : > { %5741 = vst [vmem:[#allocation39_spill] sm:$0xff] %v4888_v32  ;;  %v4890_v34 = vpop.f32.mrf.mxu3  ;;  %v4894_v43 = vpop.f32.mrf.mxu1 }
 0x105   : > { %5742 = vst [vmem:[#allocation40_spill] sm:$0xff] %v4890_v34 }
 0x106   : > { %5743 = vst [vmem:[#allocation41_spill] sm:$0xff] %v4892_v36 }
 0x107   : > { %5744 = vst [vmem:[#allocation42_spill] sm:$0xff] %v4894_v43 }
 0x10b   : > { %v4896_v46 = vpop.f32.mrf.mxu2  ;;  %v4900_v58 = vpop.f32.mrf.mxu0 }
 0x10c   : > { %5745 = vst [vmem:[#allocation43_spill] sm:$0xff] %v4896_v46  ;;  %v4898_v56 = vpop.f32.mrf.mxu3  ;;  %v4902_v6 = vpop.f32.mrf.mxu1 }
 0x10d   : > { %5746 = vst [vmem:[#allocation44_spill] sm:$0xff] %v4898_v56 }
 0x10e   : > { %5747 = vst [vmem:[#allocation45_spill] sm:$0xff] %v4900_v58 }
 0x10f   : > { %5748 = vst [vmem:[#allocation46_spill] sm:$0xff] %v4902_v6 }
 0x113   : > { %v4904_v8 = vpop.f32.mrf.mxu2  ;;  %v4908_v28 = vpop.f32.mrf.mxu0 }
 0x114   : > { %5749 = vst [vmem:[#allocation47_spill] sm:$0xff] %v4904_v8  ;;  %v4906_v19 = vpop.f32.mrf.mxu3  ;;  %v4910_v32 = vpop.f32.mrf.mxu1  ;;  %v469_v8 = vld [vmem:[%s5695_s5] sm:$0xf] }
 0x115   : > { %5750 = vst [vmem:[#allocation48_spill] sm:$0xff] %v4906_v19  ;;  %v4943_v31 = vperm.slane %v469_v8, 3 }
 0x116   : > { %5751 = vst [vmem:[#allocation49_spill] sm:$0xff] %v4908_v28 }
 0x117   : > { %5752 = vst [vmem:[#allocation50_spill] sm:$0xff] %v4910_v32  ;;  %v4931_v32 = vperm.slane %v469_v8, 0 }
 0x11b   : > { %v4912_v34 = vpop.f32.mrf.mxu2  ;;  %v4916_v43 = vpop.f32.mrf.mxu0 }
 0x11c   : > { %5753 = vst [vmem:[#allocation51_spill] sm:$0xff] %v4912_v34  ;;  %v4914_v36 = vpop.f32.mrf.mxu3  ;;  %v4918_v46 = vpop.f32.mrf.mxu1  ;;  %v4933_v34 = vperm.slane %v469_v8, 1 }
 0x11d   : > { %5754 = vst [vmem:[#allocation52_spill] sm:$0xff] %v4914_v36 }
 0x11e   : > { %5755 = vst [vmem:[#allocation53_spill] sm:$0xff] %v4916_v43  ;;  %v697_v43 = vadd.f32 %v4765_v38, %v4931_v32  ;;  %v844_v38 = vadd.f32 %v4777_v50, %v4943_v31 }
 0x11f   : > { %5756 = vst [vmem:[#allocation54_spill] sm:$0xff] %v4918_v46 }
 0x123   : > { %v4920_v56 = vpop.f32.mrf.mxu2  ;;  %v4927_v19 = vpop.f32.mrf.mxu0 }
 0x124   : > { %5757 = vst [vmem:[#allocation55_spill] sm:$0xff] %v4920_v56  ;;  %v4925_v6 = vpop.f32.mrf.mxu3  ;;  %v4929_v28 = vpop.f32.mrf.mxu1  ;;  %v746_v56 = vadd.f32 %v4767_v39, %v4933_v34 }
 0x125   : > { %5758 = vst [vmem:[#allocation56_spill] sm:$0xff] %v4925_v6 }
 0x126   : > { %5759 = vst [vmem:[#allocation57_spill] sm:$0xff] %v4927_v19 }
 0x127   : > { %5760 = vst [vmem:[#allocation58_spill] sm:$0xff] %v4929_v28 }
 0x12b   : > { %v4937_v46 = vpop.f32.mrf.mxu2  ;;  %v1155_v58 = vpop.f32.mrf.mxu0 }
 0x12c   : > { %5761 = vst [vmem:[#allocation59_spill] sm:$0xff] %v4937_v46  ;;  %v4941_v36 = vpop.f32.mrf.mxu3  ;;  %v1198_v6 = vadd.f32 %v1155_v58, %v697_v43  ;;  %v1168_v29 = vpop.f32.mrf.mxu1 }
 0x12d   : > { %5762 = vst [vmem:[#allocation60_spill] sm:$0xff] %v4941_v36  ;;  %v1199_v19 = vadd.f32 %v1168_v29, %v746_v56  ;;  %v4947_v29 = vperm.slane %v469_v8, 2 }
 0x12e   : > { %v3712_v28 = vmul.f32 -1.442695, %v1198_v6 }
 0x12f   : > { %v3713_v25 = vmul.f32 -1.442695, %v1199_v19  ;;  %5763 = vst [vmem:[#allocation61_spill] sm:$0xff] %v4947_v29  ;;  %v795_v50 = vadd.f32 %v4773_v44, %v4947_v29 }
 0x130   : > { %3864 = vpow2.f32 %v3712_v28 }
 0x131   : > { %3866 = vpow2.f32 %v3713_v25 }
 0x133   : > { %v1181_v24 = vpop.f32.mrf.mxu2  ;;  %v1157_v20 = vpop.f32.mrf.mxu0 }
 0x134   : > { %v1194_v46 = vpop.f32.mrf.mxu3  ;;  %v1170_v39 = vpop.f32.mrf.mxu1  ;;  %v1200_v20 = vadd.f32 %v1181_v24, %v795_v50 }
 0x135   : > { %v1201_v21 = vadd.f32 %v1194_v46, %v844_v38 }
 0x136   : > { %v3865_v15 = vpop.eup %3864 }
 0x137   : > { %v3714_v36 = vmul.f32 -1.442695, %v1201_v21  ;;  %v3867_v12 = vpop.eup %3866  ;;  %v1205_v43 = vadd.f32 1.0, %v3865_v15 }
 0x138   : > { %v1224_v58 = vadd.f32 1.0, %v3867_v12 }
 0x139   : > { %3868 = vpow2.f32 %v3714_v36  ;;  %v1217_v36 = vand.u32 2147483648, %v1205_v43  ;;  %vm1211_vm8 = vweird.f32 %v1205_v43 }
 0x13a   : > { %3870 = vrcp.f32 %v1205_v43  ;;  %v1236_v8 = vand.u32 2147483648, %v1224_v58  ;;  %v1234_v44 = vand.u32 2147483647, %v1224_v58  ;;  %vm1230_vm9 = vweird.f32 %v1224_v58 }
 0x13b   : > { %3872 = vrcp.f32 %v1224_v58  ;;  %v1183_v28 = vpop.f32.mrf.mxu2 }
 0x13c   : > { %v1196_v25 = vpop.f32.mrf.mxu3  ;;  %v1215_v28 = vand.u32 2147483647, %v1205_v43  ;;  %vm1235_vm13 = vcmp.eq.f32.partialorder %v1234_v44, 8.507059e+37 }
 0x13e   : > { %vm1216_vm12 = vcmp.eq.f32.partialorder %v1215_v28, 8.507059e+37 }
 0x13f   : > { %v3869_v56 = vpop.eup %3868 }
 0x140   : > { %v3871_v6 = vpop.eup %3870  ;;  %v1244_v46 = vadd.f32 1.0, %v3869_v56  ;;  %v1218_v56 = vor.u32 1.1754944e-38, %v1217_v36 }
 0x141   : > { %v3873_v19 = vpop.eup %3872  ;;  %v1207_v21 = vmul.f32 %v3871_v6, %v1205_v43  ;;  %vm1212_vm6 = vweird.f32 %v3871_v6 }
 0x142   : > { %v1226_v38 = vmul.f32 %v3873_v19, %v1224_v58  ;;  %3874 = vrcp.f32 %v1244_v46  ;;  %vm1231_vm7 = vweird.f32 %v3873_v19  ;;  %vm1213_vm10 = vmor %vm1211_vm8, %vm1212_vm6  ;;  %vm1250_vm0 = vweird.f32 %v1244_v46 }
 0x143   : > { %v1208_v12 = vsub.f32 1.0, %v1207_v21  ;;  %3876 = vtanh.f32 %v1200_v20  ;;  %vm1232_vm11 = vmor %vm1230_vm9, %vm1231_vm7  ;;  %v1237_v20 = vor.u32 1.1754944e-38, %v1236_v8  ;;  %v1256_v8 = vand.u32 2147483648, %v1244_v46 }
 0x144   : > { %v1227_v15 = vsub.f32 1.0, %v1226_v38  ;;  %v419_v38 = vld [vmem:[%s404_s16] sm:$0xff]  ;;  %v1254_v28 = vand.u32 2147483647, %v1244_v46 }
 0x145   : > { %v1209_v39 = vmul.f32 %v3871_v6, %v1208_v12 }
 0x146   : > { %v1228_v25 = vmul.f32 %v3873_v19, %v1227_v15  ;;  %vm1255_vm2 = vcmp.eq.f32.partialorder %v1254_v28, 8.507059e+37 }
 0x147   : > { %v1210_v24 = vadd.f32 %v3871_v6, %v1209_v39  ;;  %v1270_v39 = vpop.permute.xlu0 %1269 }
 0x148   : > { %v3875_v50 = vpop.eup %3874  ;;  %v1229_v21 = vadd.f32 %v3873_v19, %v1228_v25  ;;  %vm1271_vm14 = vcmp.eq.s32.totalorder %v1270_v39, 1  ;;  %v1257_v25 = vor.u32 1.1754944e-38, %v1256_v8 }
 0x149   : > { %v1214_v12 = vsel %vm1213_vm10, %v3871_v6, %v1210_v24  ;;  %v1246_v7 = vmul.f32 %v3875_v50, %v1244_v46  ;;  %v3877_v15 = vpop.eup %3876  ;;  %vm1251_vm15 = vweird.f32 %v3875_v50 }
 0x14a   : > { %v1219_v11 = vsel %vm1216_vm12, %v1218_v56, %v1214_v12  ;;  %v1233_v5 = vsel %vm1232_vm11, %v3873_v19, %v1229_v21  ;;  %vm1252_vm1 = vmor %vm1250_vm0, %vm1251_vm15  ;;  %v5764_v21 = vld [vmem:[#allocation4_spill] sm:$0xff] }
 0x14b   : > { %v1238_v1 = vsel %vm1235_vm13, %v1237_v20, %v1233_v5  ;;  %v1261_v57 = vmul.f32 %v3877_v15, %v1219_v11  ;;  %v1247_v29 = vsub.f32 1.0, %v1246_v7  ;;  %v846_v20 = vadd.f32 %v5764_v21, %v4943_v31 }
 0x14c   : > { %v1260_v43 = vmul.f32 %v1238_v1, %v419_v38 }
 0x14d   : > { %v1248_v58 = vmul.f32 %v3875_v50, %v1247_v29 }
 0x14e   : > { %v1262_v0 = vadd.f32 %v1261_v57, %v1260_v43 }
 0x14f   : > { %v1249_v36 = vadd.f32 %v3875_v50, %v1248_v58 }
 0x150   : > { %3878 = vtanh.f32 %v1262_v0  ;;  %v4956_v6 = vsel %vm1271_vm14, %v1262_v0, %v419_v38  ;;  %v748_v0 = vadd.f32 %v4781_v53, %v4933_v34 }
 0x151   : > { %v1253_v19 = vsel %vm1252_vm1, %v3875_v50, %v1249_v36 }
 0x152   : > { %v1258_v7 = vsel %vm1255_vm2, %v1257_v25, %v1253_v19  ;;  %v5765_v25 = vld [vmem:[#allocation61_spill] sm:$0xff] }
 0x156   : > { %v3879_v5 = vpop.eup %3878 }
 0x157   : > { %v1264_v11 = vmul.f32 %v3879_v5, %v1258_v7  ;;  %v5766_v5 = vld [vmem:[#allocation3_spill] sm:$0xff] }
 0x158   : > { %v797_v7 = vadd.f32 %v5766_v5, %v5765_v25  ;;  %v2196_v5 = vld [vmem:[%s4727_s9 + $0x38] sm:$0xff] }
 0x159   : > { %v4960_v1 = vsel %vm1271_vm14, %v1264_v11, %v4759_v33  ;;  %v699_v33 = vadd.f32 %v4779_v51, %v4931_v32  ;;  %v1531_v11 = vld [vmem:[%s4727_s9 + $0x10] sm:$0xff]  ;;  %vm2197_vm13 = vcmp.gt.f32.partialorder %v2196_v5, 0.0 }
 0x15a   : > { %v1278_v57 = vpack.c.bf16 %v4960_v1, %v4960_v1  ;;  %vm1532_vm3 = vcmp.gt.f32.partialorder %v1531_v11, 0.0 }
 0x15c   : > { %1287 = vmatmul.bf16.vlgmr.msra.gmra.mxu0 %v1278_v57  ;;  %1300 = vmatmul.bf16.vlgmr.msra.gmra.mxu1 %v1278_v57 }
 0x15d   : > { %1313 = vmatmul.bf16.vlgmr.msra.gmra.mxu2 %v1278_v57  ;;  %1326 = vmatmul.bf16.vlgmr.msra.gmra.mxu3 %v1278_v57 }
 0x15e   : > { %1545 = vmatpush.bf16.msra.mxu0 %v4427_v37  ;;  %1558 = vmatpush.bf16.msra.mxu1 %v4439_v42 }
 0x15f   : > { %1571 = vmatpush.bf16.msra.mxu2 %v4453_v47  ;;  %1584 = vmatpush.bf16.msra.mxu3 %v4456_v48 }
 0x162   : > { %1546 = vmatpush.bf16.msra.mxu0 %v4458_v49  ;;  %1559 = vmatpush.bf16.msra.mxu1 %v4467_v52 }
 0x163   : > { %1572 = vmatpush.bf16.msra.mxu2 %v4476_v55  ;;  %1585 = vmatpush.bf16.msra.mxu3 %v4489_v59 }
 0x166   : > { %1547 = vmatpush.bf16.msra.mxu0 %v4491_v60  ;;  %1560 = vmatpush.bf16.msra.mxu1 %v4500_v63 }
 0x167   : > { %1573 = vmatpush.bf16.msra.mxu2 %v4512_v3  ;;  %1586 = vmatpush.bf16.msra.mxu3 %v4516_v4 }
 0x16a   : > { %1548 = vmatpush.bf16.msra.mxu0 %v4531_v9  ;;  %1561 = vmatpush.bf16.msra.mxu1 %v4542_v13 }
 0x16b   : > { %1574 = vmatpush.bf16.msra.mxu2 %v4553_v17  ;;  %1587 = vmatpush.bf16.msra.mxu3 %v4544_v14 }
 0x16e   : > { %1549 = vmatpush.bf16.msra.mxu0 %v4568_v22  ;;  %1562 = vmatpush.bf16.msra.mxu1 %v4579_v26 }
 0x16f   : > { %1575 = vmatpush.bf16.msra.mxu2 %v4590_v30  ;;  %1588 = vmatpush.bf16.msra.mxu3 %v4581_v27 }
 0x172   : > { %1550 = vmatpush.bf16.msra.mxu0 %v4605_v35  ;;  %1563 = vmatpush.bf16.msra.mxu1 %v4616_v40 }
 0x173   : > { %1576 = vmatpush.bf16.msra.mxu2 %v4627_v45  ;;  %1589 = vmatpush.bf16.msra.mxu3 %v4618_v41 }
 0x176   : > { %1551 = vmatpush.bf16.msra.mxu0 %v4642_v54  ;;  %1564 = vmatpush.bf16.msra.mxu1 %v4653_v61 }
 0x177   : > { %1577 = vmatpush.bf16.msra.mxu2 %v4664_v2  ;;  %1590 = vmatpush.bf16.msra.mxu3 %v4655_v62 }
 0x17a   : > { %1552 = vmatpush.bf16.msra.mxu0 %v4679_v10  ;;  %1565 = vmatpush.bf16.msra.mxu1 %v4690_v16 }
 0x17b   : > { %1578 = vmatpush.bf16.msra.mxu2 %v4710_v23  ;;  %1591 = vmatpush.bf16.msra.mxu3 %v4692_v18 }
 0x1d9   : > { %v1288_v29 = vpop.f32.mrf.mxu0  ;;  %v1301_v46 = vpop.f32.mrf.mxu1 }
 0x1da   : > { %v1331_v44 = vadd.f32 %v1288_v29, %v699_v33  ;;  %v1332_v24 = vadd.f32 %v1301_v46, %v748_v0  ;;  %v5767_v29 = vmov 0  }
 0x1db   : > { %v1533_v46 = vsel %vm1532_vm3, 1, %v5767_v29 }
 0x1dc   : > { %v3715_v50 = vmul.f32 -1.442695, %v1331_v44  ;;  %v3716_v56 = vmul.f32 -1.442695, %v1332_v24  ;;  %v1664_v44 = vld [vmem:[%s4727_s9 + $0x18] sm:$0xff]  ;;  %1535 = vperm.xlu1 %3862, %v1533_v46  }
 0x1dd   : > { %vm1665_vm4 = vcmp.gt.f32.partialorder %v1664_v44, 0.0 }
 0x1de   : > { %3880 = vpow2.f32 %v3715_v50 }
 0x1df   : > { %3882 = vpow2.f32 %v3716_v56 }
 0x1e0   : > { %v1314_v38 = vpop.f32.mrf.mxu2  ;;  %v1327_v12 = vpop.f32.mrf.mxu3 }
 0x1e1   : > { %v1334_v15 = vadd.f32 %v1327_v12, %v846_v20  ;;  %v1290_v39 = vpop.f32.mrf.mxu0  ;;  %v1303_v51 = vpop.f32.mrf.mxu1  ;;  %v1333_v33 = vadd.f32 %v1314_v38, %v797_v7 }
 0x1e3   : > { %v3717_v43 = vmul.f32 -1.442695, %v1334_v15 }
 0x1e4   : > { %v3881_v58 = vpop.eup %3880 }
 0x1e5   : > { %v3883_v53 = vpop.eup %3882  ;;  %v1338_v36 = vadd.f32 1.0, %v3881_v58  ;;  %3884 = vpow2.f32 %v3717_v43  ;;  %v1666_v58 = vsel %vm1665_vm4, 1, %v5767_v29 }
 0x1e6   : > { %v1357_v8 = vadd.f32 1.0, %v3883_v53  ;;  %1668 = vperm.xlu1 %3862, %v1666_v58  }
 0x1e7   : > { %3886 = vrcp.f32 %v1338_v36  ;;  %v1348_v39 = vand.u32 2147483647, %v1338_v36  ;;  %v1350_v38 = vand.u32 2147483648, %v1338_v36  ;;  %vm1344_vm7 = vweird.f32 %v1338_v36 }
 0x1e8   : > { %3888 = vrcp.f32 %v1357_v8  ;;  %v1316_v28 = vpop.f32.mrf.mxu2  ;;  %v1329_v19 = vpop.f32.mrf.mxu3  ;;  %v1369_v15 = vand.u32 2147483648, %v1357_v8  ;;  %v1367_v43 = vand.u32 2147483647, %v1357_v8  ;;  %vm1363_vm8 = vweird.f32 %v1357_v8 }
 0x1e9   : > { %v1351_v7 = vor.u32 1.1754944e-38, %v1350_v38  ;;  %vm1349_vm11 = vcmp.eq.f32.partialorder %v1348_v39, 8.507059e+37 }
 0x1ea   : > { %v1370_v46 = vor.u32 1.1754944e-38, %v1369_v15  ;;  %vm1368_vm12 = vcmp.eq.f32.partialorder %v1367_v43, 8.507059e+37 }
 0x1eb   : > { %v3885_v57 = vpop.eup %3884 }
 0x1ec   : > { %v5005_v0 = vadd.f32 1.0, %v3885_v57 }
 0x1ed   : > { %v3887_v24 = vpop.eup %3886 }
 0x1ee   : > { %v3889_v50 = vpop.eup %3888  ;;  %v1340_v56 = vmul.f32 %v3887_v24, %v1338_v36  ;;  %3890 = vrcp.f32 %v5005_v0  ;;  %vm1345_vm5 = vweird.f32 %v3887_v24  ;;  %v1389_v15 = vand.u32 2147483648, %v5005_v0 }
 0x1ef   : > { %v1359_v21 = vmul.f32 %v3889_v50, %v1357_v8  ;;  %3892 = vtanh.f32 %v1333_v33  ;;  %vm1364_vm6 = vweird.f32 %v3889_v50  ;;  %vm1346_vm9 = vmor %vm1344_vm7, %vm1345_vm5  ;;  %vm1383_vm0 = vweird.f32 %v5005_v0 }
 0x1f0   : > { %v1341_v20 = vsub.f32 1.0, %v1340_v56  ;;  %vm1365_vm10 = vmor %vm1363_vm8, %vm1364_vm6  ;;  %v1387_v39 = vand.u32 2147483647, %v5005_v0 }
 0x1f1   : > { %v1360_v12 = vsub.f32 1.0, %v1359_v21 }
 0x1f2   : > { %v1342_v51 = vmul.f32 %v3887_v24, %v1341_v20  ;;  %vm1388_vm3 = vcmp.eq.f32.partialorder %v1387_v39, 8.507059e+37 }
 0x1f3   : > { %v1361_v53 = vmul.f32 %v3889_v50, %v1360_v12 }
 0x1f4   : > { %v3891_v28 = vpop.eup %3890  ;;  %v1343_v19 = vadd.f32 %v3887_v24, %v1342_v51  ;;  %v2198_v51 = vsel %vm2197_vm13, 1, %v5767_v29 }
 0x1f5   : > { %v1362_v11 = vadd.f32 %v3889_v50, %v1361_v53  ;;  %v1379_v57 = vmul.f32 %v3891_v28, %v5005_v0  ;;  %v3893_v33 = vpop.eup %3892  ;;  %v1403_v53 = vpop.permute.xlu0 %1402  ;;  %vm1384_vm15 = vweird.f32 %v3891_v28  ;;  %2200 = vperm.xlu1 %3862, %v2198_v51  }
 0x1f6   : > { %v1347_v44 = vsel %vm1346_vm9, %v3887_v24, %v1343_v19  ;;  %vm1404_vm14 = vcmp.eq.s32.totalorder %v1403_v53, 1  ;;  %v2595_v24 = vld [vmem:[%s4727_s9 + $0x50] sm:$0xff]  ;;  %vm1385_vm1 = vmor %vm1383_vm0, %vm1384_vm15  ;;  %v1390_v19 = vor.u32 1.1754944e-38, %v1389_v15 }
 0x1f7   : > { %v1352_v56 = vsel %vm1349_vm11, %v1351_v7, %v1347_v44  ;;  %v1366_v21 = vsel %vm1365_vm10, %v3889_v50, %v1362_v11  ;;  %v1380_v20 = vsub.f32 1.0, %v1379_v57  ;;  %vm2596_vm2 = vcmp.gt.f32.partialorder %v2595_v24, 0.0 }
 0x1f8   : > { %v1371_v36 = vsel %vm1368_vm12, %v1370_v46, %v1366_v21  ;;  %v1394_v12 = vmul.f32 %v3893_v33, %v1352_v56  ;;  %v2597_v5 = vsel %vm2596_vm2, 1, %v5767_v29  ;;  %v2994_v33 = vld [vmem:[%s4727_s9 + $0x68] sm:$0xff] }
 0x1f9   : > { %v1393_v8 = vmul.f32 %v1371_v36, %v4956_v6  ;;  %v1381_v38 = vmul.f32 %v3891_v28, %v1380_v20  ;;  %vm2995_vm4 = vcmp.gt.f32.partialorder %v2994_v33, 0.0 }
 0x1fb   : > { %v1395_v58 = vadd.f32 %v1394_v12, %v1393_v8  ;;  %v1382_v25 = vadd.f32 %v3891_v28, %v1381_v38  ;;  %v5770_v38 = vld [vmem:[#allocation8_spill] sm:$0xff] }
 0x1fc   : > { %v849_v51 = vadd.f32 %v5770_v38, %v4943_v31 }
 0x1fd   : > { %3894 = vtanh.f32 %v1395_v58  ;;  %v5019_v50 = vsel %vm1404_vm14, %v1395_v58, %v4956_v6  ;;  %v1386_v43 = vsel %vm1385_vm1, %v3891_v28, %v1382_v25  ;;  %2599 = vperm.xlu1 %3862, %v2597_v5   ;;  %v2996_v25 = vsel %vm2995_vm4, 1, %v5767_v29  ;;  %v5769_v28 = vld [vmem:[#allocation6_spill] sm:$0xff] }
 0x1fe   : > { %v1391_v11 = vsel %vm1388_vm3, %v1390_v19, %v1386_v43  ;;  %v751_v44 = vadd.f32 %v5769_v28, %v4933_v34 }
 0x203   : > { %v3895_v7 = vpop.eup %3894 }
 0x204   : > { %v1397_v57 = vmul.f32 %v3895_v7, %v1391_v11 }
 0x205   : > { %2998 = vperm.xlu1 %3862, %v2996_v25   ;;  %v5771_v25 = vld [vmem:[#allocation61_spill] sm:$0xff] }
 0x206   : > { %v5027_v6 = vsel %vm1404_vm14, %v1397_v57, %v4960_v1  ;;  %v5768_v1 = vld [vmem:[#allocation5_spill] sm:$0xff] }
 0x207   : > { %v1411_v46 = vpack.c.bf16 %v5027_v6, %v5027_v6  ;;  %v702_v0 = vadd.f32 %v5768_v1, %v4931_v32  ;;  %v5772_v1 = vld [vmem:[#allocation7_spill] sm:$0xff] }
 0x209   : > { %1420 = vmatmul.bf16.vlgmr.msrb.gmra.mxu0 %v1411_v46  ;;  %1433 = vmatmul.bf16.vlgmr.msrb.gmra.mxu1 %v1411_v46 }
 0x20a   : > { %1446 = vmatmul.bf16.vlgmr.msrb.gmra.mxu2 %v1411_v46  ;;  %1459 = vmatmul.bf16.vlgmr.msrb.gmra.mxu3 %v1411_v46 }
 0x20b   : > { %1678 = vmatpush.bf16.msrb.mxu0 %v4427_v37  ;;  %1691 = vmatpush.bf16.msrb.mxu1 %v4439_v42 }
 0x20c   : > { %1704 = vmatpush.bf16.msrb.mxu2 %v4453_v47  ;;  %1717 = vmatpush.bf16.msrb.mxu3 %v4456_v48 }
 0x20f   : > { %1679 = vmatpush.bf16.msrb.mxu0 %v4458_v49  ;;  %1692 = vmatpush.bf16.msrb.mxu1 %v4467_v52 }
 0x210   : > { %1705 = vmatpush.bf16.msrb.mxu2 %v4476_v55  ;;  %1718 = vmatpush.bf16.msrb.mxu3 %v4489_v59 }
 0x213   : > { %1680 = vmatpush.bf16.msrb.mxu0 %v4491_v60  ;;  %1693 = vmatpush.bf16.msrb.mxu1 %v4500_v63 }
 0x214   : > { %1706 = vmatpush.bf16.msrb.mxu2 %v4512_v3  ;;  %1719 = vmatpush.bf16.msrb.mxu3 %v4516_v4 }
 0x217   : > { %1681 = vmatpush.bf16.msrb.mxu0 %v4531_v9  ;;  %1694 = vmatpush.bf16.msrb.mxu1 %v4542_v13 }
 0x218   : > { %1707 = vmatpush.bf16.msrb.mxu2 %v4553_v17  ;;  %1720 = vmatpush.bf16.msrb.mxu3 %v4544_v14 }
 0x21b   : > { %1682 = vmatpush.bf16.msrb.mxu0 %v4568_v22  ;;  %1695 = vmatpush.bf16.msrb.mxu1 %v4579_v26 }
 0x21c   : > { %1708 = vmatpush.bf16.msrb.mxu2 %v4590_v30  ;;  %1721 = vmatpush.bf16.msrb.mxu3 %v4581_v27 }
 0x21f   : > { %1683 = vmatpush.bf16.msrb.mxu0 %v4605_v35  ;;  %1696 = vmatpush.bf16.msrb.mxu1 %v4616_v40 }
 0x220   : > { %1709 = vmatpush.bf16.msrb.mxu2 %v4627_v45  ;;  %1722 = vmatpush.bf16.msrb.mxu3 %v4618_v41 }
 0x223   : > { %1684 = vmatpush.bf16.msrb.mxu0 %v4642_v54  ;;  %1697 = vmatpush.bf16.msrb.mxu1 %v4653_v61 }
 0x224   : > { %1710 = vmatpush.bf16.msrb.mxu2 %v4664_v2  ;;  %1723 = vmatpush.bf16.msrb.mxu3 %v4655_v62 }
 0x227   : > { %1685 = vmatpush.bf16.msrb.mxu0 %v4679_v10  ;;  %1698 = vmatpush.bf16.msrb.mxu1 %v4690_v16 }
 0x228   : > { %1711 = vmatpush.bf16.msrb.mxu2 %v4710_v23  ;;  %1724 = vmatpush.bf16.msrb.mxu3 %v4692_v18 }
 0x286   : > { %v1421_v56 = vpop.f32.mrf.mxu0  ;;  %v1434_v21 = vpop.f32.mrf.mxu1 }
 0x287   : > { %v1464_v20 = vadd.f32 %v1421_v56, %v702_v0  ;;  %v1465_v36 = vadd.f32 %v1434_v21, %v751_v44  ;;  %v800_v0 = vadd.f32 %v5772_v1, %v5771_v25 }
 0x289   : > { %v3718_v12 = vmul.f32 -1.442695, %v1464_v20  ;;  %v3719_v8 = vmul.f32 -1.442695, %v1465_v36 }
 0x28b   : > { %3896 = vpow2.f32 %v3718_v12 }
 0x28c   : > { %3898 = vpow2.f32 %v3719_v8 }
 0x28d   : > { %v1447_v53 = vpop.f32.mrf.mxu2  ;;  %v1460_v58 = vpop.f32.mrf.mxu3 }
 0x28e   : > { %v1467_v24 = vadd.f32 %v1460_v58, %v849_v51  ;;  %v1423_v15 = vpop.f32.mrf.mxu0  ;;  %v1436_v39 = vpop.f32.mrf.mxu1  ;;  %v1466_v56 = vadd.f32 %v1447_v53, %v800_v0 }
 0x290   : > { %v3720_v43 = vmul.f32 -1.442695, %v1467_v24 }
 0x291   : > { %v3897_v19 = vpop.eup %3896 }
 0x292   : > { %v3899_v5 = vpop.eup %3898  ;;  %v1471_v7 = vadd.f32 1.0, %v3897_v19  ;;  %3900 = vpow2.f32 %v3720_v43 }
 0x293   : > { %v1490_v11 = vadd.f32 1.0, %v3899_v5 }
 0x294   : > { %3902 = vrcp.f32 %v1471_v7  ;;  %v1483_v38 = vand.u32 2147483648, %v1471_v7  ;;  %v1481_v58 = vand.u32 2147483647, %v1471_v7  ;;  %vm1477_vm7 = vweird.f32 %v1471_v7 }
 0x295   : > { %3904 = vrcp.f32 %v1490_v11  ;;  %v1449_v57 = vpop.f32.mrf.mxu2  ;;  %v1462_v33 = vpop.f32.mrf.mxu3  ;;  %v1502_v24 = vand.u32 2147483648, %v1490_v11  ;;  %v1500_v39 = vand.u32 2147483647, %v1490_v11  ;;  %vm1496_vm9 = vweird.f32 %v1490_v11 }
 0x296   : > { %v1484_v53 = vor.u32 1.1754944e-38, %v1483_v38  ;;  %vm1482_vm10 = vcmp.eq.f32.partialorder %v1481_v58, 8.507059e+37 }
 0x297   : > { %vm1501_vm12 = vcmp.eq.f32.partialorder %v1500_v39, 8.507059e+37 }
 0x298   : > { %v3901_v46 = vpop.eup %3900 }
 0x299   : > { %v1510_v28 = vadd.f32 1.0, %v3901_v46  ;;  %v1503_v46 = vor.u32 1.1754944e-38, %v1502_v24 }
 0x29a   : > { %v3903_v44 = vpop.eup %3902 }
 0x29b   : > { %v3905_v21 = vpop.eup %3904  ;;  %v1473_v20 = vmul.f32 %v3903_v44, %v1471_v7  ;;  %3906 = vrcp.f32 %v1510_v28  ;;  %vm1478_vm5 = vweird.f32 %v3903_v44  ;;  %vm1516_vm15 = vweird.f32 %v1510_v28 }
 0x29c   : > { %v1492_v36 = vmul.f32 %v3905_v21, %v1490_v11  ;;  %3908 = vtanh.f32 %v1466_v56  ;;  %vm1497_vm6 = vweird.f32 %v3905_v21  ;;  %vm1479_vm8 = vmor %vm1477_vm7, %vm1478_vm5  ;;  %v1522_v11 = vand.u32 2147483648, %v1510_v28 }
 0x29d   : > { %v1474_v12 = vsub.f32 1.0, %v1473_v20  ;;  %vm1498_vm11 = vmor %vm1496_vm9, %vm1497_vm6  ;;  %v1520_v58 = vand.u32 2147483647, %v1510_v28 }
 0x29e   : > { %v1493_v8 = vsub.f32 1.0, %v1492_v36  ;;  %v1523_v24 = vor.u32 1.1754944e-38, %v1522_v11 }
 0x29f   : > { %v1475_v51 = vmul.f32 %v3903_v44, %v1474_v12  ;;  %vm1521_vm1 = vcmp.eq.f32.partialorder %v1520_v58, 8.507059e+37 }
 0x2a0   : > { %v1494_v15 = vmul.f32 %v3905_v21, %v1493_v8  ;;  %v1536_v8 = vpop.permute.xlu1 %1535 }
 0x2a1   : > { %v3907_v43 = vpop.eup %3906  ;;  %v1476_v19 = vadd.f32 %v3903_v44, %v1475_v51  ;;  %vm1537_vm13 = vcmp.eq.s32.totalorder %v1536_v8, 1 }
 0x2a2   : > { %v1512_v5 = vmul.f32 %v3907_v43, %v1510_v28  ;;  %v1495_v57 = vadd.f32 %v3905_v21, %v1494_v15  ;;  %v3909_v1 = vpop.eup %3908  ;;  %vm1517_vm14 = vweird.f32 %v3907_v43  ;;  %v5774_v28 = vld [vmem:[#allocation10_spill] sm:$0xff] }
 0x2a3   : > { %v1480_v33 = vsel %vm1479_vm8, %v3903_v44, %v1476_v19  ;;  %vm1518_vm0 = vmor %vm1516_vm15, %vm1517_vm14 }
 0x2a4   : > { %v1485_v0 = vsel %vm1482_vm10, %v1484_v53, %v1480_v33  ;;  %v1513_v56 = vsub.f32 1.0, %v1512_v5  ;;  %v1499_v20 = vsel %vm1498_vm11, %v3905_v21, %v1495_v57 }
 0x2a5   : > { %v1527_v36 = vmul.f32 %v3909_v1, %v1485_v0  ;;  %v1504_v12 = vsel %vm1501_vm12, %v1503_v46, %v1499_v20 }
 0x2a6   : > { %v1514_v29 = vmul.f32 %v3907_v43, %v1513_v56  ;;  %v1526_v7 = vmul.f32 %v1504_v12, %v5019_v50  ;;  %v5775_v56 = vld [vmem:[#allocation12_spill] sm:$0xff] }
 0x2a7   : > { %v851_v20 = vadd.f32 %v5775_v56, %v4943_v31 }
 0x2a8   : > { %v1528_v38 = vadd.f32 %v1527_v36, %v1526_v7  ;;  %v1515_v51 = vadd.f32 %v3907_v43, %v1514_v29 }
 0x2aa   : > { %3910 = vtanh.f32 %v1528_v38  ;;  %v5075_v44 = vsel %vm1537_vm13, %v1528_v38, %v5019_v50  ;;  %v1519_v21 = vsel %vm1518_vm0, %v3907_v43, %v1515_v51  ;;  %v5773_v50 = vld [vmem:[#allocation9_spill] sm:$0xff]  ;;  %v753_v43 = vadd.f32 %v5774_v28, %v4933_v34 }
 0x2ab   : > { %v1524_v39 = vsel %vm1521_vm1, %v1523_v24, %v1519_v21 }
 0x2b0   : > { %v3911_v15 = vpop.eup %3910 }
 0x2b1   : > { %v1530_v19 = vmul.f32 %v3911_v15, %v1524_v39 }
 0x2b3   : > { %v5079_v53 = vsel %vm1537_vm13, %v1530_v19, %v5027_v6  ;;  %v704_v6 = vadd.f32 %v5773_v50, %v4931_v32  ;;  %v5776_v19 = vld [vmem:[#allocation11_spill] sm:$0xff] }
 0x2b4   : > { %v1544_v29 = vpack.c.bf16 %v5079_v53, %v5079_v53  ;;  %v1797_v50 = vld [vmem:[%s4727_s9 + $0x20] sm:$0xff] }
 0x2b5   : > { %vm1798_vm2 = vcmp.gt.f32.partialorder %v1797_v50, 0.0 }
 0x2b6   : > { %1553 = vmatmul.bf16.vlgmr.msra.gmra.mxu0 %v1544_v29  ;;  %1566 = vmatmul.bf16.vlgmr.msra.gmra.mxu1 %v1544_v29 }
 0x2b7   : > { %1579 = vmatmul.bf16.vlgmr.msra.gmra.mxu2 %v1544_v29  ;;  %1592 = vmatmul.bf16.vlgmr.msra.gmra.mxu3 %v1544_v29  ;;  %v802_v29 = vadd.f32 %v5776_v19, %v5771_v25  ;;  %v2329_v19 = vld [vmem:[%s4727_s9 + $0x40] sm:$0xff] }
 0x2b8   : > { %1811 = vmatpush.bf16.msra.mxu0 %v4427_v37  ;;  %1824 = vmatpush.bf16.msra.mxu1 %v4439_v42  ;;  %vm2330_vm12 = vcmp.gt.f32.partialorder %v2329_v19, 0.0 }
 0x2b9   : > { %1837 = vmatpush.bf16.msra.mxu2 %v4453_v47  ;;  %1850 = vmatpush.bf16.msra.mxu3 %v4456_v48 }
 0x2bc   : > { %1812 = vmatpush.bf16.msra.mxu0 %v4458_v49  ;;  %1825 = vmatpush.bf16.msra.mxu1 %v4467_v52 }
 0x2bd   : > { %1838 = vmatpush.bf16.msra.mxu2 %v4476_v55  ;;  %1851 = vmatpush.bf16.msra.mxu3 %v4489_v59 }
 0x2c0   : > { %1813 = vmatpush.bf16.msra.mxu0 %v4491_v60  ;;  %1826 = vmatpush.bf16.msra.mxu1 %v4500_v63 }
 0x2c1   : > { %1839 = vmatpush.bf16.msra.mxu2 %v4512_v3  ;;  %1852 = vmatpush.bf16.msra.mxu3 %v4516_v4 }
 0x2c4   : > { %1814 = vmatpush.bf16.msra.mxu0 %v4531_v9  ;;  %1827 = vmatpush.bf16.msra.mxu1 %v4542_v13 }
 0x2c5   : > { %1840 = vmatpush.bf16.msra.mxu2 %v4553_v17  ;;  %1853 = vmatpush.bf16.msra.mxu3 %v4544_v14 }
 0x2c8   : > { %1815 = vmatpush.bf16.msra.mxu0 %v4568_v22  ;;  %1828 = vmatpush.bf16.msra.mxu1 %v4579_v26 }
 0x2c9   : > { %1841 = vmatpush.bf16.msra.mxu2 %v4590_v30  ;;  %1854 = vmatpush.bf16.msra.mxu3 %v4581_v27 }
 0x2cc   : > { %1816 = vmatpush.bf16.msra.mxu0 %v4605_v35  ;;  %1829 = vmatpush.bf16.msra.mxu1 %v4616_v40 }
 0x2cd   : > { %1842 = vmatpush.bf16.msra.mxu2 %v4627_v45  ;;  %1855 = vmatpush.bf16.msra.mxu3 %v4618_v41 }
 0x2d0   : > { %1817 = vmatpush.bf16.msra.mxu0 %v4642_v54  ;;  %1830 = vmatpush.bf16.msra.mxu1 %v4653_v61 }
 0x2d1   : > { %1843 = vmatpush.bf16.msra.mxu2 %v4664_v2  ;;  %1856 = vmatpush.bf16.msra.mxu3 %v4655_v62 }
 0x2d4   : > { %1818 = vmatpush.bf16.msra.mxu0 %v4679_v10  ;;  %1831 = vmatpush.bf16.msra.mxu1 %v4690_v16 }
 0x2d5   : > { %1844 = vmatpush.bf16.msra.mxu2 %v4710_v23  ;;  %1857 = vmatpush.bf16.msra.mxu3 %v4692_v18 }
 0x333   : > { %v1554_v5 = vpop.f32.mrf.mxu0  ;;  %v1567_v57 = vpop.f32.mrf.mxu1 }
 0x334   : > { %v1597_v33 = vadd.f32 %v1554_v5, %v704_v6  ;;  %v1598_v46 = vadd.f32 %v1567_v57, %v753_v43  ;;  %v5777_v5 = vmov 0  }
 0x335   : > { %v1799_v57 = vsel %vm1798_vm2, 1, %v5777_v5 }
 0x336   : > { %v3721_v1 = vmul.f32 -1.442695, %v1597_v33  ;;  %v3722_v0 = vmul.f32 -1.442695, %v1598_v46  ;;  %v1930_v33 = vld [vmem:[%s4727_s9 + $0x28] sm:$0xff]  ;;  %1801 = vperm.xlu2 %3863, %v1799_v57  }
 0x337   : > { %vm1931_vm3 = vcmp.gt.f32.partialorder %v1930_v33, 0.0 }
 0x338   : > { %3912 = vpow2.f32 %v3721_v1 }
 0x339   : > { %3914 = vpow2.f32 %v3722_v0 }
 0x33a   : > { %v1580_v36 = vpop.f32.mrf.mxu2  ;;  %v1593_v12 = vpop.f32.mrf.mxu3 }
 0x33b   : > { %v1600_v8 = vadd.f32 %v1593_v12, %v851_v20  ;;  %v1556_v7 = vpop.f32.mrf.mxu0  ;;  %v1569_v38 = vpop.f32.mrf.mxu1  ;;  %v1599_v28 = vadd.f32 %v1580_v36, %v802_v29 }
 0x33d   : > { %v3723_v51 = vmul.f32 -1.442695, %v1600_v8 }
 0x33e   : > { %v3913_v11 = vpop.eup %3912 }
 0x33f   : > { %v3915_v58 = vpop.eup %3914  ;;  %v1604_v21 = vadd.f32 1.0, %v3913_v11  ;;  %3916 = vpow2.f32 %v3723_v51  ;;  %v1932_v11 = vsel %vm1931_vm3, 1, %v5777_v5 }
 0x340   : > { %v1623_v24 = vadd.f32 1.0, %v3915_v58  ;;  %1934 = vperm.xlu2 %3863, %v1932_v11  }
 0x341   : > { %3918 = vrcp.f32 %v1604_v21  ;;  %v1614_v7 = vand.u32 2147483647, %v1604_v21  ;;  %v1616_v36 = vand.u32 2147483648, %v1604_v21  ;;  %vm1610_vm6 = vweird.f32 %v1604_v21 }
 0x342   : > { %3920 = vrcp.f32 %v1623_v24  ;;  %v1582_v15 = vpop.f32.mrf.mxu2  ;;  %v1595_v39 = vpop.f32.mrf.mxu3  ;;  %v1635_v8 = vand.u32 2147483648, %v1623_v24  ;;  %v1633_v51 = vand.u32 2147483647, %v1623_v24  ;;  %vm1629_vm7 = vweird.f32 %v1623_v24 }
 0x343   : > { %v1617_v29 = vor.u32 1.1754944e-38, %v1616_v36  ;;  %vm1615_vm10 = vcmp.eq.f32.partialorder %v1614_v7, 8.507059e+37 }
 0x344   : > { %v1636_v57 = vor.u32 1.1754944e-38, %v1635_v8  ;;  %vm1634_vm11 = vcmp.eq.f32.partialorder %v1633_v51, 8.507059e+37 }
 0x345   : > { %v3917_v6 = vpop.eup %3916 }
 0x346   : > { %v5124_v43 = vadd.f32 1.0, %v3917_v6 }
 0x347   : > { %v3919_v46 = vpop.eup %3918 }
 0x348   : > { %v3921_v1 = vpop.eup %3920  ;;  %v1606_v0 = vmul.f32 %v3919_v46, %v1604_v21  ;;  %3922 = vrcp.f32 %v5124_v43  ;;  %vm1611_vm4 = vweird.f32 %v3919_v46  ;;  %v1655_v8 = vand.u32 2147483648, %v5124_v43 }
 0x349   : > { %v1625_v56 = vmul.f32 %v3921_v1, %v1623_v24  ;;  %3924 = vtanh.f32 %v1599_v28  ;;  %vm1630_vm5 = vweird.f32 %v3921_v1  ;;  %vm1612_vm8 = vmor %vm1610_vm6, %vm1611_vm4  ;;  %vm1649_vm15 = vweird.f32 %v5124_v43 }
 0x34a   : > { %v1607_v20 = vsub.f32 1.0, %v1606_v0  ;;  %vm1631_vm9 = vmor %vm1629_vm7, %vm1630_vm5  ;;  %v1653_v7 = vand.u32 2147483647, %v5124_v43 }
 0x34b   : > { %v1626_v12 = vsub.f32 1.0, %v1625_v56 }
 0x34c   : > { %v1608_v38 = vmul.f32 %v3919_v46, %v1607_v20  ;;  %vm1654_vm2 = vcmp.eq.f32.partialorder %v1653_v7, 8.507059e+37 }
 0x34d   : > { %v1627_v58 = vmul.f32 %v3921_v1, %v1626_v12 }
 0x34e   : > { %v3923_v15 = vpop.eup %3922  ;;  %v1609_v39 = vadd.f32 %v3919_v46, %v1608_v38  ;;  %v2331_v38 = vsel %vm2330_vm12, 1, %v5777_v5 }
 0x34f   : > { %v1628_v50 = vadd.f32 %v3921_v1, %v1627_v58  ;;  %v1645_v6 = vmul.f32 %v3923_v15, %v5124_v43  ;;  %v3925_v28 = vpop.eup %3924  ;;  %v1669_v58 = vpop.permute.xlu1 %1668  ;;  %vm1650_vm14 = vweird.f32 %v3923_v15  ;;  %2333 = vperm.xlu2 %3863, %v2331_v38  }
 0x350   : > { %v1613_v33 = vsel %vm1612_vm8, %v3919_v46, %v1609_v39  ;;  %vm1670_vm13 = vcmp.eq.s32.totalorder %v1669_v58, 1  ;;  %v2728_v46 = vld [vmem:[%s4727_s9 + $0x58] sm:$0xff]  ;;  %vm1651_vm0 = vmor %vm1649_vm15, %vm1650_vm14  ;;  %v1656_v39 = vor.u32 1.1754944e-38, %v1655_v8 }
 0x351   : > { %v1618_v0 = vsel %vm1615_vm10, %v1617_v29, %v1613_v33  ;;  %v1632_v56 = vsel %vm1631_vm9, %v3921_v1, %v1628_v50  ;;  %v1646_v20 = vsub.f32 1.0, %v1645_v6  ;;  %vm2729_vm1 = vcmp.gt.f32.partialorder %v2728_v46, 0.0 }
 0x352   : > { %v1637_v21 = vsel %vm1634_vm11, %v1636_v57, %v1632_v56  ;;  %v1660_v12 = vmul.f32 %v3925_v28, %v1618_v0  ;;  %v2730_v19 = vsel %vm2729_vm1, 1, %v5777_v5  ;;  %v3127_v28 = vld [vmem:[%s4727_s9 + $0x70] sm:$0xff] }
 0x353   : > { %v1659_v24 = vmul.f32 %v1637_v21, %v5075_v44  ;;  %v1647_v36 = vmul.f32 %v3923_v15, %v1646_v20  ;;  %vm3128_vm3 = vcmp.gt.f32.partialorder %v3127_v28, 0.0 }
 0x355   : > { %v1661_v11 = vadd.f32 %v1660_v12, %v1659_v24  ;;  %v1648_v25 = vadd.f32 %v3923_v15, %v1647_v36  ;;  %v5780_v24 = vld [vmem:[#allocation16_spill] sm:$0xff] }
 0x356   : > { %v854_v36 = vadd.f32 %v5780_v24, %v4943_v31 }
 0x357   : > { %3926 = vtanh.f32 %v1661_v11  ;;  %v5138_v1 = vsel %vm1670_vm13, %v1661_v11, %v5075_v44  ;;  %v1652_v51 = vsel %vm1651_vm0, %v3923_v15, %v1648_v25  ;;  %2732 = vperm.xlu2 %3863, %v2730_v19   ;;  %v3129_v25 = vsel %vm3128_vm3, 1, %v5777_v5  ;;  %v5779_v5 = vld [vmem:[#allocation14_spill] sm:$0xff] }
 0x358   : > { %v1657_v50 = vsel %vm1654_vm2, %v1656_v39, %v1652_v51  ;;  %v756_v15 = vadd.f32 %v5779_v5, %v4933_v34 }
 0x35d   : > { %v3927_v29 = vpop.eup %3926 }
 0x35e   : > { %v1663_v6 = vmul.f32 %v3927_v29, %v1657_v50 }
 0x35f   : > { %3131 = vperm.xlu2 %3863, %v3129_v25   ;;  %v5782_v25 = vld [vmem:[#allocation15_spill] sm:$0xff] }
 0x360   : > { %v5146_v44 = vsel %vm1670_vm13, %v1663_v6, %v5079_v53  ;;  %v5778_v53 = vld [vmem:[#allocation13_spill] sm:$0xff] }
 0x361   : > { %v1677_v57 = vpack.c.bf16 %v5146_v44, %v5146_v44  ;;  %v707_v43 = vadd.f32 %v5778_v53, %v4931_v32 }
 0x363   : > { %1686 = vmatmul.bf16.vlgmr.msrb.gmra.mxu0 %v1677_v57  ;;  %1699 = vmatmul.bf16.vlgmr.msrb.gmra.mxu1 %v1677_v57 }
 0x364   : > { %1712 = vmatmul.bf16.vlgmr.msrb.gmra.mxu2 %v1677_v57  ;;  %1725 = vmatmul.bf16.vlgmr.msrb.gmra.mxu3 %v1677_v57  ;;  %v5781_v57 = vld [vmem:[#allocation61_spill] sm:$0xff] }
 0x365   : > { %1944 = vmatpush.bf16.msrb.mxu0 %v4427_v37  ;;  %1957 = vmatpush.bf16.msrb.mxu1 %v4439_v42  ;;  %v805_v53 = vadd.f32 %v5782_v25, %v5781_v57 }
 0x366   : > { %1970 = vmatpush.bf16.msrb.mxu2 %v4453_v47  ;;  %1983 = vmatpush.bf16.msrb.mxu3 %v4456_v48 }
 0x369   : > { %1945 = vmatpush.bf16.msrb.mxu0 %v4458_v49  ;;  %1958 = vmatpush.bf16.msrb.mxu1 %v4467_v52 }
 0x36a   : > { %1971 = vmatpush.bf16.msrb.mxu2 %v4476_v55  ;;  %1984 = vmatpush.bf16.msrb.mxu3 %v4489_v59 }
 0x36d   : > { %1946 = vmatpush.bf16.msrb.mxu0 %v4491_v60  ;;  %1959 = vmatpush.bf16.msrb.mxu1 %v4500_v63 }
 0x36e   : > { %1972 = vmatpush.bf16.msrb.mxu2 %v4512_v3  ;;  %1985 = vmatpush.bf16.msrb.mxu3 %v4516_v4 }
 0x371   : > { %1947 = vmatpush.bf16.msrb.mxu0 %v4531_v9  ;;  %1960 = vmatpush.bf16.msrb.mxu1 %v4542_v13 }
 0x372   : > { %1973 = vmatpush.bf16.msrb.mxu2 %v4553_v17  ;;  %1986 = vmatpush.bf16.msrb.mxu3 %v4544_v14 }
 0x375   : > { %1948 = vmatpush.bf16.msrb.mxu0 %v4568_v22  ;;  %1961 = vmatpush.bf16.msrb.mxu1 %v4579_v26 }
 0x376   : > { %1974 = vmatpush.bf16.msrb.mxu2 %v4590_v30  ;;  %1987 = vmatpush.bf16.msrb.mxu3 %v4581_v27 }
 0x379   : > { %1949 = vmatpush.bf16.msrb.mxu0 %v4605_v35  ;;  %1962 = vmatpush.bf16.msrb.mxu1 %v4616_v40 }
 0x37a   : > { %1975 = vmatpush.bf16.msrb.mxu2 %v4627_v45  ;;  %1988 = vmatpush.bf16.msrb.mxu3 %v4618_v41 }
 0x37d   : > { %1950 = vmatpush.bf16.msrb.mxu0 %v4642_v54  ;;  %1963 = vmatpush.bf16.msrb.mxu1 %v4653_v61 }
 0x37e   : > { %1976 = vmatpush.bf16.msrb.mxu2 %v4664_v2  ;;  %1989 = vmatpush.bf16.msrb.mxu3 %v4655_v62 }
 0x381   : > { %1951 = vmatpush.bf16.msrb.mxu0 %v4679_v10  ;;  %1964 = vmatpush.bf16.msrb.mxu1 %v4690_v16 }
 0x382   : > { %1977 = vmatpush.bf16.msrb.mxu2 %v4710_v23  ;;  %1990 = vmatpush.bf16.msrb.mxu3 %v4692_v18 }
 0x3e0   : > { %v1687_v33 = vpop.f32.mrf.mxu0  ;;  %v1700_v0 = vpop.f32.mrf.mxu1 }
 0x3e1   : > { %v1730_v56 = vadd.f32 %v1687_v33, %v707_v43  ;;  %v1731_v20 = vadd.f32 %v1700_v0, %v756_v15 }
 0x3e3   : > { %v3724_v21 = vmul.f32 -1.442695, %v1730_v56  ;;  %v3725_v12 = vmul.f32 -1.442695, %v1731_v20 }
 0x3e5   : > { %3928 = vpow2.f32 %v3724_v21 }
 0x3e6   : > { %3930 = vpow2.f32 %v3725_v12 }
 0x3e7   : > { %v1713_v38 = vpop.f32.mrf.mxu2  ;;  %v1726_v58 = vpop.f32.mrf.mxu3 }
 0x3e8   : > { %v1733_v11 = vadd.f32 %v1726_v58, %v854_v36  ;;  %v1689_v46 = vpop.f32.mrf.mxu0  ;;  %v1702_v8 = vpop.f32.mrf.mxu1  ;;  %v1732_v15 = vadd.f32 %v1713_v38, %v805_v53 }
 0x3ea   : > { %v3726_v7 = vmul.f32 -1.442695, %v1733_v11 }
 0x3eb   : > { %v3929_v51 = vpop.eup %3928 }
 0x3ec   : > { %v3931_v39 = vpop.eup %3930  ;;  %v1737_v19 = vadd.f32 1.0, %v3929_v51  ;;  %3932 = vpow2.f32 %v3726_v7 }
 0x3ed   : > { %v1756_v29 = vadd.f32 1.0, %v3931_v39 }
 0x3ee   : > { %3934 = vrcp.f32 %v1737_v19  ;;  %v1749_v12 = vand.u32 2147483648, %v1737_v19  ;;  %v1747_v36 = vand.u32 2147483647, %v1737_v19  ;;  %vm1743_vm6 = vweird.f32 %v1737_v19 }
 0x3ef   : > { %3936 = vrcp.f32 %v1756_v29  ;;  %v1715_v50 = vpop.f32.mrf.mxu2  ;;  %v1728_v6 = vpop.f32.mrf.mxu3  ;;  %v1768_v58 = vand.u32 2147483648, %v1756_v29  ;;  %v1766_v46 = vand.u32 2147483647, %v1756_v29  ;;  %vm1762_vm8 = vweird.f32 %v1756_v29 }
 0x3f0   : > { %v1750_v38 = vor.u32 1.1754944e-38, %v1749_v12  ;;  %vm1748_vm9 = vcmp.eq.f32.partialorder %v1747_v36, 8.507059e+37 }
 0x3f1   : > { %v1769_v6 = vor.u32 1.1754944e-38, %v1768_v58  ;;  %vm1767_vm11 = vcmp.eq.f32.partialorder %v1766_v46, 8.507059e+37 }
 0x3f2   : > { %v3933_v28 = vpop.eup %3932 }
 0x3f3   : > { %v1776_v43 = vadd.f32 1.0, %v3933_v28 }
 0x3f4   : > { %v3935_v5 = vpop.eup %3934 }
 0x3f5   : > { %v3937_v33 = vpop.eup %3936  ;;  %v1739_v0 = vmul.f32 %v3935_v5, %v1737_v19  ;;  %3938 = vrcp.f32 %v1776_v43  ;;  %vm1744_vm4 = vweird.f32 %v3935_v5  ;;  %vm1782_vm14 = vweird.f32 %v1776_v43 }
 0x3f6   : > { %v1758_v56 = vmul.f32 %v3937_v33, %v1756_v29  ;;  %3940 = vtanh.f32 %v1732_v15  ;;  %vm1763_vm5 = vweird.f32 %v3937_v33  ;;  %vm1745_vm7 = vmor %vm1743_vm6, %vm1744_vm4  ;;  %v1788_v29 = vand.u32 2147483648, %v1776_v43 }
 0x3f7   : > { %v1740_v20 = vsub.f32 1.0, %v1739_v0  ;;  %vm1764_vm10 = vmor %vm1762_vm8, %vm1763_vm5  ;;  %v1786_v36 = vand.u32 2147483647, %v1776_v43 }
 0x3f8   : > { %v1759_v21 = vsub.f32 1.0, %v1758_v56  ;;  %v1789_v58 = vor.u32 1.1754944e-38, %v1788_v29 }
 0x3f9   : > { %v1741_v24 = vmul.f32 %v3935_v5, %v1740_v20  ;;  %v1802_v20 = vpop.permute.xlu2 %1801  ;;  %vm1787_vm0 = vcmp.eq.f32.partialorder %v1786_v36, 8.507059e+37 }
 0x3fa   : > { %v1760_v11 = vmul.f32 %v3937_v33, %v1759_v21  ;;  %vm1803_vm12 = vcmp.eq.s32.totalorder %v1802_v20, 1 }
 0x3fb   : > { %v3939_v8 = vpop.eup %3938  ;;  %v1742_v7 = vadd.f32 %v3935_v5, %v1741_v24 }
 0x3fc   : > { %v1778_v51 = vmul.f32 %v3939_v8, %v1776_v43  ;;  %v1761_v39 = vadd.f32 %v3937_v33, %v1760_v11  ;;  %v3941_v28 = vpop.eup %3940  ;;  %vm1783_vm13 = vweird.f32 %v3939_v8  ;;  %v5784_v43 = vld [vmem:[#allocation18_spill] sm:$0xff] }
 0x3fd   : > { %v1746_v50 = vsel %vm1745_vm7, %v3935_v5, %v1742_v7  ;;  %vm1784_vm15 = vmor %vm1782_vm14, %vm1783_vm13 }
 0x3fe   : > { %v1751_v25 = vsel %vm1748_vm9, %v1750_v38, %v1746_v50  ;;  %v1779_v53 = vsub.f32 1.0, %v1778_v51  ;;  %v1765_v15 = vsel %vm1764_vm10, %v3937_v33, %v1761_v39 }
 0x3ff   : > { %v1793_v0 = vmul.f32 %v3941_v28, %v1751_v25  ;;  %v1770_v56 = vsel %vm1767_vm11, %v1769_v6, %v1765_v15  ;;  %v5785_v15 = vld [vmem:[#allocation20_spill] sm:$0xff] }
 0x400   : > { %v1780_v21 = vmul.f32 %v3939_v8, %v1779_v53  ;;  %v1792_v19 = vmul.f32 %v1770_v56, %v5138_v1 }
 0x402   : > { %v1794_v12 = vadd.f32 %v1793_v0, %v1792_v19  ;;  %v1781_v24 = vadd.f32 %v3939_v8, %v1780_v21  ;;  %v856_v0 = vadd.f32 %v5785_v15, %v4943_v31 }
 0x404   : > { %3942 = vtanh.f32 %v1794_v12  ;;  %v5194_v5 = vsel %vm1803_vm12, %v1794_v12, %v5138_v1  ;;  %v1785_v33 = vsel %vm1784_vm15, %v3939_v8, %v1781_v24  ;;  %v5783_v1 = vld [vmem:[#allocation17_spill] sm:$0xff]  ;;  %v758_v8 = vadd.f32 %v5784_v43, %v4933_v34 }
 0x405   : > { %v1790_v46 = vsel %vm1787_vm0, %v1789_v58, %v1785_v33 }
 0x40a   : > { %v3943_v11 = vpop.eup %3942 }
 0x40b   : > { %v1796_v7 = vmul.f32 %v3943_v11, %v1790_v46 }
 0x40d   : > { %v5198_v38 = vsel %vm1803_vm12, %v1796_v7, %v5146_v44  ;;  %v709_v44 = vadd.f32 %v5783_v1, %v4931_v32 }
 0x40e   : > { %v1810_v51 = vpack.c.bf16 %v5198_v38, %v5198_v38 }
 0x410   : > { %1819 = vmatmul.bf16.vlgmr.msra.gmra.mxu0 %v1810_v51  ;;  %1832 = vmatmul.bf16.vlgmr.msra.gmra.mxu1 %v1810_v51 }
 0x411   : > { %1845 = vmatmul.bf16.vlgmr.msra.gmra.mxu2 %v1810_v51  ;;  %1858 = vmatmul.bf16.vlgmr.msra.gmra.mxu3 %v1810_v51  ;;  %v5786_v51 = vld [vmem:[#allocation19_spill] sm:$0xff] }
 0x412   : > { %2077 = vmatpush.bf16.msra.mxu0 %v4427_v37  ;;  %2090 = vmatpush.bf16.msra.mxu1 %v4439_v42  ;;  %v807_v1 = vadd.f32 %v5786_v51, %v5781_v57 }
 0x413   : > { %2103 = vmatpush.bf16.msra.mxu2 %v4453_v47  ;;  %2116 = vmatpush.bf16.msra.mxu3 %v4456_v48 }
 0x416   : > { %2078 = vmatpush.bf16.msra.mxu0 %v4458_v49  ;;  %2091 = vmatpush.bf16.msra.mxu1 %v4467_v52 }
 0x417   : > { %2104 = vmatpush.bf16.msra.mxu2 %v4476_v55  ;;  %2117 = vmatpush.bf16.msra.mxu3 %v4489_v59 }
 0x41a   : > { %2079 = vmatpush.bf16.msra.mxu0 %v4491_v60  ;;  %2092 = vmatpush.bf16.msra.mxu1 %v4500_v63 }
 0x41b   : > { %2105 = vmatpush.bf16.msra.mxu2 %v4512_v3  ;;  %2118 = vmatpush.bf16.msra.mxu3 %v4516_v4 }
 0x41e   : > { %2080 = vmatpush.bf16.msra.mxu0 %v4531_v9  ;;  %2093 = vmatpush.bf16.msra.mxu1 %v4542_v13 }
 0x41f   : > { %2106 = vmatpush.bf16.msra.mxu2 %v4553_v17  ;;  %2119 = vmatpush.bf16.msra.mxu3 %v4544_v14 }
 0x422   : > { %2081 = vmatpush.bf16.msra.mxu0 %v4568_v22  ;;  %2094 = vmatpush.bf16.msra.mxu1 %v4579_v26 }
 0x423   : > { %2107 = vmatpush.bf16.msra.mxu2 %v4590_v30  ;;  %2120 = vmatpush.bf16.msra.mxu3 %v4581_v27 }
 0x426   : > { %2082 = vmatpush.bf16.msra.mxu0 %v4605_v35  ;;  %2095 = vmatpush.bf16.msra.mxu1 %v4616_v40 }
 0x427   : > { %2108 = vmatpush.bf16.msra.mxu2 %v4627_v45  ;;  %2121 = vmatpush.bf16.msra.mxu3 %v4618_v41 }
 0x42a   : > { %2083 = vmatpush.bf16.msra.mxu0 %v4642_v54  ;;  %2096 = vmatpush.bf16.msra.mxu1 %v4653_v61 }
 0x42b   : > { %2109 = vmatpush.bf16.msra.mxu2 %v4664_v2  ;;  %2122 = vmatpush.bf16.msra.mxu3 %v4655_v62 }
 0x42e   : > { %2084 = vmatpush.bf16.msra.mxu0 %v4679_v10  ;;  %2097 = vmatpush.bf16.msra.mxu1 %v4690_v16 }
 0x42f   : > { %2110 = vmatpush.bf16.msra.mxu2 %v4710_v23  ;;  %2123 = vmatpush.bf16.msra.mxu3 %v4692_v18 }
 0x48d   : > { %v1820_v39 = vpop.f32.mrf.mxu0  ;;  %v1833_v50 = vpop.f32.mrf.mxu1 }
 0x48e   : > { %v1863_v6 = vadd.f32 %v1820_v39, %v709_v44  ;;  %v1864_v28 = vadd.f32 %v1833_v50, %v758_v8 }
 0x490   : > { %v3727_v25 = vmul.f32 -1.442695, %v1863_v6  ;;  %v3728_v53 = vmul.f32 -1.442695, %v1864_v28 }
 0x492   : > { %3944 = vpow2.f32 %v3727_v25 }
 0x493   : > { %3946 = vpow2.f32 %v3728_v53 }
 0x494   : > { %v1846_v56 = vpop.f32.mrf.mxu2  ;;  %v1859_v20 = vpop.f32.mrf.mxu3 }
 0x495   : > { %v1866_v21 = vadd.f32 %v1859_v20, %v856_v0  ;;  %v1822_v19 = vpop.f32.mrf.mxu0  ;;  %v1835_v12 = vpop.f32.mrf.mxu1  ;;  %v1865_v8 = vadd.f32 %v1846_v56, %v807_v1 }
 0x497   : > { %v3729_v24 = vmul.f32 -1.442695, %v1866_v21 }
 0x498   : > { %v3945_v29 = vpop.eup %3944 }
 0x499   : > { %v3947_v36 = vpop.eup %3946  ;;  %v1870_v33 = vadd.f32 1.0, %v3945_v29  ;;  %3948 = vpow2.f32 %v3729_v24 }
 0x49a   : > { %v1889_v58 = vadd.f32 1.0, %v3947_v36 }
 0x49b   : > { %3950 = vrcp.f32 %v1870_v33  ;;  %v1882_v53 = vand.u32 2147483648, %v1870_v33  ;;  %v1880_v20 = vand.u32 2147483647, %v1870_v33  ;;  %vm1876_vm3 = vweird.f32 %v1870_v33 }
 0x49c   : > { %3952 = vrcp.f32 %v1889_v58  ;;  %v1848_v11 = vpop.f32.mrf.mxu2  ;;  %v1861_v46 = vpop.f32.mrf.mxu3  ;;  %v1901_v15 = vand.u32 2147483648, %v1889_v58  ;;  %v1899_v19 = vand.u32 2147483647, %v1889_v58  ;;  %vm1895_vm4 = vweird.f32 %v1889_v58 }
 0x49d   : > { %v1883_v56 = vor.u32 1.1754944e-38, %v1882_v53  ;;  %vm1881_vm7 = vcmp.eq.f32.partialorder %v1880_v20, 8.507059e+37 }
 0x49e   : > { %v1902_v11 = vor.u32 1.1754944e-38, %v1901_v15  ;;  %vm1900_vm8 = vcmp.eq.f32.partialorder %v1899_v19, 8.507059e+37 }
 0x49f   : > { %v3949_v7 = vpop.eup %3948 }
 0x4a0   : > { %v1909_v44 = vadd.f32 1.0, %v3949_v7 }
 0x4a1   : > { %v3951_v43 = vpop.eup %3950 }
 0x4a2   : > { %v3953_v39 = vpop.eup %3952  ;;  %v1872_v50 = vmul.f32 %v3951_v43, %v1870_v33  ;;  %3954 = vrcp.f32 %v1909_v44  ;;  %vm1877_vm1 = vweird.f32 %v3951_v43  ;;  %v1935_v33 = vpop.permute.xlu2 %1934  ;;  %vm1915_vm11 = vweird.f32 %v1909_v44 }
 0x4a3   : > { %v1891_v6 = vmul.f32 %v3953_v39, %v1889_v58  ;;  %3956 = vtanh.f32 %v1865_v8  ;;  %vm1896_vm2 = vweird.f32 %v3953_v39  ;;  %vm1878_vm5 = vmor %vm1876_vm3, %vm1877_vm1  ;;  %vm1936_vm9 = vcmp.eq.s32.totalorder %v1935_v33, 1 }
 0x4a4   : > { %v1873_v28 = vsub.f32 1.0, %v1872_v50  ;;  %vm1897_vm6 = vmor %vm1895_vm4, %vm1896_vm2  ;;  %v1919_v15 = vand.u32 2147483647, %v1909_v44 }
 0x4a5   : > { %v1892_v25 = vsub.f32 1.0, %v1891_v6 }
 0x4a6   : > { %v1874_v0 = vmul.f32 %v3951_v43, %v1873_v28  ;;  %vm1920_vm13 = vcmp.eq.f32.partialorder %v1919_v15, 8.507059e+37 }
 0x4a7   : > { %v1893_v21 = vmul.f32 %v3953_v39, %v1892_v25 }
 0x4a8   : > { %v3955_v12 = vpop.eup %3954  ;;  %v1875_v24 = vadd.f32 %v3951_v43, %v1874_v0  ;;  %v1921_v0 = vand.u32 2147483648, %v1909_v44 }
 0x4a9   : > { %v1894_v29 = vadd.f32 %v3953_v39, %v1893_v21  ;;  %v1911_v36 = vmul.f32 %v3955_v12, %v1909_v44  ;;  %v3957_v7 = vpop.eup %3956  ;;  %vm1916_vm10 = vweird.f32 %v3955_v12  ;;  %v5788_v44 = vld [vmem:[#allocation22_spill] sm:$0xff] }
 0x4aa   : > { %v1879_v46 = vsel %vm1878_vm5, %v3951_v43, %v1875_v24  ;;  %vm1917_vm12 = vmor %vm1915_vm11, %vm1916_vm10  ;;  %v1922_v20 = vor.u32 1.1754944e-38, %v1921_v0 }
 0x4ab   : > { %v1884_v51 = vsel %vm1881_vm7, %v1883_v56, %v1879_v46  ;;  %v1898_v1 = vsel %vm1897_vm6, %v3953_v39, %v1894_v29  ;;  %v1912_v8 = vsub.f32 1.0, %v1911_v36 }
 0x4ac   : > { %v1903_v50 = vsel %vm1900_vm8, %v1902_v11, %v1898_v1  ;;  %v1926_v6 = vmul.f32 %v3957_v7, %v1884_v51 }
 0x4ad   : > { %v1925_v28 = vmul.f32 %v1903_v50, %v5194_v5  ;;  %v1913_v25 = vmul.f32 %v3955_v12, %v1912_v8  ;;  %v5789_v8 = vld [vmem:[#allocation24_spill] sm:$0xff] }
 0x4ae   : > { %v859_v50 = vadd.f32 %v5789_v8, %v4943_v31 }
 0x4af   : > { %v1927_v58 = vadd.f32 %v1926_v6, %v1925_v28  ;;  %v1914_v53 = vadd.f32 %v3955_v12, %v1913_v25 }
 0x4b1   : > { %3958 = vtanh.f32 %v1927_v58  ;;  %v5244_v43 = vsel %vm1936_vm9, %v1927_v58, %v5194_v5  ;;  %v1918_v39 = vsel %vm1917_vm12, %v3955_v12, %v1914_v53  ;;  %v5787_v5 = vld [vmem:[#allocation21_spill] sm:$0xff]  ;;  %v761_v12 = vadd.f32 %v5788_v44, %v4933_v34 }
 0x4b2   : > { %v1923_v19 = vsel %vm1920_vm13, %v1922_v20, %v1918_v39 }
 0x4b7   : > { %v3959_v21 = vpop.eup %3958 }
 0x4b8   : > { %v1929_v24 = vmul.f32 %v3959_v21, %v1923_v19 }
 0x4ba   : > { %v5247_v56 = vsel %vm1936_vm9, %v1929_v24, %v5198_v38  ;;  %v712_v38 = vadd.f32 %v5787_v5, %v4931_v32 }
 0x4bb   : > { %v1943_v29 = vpack.c.bf16 %v5247_v56, %v5247_v56 }
 0x4bd   : > { %1952 = vmatmul.bf16.vlgmr.msrb.gmra.mxu0 %v1943_v29  ;;  %1965 = vmatmul.bf16.vlgmr.msrb.gmra.mxu1 %v1943_v29 }
 0x4be   : > { %1978 = vmatmul.bf16.vlgmr.msrb.gmra.mxu2 %v1943_v29  ;;  %1991 = vmatmul.bf16.vlgmr.msrb.gmra.mxu3 %v1943_v29  ;;  %v5790_v29 = vld [vmem:[#allocation23_spill] sm:$0xff] }
 0x4bf   : > { %2210 = vmatpush.bf16.msrb.mxu0 %v4427_v37  ;;  %2223 = vmatpush.bf16.msrb.mxu1 %v4439_v42  ;;  %v810_v5 = vadd.f32 %v5790_v29, %v5781_v57 }
 0x4c0   : > { %2236 = vmatpush.bf16.msrb.mxu2 %v4453_v47  ;;  %2249 = vmatpush.bf16.msrb.mxu3 %v4456_v48 }
 0x4c3   : > { %2211 = vmatpush.bf16.msrb.mxu0 %v4458_v49  ;;  %2224 = vmatpush.bf16.msrb.mxu1 %v4467_v52 }
 0x4c4   : > { %2237 = vmatpush.bf16.msrb.mxu2 %v4476_v55  ;;  %2250 = vmatpush.bf16.msrb.mxu3 %v4489_v59 }
 0x4c7   : > { %2212 = vmatpush.bf16.msrb.mxu0 %v4491_v60  ;;  %2225 = vmatpush.bf16.msrb.mxu1 %v4500_v63 }
 0x4c8   : > { %2238 = vmatpush.bf16.msrb.mxu2 %v4512_v3  ;;  %2251 = vmatpush.bf16.msrb.mxu3 %v4516_v4 }
 0x4cb   : > { %2213 = vmatpush.bf16.msrb.mxu0 %v4531_v9  ;;  %2226 = vmatpush.bf16.msrb.mxu1 %v4542_v13 }
 0x4cc   : > { %2239 = vmatpush.bf16.msrb.mxu2 %v4553_v17  ;;  %2252 = vmatpush.bf16.msrb.mxu3 %v4544_v14 }
 0x4cf   : > { %2214 = vmatpush.bf16.msrb.mxu0 %v4568_v22  ;;  %2227 = vmatpush.bf16.msrb.mxu1 %v4579_v26 }
 0x4d0   : > { %2240 = vmatpush.bf16.msrb.mxu2 %v4590_v30  ;;  %2253 = vmatpush.bf16.msrb.mxu3 %v4581_v27 }
 0x4d3   : > { %2215 = vmatpush.bf16.msrb.mxu0 %v4605_v35  ;;  %2228 = vmatpush.bf16.msrb.mxu1 %v4616_v40 }
 0x4d4   : > { %2241 = vmatpush.bf16.msrb.mxu2 %v4627_v45  ;;  %2254 = vmatpush.bf16.msrb.mxu3 %v4618_v41 }
 0x4d7   : > { %2216 = vmatpush.bf16.msrb.mxu0 %v4642_v54  ;;  %2229 = vmatpush.bf16.msrb.mxu1 %v4653_v61 }
 0x4d8   : > { %2242 = vmatpush.bf16.msrb.mxu2 %v4664_v2  ;;  %2255 = vmatpush.bf16.msrb.mxu3 %v4655_v62 }
 0x4db   : > { %2217 = vmatpush.bf16.msrb.mxu0 %v4679_v10  ;;  %2230 = vmatpush.bf16.msrb.mxu1 %v4690_v16 }
 0x4dc   : > { %2243 = vmatpush.bf16.msrb.mxu2 %v4710_v23  ;;  %2256 = vmatpush.bf16.msrb.mxu3 %v4692_v18 }
 0x53a   : > { %v1953_v36 = vpop.f32.mrf.mxu0  ;;  %v1966_v11 = vpop.f32.mrf.mxu1 }
 0x53b   : > { %v1996_v46 = vadd.f32 %v1953_v36, %v712_v38  ;;  %v1997_v7 = vadd.f32 %v1966_v11, %v761_v12 }
 0x53d   : > { %v3730_v51 = vmul.f32 -1.442695, %v1996_v46  ;;  %v3731_v1 = vmul.f32 -1.442695, %v1997_v7 }
 0x53f   : > { %3960 = vpow2.f32 %v3730_v51 }
 0x540   : > { %3962 = vpow2.f32 %v3731_v1 }
 0x541   : > { %v1979_v6 = vpop.f32.mrf.mxu2  ;;  %v1992_v28 = vpop.f32.mrf.mxu3 }
 0x542   : > { %v1999_v25 = vadd.f32 %v1992_v28, %v859_v50  ;;  %v1955_v33 = vpop.f32.mrf.mxu0  ;;  %v1968_v58 = vpop.f32.mrf.mxu1  ;;  %v1998_v12 = vadd.f32 %v1979_v6, %v810_v5 }
 0x544   : > { %v3732_v53 = vmul.f32 -1.442695, %v1999_v25 }
 0x545   : > { %v3961_v0 = vpop.eup %3960 }
 0x546   : > { %v3963_v15 = vpop.eup %3962  ;;  %v2003_v39 = vadd.f32 1.0, %v3961_v0  ;;  %3964 = vpow2.f32 %v3732_v53 }
 0x547   : > { %v2022_v20 = vadd.f32 1.0, %v3963_v15 }
 0x548   : > { %3966 = vrcp.f32 %v2003_v39  ;;  %v2015_v1 = vand.u32 2147483648, %v2003_v39  ;;  %v2013_v28 = vand.u32 2147483647, %v2003_v39  ;;  %vm2009_vm0 = vweird.f32 %v2003_v39 }
 0x549   : > { %3968 = vrcp.f32 %v2022_v20  ;;  %v1981_v21 = vpop.f32.mrf.mxu2  ;;  %v1994_v19 = vpop.f32.mrf.mxu3  ;;  %v2034_v8 = vand.u32 2147483648, %v2022_v20  ;;  %v2032_v33 = vand.u32 2147483647, %v2022_v20  ;;  %vm2028_vm1 = vweird.f32 %v2022_v20 }
 0x54a   : > { %v2016_v6 = vor.u32 1.1754944e-38, %v2015_v1  ;;  %vm2014_vm4 = vcmp.eq.f32.partialorder %v2013_v28, 8.507059e+37 }
 0x54b   : > { %v2035_v21 = vor.u32 1.1754944e-38, %v2034_v8  ;;  %vm2033_vm5 = vcmp.eq.f32.partialorder %v2032_v33, 8.507059e+37 }
 0x54c   : > { %v3965_v24 = vpop.eup %3964 }
 0x54d   : > { %v2042_v38 = vadd.f32 1.0, %v3965_v24 }
 0x54e   : > { %v3967_v44 = vpop.eup %3966 }
 0x54f   : > { %v3969_v36 = vpop.eup %3968  ;;  %v2005_v11 = vmul.f32 %v3967_v44, %v2003_v39  ;;  %3970 = vrcp.f32 %v2042_v38  ;;  %vm2010_vm14 = vweird.f32 %v3967_v44  ;;  %v2068_v39 = vpop.permute.xlu0 %2067  ;;  %vm2048_vm8 = vweird.f32 %v2042_v38 }
 0x550   : > { %v2024_v46 = vmul.f32 %v3969_v36, %v2022_v20  ;;  %3972 = vtanh.f32 %v1998_v12  ;;  %vm2029_vm15 = vweird.f32 %v3969_v36  ;;  %vm2011_vm2 = vmor %vm2009_vm0, %vm2010_vm14  ;;  %vm2069_vm6 = vcmp.eq.s32.totalorder %v2068_v39, 1 }
 0x551   : > { %v2006_v7 = vsub.f32 1.0, %v2005_v11  ;;  %vm2030_vm3 = vmor %vm2028_vm1, %vm2029_vm15  ;;  %v2052_v8 = vand.u32 2147483647, %v2042_v38 }
 0x552   : > { %v2025_v51 = vsub.f32 1.0, %v2024_v46 }
 0x553   : > { %v2007_v50 = vmul.f32 %v3967_v44, %v2006_v7  ;;  %vm2053_vm10 = vcmp.eq.f32.partialorder %v2052_v8, 8.507059e+37 }
 0x554   : > { %v2026_v25 = vmul.f32 %v3969_v36, %v2025_v51 }
 0x555   : > { %v3971_v58 = vpop.eup %3970  ;;  %v2008_v53 = vadd.f32 %v3967_v44, %v2007_v50  ;;  %v2054_v50 = vand.u32 2147483648, %v2042_v38 }
 0x556   : > { %v2027_v0 = vadd.f32 %v3969_v36, %v2026_v25  ;;  %v2044_v15 = vmul.f32 %v3971_v58, %v2042_v38  ;;  %v3973_v24 = vpop.eup %3972  ;;  %vm2049_vm7 = vweird.f32 %v3971_v58  ;;  %v5792_v38 = vld [vmem:[#allocation26_spill] sm:$0xff] }
 0x557   : > { %v2012_v19 = vsel %vm2011_vm2, %v3967_v44, %v2008_v53  ;;  %vm2050_vm9 = vmor %vm2048_vm8, %vm2049_vm7  ;;  %v2055_v28 = vor.u32 1.1754944e-38, %v2054_v50 }
 0x558   : > { %v2017_v29 = vsel %vm2014_vm4, %v2016_v6, %v2012_v19  ;;  %v2031_v5 = vsel %vm2030_vm3, %v3969_v36, %v2027_v0  ;;  %v2045_v12 = vsub.f32 1.0, %v2044_v15 }
 0x559   : > { %v2036_v11 = vsel %vm2033_vm5, %v2035_v21, %v2031_v5  ;;  %v2059_v46 = vmul.f32 %v3973_v24, %v2017_v29 }
 0x55a   : > { %v2058_v7 = vmul.f32 %v2036_v11, %v5244_v43  ;;  %v2046_v51 = vmul.f32 %v3971_v58, %v2045_v12  ;;  %v5793_v12 = vld [vmem:[#allocation28_spill] sm:$0xff] }
 0x55b   : > { %v861_v11 = vadd.f32 %v5793_v12, %v4943_v31 }
 0x55c   : > { %v2060_v20 = vadd.f32 %v2059_v46, %v2058_v7  ;;  %v2047_v1 = vadd.f32 %v3971_v58, %v2046_v51 }
 0x55e   : > { %3974 = vtanh.f32 %v2060_v20  ;;  %v5293_v44 = vsel %vm2069_vm6, %v2060_v20, %v5244_v43  ;;  %v2051_v36 = vsel %vm2050_vm9, %v3971_v58, %v2047_v1  ;;  %v5791_v43 = vld [vmem:[#allocation25_spill] sm:$0xff]  ;;  %v763_v58 = vadd.f32 %v5792_v38, %v4933_v34 }
 0x55f   : > { %v2056_v33 = vsel %vm2053_vm10, %v2055_v28, %v2051_v36 }
 0x564   : > { %v3975_v25 = vpop.eup %3974 }
 0x565   : > { %v2062_v53 = vmul.f32 %v3975_v25, %v2056_v33 }
 0x567   : > { %v5296_v6 = vsel %vm2069_vm6, %v2062_v53, %v5247_v56  ;;  %v714_v56 = vadd.f32 %v5791_v43, %v4931_v32 }
 0x568   : > { %v2076_v0 = vpack.c.bf16 %v5296_v6, %v5296_v6 }
 0x56a   : > { %2085 = vmatmul.bf16.vlgmr.msra.gmra.mxu0 %v2076_v0  ;;  %2098 = vmatmul.bf16.vlgmr.msra.gmra.mxu1 %v2076_v0 }
 0x56b   : > { %2111 = vmatmul.bf16.vlgmr.msra.gmra.mxu2 %v2076_v0  ;;  %2124 = vmatmul.bf16.vlgmr.msra.gmra.mxu3 %v2076_v0  ;;  %v5794_v0 = vld [vmem:[#allocation27_spill] sm:$0xff] }
 0x56c   : > { %2343 = vmatpush.bf16.msra.mxu0 %v4427_v37  ;;  %2356 = vmatpush.bf16.msra.mxu1 %v4439_v42  ;;  %v812_v43 = vadd.f32 %v5794_v0, %v5781_v57 }
 0x56d   : > { %2369 = vmatpush.bf16.msra.mxu2 %v4453_v47  ;;  %2382 = vmatpush.bf16.msra.mxu3 %v4456_v48 }
 0x570   : > { %2344 = vmatpush.bf16.msra.mxu0 %v4458_v49  ;;  %2357 = vmatpush.bf16.msra.mxu1 %v4467_v52 }
 0x571   : > { %2370 = vmatpush.bf16.msra.mxu2 %v4476_v55  ;;  %2383 = vmatpush.bf16.msra.mxu3 %v4489_v59 }
 0x574   : > { %2345 = vmatpush.bf16.msra.mxu0 %v4491_v60  ;;  %2358 = vmatpush.bf16.msra.mxu1 %v4500_v63 }
 0x575   : > { %2371 = vmatpush.bf16.msra.mxu2 %v4512_v3  ;;  %2384 = vmatpush.bf16.msra.mxu3 %v4516_v4 }
 0x578   : > { %2346 = vmatpush.bf16.msra.mxu0 %v4531_v9  ;;  %2359 = vmatpush.bf16.msra.mxu1 %v4542_v13 }
 0x579   : > { %2372 = vmatpush.bf16.msra.mxu2 %v4553_v17  ;;  %2385 = vmatpush.bf16.msra.mxu3 %v4544_v14 }
 0x57c   : > { %2347 = vmatpush.bf16.msra.mxu0 %v4568_v22  ;;  %2360 = vmatpush.bf16.msra.mxu1 %v4579_v26 }
 0x57d   : > { %2373 = vmatpush.bf16.msra.mxu2 %v4590_v30  ;;  %2386 = vmatpush.bf16.msra.mxu3 %v4581_v27 }
 0x580   : > { %2348 = vmatpush.bf16.msra.mxu0 %v4605_v35  ;;  %2361 = vmatpush.bf16.msra.mxu1 %v4616_v40 }
 0x581   : > { %2374 = vmatpush.bf16.msra.mxu2 %v4627_v45  ;;  %2387 = vmatpush.bf16.msra.mxu3 %v4618_v41 }
 0x584   : > { %2349 = vmatpush.bf16.msra.mxu0 %v4642_v54  ;;  %2362 = vmatpush.bf16.msra.mxu1 %v4653_v61 }
 0x585   : > { %2375 = vmatpush.bf16.msra.mxu2 %v4664_v2  ;;  %2388 = vmatpush.bf16.msra.mxu3 %v4655_v62 }
 0x588   : > { %2350 = vmatpush.bf16.msra.mxu0 %v4679_v10  ;;  %2363 = vmatpush.bf16.msra.mxu1 %v4690_v16 }
 0x589   : > { %2376 = vmatpush.bf16.msra.mxu2 %v4710_v23  ;;  %2389 = vmatpush.bf16.msra.mxu3 %v4692_v18 }
 0x5e7   : > { %v2086_v15 = vpop.f32.mrf.mxu0  ;;  %v2099_v21 = vpop.f32.mrf.mxu1 }
 0x5e8   : > { %v2129_v19 = vadd.f32 %v2086_v15, %v714_v56  ;;  %v2130_v24 = vadd.f32 %v2099_v21, %v763_v58 }
 0x5ea   : > { %v3733_v29 = vmul.f32 -1.442695, %v2129_v19  ;;  %v3734_v5 = vmul.f32 -1.442695, %v2130_v24 }
 0x5ec   : > { %3976 = vpow2.f32 %v3733_v29 }
 0x5ed   : > { %3978 = vpow2.f32 %v3734_v5 }
 0x5ee   : > { %v2112_v46 = vpop.f32.mrf.mxu2  ;;  %v2125_v7 = vpop.f32.mrf.mxu3 }
 0x5ef   : > { %v2132_v51 = vadd.f32 %v2125_v7, %v861_v11  ;;  %v2088_v39 = vpop.f32.mrf.mxu0  ;;  %v2101_v20 = vpop.f32.mrf.mxu1  ;;  %v2131_v58 = vadd.f32 %v2112_v46, %v812_v43 }
 0x5f1   : > { %v3735_v1 = vmul.f32 -1.442695, %v2132_v51 }
 0x5f2   : > { %v3977_v50 = vpop.eup %3976 }
 0x5f3   : > { %v3979_v8 = vpop.eup %3978  ;;  %v2136_v36 = vadd.f32 1.0, %v3977_v50  ;;  %3980 = vpow2.f32 %v3735_v1 }
 0x5f4   : > { %v2155_v28 = vadd.f32 1.0, %v3979_v8 }
 0x5f5   : > { %3982 = vrcp.f32 %v2136_v36  ;;  %v2148_v5 = vand.u32 2147483648, %v2136_v36  ;;  %v2146_v7 = vand.u32 2147483647, %v2136_v36  ;;  %vm2142_vm13 = vweird.f32 %v2136_v36 }
 0x5f6   : > { %3984 = vrcp.f32 %v2155_v28  ;;  %v2114_v25 = vpop.f32.mrf.mxu2  ;;  %v2127_v33 = vpop.f32.mrf.mxu3  ;;  %v2167_v12 = vand.u32 2147483648, %v2155_v28  ;;  %v2165_v39 = vand.u32 2147483647, %v2155_v28  ;;  %vm2161_vm14 = vweird.f32 %v2155_v28 }
 0x5f7   : > { %v2149_v46 = vor.u32 1.1754944e-38, %v2148_v5  ;;  %vm2147_vm1 = vcmp.eq.f32.partialorder %v2146_v7, 8.507059e+37 }
 0x5f8   : > { %v2168_v25 = vor.u32 1.1754944e-38, %v2167_v12  ;;  %vm2166_vm2 = vcmp.eq.f32.partialorder %v2165_v39, 8.507059e+37 }
 0x5f9   : > { %v3981_v53 = vpop.eup %3980 }
 0x5fa   : > { %v2175_v56 = vadd.f32 1.0, %v3981_v53 }
 0x5fb   : > { %v3983_v38 = vpop.eup %3982 }
 0x5fc   : > { %v3985_v15 = vpop.eup %3984  ;;  %v2138_v21 = vmul.f32 %v3983_v38, %v2136_v36  ;;  %3986 = vrcp.f32 %v2175_v56  ;;  %vm2143_vm11 = vweird.f32 %v3983_v38  ;;  %v2201_v36 = vpop.permute.xlu1 %2200  ;;  %vm2181_vm5 = vweird.f32 %v2175_v56 }
 0x5fd   : > { %v2157_v19 = vmul.f32 %v3985_v15, %v2155_v28  ;;  %3988 = vtanh.f32 %v2131_v58  ;;  %vm2162_vm12 = vweird.f32 %v3985_v15  ;;  %vm2144_vm15 = vmor %vm2142_vm13, %vm2143_vm11  ;;  %vm2202_vm3 = vcmp.eq.s32.totalorder %v2201_v36, 1 }
 0x5fe   : > { %v2139_v24 = vsub.f32 1.0, %v2138_v21  ;;  %vm2163_vm0 = vmor %vm2161_vm14, %vm2162_vm12  ;;  %v2185_v12 = vand.u32 2147483647, %v2175_v56 }
 0x5ff   : > { %v2158_v29 = vsub.f32 1.0, %v2157_v19 }
 0x600   : > { %v2140_v11 = vmul.f32 %v3983_v38, %v2139_v24  ;;  %vm2186_vm7 = vcmp.eq.f32.partialorder %v2185_v12, 8.507059e+37 }
 0x601   : > { %v2159_v51 = vmul.f32 %v3985_v15, %v2158_v29 }
 0x602   : > { %v3987_v20 = vpop.eup %3986  ;;  %v2141_v1 = vadd.f32 %v3983_v38, %v2140_v11  ;;  %v2187_v11 = vand.u32 2147483648, %v2175_v56 }
 0x603   : > { %v2160_v50 = vadd.f32 %v3985_v15, %v2159_v51  ;;  %v2177_v8 = vmul.f32 %v3987_v20, %v2175_v56  ;;  %v3989_v53 = vpop.eup %3988  ;;  %vm2182_vm4 = vweird.f32 %v3987_v20  ;;  %v5796_v56 = vld [vmem:[#allocation30_spill] sm:$0xff] }
 0x604   : > { %v2145_v33 = vsel %vm2144_vm15, %v3983_v38, %v2141_v1  ;;  %vm2183_vm6 = vmor %vm2181_vm5, %vm2182_vm4  ;;  %v2188_v7 = vor.u32 1.1754944e-38, %v2187_v11 }
 0x605   : > { %v2150_v0 = vsel %vm2147_vm1, %v2149_v46, %v2145_v33  ;;  %v2164_v43 = vsel %vm2163_vm0, %v3985_v15, %v2160_v50  ;;  %v2178_v58 = vsub.f32 1.0, %v2177_v8 }
 0x606   : > { %v2169_v21 = vsel %vm2166_vm2, %v2168_v25, %v2164_v43  ;;  %v2192_v19 = vmul.f32 %v3989_v53, %v2150_v0 }
 0x607   : > { %v2191_v24 = vmul.f32 %v2169_v21, %v5293_v44  ;;  %v2179_v29 = vmul.f32 %v3987_v20, %v2178_v58  ;;  %v5797_v58 = vld [vmem:[#allocation32_spill] sm:$0xff] }
 0x608   : > { %v864_v21 = vadd.f32 %v5797_v58, %v4943_v31 }
 0x609   : > { %v2193_v28 = vadd.f32 %v2192_v19, %v2191_v24  ;;  %v2180_v5 = vadd.f32 %v3987_v20, %v2179_v29 }
 0x60b   : > { %3990 = vtanh.f32 %v2193_v28  ;;  %v5342_v38 = vsel %vm2202_vm3, %v2193_v28, %v5293_v44  ;;  %v2184_v15 = vsel %vm2183_vm6, %v3987_v20, %v2180_v5  ;;  %v5795_v44 = vld [vmem:[#allocation29_spill] sm:$0xff]  ;;  %v766_v20 = vadd.f32 %v5796_v56, %v4933_v34 }
 0x60c   : > { %v2189_v39 = vsel %vm2186_vm7, %v2188_v7, %v2184_v15 }
 0x611   : > { %v3991_v51 = vpop.eup %3990 }
 0x612   : > { %v2195_v1 = vmul.f32 %v3991_v51, %v2189_v39 }
 0x614   : > { %v5345_v46 = vsel %vm2202_vm3, %v2195_v1, %v5296_v6  ;;  %v717_v6 = vadd.f32 %v5795_v44, %v4931_v32 }
 0x615   : > { %v2209_v50 = vpack.c.bf16 %v5345_v46, %v5345_v46 }
 0x617   : > { %2218 = vmatmul.bf16.vlgmr.msrb.gmra.mxu0 %v2209_v50  ;;  %2231 = vmatmul.bf16.vlgmr.msrb.gmra.mxu1 %v2209_v50 }
 0x618   : > { %2244 = vmatmul.bf16.vlgmr.msrb.gmra.mxu2 %v2209_v50  ;;  %2257 = vmatmul.bf16.vlgmr.msrb.gmra.mxu3 %v2209_v50  ;;  %v5798_v50 = vld [vmem:[#allocation31_spill] sm:$0xff] }
 0x619   : > { %2476 = vmatpush.bf16.msrb.mxu0 %v4427_v37  ;;  %2489 = vmatpush.bf16.msrb.mxu1 %v4439_v42  ;;  %v815_v44 = vadd.f32 %v5798_v50, %v5781_v57 }
 0x61a   : > { %2502 = vmatpush.bf16.msrb.mxu2 %v4453_v47  ;;  %2515 = vmatpush.bf16.msrb.mxu3 %v4456_v48 }
 0x61d   : > { %2477 = vmatpush.bf16.msrb.mxu0 %v4458_v49  ;;  %2490 = vmatpush.bf16.msrb.mxu1 %v4467_v52 }
 0x61e   : > { %2503 = vmatpush.bf16.msrb.mxu2 %v4476_v55  ;;  %2516 = vmatpush.bf16.msrb.mxu3 %v4489_v59 }
 0x621   : > { %2478 = vmatpush.bf16.msrb.mxu0 %v4491_v60  ;;  %2491 = vmatpush.bf16.msrb.mxu1 %v4500_v63 }
 0x622   : > { %2504 = vmatpush.bf16.msrb.mxu2 %v4512_v3  ;;  %2517 = vmatpush.bf16.msrb.mxu3 %v4516_v4 }
 0x625   : > { %2479 = vmatpush.bf16.msrb.mxu0 %v4531_v9  ;;  %2492 = vmatpush.bf16.msrb.mxu1 %v4542_v13 }
 0x626   : > { %2505 = vmatpush.bf16.msrb.mxu2 %v4553_v17  ;;  %2518 = vmatpush.bf16.msrb.mxu3 %v4544_v14 }
 0x629   : > { %2480 = vmatpush.bf16.msrb.mxu0 %v4568_v22  ;;  %2493 = vmatpush.bf16.msrb.mxu1 %v4579_v26 }
 0x62a   : > { %2506 = vmatpush.bf16.msrb.mxu2 %v4590_v30  ;;  %2519 = vmatpush.bf16.msrb.mxu3 %v4581_v27 }
 0x62d   : > { %2481 = vmatpush.bf16.msrb.mxu0 %v4605_v35  ;;  %2494 = vmatpush.bf16.msrb.mxu1 %v4616_v40 }
 0x62e   : > { %2507 = vmatpush.bf16.msrb.mxu2 %v4627_v45  ;;  %2520 = vmatpush.bf16.msrb.mxu3 %v4618_v41 }
 0x631   : > { %2482 = vmatpush.bf16.msrb.mxu0 %v4642_v54  ;;  %2495 = vmatpush.bf16.msrb.mxu1 %v4653_v61 }
 0x632   : > { %2508 = vmatpush.bf16.msrb.mxu2 %v4664_v2  ;;  %2521 = vmatpush.bf16.msrb.mxu3 %v4655_v62 }
 0x635   : > { %2483 = vmatpush.bf16.msrb.mxu0 %v4679_v10  ;;  %2496 = vmatpush.bf16.msrb.mxu1 %v4690_v16 }
 0x636   : > { %2509 = vmatpush.bf16.msrb.mxu2 %v4710_v23  ;;  %2522 = vmatpush.bf16.msrb.mxu3 %v4692_v18 }
 0x694   : > { %v2219_v8 = vpop.f32.mrf.mxu0  ;;  %v2232_v25 = vpop.f32.mrf.mxu1 }
 0x695   : > { %v2262_v33 = vadd.f32 %v2219_v8, %v717_v6  ;;  %v2263_v53 = vadd.f32 %v2232_v25, %v766_v20 }
 0x697   : > { %v3736_v0 = vmul.f32 -1.442695, %v2262_v33  ;;  %v3737_v43 = vmul.f32 -1.442695, %v2263_v53 }
 0x699   : > { %3992 = vpow2.f32 %v3736_v0 }
 0x69a   : > { %3994 = vpow2.f32 %v3737_v43 }
 0x69b   : > { %v2245_v19 = vpop.f32.mrf.mxu2  ;;  %v2258_v24 = vpop.f32.mrf.mxu3 }
 0x69c   : > { %v2265_v29 = vadd.f32 %v2258_v24, %v864_v21  ;;  %v2221_v36 = vpop.f32.mrf.mxu0  ;;  %v2234_v28 = vpop.f32.mrf.mxu1  ;;  %v2264_v20 = vadd.f32 %v2245_v19, %v815_v44 }
 0x69e   : > { %v3738_v5 = vmul.f32 -1.442695, %v2265_v29 }
 0x69f   : > { %v3993_v11 = vpop.eup %3992 }
 0x6a0   : > { %v3995_v12 = vpop.eup %3994  ;;  %v2269_v15 = vadd.f32 1.0, %v3993_v11  ;;  %3996 = vpow2.f32 %v3738_v5 }
 0x6a1   : > { %v2288_v7 = vadd.f32 1.0, %v3995_v12 }
 0x6a2   : > { %3998 = vrcp.f32 %v2269_v15  ;;  %v2281_v43 = vand.u32 2147483648, %v2269_v15  ;;  %v2279_v24 = vand.u32 2147483647, %v2269_v15  ;;  %vm2275_vm10 = vweird.f32 %v2269_v15 }
 0x6a3   : > { %4000 = vrcp.f32 %v2288_v7  ;;  %v2247_v51 = vpop.f32.mrf.mxu2  ;;  %v2260_v39 = vpop.f32.mrf.mxu3  ;;  %v2300_v58 = vand.u32 2147483648, %v2288_v7  ;;  %v2298_v36 = vand.u32 2147483647, %v2288_v7  ;;  %vm2294_vm11 = vweird.f32 %v2288_v7 }
 0x6a4   : > { %v2282_v19 = vor.u32 1.1754944e-38, %v2281_v43  ;;  %vm2280_vm14 = vcmp.eq.f32.partialorder %v2279_v24, 8.507059e+37 }
 0x6a5   : > { %v2301_v51 = vor.u32 1.1754944e-38, %v2300_v58  ;;  %vm2299_vm15 = vcmp.eq.f32.partialorder %v2298_v36, 8.507059e+37 }
 0x6a6   : > { %v3997_v1 = vpop.eup %3996 }
 0x6a7   : > { %v2308_v6 = vadd.f32 1.0, %v3997_v1 }
 0x6a8   : > { %v3999_v56 = vpop.eup %3998 }
 0x6a9   : > { %v4001_v8 = vpop.eup %4000  ;;  %v2271_v25 = vmul.f32 %v3999_v56, %v2269_v15  ;;  %4002 = vrcp.f32 %v2308_v6  ;;  %vm2276_vm8 = vweird.f32 %v3999_v56  ;;  %v2334_v15 = vpop.permute.xlu2 %2333  ;;  %vm2314_vm2 = vweird.f32 %v2308_v6 }
 0x6aa   : > { %v2290_v33 = vmul.f32 %v4001_v8, %v2288_v7  ;;  %4004 = vtanh.f32 %v2264_v20  ;;  %vm2295_vm9 = vweird.f32 %v4001_v8  ;;  %vm2277_vm12 = vmor %vm2275_vm10, %vm2276_vm8  ;;  %vm2335_vm0 = vcmp.eq.s32.totalorder %v2334_v15, 1 }
 0x6ab   : > { %v2272_v53 = vsub.f32 1.0, %v2271_v25  ;;  %vm2296_vm13 = vmor %vm2294_vm11, %vm2295_vm9  ;;  %v2318_v58 = vand.u32 2147483647, %v2308_v6 }
 0x6ac   : > { %v2291_v0 = vsub.f32 1.0, %v2290_v33 }
 0x6ad   : > { %v2273_v21 = vmul.f32 %v3999_v56, %v2272_v53  ;;  %vm2319_vm4 = vcmp.eq.f32.partialorder %v2318_v58, 8.507059e+37 }
 0x6ae   : > { %v2292_v29 = vmul.f32 %v4001_v8, %v2291_v0 }
 0x6af   : > { %v4003_v28 = vpop.eup %4002  ;;  %v2274_v5 = vadd.f32 %v3999_v56, %v2273_v21  ;;  %v2320_v21 = vand.u32 2147483648, %v2308_v6 }
 0x6b0   : > { %v2293_v11 = vadd.f32 %v4001_v8, %v2292_v29  ;;  %v2310_v12 = vmul.f32 %v4003_v28, %v2308_v6  ;;  %v4005_v1 = vpop.eup %4004  ;;  %vm2315_vm1 = vweird.f32 %v4003_v28  ;;  %v5800_v6 = vld [vmem:[#allocation34_spill] sm:$0xff] }
 0x6b1   : > { %v2278_v39 = vsel %vm2277_vm12, %v3999_v56, %v2274_v5  ;;  %vm2316_vm3 = vmor %vm2314_vm2, %vm2315_vm1  ;;  %v2321_v24 = vor.u32 1.1754944e-38, %v2320_v21 }
 0x6b2   : > { %v2283_v50 = vsel %vm2280_vm14, %v2282_v19, %v2278_v39  ;;  %v2297_v44 = vsel %vm2296_vm13, %v4001_v8, %v2293_v11  ;;  %v2311_v20 = vsub.f32 1.0, %v2310_v12 }
 0x6b3   : > { %v2302_v25 = vsel %vm2299_vm15, %v2301_v51, %v2297_v44  ;;  %v2325_v33 = vmul.f32 %v4005_v1, %v2283_v50 }
 0x6b4   : > { %v2324_v53 = vmul.f32 %v2302_v25, %v5342_v38  ;;  %v2312_v0 = vmul.f32 %v4003_v28, %v2311_v20  ;;  %v5801_v20 = vld [vmem:[#allocation36_spill] sm:$0xff] }
 0x6b5   : > { %v866_v25 = vadd.f32 %v5801_v20, %v4943_v31 }
 0x6b6   : > { %v2326_v7 = vadd.f32 %v2325_v33, %v2324_v53  ;;  %v2313_v43 = vadd.f32 %v4003_v28, %v2312_v0 }
 0x6b8   : > { %4006 = vtanh.f32 %v2326_v7  ;;  %v5391_v56 = vsel %vm2335_vm0, %v2326_v7, %v5342_v38  ;;  %v2317_v8 = vsel %vm2316_vm3, %v4003_v28, %v2313_v43  ;;  %v5799_v38 = vld [vmem:[#allocation33_spill] sm:$0xff]  ;;  %v768_v28 = vadd.f32 %v5800_v6, %v4933_v34 }
 0x6b9   : > { %v2322_v36 = vsel %vm2319_vm4, %v2321_v24, %v2317_v8 }
 0x6be   : > { %v4007_v29 = vpop.eup %4006 }
 0x6bf   : > { %v2328_v5 = vmul.f32 %v4007_v29, %v2322_v36 }
 0x6c1   : > { %v5394_v19 = vsel %vm2335_vm0, %v2328_v5, %v5345_v46  ;;  %v719_v46 = vadd.f32 %v5799_v38, %v4931_v32 }
 0x6c2   : > { %v2342_v11 = vpack.c.bf16 %v5394_v19, %v5394_v19 }
 0x6c4   : > { %2351 = vmatmul.bf16.vlgmr.msra.gmra.mxu0 %v2342_v11  ;;  %2364 = vmatmul.bf16.vlgmr.msra.gmra.mxu1 %v2342_v11 }
 0x6c5   : > { %2377 = vmatmul.bf16.vlgmr.msra.gmra.mxu2 %v2342_v11  ;;  %2390 = vmatmul.bf16.vlgmr.msra.gmra.mxu3 %v2342_v11  ;;  %v5802_v11 = vld [vmem:[#allocation35_spill] sm:$0xff] }
 0x6c6   : > { %2609 = vmatpush.bf16.msra.mxu0 %v4427_v37  ;;  %2622 = vmatpush.bf16.msra.mxu1 %v4439_v42  ;;  %v817_v38 = vadd.f32 %v5802_v11, %v5781_v57 }
 0x6c7   : > { %2635 = vmatpush.bf16.msra.mxu2 %v4453_v47  ;;  %2648 = vmatpush.bf16.msra.mxu3 %v4456_v48 }
 0x6ca   : > { %2610 = vmatpush.bf16.msra.mxu0 %v4458_v49  ;;  %2623 = vmatpush.bf16.msra.mxu1 %v4467_v52 }
 0x6cb   : > { %2636 = vmatpush.bf16.msra.mxu2 %v4476_v55  ;;  %2649 = vmatpush.bf16.msra.mxu3 %v4489_v59 }
 0x6ce   : > { %2611 = vmatpush.bf16.msra.mxu0 %v4491_v60  ;;  %2624 = vmatpush.bf16.msra.mxu1 %v4500_v63 }
 0x6cf   : > { %2637 = vmatpush.bf16.msra.mxu2 %v4512_v3  ;;  %2650 = vmatpush.bf16.msra.mxu3 %v4516_v4 }
 0x6d2   : > { %2612 = vmatpush.bf16.msra.mxu0 %v4531_v9  ;;  %2625 = vmatpush.bf16.msra.mxu1 %v4542_v13 }
 0x6d3   : > { %2638 = vmatpush.bf16.msra.mxu2 %v4553_v17  ;;  %2651 = vmatpush.bf16.msra.mxu3 %v4544_v14 }
 0x6d6   : > { %2613 = vmatpush.bf16.msra.mxu0 %v4568_v22  ;;  %2626 = vmatpush.bf16.msra.mxu1 %v4579_v26 }
 0x6d7   : > { %2639 = vmatpush.bf16.msra.mxu2 %v4590_v30  ;;  %2652 = vmatpush.bf16.msra.mxu3 %v4581_v27 }
 0x6da   : > { %2614 = vmatpush.bf16.msra.mxu0 %v4605_v35  ;;  %2627 = vmatpush.bf16.msra.mxu1 %v4616_v40 }
 0x6db   : > { %2640 = vmatpush.bf16.msra.mxu2 %v4627_v45  ;;  %2653 = vmatpush.bf16.msra.mxu3 %v4618_v41 }
 0x6de   : > { %2615 = vmatpush.bf16.msra.mxu0 %v4642_v54  ;;  %2628 = vmatpush.bf16.msra.mxu1 %v4653_v61 }
 0x6df   : > { %2641 = vmatpush.bf16.msra.mxu2 %v4664_v2  ;;  %2654 = vmatpush.bf16.msra.mxu3 %v4655_v62 }
 0x6e2   : > { %2616 = vmatpush.bf16.msra.mxu0 %v4679_v10  ;;  %2629 = vmatpush.bf16.msra.mxu1 %v4690_v16 }
 0x6e3   : > { %2642 = vmatpush.bf16.msra.mxu2 %v4710_v23  ;;  %2655 = vmatpush.bf16.msra.mxu3 %v4692_v18 }
 0x741   : > { %v2352_v12 = vpop.f32.mrf.mxu0  ;;  %v2365_v51 = vpop.f32.mrf.mxu1 }
 0x742   : > { %v2395_v39 = vadd.f32 %v2352_v12, %v719_v46  ;;  %v2396_v1 = vadd.f32 %v2365_v51, %v768_v28 }
 0x744   : > { %v3739_v50 = vmul.f32 -1.442695, %v2395_v39  ;;  %v3740_v44 = vmul.f32 -1.442695, %v2396_v1 }
 0x746   : > { %4008 = vpow2.f32 %v3739_v50 }
 0x747   : > { %4010 = vpow2.f32 %v3740_v44 }
 0x748   : > { %v2378_v33 = vpop.f32.mrf.mxu2  ;;  %v2391_v53 = vpop.f32.mrf.mxu3 }
 0x749   : > { %v2398_v0 = vadd.f32 %v2391_v53, %v866_v25  ;;  %v2354_v15 = vpop.f32.mrf.mxu0  ;;  %v2367_v7 = vpop.f32.mrf.mxu1  ;;  %v2397_v28 = vadd.f32 %v2378_v33, %v817_v38 }
 0x74b   : > { %v3741_v43 = vmul.f32 -1.442695, %v2398_v0 }
 0x74c   : > { %v4009_v21 = vpop.eup %4008 }
 0x74d   : > { %v4011_v58 = vpop.eup %4010  ;;  %v2402_v8 = vadd.f32 1.0, %v4009_v21  ;;  %4012 = vpow2.f32 %v3741_v43 }
 0x74e   : > { %v2421_v24 = vadd.f32 1.0, %v4011_v58 }
 0x74f   : > { %4014 = vrcp.f32 %v2402_v8  ;;  %v2414_v44 = vand.u32 2147483648, %v2402_v8  ;;  %v2412_v53 = vand.u32 2147483647, %v2402_v8  ;;  %vm2408_vm7 = vweird.f32 %v2402_v8 }
 0x750   : > { %4016 = vrcp.f32 %v2421_v24  ;;  %v2380_v29 = vpop.f32.mrf.mxu2  ;;  %v2393_v36 = vpop.f32.mrf.mxu3  ;;  %v2433_v20 = vand.u32 2147483648, %v2421_v24  ;;  %v2431_v15 = vand.u32 2147483647, %v2421_v24  ;;  %vm2427_vm8 = vweird.f32 %v2421_v24 }
 0x751   : > { %v2415_v33 = vor.u32 1.1754944e-38, %v2414_v44  ;;  %vm2413_vm11 = vcmp.eq.f32.partialorder %v2412_v53, 8.507059e+37 }
 0x752   : > { %v2434_v29 = vor.u32 1.1754944e-38, %v2433_v20  ;;  %vm2432_vm12 = vcmp.eq.f32.partialorder %v2431_v15, 8.507059e+37 }
 0x753   : > { %v4013_v5 = vpop.eup %4012 }
 0x754   : > { %v2441_v46 = vadd.f32 1.0, %v4013_v5 }
 0x755   : > { %v4015_v6 = vpop.eup %4014 }
 0x756   : > { %v4017_v12 = vpop.eup %4016  ;;  %v2404_v51 = vmul.f32 %v4015_v6, %v2402_v8  ;;  %4018 = vrcp.f32 %v2441_v46  ;;  %vm2409_vm5 = vweird.f32 %v4015_v6  ;;  %v2467_v8 = vpop.permute.xlu0 %2466  ;;  %vm2447_vm15 = vweird.f32 %v2441_v46 }
 0x757   : > { %v2423_v39 = vmul.f32 %v4017_v12, %v2421_v24  ;;  %4020 = vtanh.f32 %v2397_v28  ;;  %vm2428_vm6 = vweird.f32 %v4017_v12  ;;  %vm2410_vm9 = vmor %vm2408_vm7, %vm2409_vm5  ;;  %vm2468_vm13 = vcmp.eq.s32.totalorder %v2467_v8, 1 }
 0x758   : > { %v2405_v1 = vsub.f32 1.0, %v2404_v51  ;;  %vm2429_vm10 = vmor %vm2427_vm8, %vm2428_vm6  ;;  %v2451_v20 = vand.u32 2147483647, %v2441_v46 }
 0x759   : > { %v2424_v50 = vsub.f32 1.0, %v2423_v39 }
 0x75a   : > { %v2406_v25 = vmul.f32 %v4015_v6, %v2405_v1  ;;  %vm2452_vm1 = vcmp.eq.f32.partialorder %v2451_v20, 8.507059e+37 }
 0x75b   : > { %v2425_v0 = vmul.f32 %v4017_v12, %v2424_v50 }
 0x75c   : > { %v4019_v7 = vpop.eup %4018  ;;  %v2407_v43 = vadd.f32 %v4015_v6, %v2406_v25  ;;  %v2453_v25 = vand.u32 2147483648, %v2441_v46 }
 0x75d   : > { %v2426_v21 = vadd.f32 %v4017_v12, %v2425_v0  ;;  %v2443_v58 = vmul.f32 %v4019_v7, %v2441_v46  ;;  %v4021_v5 = vpop.eup %4020  ;;  %vm2448_vm14 = vweird.f32 %v4019_v7  ;;  %v5804_v46 = vld [vmem:[#allocation38_spill] sm:$0xff] }
 0x75e   : > { %v2411_v36 = vsel %vm2410_vm9, %v4015_v6, %v2407_v43  ;;  %vm2449_vm0 = vmor %vm2447_vm15, %vm2448_vm14  ;;  %v2454_v53 = vor.u32 1.1754944e-38, %v2453_v25 }
 0x75f   : > { %v2416_v11 = vsel %vm2413_vm11, %v2415_v33, %v2411_v36  ;;  %v2430_v38 = vsel %vm2429_vm10, %v4017_v12, %v2426_v21  ;;  %v2444_v28 = vsub.f32 1.0, %v2443_v58 }
 0x760   : > { %v2435_v51 = vsel %vm2432_vm12, %v2434_v29, %v2430_v38  ;;  %v2458_v39 = vmul.f32 %v4021_v5, %v2416_v11 }
 0x761   : > { %v2457_v1 = vmul.f32 %v2435_v51, %v5391_v56  ;;  %v2445_v50 = vmul.f32 %v4019_v7, %v2444_v28  ;;  %v5805_v28 = vld [vmem:[#allocation40_spill] sm:$0xff] }
 0x762   : > { %v869_v51 = vadd.f32 %v5805_v28, %v4943_v31 }
 0x763   : > { %v2459_v24 = vadd.f32 %v2458_v39, %v2457_v1  ;;  %v2446_v44 = vadd.f32 %v4019_v7, %v2445_v50 }
 0x765   : > { %4022 = vtanh.f32 %v2459_v24  ;;  %v5440_v6 = vsel %vm2468_vm13, %v2459_v24, %v5391_v56  ;;  %v2450_v12 = vsel %vm2449_vm0, %v4019_v7, %v2446_v44  ;;  %v5803_v56 = vld [vmem:[#allocation37_spill] sm:$0xff]  ;;  %v771_v7 = vadd.f32 %v5804_v46, %v4933_v34 }
 0x766   : > { %v2455_v15 = vsel %vm2452_vm1, %v2454_v53, %v2450_v12 }
 0x76b   : > { %v4023_v0 = vpop.eup %4022 }
 0x76c   : > { %v2461_v43 = vmul.f32 %v4023_v0, %v2455_v15 }
 0x76e   : > { %v5443_v33 = vsel %vm2468_vm13, %v2461_v43, %v5394_v19  ;;  %v722_v19 = vadd.f32 %v5803_v56, %v4931_v32 }
 0x76f   : > { %v2475_v21 = vpack.c.bf16 %v5443_v33, %v5443_v33 }
 0x771   : > { %2484 = vmatmul.bf16.vlgmr.msrb.gmra.mxu0 %v2475_v21  ;;  %2497 = vmatmul.bf16.vlgmr.msrb.gmra.mxu1 %v2475_v21 }
 0x772   : > { %2510 = vmatmul.bf16.vlgmr.msrb.gmra.mxu2 %v2475_v21  ;;  %2523 = vmatmul.bf16.vlgmr.msrb.gmra.mxu3 %v2475_v21  ;;  %v5806_v21 = vld [vmem:[#allocation39_spill] sm:$0xff] }
 0x773   : > { %2742 = vmatpush.bf16.msrb.mxu0 %v4427_v37  ;;  %2755 = vmatpush.bf16.msrb.mxu1 %v4439_v42  ;;  %v820_v56 = vadd.f32 %v5806_v21, %v5781_v57 }
 0x774   : > { %2768 = vmatpush.bf16.msrb.mxu2 %v4453_v47  ;;  %2781 = vmatpush.bf16.msrb.mxu3 %v4456_v48 }
 0x777   : > { %2743 = vmatpush.bf16.msrb.mxu0 %v4458_v49  ;;  %2756 = vmatpush.bf16.msrb.mxu1 %v4467_v52 }
 0x778   : > { %2769 = vmatpush.bf16.msrb.mxu2 %v4476_v55  ;;  %2782 = vmatpush.bf16.msrb.mxu3 %v4489_v59 }
 0x77b   : > { %2744 = vmatpush.bf16.msrb.mxu0 %v4491_v60  ;;  %2757 = vmatpush.bf16.msrb.mxu1 %v4500_v63 }
 0x77c   : > { %2770 = vmatpush.bf16.msrb.mxu2 %v4512_v3  ;;  %2783 = vmatpush.bf16.msrb.mxu3 %v4516_v4 }
 0x77f   : > { %2745 = vmatpush.bf16.msrb.mxu0 %v4531_v9  ;;  %2758 = vmatpush.bf16.msrb.mxu1 %v4542_v13 }
 0x780   : > { %2771 = vmatpush.bf16.msrb.mxu2 %v4553_v17  ;;  %2784 = vmatpush.bf16.msrb.mxu3 %v4544_v14 }
 0x783   : > { %2746 = vmatpush.bf16.msrb.mxu0 %v4568_v22  ;;  %2759 = vmatpush.bf16.msrb.mxu1 %v4579_v26 }
 0x784   : > { %2772 = vmatpush.bf16.msrb.mxu2 %v4590_v30  ;;  %2785 = vmatpush.bf16.msrb.mxu3 %v4581_v27 }
 0x787   : > { %2747 = vmatpush.bf16.msrb.mxu0 %v4605_v35  ;;  %2760 = vmatpush.bf16.msrb.mxu1 %v4616_v40 }
 0x788   : > { %2773 = vmatpush.bf16.msrb.mxu2 %v4627_v45  ;;  %2786 = vmatpush.bf16.msrb.mxu3 %v4618_v41 }
 0x78b   : > { %2748 = vmatpush.bf16.msrb.mxu0 %v4642_v54  ;;  %2761 = vmatpush.bf16.msrb.mxu1 %v4653_v61 }
 0x78c   : > { %2774 = vmatpush.bf16.msrb.mxu2 %v4664_v2  ;;  %2787 = vmatpush.bf16.msrb.mxu3 %v4655_v62 }
 0x78f   : > { %2749 = vmatpush.bf16.msrb.mxu0 %v4679_v10  ;;  %2762 = vmatpush.bf16.msrb.mxu1 %v4690_v16 }
 0x790   : > { %2775 = vmatpush.bf16.msrb.mxu2 %v4710_v23  ;;  %2788 = vmatpush.bf16.msrb.mxu3 %v4692_v18 }
 0x7ee   : > { %v2485_v58 = vpop.f32.mrf.mxu0  ;;  %v2498_v29 = vpop.f32.mrf.mxu1 }
 0x7ef   : > { %v2528_v36 = vadd.f32 %v2485_v58, %v722_v19  ;;  %v2529_v5 = vadd.f32 %v2498_v29, %v771_v7 }
 0x7f1   : > { %v3742_v11 = vmul.f32 -1.442695, %v2528_v36  ;;  %v3743_v38 = vmul.f32 -1.442695, %v2529_v5 }
 0x7f3   : > { %4024 = vpow2.f32 %v3742_v11 }
 0x7f4   : > { %4026 = vpow2.f32 %v3743_v38 }
 0x7f5   : > { %v2511_v39 = vpop.f32.mrf.mxu2  ;;  %v2524_v1 = vpop.f32.mrf.mxu3 }
 0x7f6   : > { %v2531_v50 = vadd.f32 %v2524_v1, %v869_v51  ;;  %v2487_v8 = vpop.f32.mrf.mxu0  ;;  %v2500_v24 = vpop.f32.mrf.mxu1  ;;  %v2530_v7 = vadd.f32 %v2511_v39, %v820_v56 }
 0x7f8   : > { %v3744_v44 = vmul.f32 -1.442695, %v2531_v50 }
 0x7f9   : > { %v4025_v25 = vpop.eup %4024 }
 0x7fa   : > { %v4027_v20 = vpop.eup %4026  ;;  %v2535_v12 = vadd.f32 1.0, %v4025_v25  ;;  %4028 = vpow2.f32 %v3744_v44 }
 0x7fb   : > { %v2554_v53 = vadd.f32 1.0, %v4027_v20 }
 0x7fc   : > { %4030 = vrcp.f32 %v2535_v12  ;;  %v2547_v38 = vand.u32 2147483648, %v2535_v12  ;;  %v2545_v1 = vand.u32 2147483647, %v2535_v12  ;;  %vm2541_vm4 = vweird.f32 %v2535_v12 }
 0x7fd   : > { %4032 = vrcp.f32 %v2554_v53  ;;  %v2513_v0 = vpop.f32.mrf.mxu2  ;;  %v2526_v15 = vpop.f32.mrf.mxu3  ;;  %v2566_v28 = vand.u32 2147483648, %v2554_v53  ;;  %v2564_v8 = vand.u32 2147483647, %v2554_v53  ;;  %vm2560_vm5 = vweird.f32 %v2554_v53 }
 0x7fe   : > { %v2548_v39 = vor.u32 1.1754944e-38, %v2547_v38  ;;  %vm2546_vm8 = vcmp.eq.f32.partialorder %v2545_v1, 8.507059e+37 }
 0x7ff   : > { %v2567_v0 = vor.u32 1.1754944e-38, %v2566_v28  ;;  %vm2565_vm9 = vcmp.eq.f32.partialorder %v2564_v8, 8.507059e+37 }
 0x800   : > { %v4029_v43 = vpop.eup %4028 }
 0x801   : > { %v2574_v19 = vadd.f32 1.0, %v4029_v43 }
 0x802   : > { %v4031_v46 = vpop.eup %4030 }
 0x803   : > { %v4033_v58 = vpop.eup %4032  ;;  %v2537_v29 = vmul.f32 %v4031_v46, %v2535_v12  ;;  %4034 = vrcp.f32 %v2574_v19  ;;  %vm2542_vm2 = vweird.f32 %v4031_v46  ;;  %v2600_v12 = vpop.permute.xlu1 %2599  ;;  %vm2580_vm12 = vweird.f32 %v2574_v19 }
 0x804   : > { %v2556_v36 = vmul.f32 %v4033_v58, %v2554_v53  ;;  %4036 = vtanh.f32 %v2530_v7  ;;  %vm2561_vm3 = vweird.f32 %v4033_v58  ;;  %vm2543_vm6 = vmor %vm2541_vm4, %vm2542_vm2  ;;  %vm2601_vm10 = vcmp.eq.s32.totalorder %v2600_v12, 1 }
 0x805   : > { %v2538_v5 = vsub.f32 1.0, %v2537_v29  ;;  %vm2562_vm7 = vmor %vm2560_vm5, %vm2561_vm3  ;;  %v2584_v28 = vand.u32 2147483647, %v2574_v19 }
 0x806   : > { %v2557_v11 = vsub.f32 1.0, %v2556_v36 }
 0x807   : > { %v2539_v51 = vmul.f32 %v4031_v46, %v2538_v5  ;;  %vm2585_vm14 = vcmp.eq.f32.partialorder %v2584_v28, 8.507059e+37 }
 0x808   : > { %v2558_v50 = vmul.f32 %v4033_v58, %v2557_v11 }
 0x809   : > { %v4035_v24 = vpop.eup %4034  ;;  %v2540_v44 = vadd.f32 %v4031_v46, %v2539_v51  ;;  %v2586_v51 = vand.u32 2147483648, %v2574_v19 }
 0x80a   : > { %v2559_v25 = vadd.f32 %v4033_v58, %v2558_v50  ;;  %v2576_v20 = vmul.f32 %v4035_v24, %v2574_v19  ;;  %v4037_v43 = vpop.eup %4036  ;;  %vm2581_vm11 = vweird.f32 %v4035_v24  ;;  %v5808_v19 = vld [vmem:[#allocation42_spill] sm:$0xff] }
 0x80b   : > { %v2544_v15 = vsel %vm2543_vm6, %v4031_v46, %v2540_v44  ;;  %vm2582_vm13 = vmor %vm2580_vm12, %vm2581_vm11  ;;  %v2587_v1 = vor.u32 1.1754944e-38, %v2586_v51 }
 0x80c   : > { %v2549_v21 = vsel %vm2546_vm8, %v2548_v39, %v2544_v15  ;;  %v2563_v56 = vsel %vm2562_vm7, %v4033_v58, %v2559_v25  ;;  %v2577_v7 = vsub.f32 1.0, %v2576_v20 }
 0x80d   : > { %v2568_v29 = vsel %vm2565_vm9, %v2567_v0, %v2563_v56  ;;  %v2591_v36 = vmul.f32 %v4037_v43, %v2549_v21 }
 0x80e   : > { %v2590_v5 = vmul.f32 %v2568_v29, %v5440_v6  ;;  %v2578_v11 = vmul.f32 %v4035_v24, %v2577_v7  ;;  %v5809_v7 = vld [vmem:[#allocation44_spill] sm:$0xff] }
 0x80f   : > { %v871_v29 = vadd.f32 %v5809_v7, %v4943_v31 }
 0x810   : > { %v2592_v53 = vadd.f32 %v2591_v36, %v2590_v5  ;;  %v2579_v38 = vadd.f32 %v4035_v24, %v2578_v11 }
 0x812   : > { %4038 = vtanh.f32 %v2592_v53  ;;  %v5489_v46 = vsel %vm2601_vm10, %v2592_v53, %v5440_v6  ;;  %v2583_v58 = vsel %vm2582_vm13, %v4035_v24, %v2579_v38  ;;  %v5807_v6 = vld [vmem:[#allocation41_spill] sm:$0xff]  ;;  %v773_v24 = vadd.f32 %v5808_v19, %v4933_v34 }
 0x813   : > { %v2588_v8 = vsel %vm2585_vm14, %v2587_v1, %v2583_v58 }
 0x818   : > { %v4039_v50 = vpop.eup %4038 }
 0x819   : > { %v2594_v44 = vmul.f32 %v4039_v50, %v2588_v8 }
 0x81b   : > { %v5492_v39 = vsel %vm2601_vm10, %v2594_v44, %v5443_v33  ;;  %v724_v33 = vadd.f32 %v5807_v6, %v4931_v32 }
 0x81c   : > { %v2608_v25 = vpack.c.bf16 %v5492_v39, %v5492_v39 }
 0x81e   : > { %2617 = vmatmul.bf16.vlgmr.msra.gmra.mxu0 %v2608_v25  ;;  %2630 = vmatmul.bf16.vlgmr.msra.gmra.mxu1 %v2608_v25 }
 0x81f   : > { %2643 = vmatmul.bf16.vlgmr.msra.gmra.mxu2 %v2608_v25  ;;  %2656 = vmatmul.bf16.vlgmr.msra.gmra.mxu3 %v2608_v25  ;;  %v5810_v25 = vld [vmem:[#allocation43_spill] sm:$0xff] }
 0x820   : > { %2875 = vmatpush.bf16.msra.mxu0 %v4427_v37  ;;  %2888 = vmatpush.bf16.msra.mxu1 %v4439_v42  ;;  %v822_v6 = vadd.f32 %v5810_v25, %v5781_v57 }
 0x821   : > { %2901 = vmatpush.bf16.msra.mxu2 %v4453_v47  ;;  %2914 = vmatpush.bf16.msra.mxu3 %v4456_v48 }
 0x824   : > { %2876 = vmatpush.bf16.msra.mxu0 %v4458_v49  ;;  %2889 = vmatpush.bf16.msra.mxu1 %v4467_v52 }
 0x825   : > { %2902 = vmatpush.bf16.msra.mxu2 %v4476_v55  ;;  %2915 = vmatpush.bf16.msra.mxu3 %v4489_v59 }
 0x828   : > { %2877 = vmatpush.bf16.msra.mxu0 %v4491_v60  ;;  %2890 = vmatpush.bf16.msra.mxu1 %v4500_v63 }
 0x829   : > { %2903 = vmatpush.bf16.msra.mxu2 %v4512_v3  ;;  %2916 = vmatpush.bf16.msra.mxu3 %v4516_v4 }
 0x82c   : > { %2878 = vmatpush.bf16.msra.mxu0 %v4531_v9  ;;  %2891 = vmatpush.bf16.msra.mxu1 %v4542_v13 }
 0x82d   : > { %2904 = vmatpush.bf16.msra.mxu2 %v4553_v17  ;;  %2917 = vmatpush.bf16.msra.mxu3 %v4544_v14 }
 0x830   : > { %2879 = vmatpush.bf16.msra.mxu0 %v4568_v22  ;;  %2892 = vmatpush.bf16.msra.mxu1 %v4579_v26 }
 0x831   : > { %2905 = vmatpush.bf16.msra.mxu2 %v4590_v30  ;;  %2918 = vmatpush.bf16.msra.mxu3 %v4581_v27 }
 0x834   : > { %2880 = vmatpush.bf16.msra.mxu0 %v4605_v35  ;;  %2893 = vmatpush.bf16.msra.mxu1 %v4616_v40 }
 0x835   : > { %2906 = vmatpush.bf16.msra.mxu2 %v4627_v45  ;;  %2919 = vmatpush.bf16.msra.mxu3 %v4618_v41 }
 0x838   : > { %2881 = vmatpush.bf16.msra.mxu0 %v4642_v54  ;;  %2894 = vmatpush.bf16.msra.mxu1 %v4653_v61 }
 0x839   : > { %2907 = vmatpush.bf16.msra.mxu2 %v4664_v2  ;;  %2920 = vmatpush.bf16.msra.mxu3 %v4655_v62 }
 0x83c   : > { %2882 = vmatpush.bf16.msra.mxu0 %v4679_v10  ;;  %2895 = vmatpush.bf16.msra.mxu1 %v4690_v16 }
 0x83d   : > { %2908 = vmatpush.bf16.msra.mxu2 %v4710_v23  ;;  %2921 = vmatpush.bf16.msra.mxu3 %v4692_v18 }
 0x89b   : > { %v2618_v20 = vpop.f32.mrf.mxu0  ;;  %v2631_v0 = vpop.f32.mrf.mxu1 }
 0x89c   : > { %v2661_v15 = vadd.f32 %v2618_v20, %v724_v33  ;;  %v2662_v43 = vadd.f32 %v2631_v0, %v773_v24 }
 0x89e   : > { %v3745_v21 = vmul.f32 -1.442695, %v2661_v15  ;;  %v3746_v56 = vmul.f32 -1.442695, %v2662_v43 }
 0x8a0   : > { %4040 = vpow2.f32 %v3745_v21 }
 0x8a1   : > { %4042 = vpow2.f32 %v3746_v56 }
 0x8a2   : > { %v2644_v36 = vpop.f32.mrf.mxu2  ;;  %v2657_v5 = vpop.f32.mrf.mxu3 }
 0x8a3   : > { %v2664_v11 = vadd.f32 %v2657_v5, %v871_v29  ;;  %v2620_v12 = vpop.f32.mrf.mxu0  ;;  %v2633_v53 = vpop.f32.mrf.mxu1  ;;  %v2663_v24 = vadd.f32 %v2644_v36, %v822_v6 }
 0x8a5   : > { %v3747_v38 = vmul.f32 -1.442695, %v2664_v11 }
 0x8a6   : > { %v4041_v51 = vpop.eup %4040 }
 0x8a7   : > { %v4043_v28 = vpop.eup %4042  ;;  %v2668_v58 = vadd.f32 1.0, %v4041_v51  ;;  %4044 = vpow2.f32 %v3747_v38 }
 0x8a8   : > { %v2687_v1 = vadd.f32 1.0, %v4043_v28 }
 0x8a9   : > { %4046 = vrcp.f32 %v2668_v58  ;;  %v2680_v56 = vand.u32 2147483648, %v2668_v58  ;;  %v2678_v5 = vand.u32 2147483647, %v2668_v58  ;;  %vm2674_vm1 = vweird.f32 %v2668_v58 }
 0x8aa   : > { %4048 = vrcp.f32 %v2687_v1  ;;  %v2646_v50 = vpop.f32.mrf.mxu2  ;;  %v2659_v8 = vpop.f32.mrf.mxu3  ;;  %v2699_v7 = vand.u32 2147483648, %v2687_v1  ;;  %v2697_v12 = vand.u32 2147483647, %v2687_v1  ;;  %vm2693_vm2 = vweird.f32 %v2687_v1 }
 0x8ab   : > { %v2681_v36 = vor.u32 1.1754944e-38, %v2680_v56  ;;  %vm2679_vm5 = vcmp.eq.f32.partialorder %v2678_v5, 8.507059e+37 }
 0x8ac   : > { %v2700_v50 = vor.u32 1.1754944e-38, %v2699_v7  ;;  %vm2698_vm6 = vcmp.eq.f32.partialorder %v2697_v12, 8.507059e+37 }
 0x8ad   : > { %v4045_v44 = vpop.eup %4044 }
 0x8ae   : > { %v2707_v33 = vadd.f32 1.0, %v4045_v44 }
 0x8af   : > { %v4047_v19 = vpop.eup %4046 }
 0x8b0   : > { %v4049_v20 = vpop.eup %4048  ;;  %v2670_v0 = vmul.f32 %v4047_v19, %v2668_v58  ;;  %4050 = vrcp.f32 %v2707_v33  ;;  %vm2675_vm15 = vweird.f32 %v4047_v19  ;;  %v2733_v58 = vpop.permute.xlu2 %2732  ;;  %vm2713_vm9 = vweird.f32 %v2707_v33 }
 0x8b1   : > { %v2689_v15 = vmul.f32 %v4049_v20, %v2687_v1  ;;  %4052 = vtanh.f32 %v2663_v24  ;;  %vm2694_vm0 = vweird.f32 %v4049_v20  ;;  %vm2676_vm3 = vmor %vm2674_vm1, %vm2675_vm15  ;;  %vm2734_vm7 = vcmp.eq.s32.totalorder %v2733_v58, 1 }
 0x8b2   : > { %v2671_v43 = vsub.f32 1.0, %v2670_v0  ;;  %vm2695_vm4 = vmor %vm2693_vm2, %vm2694_vm0  ;;  %v2717_v7 = vand.u32 2147483647, %v2707_v33 }
 0x8b3   : > { %v2690_v21 = vsub.f32 1.0, %v2689_v15 }
 0x8b4   : > { %v2672_v29 = vmul.f32 %v4047_v19, %v2671_v43  ;;  %vm2718_vm11 = vcmp.eq.f32.partialorder %v2717_v7, 8.507059e+37 }
 0x8b5   : > { %v2691_v11 = vmul.f32 %v4049_v20, %v2690_v21 }
 0x8b6   : > { %v4051_v53 = vpop.eup %4050  ;;  %v2673_v38 = vadd.f32 %v4047_v19, %v2672_v29  ;;  %v2719_v29 = vand.u32 2147483648, %v2707_v33 }
 0x8b7   : > { %v2692_v51 = vadd.f32 %v4049_v20, %v2691_v11  ;;  %v2709_v28 = vmul.f32 %v4051_v53, %v2707_v33  ;;  %v4053_v44 = vpop.eup %4052  ;;  %vm2714_vm8 = vweird.f32 %v4051_v53  ;;  %v5812_v33 = vld [vmem:[#allocation46_spill] sm:$0xff] }
 0x8b8   : > { %v2677_v8 = vsel %vm2676_vm3, %v4047_v19, %v2673_v38  ;;  %vm2715_vm10 = vmor %vm2713_vm9, %vm2714_vm8  ;;  %v2720_v5 = vor.u32 1.1754944e-38, %v2719_v29 }
 0x8b9   : > { %v2682_v25 = vsel %vm2679_vm5, %v2681_v36, %v2677_v8  ;;  %v2696_v6 = vsel %vm2695_vm4, %v4049_v20, %v2692_v51  ;;  %v2710_v24 = vsub.f32 1.0, %v2709_v28 }
 0x8ba   : > { %v2701_v0 = vsel %vm2698_vm6, %v2700_v50, %v2696_v6  ;;  %v2724_v15 = vmul.f32 %v4053_v44, %v2682_v25 }
 0x8bb   : > { %v2723_v43 = vmul.f32 %v2701_v0, %v5489_v46  ;;  %v2711_v21 = vmul.f32 %v4051_v53, %v2710_v24  ;;  %v5813_v24 = vld [vmem:[#allocation48_spill] sm:$0xff] }
 0x8bc   : > { %v874_v0 = vadd.f32 %v5813_v24, %v4943_v31 }
 0x8bd   : > { %v2725_v1 = vadd.f32 %v2724_v15, %v2723_v43  ;;  %v2712_v56 = vadd.f32 %v4051_v53, %v2711_v21 }
 0x8bf   : > { %4054 = vtanh.f32 %v2725_v1  ;;  %v5538_v19 = vsel %vm2734_vm7, %v2725_v1, %v5489_v46  ;;  %v2716_v20 = vsel %vm2715_vm10, %v4051_v53, %v2712_v56  ;;  %v5811_v46 = vld [vmem:[#allocation45_spill] sm:$0xff]  ;;  %v776_v53 = vadd.f32 %v5812_v33, %v4933_v34 }
 0x8c0   : > { %v2721_v12 = vsel %vm2718_vm11, %v2720_v5, %v2716_v20 }
 0x8c5   : > { %v4055_v11 = vpop.eup %4054 }
 0x8c6   : > { %v2727_v38 = vmul.f32 %v4055_v11, %v2721_v12 }
 0x8c8   : > { %v5541_v36 = vsel %vm2734_vm7, %v2727_v38, %v5492_v39  ;;  %v727_v39 = vadd.f32 %v5811_v46, %v4931_v32 }
 0x8c9   : > { %v2741_v51 = vpack.c.bf16 %v5541_v36, %v5541_v36 }
 0x8cb   : > { %2750 = vmatmul.bf16.vlgmr.msrb.gmra.mxu0 %v2741_v51  ;;  %2763 = vmatmul.bf16.vlgmr.msrb.gmra.mxu1 %v2741_v51 }
 0x8cc   : > { %2776 = vmatmul.bf16.vlgmr.msrb.gmra.mxu2 %v2741_v51  ;;  %2789 = vmatmul.bf16.vlgmr.msrb.gmra.mxu3 %v2741_v51  ;;  %v5814_v51 = vld [vmem:[#allocation47_spill] sm:$0xff] }
 0x8cd   : > { %3008 = vmatpush.bf16.msrb.mxu0 %v4427_v37  ;;  %3021 = vmatpush.bf16.msrb.mxu1 %v4439_v42  ;;  %v825_v46 = vadd.f32 %v5814_v51, %v5781_v57 }
 0x8ce   : > { %3034 = vmatpush.bf16.msrb.mxu2 %v4453_v47  ;;  %3047 = vmatpush.bf16.msrb.mxu3 %v4456_v48 }
 0x8d1   : > { %3009 = vmatpush.bf16.msrb.mxu0 %v4458_v49  ;;  %3022 = vmatpush.bf16.msrb.mxu1 %v4467_v52 }
 0x8d2   : > { %3035 = vmatpush.bf16.msrb.mxu2 %v4476_v55  ;;  %3048 = vmatpush.bf16.msrb.mxu3 %v4489_v59 }
 0x8d5   : > { %3010 = vmatpush.bf16.msrb.mxu0 %v4491_v60  ;;  %3023 = vmatpush.bf16.msrb.mxu1 %v4500_v63 }
 0x8d6   : > { %3036 = vmatpush.bf16.msrb.mxu2 %v4512_v3  ;;  %3049 = vmatpush.bf16.msrb.mxu3 %v4516_v4 }
 0x8d9   : > { %3011 = vmatpush.bf16.msrb.mxu0 %v4531_v9  ;;  %3024 = vmatpush.bf16.msrb.mxu1 %v4542_v13 }
 0x8da   : > { %3037 = vmatpush.bf16.msrb.mxu2 %v4553_v17  ;;  %3050 = vmatpush.bf16.msrb.mxu3 %v4544_v14 }
 0x8dd   : > { %3012 = vmatpush.bf16.msrb.mxu0 %v4568_v22  ;;  %3025 = vmatpush.bf16.msrb.mxu1 %v4579_v26 }
 0x8de   : > { %3038 = vmatpush.bf16.msrb.mxu2 %v4590_v30  ;;  %3051 = vmatpush.bf16.msrb.mxu3 %v4581_v27 }
 0x8e1   : > { %3013 = vmatpush.bf16.msrb.mxu0 %v4605_v35  ;;  %3026 = vmatpush.bf16.msrb.mxu1 %v4616_v40 }
 0x8e2   : > { %3039 = vmatpush.bf16.msrb.mxu2 %v4627_v45  ;;  %3052 = vmatpush.bf16.msrb.mxu3 %v4618_v41 }
 0x8e5   : > { %3014 = vmatpush.bf16.msrb.mxu0 %v4642_v54  ;;  %3027 = vmatpush.bf16.msrb.mxu1 %v4653_v61 }
 0x8e6   : > { %3040 = vmatpush.bf16.msrb.mxu2 %v4664_v2  ;;  %3053 = vmatpush.bf16.msrb.mxu3 %v4655_v62 }
 0x8e9   : > { %3015 = vmatpush.bf16.msrb.mxu0 %v4679_v10  ;;  %3028 = vmatpush.bf16.msrb.mxu1 %v4690_v16 }
 0x8ea   : > { %3041 = vmatpush.bf16.msrb.mxu2 %v4710_v23  ;;  %3054 = vmatpush.bf16.msrb.mxu3 %v4692_v18 }
 0x948   : > { %v2751_v28 = vpop.f32.mrf.mxu0  ;;  %v2764_v50 = vpop.f32.mrf.mxu1 }
 0x949   : > { %v2794_v8 = vadd.f32 %v2751_v28, %v727_v39  ;;  %v2795_v44 = vadd.f32 %v2764_v50, %v776_v53 }
 0x94b   : > { %v3748_v25 = vmul.f32 -1.442695, %v2794_v8  ;;  %v3749_v6 = vmul.f32 -1.442695, %v2795_v44 }
 0x94d   : > { %4056 = vpow2.f32 %v3748_v25 }
 0x94e   : > { %4058 = vpow2.f32 %v3749_v6 }
 0x94f   : > { %v2777_v15 = vpop.f32.mrf.mxu2  ;;  %v2790_v43 = vpop.f32.mrf.mxu3 }
 0x950   : > { %v2797_v21 = vadd.f32 %v2790_v43, %v874_v0  ;;  %v2753_v58 = vpop.f32.mrf.mxu0  ;;  %v2766_v1 = vpop.f32.mrf.mxu1  ;;  %v2796_v53 = vadd.f32 %v2777_v15, %v825_v46 }
 0x952   : > { %v3750_v56 = vmul.f32 -1.442695, %v2797_v21 }
 0x953   : > { %v4057_v29 = vpop.eup %4056 }
 0x954   : > { %v4059_v7 = vpop.eup %4058  ;;  %v2801_v20 = vadd.f32 1.0, %v4057_v29  ;;  %4060 = vpow2.f32 %v3750_v56 }
 0x955   : > { %v2820_v5 = vadd.f32 1.0, %v4059_v7 }
 0x956   : > { %4062 = vrcp.f32 %v2801_v20  ;;  %v2813_v6 = vand.u32 2147483648, %v2801_v20  ;;  %v2811_v43 = vand.u32 2147483647, %v2801_v20  ;;  %vm2807_vm14 = vweird.f32 %v2801_v20 }
 0x957   : > { %4064 = vrcp.f32 %v2820_v5  ;;  %v2779_v11 = vpop.f32.mrf.mxu2  ;;  %v2792_v12 = vpop.f32.mrf.mxu3  ;;  %v2832_v24 = vand.u32 2147483648, %v2820_v5  ;;  %v2830_v58 = vand.u32 2147483647, %v2820_v5  ;;  %vm2826_vm15 = vweird.f32 %v2820_v5 }
 0x958   : > { %v2814_v15 = vor.u32 1.1754944e-38, %v2813_v6  ;;  %vm2812_vm2 = vcmp.eq.f32.partialorder %v2811_v43, 8.507059e+37 }
 0x959   : > { %v2833_v11 = vor.u32 1.1754944e-38, %v2832_v24  ;;  %vm2831_vm3 = vcmp.eq.f32.partialorder %v2830_v58, 8.507059e+37 }
 0x95a   : > { %v4061_v38 = vpop.eup %4060 }
 0x95b   : > { %v2840_v39 = vadd.f32 1.0, %v4061_v38 }
 0x95c   : > { %v4063_v33 = vpop.eup %4062 }
 0x95d   : > { %v4065_v28 = vpop.eup %4064  ;;  %v2803_v50 = vmul.f32 %v4063_v33, %v2801_v20  ;;  %4066 = vrcp.f32 %v2840_v39  ;;  %vm2808_vm12 = vweird.f32 %v4063_v33  ;;  %v2866_v20 = vpop.permute.xlu0 %2865  ;;  %vm2846_vm6 = vweird.f32 %v2840_v39 }
 0x95e   : > { %v2822_v8 = vmul.f32 %v4065_v28, %v2820_v5  ;;  %4068 = vtanh.f32 %v2796_v53  ;;  %vm2827_vm13 = vweird.f32 %v4065_v28  ;;  %vm2809_vm0 = vmor %vm2807_vm14, %vm2808_vm12  ;;  %vm2867_vm4 = vcmp.eq.s32.totalorder %v2866_v20, 1 }
 0x95f   : > { %v2804_v44 = vsub.f32 1.0, %v2803_v50  ;;  %vm2828_vm1 = vmor %vm2826_vm15, %vm2827_vm13  ;;  %v2850_v24 = vand.u32 2147483647, %v2840_v39 }
 0x960   : > { %v2823_v25 = vsub.f32 1.0, %v2822_v8 }
 0x961   : > { %v2805_v0 = vmul.f32 %v4063_v33, %v2804_v44  ;;  %vm2851_vm8 = vcmp.eq.f32.partialorder %v2850_v24, 8.507059e+37 }
 0x962   : > { %v2824_v21 = vmul.f32 %v4065_v28, %v2823_v25 }
 0x963   : > { %v4067_v1 = vpop.eup %4066  ;;  %v2806_v56 = vadd.f32 %v4063_v33, %v2805_v0  ;;  %v2852_v0 = vand.u32 2147483648, %v2840_v39 }
 0x964   : > { %v2825_v29 = vadd.f32 %v4065_v28, %v2824_v21  ;;  %v2842_v7 = vmul.f32 %v4067_v1, %v2840_v39  ;;  %v4069_v38 = vpop.eup %4068  ;;  %vm2847_vm5 = vweird.f32 %v4067_v1 }
 0x965   : > { %v2810_v12 = vsel %vm2809_vm0, %v4063_v33, %v2806_v56  ;;  %vm2848_vm7 = vmor %vm2846_vm6, %vm2847_vm5  ;;  %v2853_v43 = vor.u32 1.1754944e-38, %v2852_v0 }
 0x966   : > { %v2815_v51 = vsel %vm2812_vm2, %v2814_v15, %v2810_v12  ;;  %v2829_v46 = vsel %vm2828_vm1, %v4065_v28, %v2825_v29  ;;  %v2843_v53 = vsub.f32 1.0, %v2842_v7 }
 0x967   : > { %v2834_v50 = vsel %vm2831_vm3, %v2833_v11, %v2829_v46  ;;  %v2857_v8 = vmul.f32 %v4069_v38, %v2815_v51 }
 0x968   : > { %v2856_v44 = vmul.f32 %v2834_v50, %v5538_v19  ;;  %v2844_v25 = vmul.f32 %v4067_v1, %v2843_v53 }
 0x96a   : > { %v2858_v5 = vadd.f32 %v2857_v8, %v2856_v44  ;;  %v2845_v6 = vadd.f32 %v4067_v1, %v2844_v25 }
 0x96c   : > { %4070 = vtanh.f32 %v2858_v5  ;;  %v5587_v33 = vsel %vm2867_vm4, %v2858_v5, %v5538_v19  ;;  %v2849_v28 = vsel %vm2848_vm7, %v4067_v1, %v2845_v6 }
 0x96d   : > { %v2854_v58 = vsel %vm2851_vm8, %v2853_v43, %v2849_v28 }
 0x972   : > { %v4071_v21 = vpop.eup %4070 }
 0x973   : > { %v2860_v56 = vmul.f32 %v4071_v21, %v2854_v58  ;;  %v2999_v21 = vpop.permute.xlu1 %2998 }
 0x974   : > { %vm3000_vm1 = vcmp.eq.s32.totalorder %v2999_v21, 1 }
 0x975   : > { %v5590_v15 = vsel %vm2867_vm4, %v2860_v56, %v5541_v36 }
 0x976   : > { %v2874_v29 = vpack.c.bf16 %v5590_v15, %v5590_v15 }
 0x978   : > { %2883 = vmatmul.bf16.vlgmr.msra.gmra.mxu0 %v2874_v29  ;;  %2896 = vmatmul.bf16.vlgmr.msra.gmra.mxu1 %v2874_v29 }
 0x979   : > { %2909 = vmatmul.bf16.vlgmr.msra.gmra.mxu2 %v2874_v29  ;;  %2922 = vmatmul.bf16.vlgmr.msra.gmra.mxu3 %v2874_v29 }
 0x97a   : > { %3141 = vmatpush.bf16.msra.mxu0 %v4427_v37  ;;  %3154 = vmatpush.bf16.msra.mxu1 %v4439_v42  ;;  %v5815_v37 = vld [vmem:[#allocation49_spill] sm:$0xff] }
 0x97b   : > { %3167 = vmatpush.bf16.msra.mxu2 %v4453_v47  ;;  %3180 = vmatpush.bf16.msra.mxu3 %v4456_v48  ;;  %v729_v42 = vadd.f32 %v5815_v37, %v4931_v32  ;;  %v5816_v47 = vld [vmem:[#allocation50_spill] sm:$0xff] }
 0x97c   : > { %v778_v48 = vadd.f32 %v5816_v47, %v4933_v34 }
 0x97e   : > { %3142 = vmatpush.bf16.msra.mxu0 %v4458_v49  ;;  %3155 = vmatpush.bf16.msra.mxu1 %v4467_v52 }
 0x97f   : > { %3168 = vmatpush.bf16.msra.mxu2 %v4476_v55  ;;  %3181 = vmatpush.bf16.msra.mxu3 %v4489_v59 }
 0x982   : > { %3143 = vmatpush.bf16.msra.mxu0 %v4491_v60  ;;  %3156 = vmatpush.bf16.msra.mxu1 %v4500_v63 }
 0x983   : > { %3169 = vmatpush.bf16.msra.mxu2 %v4512_v3  ;;  %3182 = vmatpush.bf16.msra.mxu3 %v4516_v4  ;;  %v5817_v3 = vld [vmem:[#allocation52_spill] sm:$0xff] }
 0x984   : > { %v876_v4 = vadd.f32 %v5817_v3, %v4943_v31 }
 0x986   : > { %3144 = vmatpush.bf16.msra.mxu0 %v4531_v9  ;;  %3157 = vmatpush.bf16.msra.mxu1 %v4542_v13 }
 0x987   : > { %3170 = vmatpush.bf16.msra.mxu2 %v4553_v17  ;;  %3183 = vmatpush.bf16.msra.mxu3 %v4544_v14 }
 0x98a   : > { %3145 = vmatpush.bf16.msra.mxu0 %v4568_v22  ;;  %3158 = vmatpush.bf16.msra.mxu1 %v4579_v26 }
 0x98b   : > { %3171 = vmatpush.bf16.msra.mxu2 %v4590_v30  ;;  %3184 = vmatpush.bf16.msra.mxu3 %v4581_v27 }
 0x98e   : > { %3146 = vmatpush.bf16.msra.mxu0 %v4605_v35  ;;  %3159 = vmatpush.bf16.msra.mxu1 %v4616_v40 }
 0x98f   : > { %3172 = vmatpush.bf16.msra.mxu2 %v4627_v45  ;;  %3185 = vmatpush.bf16.msra.mxu3 %v4618_v41 }
 0x992   : > { %3147 = vmatpush.bf16.msra.mxu0 %v4642_v54  ;;  %3160 = vmatpush.bf16.msra.mxu1 %v4653_v61  ;;  %v5818_v61 = vld [vmem:[#allocation51_spill] sm:$0xff] }
 0x993   : > { %3173 = vmatpush.bf16.msra.mxu2 %v4664_v2  ;;  %3186 = vmatpush.bf16.msra.mxu3 %v4655_v62  ;;  %v827_v62 = vadd.f32 %v5818_v61, %v5781_v57 }
 0x996   : > { %3148 = vmatpush.bf16.msra.mxu0 %v4679_v10  ;;  %3161 = vmatpush.bf16.msra.mxu1 %v4690_v16 }
 0x997   : > { %3174 = vmatpush.bf16.msra.mxu2 %v4710_v23  ;;  %3187 = vmatpush.bf16.msra.mxu3 %v4692_v18 }
 0x9f5   : > { %v2884_v49 = vpop.f32.mrf.mxu0  ;;  %v2897_v52 = vpop.f32.mrf.mxu1 }
 0x9f6   : > { %v2927_v55 = vadd.f32 %v2884_v49, %v729_v42  ;;  %v2928_v59 = vadd.f32 %v2897_v52, %v778_v48 }
 0x9f8   : > { %v3751_v60 = vmul.f32 -1.442695, %v2927_v55  ;;  %v3752_v63 = vmul.f32 -1.442695, %v2928_v59 }
 0x9fa   : > { %4072 = vpow2.f32 %v3751_v60 }
 0x9fb   : > { %4074 = vpow2.f32 %v3752_v63 }
 0x9fc   : > { %v2910_v9 = vpop.f32.mrf.mxu2  ;;  %v2923_v13 = vpop.f32.mrf.mxu3 }
 0x9fd   : > { %v2930_v14 = vadd.f32 %v2923_v13, %v876_v4  ;;  %v2886_v17 = vpop.f32.mrf.mxu0  ;;  %v2899_v22 = vpop.f32.mrf.mxu1  ;;  %v2929_v16 = vadd.f32 %v2910_v9, %v827_v62  ;;  %v5820_v9 = vld [vmem:[#allocation54_spill] sm:$0xff] }
 0x9fe   : > { %v781_v13 = vadd.f32 %v5820_v9, %v4933_v34 }
 0x9ff   : > { %v3753_v26 = vmul.f32 -1.442695, %v2930_v14 }
 0xa00   : > { %v4073_v27 = vpop.eup %4072 }
 0xa01   : > { %v4075_v30 = vpop.eup %4074  ;;  %v2934_v35 = vadd.f32 1.0, %v4073_v27  ;;  %4076 = vpow2.f32 %v3753_v26 }
 0xa02   : > { %v2953_v40 = vadd.f32 1.0, %v4075_v30  ;;  %v5821_v30 = vld [vmem:[#allocation56_spill] sm:$0xff] }
 0xa03   : > { %4078 = vrcp.f32 %v2934_v35  ;;  %v2946_v1 = vand.u32 2147483648, %v2934_v35  ;;  %v2944_v12 = vand.u32 2147483647, %v2934_v35  ;;  %vm2940_vm11 = vweird.f32 %v2934_v35 }
 0xa04   : > { %4080 = vrcp.f32 %v2953_v40  ;;  %v2912_v41 = vpop.f32.mrf.mxu2  ;;  %v2925_v45 = vpop.f32.mrf.mxu3  ;;  %v2965_v7 = vand.u32 2147483648, %v2953_v40  ;;  %v2963_v51 = vand.u32 2147483647, %v2953_v40  ;;  %vm2959_vm12 = vweird.f32 %v2953_v40 }
 0xa05   : > { %v2947_v50 = vor.u32 1.1754944e-38, %v2946_v1  ;;  %vm2945_vm15 = vcmp.eq.f32.partialorder %v2944_v12, 8.507059e+37 }
 0xa06   : > { %v2966_v25 = vor.u32 1.1754944e-38, %v2965_v7  ;;  %vm2964_vm0 = vcmp.eq.f32.partialorder %v2963_v51, 8.507059e+37 }
 0xa07   : > { %v4077_v54 = vpop.eup %4076 }
 0xa08   : > { %v2973_v2 = vadd.f32 1.0, %v4077_v54 }
 0xa09   : > { %v4079_v10 = vpop.eup %4078 }
 0xa0a   : > { %v4081_v18 = vpop.eup %4080  ;;  %v2936_v23 = vmul.f32 %v4079_v10, %v2934_v35  ;;  %4082 = vrcp.f32 %v2973_v2  ;;  %vm2941_vm9 = vweird.f32 %v4079_v10  ;;  %v2985_v42 = vand.u32 2147483648, %v2973_v2 }
 0xa0b   : > { %v2955_v19 = vmul.f32 %v4081_v18, %v2953_v40  ;;  %4084 = vtanh.f32 %v2929_v16  ;;  %vm2960_vm10 = vweird.f32 %v4081_v18  ;;  %vm2942_vm13 = vmor %vm2940_vm11, %vm2941_vm9  ;;  %vm2979_vm3 = vweird.f32 %v2973_v2 }
 0xa0c   : > { %v2937_v36 = vsub.f32 1.0, %v2936_v23  ;;  %vm2961_vm14 = vmor %vm2959_vm12, %vm2960_vm10  ;;  %v2983_v48 = vand.u32 2147483647, %v2973_v2  ;;  %v2986_v52 = vor.u32 1.1754944e-38, %v2985_v42  ;;  %v879_v35 = vadd.f32 %v5821_v30, %v4943_v31 }
 0xa0d   : > { %v2956_v39 = vsub.f32 1.0, %v2955_v19 }
 0xa0e   : > { %v2938_v11 = vmul.f32 %v4079_v10, %v2937_v36  ;;  %vm2984_vm5 = vcmp.eq.f32.partialorder %v2983_v48, 8.507059e+37 }
 0xa0f   : > { %v2957_v38 = vmul.f32 %v4081_v18, %v2956_v39  ;;  %v5822_v39 = vld [vmem:[#allocation55_spill] sm:$0xff] }
 0xa10   : > { %v4083_v46 = vpop.eup %4082  ;;  %v2939_v53 = vadd.f32 %v4079_v10, %v2938_v11  ;;  %v830_v1 = vadd.f32 %v5822_v39, %v5781_v57 }
 0xa11   : > { %v2958_v8 = vadd.f32 %v4081_v18, %v2957_v38  ;;  %v2975_v44 = vmul.f32 %v4083_v46, %v2973_v2  ;;  %v4085_v5 = vpop.eup %4084  ;;  %vm2980_vm2 = vweird.f32 %v4083_v46 }
 0xa12   : > { %v2943_v20 = vsel %vm2942_vm13, %v4079_v10, %v2939_v53  ;;  %vm2981_vm4 = vmor %vm2979_vm3, %vm2980_vm2 }
 0xa13   : > { %v2948_v6 = vsel %vm2945_vm15, %v2947_v50, %v2943_v20  ;;  %v2962_v0 = vsel %vm2961_vm14, %v4081_v18, %v2958_v8  ;;  %v2976_v24 = vsub.f32 1.0, %v2975_v44 }
 0xa14   : > { %v2967_v28 = vsel %vm2964_vm0, %v2966_v25, %v2962_v0  ;;  %v2990_v43 = vmul.f32 %v4085_v5, %v2948_v6 }
 0xa15   : > { %v2989_v58 = vmul.f32 %v2967_v28, %v5587_v33  ;;  %v2977_v56 = vmul.f32 %v4083_v46, %v2976_v24 }
 0xa17   : > { %v2991_v29 = vadd.f32 %v2990_v43, %v2989_v58  ;;  %v2978_v37 = vadd.f32 %v4083_v46, %v2977_v56 }
 0xa19   : > { %4086 = vtanh.f32 %v2991_v29  ;;  %v5636_v47 = vsel %vm3000_vm1, %v2991_v29, %v5587_v33  ;;  %v2982_v49 = vsel %vm2981_vm4, %v4083_v46, %v2978_v37  ;;  %v5819_v33 = vld [vmem:[#allocation53_spill] sm:$0xff] }
 0xa1a   : > { %v2987_v59 = vsel %vm2984_vm5, %v2986_v52, %v2982_v49  ;;  %v732_v4 = vadd.f32 %v5819_v33, %v4931_v32 }
 0xa1f   : > { %v4087_v55 = vpop.eup %4086 }
 0xa20   : > { %v2993_v60 = vmul.f32 %v4087_v55, %v2987_v59  ;;  %v3132_v55 = vpop.permute.xlu2 %3131 }
 0xa21   : > { %vm3133_vm14 = vcmp.eq.s32.totalorder %v3132_v55, 1 }
 0xa22   : > { %v5639_v63 = vsel %vm3000_vm1, %v2993_v60, %v5590_v15 }
 0xa23   : > { %v3007_v3 = vpack.c.bf16 %v5639_v63, %v5639_v63 }
 0xa25   : > { %3016 = vmatmul.bf16.vlgmr.msrb.gmra.mxu0 %v3007_v3  ;;  %3029 = vmatmul.bf16.vlgmr.msrb.gmra.mxu1 %v3007_v3 }
 0xa26   : > { %3042 = vmatmul.bf16.vlgmr.msrb.gmra.mxu2 %v3007_v3  ;;  %3055 = vmatmul.bf16.vlgmr.msrb.gmra.mxu3 %v3007_v3 }
 0xaa2   : > { %v3017_v14 = vpop.f32.mrf.mxu0  ;;  %v3030_v17 = vpop.f32.mrf.mxu1 }
 0xaa3   : > { %v3060_v22 = vadd.f32 %v3017_v14, %v732_v4  ;;  %v3061_v26 = vadd.f32 %v3030_v17, %v781_v13 }
 0xaa5   : > { %v3754_v27 = vmul.f32 -1.442695, %v3060_v22  ;;  %v3755_v15 = vmul.f32 -1.442695, %v3061_v26 }
 0xaa7   : > { %4088 = vpow2.f32 %v3754_v27 }
 0xaa8   : > { %4090 = vpow2.f32 %v3755_v15 }
 0xaa9   : > { %v3043_v40 = vpop.f32.mrf.mxu2  ;;  %v3056_v41 = vpop.f32.mrf.mxu3 }
 0xaaa   : > { %v3063_v45 = vadd.f32 %v3056_v41, %v879_v35  ;;  %v3019_v54 = vpop.f32.mrf.mxu0  ;;  %v3032_v61 = vpop.f32.mrf.mxu1  ;;  %v3062_v12 = vadd.f32 %v3043_v40, %v830_v1  ;;  %v5824_v40 = vld [vmem:[#allocation58_spill] sm:$0xff] }
 0xaab   : > { %v783_v41 = vadd.f32 %v5824_v40, %v4933_v34 }
 0xaac   : > { %v3756_v62 = vmul.f32 -1.442695, %v3063_v45 }
 0xaad   : > { %v4089_v2 = vpop.eup %4088 }
 0xaae   : > { %v4091_v10 = vpop.eup %4090  ;;  %v3067_v16 = vadd.f32 1.0, %v4089_v2  ;;  %4092 = vpow2.f32 %v3756_v62 }
 0xaaf   : > { %v3086_v18 = vadd.f32 1.0, %v4091_v10  ;;  %v5825_v10 = vld [vmem:[#allocation60_spill] sm:$0xff] }
 0xab0   : > { %4094 = vrcp.f32 %v3067_v16  ;;  %v3079_v8 = vand.u32 2147483648, %v3067_v16  ;;  %v3077_v20 = vand.u32 2147483647, %v3067_v16  ;;  %vm3073_vm8 = vweird.f32 %v3067_v16 }
 0xab1   : > { %4096 = vrcp.f32 %v3086_v18  ;;  %v3045_v23 = vpop.f32.mrf.mxu2  ;;  %v3058_v19 = vpop.f32.mrf.mxu3  ;;  %v3098_v44 = vand.u32 2147483648, %v3086_v18  ;;  %v3096_v6 = vand.u32 2147483647, %v3086_v18  ;;  %vm3092_vm9 = vweird.f32 %v3086_v18 }
 0xab2   : > { %v3080_v28 = vor.u32 1.1754944e-38, %v3079_v8  ;;  %vm3078_vm12 = vcmp.eq.f32.partialorder %v3077_v20, 8.507059e+37 }
 0xab3   : > { %v3099_v58 = vor.u32 1.1754944e-38, %v3098_v44  ;;  %vm3097_vm13 = vcmp.eq.f32.partialorder %v3096_v6, 8.507059e+37 }
 0xab4   : > { %v4093_v36 = vpop.eup %4092 }
 0xab5   : > { %v3106_v7 = vadd.f32 1.0, %v4093_v36 }
 0xab6   : > { %v4095_v11 = vpop.eup %4094 }
 0xab7   : > { %v4097_v38 = vpop.eup %4096  ;;  %v3069_v51 = vmul.f32 %v4095_v11, %v3067_v16  ;;  %4098 = vrcp.f32 %v3106_v7  ;;  %vm3074_vm6 = vweird.f32 %v4095_v11  ;;  %v3118_v4 = vand.u32 2147483648, %v3106_v7 }
 0xab8   : > { %v3088_v46 = vmul.f32 %v4097_v38, %v3086_v18  ;;  %4100 = vtanh.f32 %v3062_v12  ;;  %vm3093_vm7 = vweird.f32 %v4097_v38  ;;  %vm3075_vm10 = vmor %vm3073_vm8, %vm3074_vm6  ;;  %vm3112_vm0 = vweird.f32 %v3106_v7 }
 0xab9   : > { %v3070_v53 = vsub.f32 1.0, %v3069_v51  ;;  %vm3094_vm11 = vmor %vm3092_vm9, %vm3093_vm7  ;;  %v3116_v13 = vand.u32 2147483647, %v3106_v7  ;;  %v3119_v17 = vor.u32 1.1754944e-38, %v3118_v4  ;;  %v881_v16 = vadd.f32 %v5825_v10, %v4943_v31  ;;  %v3265_v4 = vpop.permute.xlu0 %3264 }
 0xaba   : > { %v3089_v50 = vsub.f32 1.0, %v3088_v46  ;;  %v5826_v46 = vld [vmem:[#allocation59_spill] sm:$0xff] }
 0xabb   : > { %v3071_v25 = vmul.f32 %v4095_v11, %v3070_v53  ;;  %vm3117_vm2 = vcmp.eq.f32.partialorder %v3116_v13, 8.507059e+37  ;;  %v832_v31 = vadd.f32 %v5826_v46, %v5781_v57 }
 0xabc   : > { %v3090_v5 = vmul.f32 %v4097_v38, %v3089_v50 }
 0xabd   : > { %v4099_v0 = vpop.eup %4098  ;;  %v3072_v24 = vadd.f32 %v4095_v11, %v3071_v25 }
 0xabe   : > { %v3091_v43 = vadd.f32 %v4097_v38, %v3090_v5  ;;  %v3108_v21 = vmul.f32 %v4099_v0, %v3106_v7  ;;  %v4101_v29 = vpop.eup %4100  ;;  %vm3113_vm15 = vweird.f32 %v4099_v0 }
 0xabf   : > { %v3076_v56 = vsel %vm3075_vm10, %v4095_v11, %v3072_v24  ;;  %vm3114_vm1 = vmor %vm3112_vm0, %vm3113_vm15 }
 0xac0   : > { %v3081_v37 = vsel %vm3078_vm12, %v3080_v28, %v3076_v56  ;;  %v3095_v42 = vsel %vm3094_vm11, %v4097_v38, %v3091_v43  ;;  %v3109_v48 = vsub.f32 1.0, %v3108_v21  ;;  %vm3266_vm11 = vcmp.eq.s32.totalorder %v3265_v4, 1 }
 0xac1   : > { %v3100_v49 = vsel %vm3097_vm13, %v3099_v58, %v3095_v42  ;;  %v3123_v52 = vmul.f32 %v4101_v29, %v3081_v37 }
 0xac2   : > { %v3122_v59 = vmul.f32 %v3100_v49, %v5636_v47  ;;  %v3110_v60 = vmul.f32 %v4099_v0, %v3109_v48 }
 0xac4   : > { %v3124_v3 = vadd.f32 %v3123_v52, %v3122_v59  ;;  %v3111_v33 = vadd.f32 %v4099_v0, %v3110_v60 }
 0xac6   : > { %4102 = vtanh.f32 %v3124_v3  ;;  %v5653_v9 = vsel %vm3133_vm14, %v3124_v3, %v5636_v47  ;;  %v3115_v14 = vsel %vm3114_vm1, %v4099_v0, %v3111_v33  ;;  %v5823_v47 = vld [vmem:[#allocation57_spill] sm:$0xff] }
 0xac7   : > { %v3120_v26 = vsel %vm3117_vm2, %v3119_v17, %v3115_v14  ;;  %v734_v35 = vadd.f32 %v5823_v47, %v4931_v32 }
 0xacc   : > { %v4103_v22 = vpop.eup %4102 }
 0xacd   : > { %v3126_v27 = vmul.f32 %v4103_v22, %v3120_v26 }
 0xacf   : > { %v5656_v15 = vsel %vm3133_vm14, %v3126_v27, %v5639_v63 }
 0xad0   : > { %v3140_v30 = vpack.c.bf16 %v5656_v15, %v5656_v15 }
 0xad2   : > { %3149 = vmatmul.bf16.vlgmr.msra.gmra.mxu0 %v3140_v30  ;;  %3162 = vmatmul.bf16.vlgmr.msra.gmra.mxu1 %v3140_v30 }
 0xad3   : > { %3175 = vmatmul.bf16.vlgmr.msra.gmra.mxu2 %v3140_v30  ;;  %3188 = vmatmul.bf16.vlgmr.msra.gmra.mxu3 %v3140_v30 }
 0xb4f   : > { %v3150_v45 = vpop.f32.mrf.mxu0  ;;  %v3163_v54 = vpop.f32.mrf.mxu1 }
 0xb50   : > { %v3193_v61 = vadd.f32 %v3150_v45, %v734_v35  ;;  %v3194_v62 = vadd.f32 %v3163_v54, %v783_v41 }
 0xb52   : > { %v3757_v2 = vmul.f32 -1.442695, %v3193_v61  ;;  %v3758_v63 = vmul.f32 -1.442695, %v3194_v62 }
 0xb54   : > { %4104 = vpow2.f32 %v3757_v2 }
 0xb55   : > { %4106 = vpow2.f32 %v3758_v63 }
 0xb56   : > { %v3176_v18 = vpop.f32.mrf.mxu2  ;;  %v3189_v23 = vpop.f32.mrf.mxu3 }
 0xb57   : > { %v3196_v19 = vadd.f32 %v3189_v23, %v881_v16  ;;  %v3152_v36 = vpop.f32.mrf.mxu0  ;;  %v3165_v39 = vpop.f32.mrf.mxu1  ;;  %v3195_v8 = vadd.f32 %v3176_v18, %v832_v31 }
 0xb59   : > { %v3759_v32 = vmul.f32 -1.442695, %v3196_v19 }
 0xb5a   : > { %v4105_v1 = vpop.eup %4104 }
 0xb5b   : > { %v4107_v7 = vpop.eup %4106  ;;  %v3200_v34 = vadd.f32 1.0, %v4105_v1  ;;  %4108 = vpow2.f32 %v3759_v32 }
 0xb5c   : > { %v3219_v11 = vadd.f32 1.0, %v4107_v7 }
 0xb5d   : > { %4110 = vrcp.f32 %v3200_v34  ;;  %v3212_v0 = vand.u32 2147483648, %v3200_v34  ;;  %v3210_v43 = vand.u32 2147483647, %v3200_v34  ;;  %vm3206_vm5 = vweird.f32 %v3200_v34 }
 0xb5e   : > { %4112 = vrcp.f32 %v3219_v11  ;;  %v3178_v12 = vpop.f32.mrf.mxu2  ;;  %v3191_v38 = vpop.f32.mrf.mxu3  ;;  %v3231_v24 = vand.u32 2147483648, %v3219_v11  ;;  %v3229_v58 = vand.u32 2147483647, %v3219_v11  ;;  %vm3225_vm6 = vweird.f32 %v3219_v11 }
 0xb5f   : > { %v3213_v29 = vor.u32 1.1754944e-38, %v3212_v0  ;;  %vm3211_vm9 = vcmp.eq.f32.partialorder %v3210_v43, 8.507059e+37 }
 0xb60   : > { %v3232_v48 = vor.u32 1.1754944e-38, %v3231_v24  ;;  %vm3230_vm10 = vcmp.eq.f32.partialorder %v3229_v58, 8.507059e+37 }
 0xb61   : > { %v4109_v51 = vpop.eup %4108 }
 0xb62   : > { %v3239_v53 = vadd.f32 1.0, %v4109_v51 }
 0xb63   : > { %v4111_v50 = vpop.eup %4110 }
 0xb64   : > { %v4113_v44 = vpop.eup %4112  ;;  %v3202_v25 = vmul.f32 %v4111_v50, %v3200_v34  ;;  %4114 = vrcp.f32 %v3239_v53  ;;  %vm3207_vm3 = vweird.f32 %v4111_v50  ;;  %v3251_v27 = vand.u32 2147483648, %v3239_v53 }
 0xb65   : > { %v3221_v20 = vmul.f32 %v4113_v44, %v3219_v11  ;;  %4116 = vtanh.f32 %v3195_v8  ;;  %vm3226_vm4 = vweird.f32 %v4113_v44  ;;  %vm3208_vm7 = vmor %vm3206_vm5, %vm3207_vm3  ;;  %vm3245_vm13 = vweird.f32 %v3239_v53 }
 0xb66   : > { %v3203_v5 = vsub.f32 1.0, %v3202_v25  ;;  %vm3227_vm8 = vmor %vm3225_vm6, %vm3226_vm4  ;;  %v3249_v30 = vand.u32 2147483647, %v3239_v53  ;;  %v3252_v35 = vor.u32 1.1754944e-38, %v3251_v27 }
 0xb67   : > { %v3222_v6 = vsub.f32 1.0, %v3221_v20 }
 0xb68   : > { %v3204_v28 = vmul.f32 %v4111_v50, %v3203_v5  ;;  %vm3250_vm15 = vcmp.eq.f32.partialorder %v3249_v30, 8.507059e+37 }
 0xb69   : > { %v3223_v21 = vmul.f32 %v4113_v44, %v3222_v6 }
 0xb6a   : > { %v4115_v56 = vpop.eup %4114  ;;  %v3205_v57 = vadd.f32 %v4111_v50, %v3204_v28 }
 0xb6b   : > { %v3224_v37 = vadd.f32 %v4113_v44, %v3223_v21  ;;  %v3241_v42 = vmul.f32 %v4115_v56, %v3239_v53  ;;  %v4117_v52 = vpop.eup %4116  ;;  %vm3246_vm12 = vweird.f32 %v4115_v56 }
 0xb6c   : > { %v3209_v49 = vsel %vm3208_vm7, %v4111_v50, %v3205_v57  ;;  %vm3247_vm14 = vmor %vm3245_vm13, %vm3246_vm12 }
 0xb6d   : > { %v3214_v55 = vsel %vm3211_vm9, %v3213_v29, %v3209_v49  ;;  %v3228_v59 = vsel %vm3227_vm8, %v4113_v44, %v3224_v37  ;;  %v3242_v60 = vsub.f32 1.0, %v3241_v42 }
 0xb6e   : > { %v3233_v3 = vsel %vm3230_vm10, %v3232_v48, %v3228_v59  ;;  %v3256_v33 = vmul.f32 %v4117_v52, %v3214_v55 }
 0xb6f   : > { %v3255_v13 = vmul.f32 %v3233_v3, %v5653_v9  ;;  %v3243_v14 = vmul.f32 %v4115_v56, %v3242_v60 }
 0xb71   : > { %v3257_v17 = vadd.f32 %v3256_v33, %v3255_v13  ;;  %v3244_v22 = vadd.f32 %v4115_v56, %v3243_v14 }
 0xb73   : > { %4118 = vtanh.f32 %v3257_v17  ;;  %v3268_v26 = vsel %vm3266_vm11, %v3257_v17, %v5653_v9  ;;  %v3248_v47 = vsel %vm3247_vm14, %v4115_v56, %v3244_v22 }
 0xb74   : > { %3270 = vst [vmem:[%s412_s20] sm:$0xff] %v3268_v26  ;;  %v3253_v41 = vsel %vm3250_vm15, %v3252_v35, %v3248_v47 }
 0xb79   : > { %v4119_v40 = vpop.eup %4118 }
 0xb7a   : > { %v3259_v45 = vmul.f32 %v4119_v40, %v3253_v41 }
 0xb7c   : > { %v3267_v54 = vsel %vm3266_vm11, %v3259_v45, %v5656_v15 }
 0xb7d   : > { %3269 = vst [vmem:[%s408_s23] sm:$0xff] %v3267_v54 }
 0xb7e PF: > { %s19_s29 = sadd.s32 1, %s4142_s29   ;;  %s5827_s27 = smov %s4138_s28 }
 0xb7f   : > { %p16_p5 = scmp.ge.s32.totalorder %s19_s29, 4   ;;  %s5828_s28 = smov %s5830_s30 }
 0xb81   :  { %18 = sbr.rel (!%p16_p5) target bundleno = 2 (0x2), region = 103 }

// kernel: seq2seq_forward.4
= control target key start
LH: loop header
LB: loop body
LE: loop exit
PB: predicated region body
PF: predicated region fallthrough
CT: control target
= control target key end

     0   :  { %s7457_s0 = inlined_call_operand.vmem [shape: bf16[2,64,128], index: 0, kind: input, shape index: {}]   ;;  %s7458_s1 = inlined_call_operand.vmem [shape: f32[16,128], index: 1, kind: input, shape index: {}]   ;;  %s7459_s2 = inlined_call_operand.vmem [shape: f32[16,128], index: 2, kind: input, shape index: {}]   ;;  %s7460_s3 = inlined_call_operand.vmem [shape: bf16[128,512], index: 3, kind: input, shape index: {}]   ;;  %s7461_s4 = inlined_call_operand.vmem [shape: f32[1,512], index: 4, kind: input, shape index: {}]   ;;  %s7462_s5 = inlined_call_operand.vmem [shape: bf16[128,512], index: 5, kind: input, shape index: {}]   ;;  %s7463_s6 = inlined_call_operand.vmem [shape: f32[2,64,128], index: 6, kind: output, shape index: {0}]   ;;  %s7464_s7 = inlined_call_operand.hbm [shape: f32[16,128], index: 7, kind: output, shape index: {1}]   ;;  %s7465_s8 = inlined_call_operand.hbm [shape: f32[16,128], index: 8, kind: output, shape index: {2}]  }
   0x1   :  { %7467 = sst [smem:[#allocation10_spill]] %s7457_s0 }
   0x2   :  { %14 = vsyncpa [#allocation4], 0 }
   0x3   :  { %16 = vsyncpa [#allocation4 + $0x1], 0 }
   0x4   :  { %17 = vsyncpa [#allocation6], 0 }
   0x5   :  { %19 = vsyncpa [#allocation6 + $0x1], 0  ;;  %s5395_s27 = smov 0   ;;  %s5397_s28 = smov 0  }
   0x6   :  { %s5399_s29 = smov 0   ;;  %s5401_s30 = smov 0  }
   0x7   :  { %s5403_s9 = smov 0   ;;  %s5405_s10 = smov 0  }
   0x8 LB: > { %s3545_s11 = sadd.s32 4294967295, %s5348_s10   ;;  %s3546_s12 = sadd.s32 4294967294, %s5348_s10   ;;  %s5348_s10 = sphi %s5405_s10, %s25_s10   ;;  %s5344_s9 = sphi %s5403_s9, %s7477_s9   ;;  %s5340_s30 = sphi %s5401_s30, %s7476_s30   ;;  %s5336_s29 = sphi %s5399_s29, %s7475_s29   ;;  %s5332_s28 = sphi %s5397_s28, %s7474_s28   ;;  %s5328_s27 = sphi %s5395_s27, %s7473_s27  }
   0x9   : > { %s37_s13 = sadd.s32 1, %s5344_s9  ;;  %s215_s14 = sadd.s32 1, %s5336_s29 }
   0xa   : > { %p39_p0 = scmp.ge.s32.totalorder %s37_s13, 2  ;;  %p225_p1 = scmp.ne.s32.totalorder %s5336_s29, %s5332_s28 }
   0xb   : > { %p226_p2 = scmp.eq.s32.totalorder %s3545_s11, 1  ;;  %p231_p3 = scmp.ne.s32.totalorder %s5332_s28, %s5328_s27 }
   0xc   : > { %s7479_s13 = smov (%p39_p0, %s37_s13), 0  ;;  %p232_p5 = scmp.eq.s32.totalorder %s3546_s12, 1 }
   0xd   : > { %7468 = sst [smem:[#allocation9_spill]] %s7479_s13  ;;  %p5435_p4 = por %p226_p2, %p225_p1 }
   0xe   : > { %s212_s16 = ssub.s32 %s5344_s9, %s7479_s13  ;;  %p3549_p6 = scmp.ge.s32.totalorder %s5348_s10, 1 }
   0xf   : > { %p213_p7 = scmp.eq.s32.totalorder %s212_s16, 0  ;;  %p5442_p8 = por %p232_p5, %p231_p3 }
  0x10   : > { %p312_p9 = scmp.lt.s32.totalorder %s5348_s10, 3 }
  0x11   : > { %s5448_s18 = scalar_select %p213_p7, %s5336_s29, %s215_s14  }
  0x12   : > { %p313_p10 = pnand %p3549_p6, %p312_p9 }
  0x13   : > { %p373_p11 = scmp.lt.s32.totalorder (!%p313_p10), %s5340_s30, 1  ;;  %s7471_s0 = sld [smem:[#allocation10_spill]] (!%p313_p10) }
  0x14   : > { %316 = sbr.rel (%p313_p10) target bundleno = 1506 (0x5e2), region = 44  ;;  %s4752_s13 = sshll.u32 (!%p313_p10), %s5340_s30, 3 }
  0x15   : > { %s3373_s12 = scalar_lea.hbm (!%p313_p10), %s7465_s8, %s4752_s13  ;;  %s5258_s23 = scalar_lea.hbm (!%p313_p10), %s7465_s8, 16 }
  0x19   : > { %v3688_v0 = vld [vmem:[%s7460_s3 + $0xe0] sm:$0xf]  ;;  %v4792_v1 = vld [vmem:[%s7460_s3 + $0xec] sm:$0xf0]  ;;  %v4790_v2 = vld [vmem:[%s7460_s3 + $0xe4] sm:$0xf] }
  0x1a   : > { %v3689_v3 = vor.u32 %v4792_v1, %v3688_v0  ;;  %v3690_v4 = vld [vmem:[%s7460_s3 + $0xf0] sm:$0xf0]  ;;  %v3696_v5 = vld [vmem:[%s7460_s3 + $0xe8] sm:$0xf]  ;;  %v4793_v6 = vld [vmem:[%s7460_s3 + $0xf4] sm:$0xf0] }
  0x1b   : > { %v3693_v7 = vor.u32 %v4790_v2, %v3690_v4  ;;  %v3697_v8 = vor.u32 %v4793_v6, %v3696_v5  ;;  %v4791_v9 = vld [vmem:[%s7460_s3 + $0xec] sm:$0xf]  ;;  %v3698_v10 = vld [vmem:[%s7460_s3 + $0xf8] sm:$0xf0]  ;;  %v3672_v11 = vld [vmem:[%s7460_s3 + $0xc0] sm:$0xf] }
  0x1c   : > { %642 = vmatpush.bf16.msra.mxu0 %v3689_v3  ;;  %v3701_v12 = vor.u32 %v4791_v9, %v3698_v10  ;;  %v4788_v13 = vld [vmem:[%s7460_s3 + $0xcc] sm:$0xf0]  ;;  %v4786_v14 = vld [vmem:[%s7460_s3 + $0xc4] sm:$0xf]  ;;  %v3674_v15 = vld [vmem:[%s7460_s3 + $0xd0] sm:$0xf0] }
  0x1d   : > { %671 = vmatpush.bf16.msra.mxu1 %v3693_v7  ;;  %700 = vmatpush.bf16.msra.mxu2 %v3697_v8  ;;  %v3673_v16 = vor.u32 %v4788_v13, %v3672_v11  ;;  %v3677_v17 = vor.u32 %v4786_v14, %v3674_v15  ;;  %v3680_v18 = vld [vmem:[%s7460_s3 + $0xc8] sm:$0xf]  ;;  %v4789_v19 = vld [vmem:[%s7460_s3 + $0xd4] sm:$0xf0]  ;;  %v4787_v20 = vld [vmem:[%s7460_s3 + $0xcc] sm:$0xf] }
  0x1e   : > { %729 = vmatpush.bf16.msra.mxu3 %v3701_v12  ;;  %v3681_v21 = vor.u32 %v4789_v19, %v3680_v18  ;;  %v3682_v22 = vld [vmem:[%s7460_s3 + $0xd8] sm:$0xf0]  ;;  %v3656_v23 = vld [vmem:[%s7460_s3 + $0xa0] sm:$0xf]  ;;  %v4784_v24 = vld [vmem:[%s7460_s3 + $0xac] sm:$0xf0] }
  0x1f   : > { %v3685_v25 = vor.u32 %v4787_v20, %v3682_v22  ;;  %v4782_v26 = vld [vmem:[%s7460_s3 + $0xa4] sm:$0xf]  ;;  %v3658_v27 = vld [vmem:[%s7460_s3 + $0xb0] sm:$0xf0]  ;;  %v3664_v28 = vld [vmem:[%s7460_s3 + $0xa8] sm:$0xf]  ;;  %v3657_v29 = vor.u32 %v4784_v24, %v3656_v23 }
  0x20   : > { %643 = vmatpush.bf16.msra.mxu0 %v3673_v16  ;;  %v4785_v30 = vld [vmem:[%s7460_s3 + $0xb4] sm:$0xf0]  ;;  %v4783_v31 = vld [vmem:[%s7460_s3 + $0xac] sm:$0xf]  ;;  %v3666_v32 = vld [vmem:[%s7460_s3 + $0xb8] sm:$0xf0]  ;;  %v3661_v33 = vor.u32 %v4782_v26, %v3658_v27 }
  0x21   : > { %672 = vmatpush.bf16.msra.mxu1 %v3677_v17  ;;  %701 = vmatpush.bf16.msra.mxu2 %v3681_v21  ;;  %v3665_v34 = vor.u32 %v4785_v30, %v3664_v28  ;;  %v3640_v35 = vld [vmem:[%s7460_s3 + $0x80] sm:$0xf]  ;;  %v4780_v36 = vld [vmem:[%s7460_s3 + $0x8c] sm:$0xf0]  ;;  %v4778_v37 = vld [vmem:[%s7460_s3 + $0x84] sm:$0xf]  ;;  %v3669_v38 = vor.u32 %v4783_v31, %v3666_v32 }
  0x22   : > { %730 = vmatpush.bf16.msra.mxu3 %v3685_v25  ;;  %v3642_v39 = vld [vmem:[%s7460_s3 + $0x90] sm:$0xf0]  ;;  %v3648_v40 = vld [vmem:[%s7460_s3 + $0x88] sm:$0xf]  ;;  %v4781_v41 = vld [vmem:[%s7460_s3 + $0x94] sm:$0xf0]  ;;  %v3641_v44 = vor.u32 %v4780_v36, %v3640_v35 }
  0x23   : > { %v4779_v42 = vld [vmem:[%s7460_s3 + $0x8c] sm:$0xf]  ;;  %v3650_v43 = vld [vmem:[%s7460_s3 + $0x98] sm:$0xf0]  ;;  %v3645_v45 = vor.u32 %v4778_v37, %v3642_v39  ;;  %v3649_v46 = vor.u32 %v4781_v41, %v3648_v40  ;;  %v3624_v47 = vld [vmem:[%s7460_s3 + $0x60] sm:$0xf] }
  0x24   : > { %644 = vmatpush.bf16.msra.mxu0 %v3657_v29  ;;  %v4776_v48 = vld [vmem:[%s7460_s3 + $0x6c] sm:$0xf0]  ;;  %v4774_v49 = vld [vmem:[%s7460_s3 + $0x64] sm:$0xf]  ;;  %v3653_v50 = vor.u32 %v4779_v42, %v3650_v43  ;;  %v3626_v51 = vld [vmem:[%s7460_s3 + $0x70] sm:$0xf0] }
  0x25   : > { %673 = vmatpush.bf16.msra.mxu1 %v3661_v33  ;;  %702 = vmatpush.bf16.msra.mxu2 %v3665_v34  ;;  %v3632_v52 = vld [vmem:[%s7460_s3 + $0x68] sm:$0xf]  ;;  %v4777_v53 = vld [vmem:[%s7460_s3 + $0x74] sm:$0xf0]  ;;  %v4775_v54 = vld [vmem:[%s7460_s3 + $0x6c] sm:$0xf]  ;;  %v3625_v56 = vor.u32 %v4776_v48, %v3624_v47  ;;  %v3629_v57 = vor.u32 %v4774_v49, %v3626_v51 }
  0x26   : > { %731 = vmatpush.bf16.msra.mxu3 %v3669_v38  ;;  %v3634_v55 = vld [vmem:[%s7460_s3 + $0x78] sm:$0xf0]  ;;  %v3633_v58 = vor.u32 %v4777_v53, %v3632_v52  ;;  %v3608_v59 = vld [vmem:[%s7460_s3 + $0x40] sm:$0xf]  ;;  %v4772_v60 = vld [vmem:[%s7460_s3 + $0x4c] sm:$0xf0] }
  0x27   : > { %v4770_v61 = vld [vmem:[%s7460_s3 + $0x44] sm:$0xf]  ;;  %v3637_v62 = vor.u32 %v4775_v54, %v3634_v55  ;;  %v3610_v63 = vld [vmem:[%s7460_s3 + $0x50] sm:$0xf0]  ;;  %v3616_v0 = vld [vmem:[%s7460_s3 + $0x48] sm:$0xf]  ;;  %v3609_v4 = vor.u32 %v4772_v60, %v3608_v59 }
  0x28   : > { %645 = vmatpush.bf16.msra.mxu0 %v3641_v44  ;;  %v4773_v1 = vld [vmem:[%s7460_s3 + $0x54] sm:$0xf0]  ;;  %v4771_v2 = vld [vmem:[%s7460_s3 + $0x4c] sm:$0xf]  ;;  %v3618_v3 = vld [vmem:[%s7460_s3 + $0x58] sm:$0xf0]  ;;  %v3613_v6 = vor.u32 %v4770_v61, %v3610_v63 }
  0x29   : > { %674 = vmatpush.bf16.msra.mxu1 %v3645_v45  ;;  %703 = vmatpush.bf16.msra.mxu2 %v3649_v46  ;;  %v3592_v5 = vld [vmem:[%s7460_s3 + $0x20] sm:$0xf]  ;;  %v3617_v7 = vor.u32 %v4773_v1, %v3616_v0  ;;  %v4768_v8 = vld [vmem:[%s7460_s3 + $0x2c] sm:$0xf0]  ;;  %v4766_v9 = vld [vmem:[%s7460_s3 + $0x24] sm:$0xf]  ;;  %v3621_v11 = vor.u32 %v4771_v2, %v3618_v3 }
  0x2a   : > { %732 = vmatpush.bf16.msra.mxu3 %v3653_v50  ;;  %v3594_v10 = vld [vmem:[%s7460_s3 + $0x30] sm:$0xf0]  ;;  %v3600_v12 = vld [vmem:[%s7460_s3 + $0x28] sm:$0xf]  ;;  %v4769_v13 = vld [vmem:[%s7460_s3 + $0x34] sm:$0xf0]  ;;  %v3593_v16 = vor.u32 %v4768_v8, %v3592_v5 }
  0x2b   : > { %v4767_v14 = vld [vmem:[%s7460_s3 + $0x2c] sm:$0xf]  ;;  %v3602_v15 = vld [vmem:[%s7460_s3 + $0x38] sm:$0xf0]  ;;  %v3576_v17 = vld [vmem:[%s7460_s3] sm:$0xf]  ;;  %v3597_v19 = vor.u32 %v4766_v9, %v3594_v10  ;;  %v3601_v20 = vor.u32 %v4769_v13, %v3600_v12 }
  0x2c   : > { %646 = vmatpush.bf16.msra.mxu0 %v3625_v56  ;;  %v4764_v18 = vld [vmem:[%s7460_s3 + $0xc] sm:$0xf0]  ;;  %s5626_s11 = scalar_select %p373_p11, %s5340_s30, 1  ;;  %v4762_v21 = vld [vmem:[%s7460_s3 + $0x4] sm:$0xf]  ;;  %v3605_v24 = vor.u32 %v4767_v14, %v3602_v15 }
  0x2d   : > { %675 = vmatpush.bf16.msra.mxu1 %v3629_v57  ;;  %704 = vmatpush.bf16.msra.mxu2 %v3633_v58  ;;  %v3578_v22 = vld [vmem:[%s7460_s3 + $0x10] sm:$0xf0]  ;;  %v3584_v23 = vld [vmem:[%s7460_s3 + $0x8] sm:$0xf]  ;;  %v4765_v25 = vld [vmem:[%s7460_s3 + $0x14] sm:$0xf0]  ;;  %v3577_v30 = vor.u32 %v4764_v18, %v3576_v17 }
  0x2e   : > { %733 = vmatpush.bf16.msra.mxu3 %v3637_v62  ;;  %v4763_v26 = vld [vmem:[%s7460_s3 + $0xc] sm:$0xf]  ;;  %s4756_s26 = sshll.u32 %s5626_s11, 5  ;;  %v3586_v27 = vld [vmem:[%s7460_s3 + $0x18] sm:$0xf0]  ;;  %v3581_v33 = vor.u32 %v4762_v21, %v3578_v22  ;;  %v3585_v34 = vor.u32 %v4765_v25, %v3584_v23  ;;  %s3554_s25 = sshll.u32 %s5626_s11, 3 }
  0x2f   : > { %v3816_v28 = vld [vmem:[%s7462_s5 + $0xe0] sm:$0xf]  ;;  %v4824_v29 = vld [vmem:[%s7462_s5 + $0xec] sm:$0xf0]  ;;  %s5656_s24 = scalar_lea.vmem %s7471_s0, %s4756_s26  ;;  %v4822_v31 = vld [vmem:[%s7462_s5 + $0xe4] sm:$0xf]  ;;  %v3589_v36 = vor.u32 %v4763_v26, %v3586_v27  ;;  %s385_s16 = scalar_lea.vmem %s7458_s1, %s3554_s25 }
  0x30   : > { %647 = vmatpush.bf16.msra.mxu0 %v3609_v4  ;;  %v3818_v32 = vld [vmem:[%s7462_s5 + $0xf0] sm:$0xf0]  ;;  %v4823_v35 = vld [vmem:[%s7462_s5 + $0xec] sm:$0xf]  ;;  %v3817_v37 = vor.u32 %v4824_v29, %v3816_v28  ;;  %v3826_v38 = vld [vmem:[%s7462_s5 + $0xf8] sm:$0xf0] }
  0x31   : > { %676 = vmatpush.bf16.msra.mxu1 %v3613_v6  ;;  %705 = vmatpush.bf16.msra.mxu2 %v3617_v7  ;;  %v3824_v39 = vld [vmem:[%s7462_s5 + $0xe8] sm:$0xf]  ;;  %v4825_v40 = vld [vmem:[%s7462_s5 + $0xf4] sm:$0xf0]  ;;  %v4758_v41 = vld [vmem:[%s5656_s24] sm:$0xff]  ;;  %v3821_v42 = vor.u32 %v4822_v31, %v3818_v32  ;;  %v3829_v48 = vor.u32 %v4823_v35, %v3826_v38 }
  0x32   : > { %734 = vmatpush.bf16.msra.mxu3 %v3621_v11  ;;  %v3800_v43 = vld [vmem:[%s7462_s5 + $0xc0] sm:$0xf]  ;;  %v4820_v44 = vld [vmem:[%s7462_s5 + $0xcc] sm:$0xf0]  ;;  %v4818_v45 = vld [vmem:[%s7462_s5 + $0xc4] sm:$0xf]  ;;  %v3825_v47 = vor.u32 %v4825_v40, %v3824_v39 }
  0x33   : > { %v3802_v46 = vld [vmem:[%s7462_s5 + $0xd0] sm:$0xf0]  ;;  %v3801_v49 = vor.u32 %v4820_v44, %v3800_v43  ;;  %v4819_v50 = vld [vmem:[%s7462_s5 + $0xcc] sm:$0xf]  ;;  %v3808_v51 = vld [vmem:[%s7462_s5 + $0xc8] sm:$0xf] }
  0x34   : > { %648 = vmatpush.bf16.msra.mxu0 %v3593_v16  ;;  %v4821_v52 = vld [vmem:[%s7462_s5 + $0xd4] sm:$0xf0]  ;;  %v3805_v53 = vor.u32 %v4818_v45, %v3802_v46  ;;  %v3810_v54 = vld [vmem:[%s7462_s5 + $0xd8] sm:$0xf0]  ;;  %v3784_v55 = vld [vmem:[%s7462_s5 + $0xa0] sm:$0xf] }
  0x35   : > { %677 = vmatpush.bf16.msra.mxu1 %v3597_v19  ;;  %706 = vmatpush.bf16.msra.mxu2 %v3601_v20  ;;  %v4816_v56 = vld [vmem:[%s7462_s5 + $0xac] sm:$0xf0]  ;;  %v4814_v57 = vld [vmem:[%s7462_s5 + $0xa4] sm:$0xf]  ;;  %v3786_v58 = vld [vmem:[%s7462_s5 + $0xb0] sm:$0xf0]  ;;  %v3809_v59 = vor.u32 %v4821_v52, %v3808_v51  ;;  %v3813_v60 = vor.u32 %v4819_v50, %v3810_v54 }
  0x36   : > { %735 = vmatpush.bf16.msra.mxu3 %v3605_v24  ;;  %v3785_v61 = vor.u32 %v4816_v56, %v3784_v55  ;;  %v4815_v62 = vld [vmem:[%s7462_s5 + $0xac] sm:$0xf]  ;;  %v3792_v63 = vld [vmem:[%s7462_s5 + $0xa8] sm:$0xf]  ;;  %v4817_v0 = vld [vmem:[%s7462_s5 + $0xb4] sm:$0xf0]  ;;  %v3789_v1 = vor.u32 %v4814_v57, %v3786_v58 }
  0x37   : > { %v3794_v2 = vld [vmem:[%s7462_s5 + $0xb8] sm:$0xf0]  ;;  %v3768_v3 = vld [vmem:[%s7462_s5 + $0x80] sm:$0xf]  ;;  %v4812_v4 = vld [vmem:[%s7462_s5 + $0x8c] sm:$0xf0]  ;;  %v3793_v7 = vor.u32 %v4817_v0, %v3792_v63 }
  0x38   : > { %649 = vmatpush.bf16.msra.mxu0 %v3577_v30  ;;  %v4810_v5 = vld [vmem:[%s7462_s5 + $0x84] sm:$0xf]  ;;  %v3770_v6 = vld [vmem:[%s7462_s5 + $0x90] sm:$0xf0]  ;;  %v3797_v8 = vor.u32 %v4815_v62, %v3794_v2  ;;  %v3769_v9 = vor.u32 %v4812_v4, %v3768_v3  ;;  %v4811_v10 = vld [vmem:[%s7462_s5 + $0x8c] sm:$0xf] }
  0x39   : > { %678 = vmatpush.bf16.msra.mxu1 %v3581_v33  ;;  %707 = vmatpush.bf16.msra.mxu2 %v3585_v34  ;;  %v3776_v11 = vld [vmem:[%s7462_s5 + $0x88] sm:$0xf]  ;;  %v4813_v12 = vld [vmem:[%s7462_s5 + $0x94] sm:$0xf0]  ;;  %v3773_v13 = vor.u32 %v4810_v5, %v3770_v6  ;;  %v3778_v14 = vld [vmem:[%s7462_s5 + $0x98] sm:$0xf0] }
  0x3a   : > { %736 = vmatpush.bf16.msra.mxu3 %v3589_v36  ;;  %v3752_v15 = vld [vmem:[%s7462_s5 + $0x60] sm:$0xf]  ;;  %v4808_v16 = vld [vmem:[%s7462_s5 + $0x6c] sm:$0xf0]  ;;  %v4806_v17 = vld [vmem:[%s7462_s5 + $0x64] sm:$0xf]  ;;  %v3777_v20 = vor.u32 %v4813_v12, %v3776_v11  ;;  %v3781_v21 = vor.u32 %v4811_v10, %v3778_v14 }
  0x3b   : > { %650 = vmatmul.bf16.vlgmr.msra.gmra.mxu0 %v4758_v41  ;;  %v3754_v18 = vld [vmem:[%s7462_s5 + $0x70] sm:$0xf0]  ;;  %v4759_v19 = vld [vmem:[%s5656_s24 + $0x8] sm:$0xff]  ;;  %v3753_v22 = vor.u32 %v4808_v16, %v3752_v15  ;;  %v4809_v25 = vld [vmem:[%s7462_s5 + $0x74] sm:$0xf0] }
  0x3c   : > { %989 = vmatpush.bf16.msrb.mxu0 %v3817_v37  ;;  %679 = vmatmul.bf16.vlgmr.msra.gmra.mxu1 %v4758_v41  ;;  %v4807_v23 = vld [vmem:[%s7462_s5 + $0x6c] sm:$0xf]  ;;  %v3760_v24 = vld [vmem:[%s7462_s5 + $0x68] sm:$0xf]  ;;  %v3757_v26 = vor.u32 %v4806_v17, %v3754_v18  ;;  %v3762_v27 = vld [vmem:[%s7462_s5 + $0x78] sm:$0xf0] }
  0x3d   : > { %1002 = vmatpush.bf16.msrb.mxu1 %v3821_v42  ;;  %708 = vmatmul.bf16.vlgmr.msra.gmra.mxu2 %v4758_v41  ;;  %v3736_v28 = vld [vmem:[%s7462_s5 + $0x40] sm:$0xf]  ;;  %v4804_v29 = vld [vmem:[%s7462_s5 + $0x4c] sm:$0xf0]  ;;  %v4802_v30 = vld [vmem:[%s7462_s5 + $0x44] sm:$0xf]  ;;  %v3761_v32 = vor.u32 %v4809_v25, %v3760_v24  ;;  %v3765_v33 = vor.u32 %v4807_v23, %v3762_v27 }
  0x3e   : > { %737 = vmatmul.bf16.vlgmr.msra.gmra.mxu3 %v4758_v41  ;;  %1015 = vmatpush.bf16.msrb.mxu2 %v3825_v47  ;;  %v3738_v31 = vld [vmem:[%s7462_s5 + $0x50] sm:$0xf0]  ;;  %v3737_v34 = vor.u32 %v4804_v29, %v3736_v28  ;;  %v4803_v36 = vld [vmem:[%s7462_s5 + $0x4c] sm:$0xf]  ;;  %v3746_v37 = vld [vmem:[%s7462_s5 + $0x58] sm:$0xf0] }
  0x3f   : > { %1028 = vmatpush.bf16.msrb.mxu3 %v3829_v48  ;;  %v3741_v35 = vor.u32 %v4802_v30, %v3738_v31  ;;  %v3720_v38 = vld [vmem:[%s7462_s5 + $0x20] sm:$0xf]  ;;  %v4800_v39 = vld [vmem:[%s7462_s5 + $0x2c] sm:$0xf0]  ;;  %v4798_v40 = vld [vmem:[%s7462_s5 + $0x24] sm:$0xf]  ;;  %v3749_v41 = vor.u32 %v4803_v36, %v3746_v37 }
  0x40   : > { %990 = vmatpush.bf16.msrb.mxu0 %v3801_v49  ;;  %v3721_v42 = vor.u32 %v4800_v39, %v3720_v38  ;;  %v3722_v43 = vld [vmem:[%s7462_s5 + $0x30] sm:$0xf0]  ;;  %v3744_v44 = vld [vmem:[%s7462_s5 + $0x48] sm:$0xf]  ;;  %v4805_v45 = vld [vmem:[%s7462_s5 + $0x54] sm:$0xf0] }
  0x41   : > { %1003 = vmatpush.bf16.msrb.mxu1 %v3805_v53  ;;  %v3725_v46 = vor.u32 %v4798_v40, %v3722_v43  ;;  %v3745_v47 = vor.u32 %v4805_v45, %v3744_v44  ;;  %v4799_v48 = vld [vmem:[%s7462_s5 + $0x2c] sm:$0xf]  ;;  %v3730_v49 = vld [vmem:[%s7462_s5 + $0x38] sm:$0xf0]  ;;  %v3704_v50 = vld [vmem:[%s7462_s5] sm:$0xf] }
  0x42   : > { %1016 = vmatpush.bf16.msrb.mxu2 %v3809_v59  ;;  %v4796_v51 = vld [vmem:[%s7462_s5 + $0xc] sm:$0xf0]  ;;  %v4794_v52 = vld [vmem:[%s7462_s5 + $0x4] sm:$0xf]  ;;  %v3706_v53 = vld [vmem:[%s7462_s5 + $0x10] sm:$0xf0]  ;;  %v3733_v56 = vor.u32 %v4799_v48, %v3730_v49 }
  0x43   : > { %1029 = vmatpush.bf16.msrb.mxu3 %v3813_v60  ;;  %v3728_v54 = vld [vmem:[%s7462_s5 + $0x28] sm:$0xf]  ;;  %v4801_v55 = vld [vmem:[%s7462_s5 + $0x34] sm:$0xf0]  ;;  %v3705_v57 = vor.u32 %v4796_v51, %v3704_v50  ;;  %v4795_v62 = vld [vmem:[%s7462_s5 + $0xc] sm:$0xf] }
  0x44   : > { %991 = vmatpush.bf16.msrb.mxu0 %v3785_v61  ;;  %v3729_v58 = vor.u32 %v4801_v55, %v3728_v54  ;;  %v3712_v59 = vld [vmem:[%s7462_s5 + $0x8] sm:$0xf]  ;;  %v4797_v60 = vld [vmem:[%s7462_s5 + $0x14] sm:$0xf0]  ;;  %v3709_v61 = vor.u32 %v4794_v52, %v3706_v53  ;;  %v3714_v63 = vld [vmem:[%s7462_s5 + $0x18] sm:$0xf0] }
  0x45   : > { %1004 = vmatpush.bf16.msrb.mxu1 %v3789_v1  ;;  %v3713_v0 = vor.u32 %v4797_v60, %v3712_v59  ;;  %v3717_v1 = vor.u32 %v4795_v62, %v3714_v63  ;;  %v4760_v2 = vld [vmem:[%s5656_s24 + $0x10] sm:$0xff]  ;;  %v4761_v3 = vld [vmem:[%s5656_s24 + $0x18] sm:$0xff]  ;;  %v404_v4 = vld [vmem:[%s385_s16] sm:$0xff]  ;;  %s389_s24 = scalar_lea.vmem %s7459_s2, %s3554_s25  ;;  %s4757_s25 = sshll.u32 %s5626_s11, 6 }
  0x46   : > { %1017 = vmatpush.bf16.msrb.mxu2 %v3793_v7  ;;  %v796_v5 = vpack.c.bf16 %v404_v4, %v404_v4  ;;  %v3947_v51 = vld [vmem:[%s7462_s5 + $0xe0] sm:$0xf]  ;;  %v4856_v52 = vld [vmem:[%s7462_s5 + $0xec] sm:$0xf0]  ;;  %v4854_v53 = vld [vmem:[%s7462_s5 + $0xe4] sm:$0xf]  ;;  %s6169_s0 = scalar_lea.vmem %s7463_s6, %s4757_s25 }
  0x47   : > { %1030 = vmatpush.bf16.msrb.mxu3 %v3797_v8  ;;  %v448_v8 = vld [vmem:[%s7461_s4] sm:$0xf]  ;;  %v3948_v55 = vor.u32 %v4856_v52, %v3947_v51  ;;  %v3923_v51 = vld [vmem:[%s7462_s5 + $0xa8] sm:$0xf]  ;;  %v4849_v52 = vld [vmem:[%s7462_s5 + $0xb4] sm:$0xf0] }
  0x48   : > { %992 = vmatpush.bf16.msrb.mxu0 %v3769_v9  ;;  %v5861_v9 = vperm.slane %v448_v8, 0  ;;  %v5865_v11 = vperm.slane %v448_v8, 1  ;;  %v5875_v17 = vperm.slane %v448_v8, 2  ;;  %v5877_v18 = vperm.slane %v448_v8, 3  ;;  %s7386_s11 = sand.u32 1, %s5332_s28  }
  0x49   : > { %1005 = vmatpush.bf16.msrb.mxu1 %v3773_v13  ;;  %s3550_s21 = sshll.u32 %s7386_s11, 3  ;;  %s3345_s25 = scalar_lea.sflag [#allocation6], %s7386_s11 }
  0x4a   : > { %1018 = vmatpush.bf16.msrb.mxu2 %v3777_v20  ;;  %s371_s14 = scalar_lea.vmem [#allocation5], %s3550_s21 }
  0x4b   : > { %1031 = vmatpush.bf16.msrb.mxu3 %v3781_v21  ;;  %655 = vmatmul.bf16.gmra.mxu0 %v4759_v19  ;;  %s3375_s16 = sshll.u32 %s371_s14, 4  ;;  %s3376_s16 = int_to_ptr.vmem [resolvable:$true] %s3375_s16 }
  0x4c   : > { %993 = vmatpush.bf16.msrb.mxu0 %v3753_v22  ;;  %684 = vmatmul.bf16.gmra.mxu1 %v4759_v19 }
  0x4d   : > { %1006 = vmatpush.bf16.msrb.mxu1 %v3757_v26  ;;  %713 = vmatmul.bf16.gmra.mxu2 %v4759_v19 }
  0x4e   : > { %742 = vmatmul.bf16.gmra.mxu3 %v4759_v19  ;;  %1019 = vmatpush.bf16.msrb.mxu2 %v3761_v32 }
  0x4f   : > { %1032 = vmatpush.bf16.msrb.mxu3 %v3765_v33 }
  0x50   : > { %994 = vmatpush.bf16.msrb.mxu0 %v3737_v34 }
  0x51   : > { %1007 = vmatpush.bf16.msrb.mxu1 %v3741_v35 }
  0x52   : > { %1020 = vmatpush.bf16.msrb.mxu2 %v3745_v47 }
  0x53   : > { %1033 = vmatpush.bf16.msrb.mxu3 %v3749_v41 }
  0x54   : > { %995 = vmatpush.bf16.msrb.mxu0 %v3721_v42 }
  0x55   : > { %1008 = vmatpush.bf16.msrb.mxu1 %v3725_v46 }
  0x56   : > { %1021 = vmatpush.bf16.msrb.mxu2 %v3729_v58  ;;  %v4857_v58 = vld [vmem:[%s7462_s5 + $0xf4] sm:$0xf0] }
  0x57   : > { %1034 = vmatpush.bf16.msrb.mxu3 %v3733_v56  ;;  %v3949_v56 = vld [vmem:[%s7462_s5 + $0xf0] sm:$0xf0] }
  0x58   : > { %996 = vmatpush.bf16.msrb.mxu0 %v3705_v57  ;;  %v3955_v57 = vld [vmem:[%s7462_s5 + $0xe8] sm:$0xf]  ;;  %v3952_v62 = vor.u32 %v4854_v53, %v3949_v56 }
  0x59   : > { %1009 = vmatpush.bf16.msrb.mxu1 %v3709_v61  ;;  %v3956_v63 = vor.u32 %v4857_v58, %v3955_v57  ;;  %v3924_v57 = vor.u32 %v4849_v52, %v3923_v51  ;;  %v4847_v58 = vld [vmem:[%s7462_s5 + $0xac] sm:$0xf]  ;;  %v4841_v51 = vld [vmem:[%s7462_s5 + $0x74] sm:$0xf0] }
  0x5a   : > { %1022 = vmatpush.bf16.msrb.mxu2 %v3713_v0  ;;  %v4855_v0 = vld [vmem:[%s7462_s5 + $0xec] sm:$0xf] }
  0x5b   : > { %1035 = vmatpush.bf16.msrb.mxu3 %v3717_v1  ;;  %660 = vmatmul.bf16.gmra.mxu0 %v4760_v2  ;;  %v3957_v1 = vld [vmem:[%s7462_s5 + $0xf8] sm:$0xf0] }
  0x5c   : > { %689 = vmatmul.bf16.gmra.mxu1 %v4760_v2  ;;  %1306 = vmatpush.bf16.msra.mxu0 %v3948_v55 }
  0x5d   : > { %718 = vmatmul.bf16.gmra.mxu2 %v4760_v2  ;;  %1319 = vmatpush.bf16.msra.mxu1 %v3952_v62 }
  0x5e   : > { %747 = vmatmul.bf16.gmra.mxu3 %v4760_v2  ;;  %1332 = vmatpush.bf16.msra.mxu2 %v3956_v63 }
  0x6b   : > { %665 = vmatmul.bf16.gmra.mxu0 %v4761_v3 }
  0x6c   : > { %694 = vmatmul.bf16.gmra.mxu1 %v4761_v3 }
  0x6d   : > { %723 = vmatmul.bf16.gmra.mxu2 %v4761_v3 }
  0x6e   : > { %752 = vmatmul.bf16.gmra.mxu3 %v4761_v3 }
  0x7b   : > { %997 = vmatmul.bf16.vlgmr.msrb.gmra.mxu0 %v796_v5 }
  0x7c   : > { %1010 = vmatmul.bf16.vlgmr.msrb.gmra.mxu1 %v796_v5 }
  0x7d   : > { %1023 = vmatmul.bf16.vlgmr.msrb.gmra.mxu2 %v796_v5 }
  0x7e   : > { %1036 = vmatmul.bf16.vlgmr.msrb.gmra.mxu3 %v796_v5  ;;  %v3960_v5 = vor.u32 %v4855_v0, %v3957_v1 }
  0x80   : > { %1345 = vmatpush.bf16.msra.mxu3 %v3960_v5  ;;  %v4844_v5 = vld [vmem:[%s7462_s5 + $0x8c] sm:$0xf0] }
  0xb8   : > { %v5854_v6 = vpop.f32.mrf.mxu0 }
  0xb9   : > { %v5856_v7 = vpop.f32.mrf.mxu1 }
  0xba   : > { %v681_v52 = vadd.f32 %v5856_v7, %v5865_v11 }
  0xc0   : > { %v5863_v10 = vpop.f32.mrf.mxu2  ;;  %v653_v13 = vpop.f32.mrf.mxu0 }
  0xc1   : > { %v5867_v12 = vpop.f32.mrf.mxu3  ;;  %v5870_v14 = vadd.f32 %v653_v13, %v5861_v9  ;;  %v682_v15 = vpop.f32.mrf.mxu1  ;;  %v3931_v13 = vld [vmem:[%s7462_s5 + $0xc0] sm:$0xf] }
  0xc2   : > { %v5873_v16 = vadd.f32 %v682_v15, %v5865_v11  ;;  %v4852_v15 = vld [vmem:[%s7462_s5 + $0xcc] sm:$0xf0] }
  0xc8   : > { %v711_v19 = vpop.f32.mrf.mxu2  ;;  %v656_v22 = vpop.f32.mrf.mxu0 }
  0xc9   : > { %v5880_v20 = vadd.f32 %v711_v19, %v5875_v17  ;;  %v740_v21 = vpop.f32.mrf.mxu3  ;;  %v5886_v24 = vadd.f32 %v656_v22, %v5861_v9  ;;  %v685_v25 = vpop.f32.mrf.mxu1  ;;  %v4850_v19 = vld [vmem:[%s7462_s5 + $0xc4] sm:$0xf]  ;;  %v3933_v22 = vld [vmem:[%s7462_s5 + $0xd0] sm:$0xf0] }
  0xca   : > { %v5883_v23 = vadd.f32 %v740_v21, %v5877_v18  ;;  %v5889_v26 = vadd.f32 %v685_v25, %v5865_v11  ;;  %v3932_v21 = vor.u32 %v4852_v15, %v3931_v13  ;;  %v3939_v25 = vld [vmem:[%s7462_s5 + $0xc8] sm:$0xf]  ;;  %v4842_v13 = vld [vmem:[%s7462_s5 + $0x84] sm:$0xf] }
  0xcc   : > { %1307 = vmatpush.bf16.msra.mxu0 %v3932_v21  ;;  %v3907_v21 = vld [vmem:[%s7462_s5 + $0x88] sm:$0xf] }
  0xd0   : > { %v714_v27 = vpop.f32.mrf.mxu2  ;;  %v658_v30 = vpop.f32.mrf.mxu0 }
  0xd1   : > { %v5892_v28 = vadd.f32 %v714_v27, %v5875_v17  ;;  %v743_v29 = vpop.f32.mrf.mxu3  ;;  %v5898_v32 = vadd.f32 %v658_v30, %v5861_v9  ;;  %v687_v33 = vpop.f32.mrf.mxu1  ;;  %v4853_v27 = vld [vmem:[%s7462_s5 + $0xd4] sm:$0xf0] }
  0xd2   : > { %v5895_v31 = vadd.f32 %v743_v29, %v5877_v18  ;;  %v5901_v34 = vadd.f32 %v687_v33, %v5865_v11  ;;  %v3936_v29 = vor.u32 %v4850_v19, %v3933_v22  ;;  %v3940_v30 = vor.u32 %v4853_v27, %v3939_v25  ;;  %v4851_v33 = vld [vmem:[%s7462_s5 + $0xcc] sm:$0xf]  ;;  %v3901_v19 = vld [vmem:[%s7462_s5 + $0x90] sm:$0xf0]  ;;  %v4845_v22 = vld [vmem:[%s7462_s5 + $0x94] sm:$0xf0] }
  0xd3   : > { %v3904_v25 = vor.u32 %v4842_v13, %v3901_v19  ;;  %v3908_v27 = vor.u32 %v4845_v22, %v3907_v21  ;;  %v4834_v13 = vld [vmem:[%s7462_s5 + $0x44] sm:$0xf]  ;;  %v3869_v21 = vld [vmem:[%s7462_s5 + $0x50] sm:$0xf0]  ;;  %v3875_v22 = vld [vmem:[%s7462_s5 + $0x48] sm:$0xf] }
  0xd4   : > { %1320 = vmatpush.bf16.msra.mxu1 %v3936_v29  ;;  %1333 = vmatpush.bf16.msra.mxu2 %v3940_v30  ;;  %v4843_v29 = vld [vmem:[%s7462_s5 + $0x8c] sm:$0xf]  ;;  %v3909_v30 = vld [vmem:[%s7462_s5 + $0x98] sm:$0xf0] }
  0xd8   : > { %v716_v35 = vpop.f32.mrf.mxu2  ;;  %v661_v38 = vpop.f32.mrf.mxu0  ;;  %1334 = vmatpush.bf16.msra.mxu2 %v3924_v57  ;;  %v4839_v57 = vld [vmem:[%s7462_s5 + $0x6c] sm:$0xf] }
  0xd9   : > { %v5904_v36 = vadd.f32 %v716_v35, %v5875_v17  ;;  %v745_v37 = vpop.f32.mrf.mxu3  ;;  %v5910_v40 = vadd.f32 %v661_v38, %v5861_v9  ;;  %v690_v41 = vpop.f32.mrf.mxu1  ;;  %v3941_v35 = vld [vmem:[%s7462_s5 + $0xd8] sm:$0xf0]  ;;  %v3915_v38 = vld [vmem:[%s7462_s5 + $0xa0] sm:$0xf] }
  0xda   : > { %v5907_v39 = vadd.f32 %v745_v37, %v5877_v18  ;;  %v5913_v42 = vadd.f32 %v690_v41, %v5865_v11  ;;  %v3944_v37 = vor.u32 %v4851_v33, %v3941_v35  ;;  %v4848_v41 = vld [vmem:[%s7462_s5 + $0xac] sm:$0xf0]  ;;  %v3912_v33 = vor.u32 %v4843_v29, %v3909_v30  ;;  %v3883_v35 = vld [vmem:[%s7462_s5 + $0x60] sm:$0xf]  ;;  %v4837_v29 = vld [vmem:[%s7462_s5 + $0x54] sm:$0xf0] }
  0xdb   : > { %v4835_v30 = vld [vmem:[%s7462_s5 + $0x4c] sm:$0xf] }
  0xdc   : > { %1346 = vmatpush.bf16.msra.mxu3 %v3944_v37  ;;  %1335 = vmatpush.bf16.msra.mxu2 %v3908_v27  ;;  %v4840_v37 = vld [vmem:[%s7462_s5 + $0x6c] sm:$0xf0]  ;;  %v3872_v27 = vor.u32 %v4834_v13, %v3869_v21  ;;  %v3837_v13 = vld [vmem:[%s7462_s5 + $0x10] sm:$0xf0] }
  0xe0   : > { %v719_v43 = vpop.f32.mrf.mxu2  ;;  %v663_v46 = vpop.f32.mrf.mxu0 }
  0xe1   : > { %v5916_v44 = vadd.f32 %v719_v43, %v5875_v17  ;;  %v748_v45 = vpop.f32.mrf.mxu3  ;;  %v5922_v48 = vadd.f32 %v663_v46, %v5861_v9  ;;  %v692_v49 = vpop.f32.mrf.mxu1  ;;  %v4846_v43 = vld [vmem:[%s7462_s5 + $0xa4] sm:$0xf]  ;;  %v3916_v46 = vor.u32 %v4848_v41, %v3915_v38  ;;  %v652_v41 = vadd.f32 %v5854_v6, %v5861_v9 }
  0xe2   : > { %v5919_v47 = vadd.f32 %v748_v45, %v5877_v18  ;;  %v5925_v50 = vadd.f32 %v692_v49, %v5865_v11  ;;  %v3917_v49 = vld [vmem:[%s7462_s5 + $0xb0] sm:$0xf0]  ;;  %v4838_v38 = vld [vmem:[%s7462_s5 + $0x64] sm:$0xf] }
  0xe3   : > { %v3920_v56 = vor.u32 %v4846_v43, %v3917_v49  ;;  %1308 = vmatpush.bf16.msra.mxu0 %v3916_v46  ;;  %v3885_v46 = vld [vmem:[%s7462_s5 + $0x70] sm:$0xf0]  ;;  %v3891_v49 = vld [vmem:[%s7462_s5 + $0x68] sm:$0xf] }
  0xe5   : > { %1321 = vmatpush.bf16.msra.mxu1 %v3920_v56  ;;  %v3892_v56 = vor.u32 %v4841_v51, %v3891_v49  ;;  %v3859_v49 = vld [vmem:[%s7462_s5 + $0x28] sm:$0xf]  ;;  %v739_v51 = vadd.f32 %v5867_v12, %v5877_v18 }
  0xe7   : > { %1336 = vmatpush.bf16.msra.mxu2 %v3892_v56  ;;  %v3861_v56 = vld [vmem:[%s7462_s5 + $0x38] sm:$0xf0] }
  0xe8   : > { %v721_v54 = vpop.f32.mrf.mxu2  ;;  %v666_v61 = vpop.f32.mrf.mxu0 }
  0xe9   : > { %v5946_v59 = vadd.f32 %v721_v54, %v5875_v17  ;;  %v750_v60 = vpop.f32.mrf.mxu3  ;;  %v5958_v3 = vadd.f32 %v666_v61, %v5861_v9  ;;  %v695_v4 = vpop.f32.mrf.mxu1  ;;  %1322 = vmatpush.bf16.msra.mxu1 %v3904_v25 }
  0xea   : > { %v5955_v2 = vadd.f32 %v750_v60, %v5877_v18  ;;  %v5961_v8 = vadd.f32 %v695_v4, %v5865_v11  ;;  %v3925_v60 = vld [vmem:[%s7462_s5 + $0xb8] sm:$0xf0]  ;;  %v3899_v4 = vld [vmem:[%s7462_s5 + $0x80] sm:$0xf] }
  0xeb   : > { %v3928_v0 = vor.u32 %v4847_v58, %v3925_v60  ;;  %v3900_v15 = vor.u32 %v4844_v5, %v3899_v4  ;;  %v3893_v58 = vld [vmem:[%s7462_s5 + $0x78] sm:$0xf0]  ;;  %v3867_v4 = vld [vmem:[%s7462_s5 + $0x40] sm:$0xf]  ;;  %v4836_v5 = vld [vmem:[%s7462_s5 + $0x4c] sm:$0xf0] }
  0xec   : > { %v3868_v19 = vor.u32 %v4836_v5, %v3867_v4 }
  0xed   : > { %1347 = vmatpush.bf16.msra.mxu3 %v3928_v0  ;;  %1309 = vmatpush.bf16.msra.mxu0 %v3900_v15 }
  0xf0   : > { %v724_v45 = vpop.f32.mrf.mxu2  ;;  %v668_v55 = vpop.f32.mrf.mxu0 }
  0xf1   : > { %v6006_v53 = vadd.f32 %v724_v45, %v5875_v17  ;;  %v753_v54 = vpop.f32.mrf.mxu3  ;;  %v6018_v62 = vadd.f32 %v668_v55, %v5861_v9  ;;  %v697_v63 = vpop.f32.mrf.mxu1  ;;  %1348 = vmatpush.bf16.msra.mxu3 %v3912_v33  ;;  %v3884_v45 = vor.u32 %v4840_v37, %v3883_v35  ;;  %v3888_v55 = vor.u32 %v4838_v38, %v3885_v46  ;;  %v3877_v35 = vld [vmem:[%s7462_s5 + $0x58] sm:$0xf0]  ;;  %v3851_v37 = vld [vmem:[%s7462_s5 + $0x20] sm:$0xf]  ;;  %v4832_v38 = vld [vmem:[%s7462_s5 + $0x2c] sm:$0xf0] }
  0xf2   : > { %v6015_v61 = vadd.f32 %v753_v54, %v5877_v18  ;;  %v6021_v1 = vadd.f32 %v697_v63, %v5865_v11  ;;  %v3896_v11 = vor.u32 %v4839_v57, %v3893_v58  ;;  %v3876_v33 = vor.u32 %v4837_v29, %v3875_v22  ;;  %v3853_v46 = vld [vmem:[%s7462_s5 + $0x30] sm:$0xf0]  ;;  %v4827_v22 = vld [vmem:[%s7462_s5 + $0xc] sm:$0xf] }
  0xf3   : > { %1310 = vmatpush.bf16.msra.mxu0 %v3884_v45  ;;  %1323 = vmatpush.bf16.msra.mxu1 %v3888_v55  ;;  %v4830_v45 = vld [vmem:[%s7462_s5 + $0x24] sm:$0xf]  ;;  %v4831_v55 = vld [vmem:[%s7462_s5 + $0x2c] sm:$0xf] }
  0xf4   : > { %1337 = vmatpush.bf16.msra.mxu2 %v3876_v33  ;;  %v3864_v12 = vor.u32 %v4831_v55, %v3861_v56 }
  0xf5   : > { %1349 = vmatpush.bf16.msra.mxu3 %v3896_v11  ;;  %v4826_v11 = vld [vmem:[%s7462_s5 + $0x4] sm:$0xf] }
  0xf6   : > { %v3840_v21 = vor.u32 %v4826_v11, %v3837_v13 }
  0xf7   : > { %1311 = vmatpush.bf16.msra.mxu0 %v3868_v19  ;;  %1324 = vmatpush.bf16.msra.mxu1 %v3872_v27  ;;  %v4829_v19 = vld [vmem:[%s7462_s5 + $0x14] sm:$0xf0] }
  0xf8   : > { %v726_v43 = vpop.f32.mrf.mxu2  ;;  %v998_v54 = vpop.f32.mrf.mxu0 }
  0xf9   : > { %v6070_v6 = vadd.f32 %v726_v43, %v5875_v17  ;;  %v755_v9 = vpop.f32.mrf.mxu3  ;;  %v1041_v63 = vadd.f32 %v998_v54, %v652_v41  ;;  %v1011_v7 = vpop.f32.mrf.mxu1  ;;  %v3880_v41 = vor.u32 %v4835_v30, %v3877_v35  ;;  %v3852_v43 = vor.u32 %v4832_v38, %v3851_v37  ;;  %v4833_v54 = vld [vmem:[%s7462_s5 + $0x34] sm:$0xf0] }
  0xfa   : > { %v6079_v60 = vadd.f32 %v755_v9, %v5877_v18  ;;  %v1042_v0 = vadd.f32 %v1011_v7, %v681_v52  ;;  %v3856_v9 = vor.u32 %v4830_v45, %v3853_v46  ;;  %v3835_v18 = vld [vmem:[%s7462_s5] sm:$0xf]  ;;  %v4828_v7 = vld [vmem:[%s7462_s5 + $0xc] sm:$0xf0]  ;;  %v710_v45 = vadd.f32 %v5863_v10, %v5875_v17 }
  0xfb   : > { %v3830_v15 = vmul.f32 -1.442695, %v1041_v63  ;;  %1350 = vmatpush.bf16.msra.mxu3 %v3880_v41  ;;  %v3860_v63 = vor.u32 %v4833_v54, %v3859_v49  ;;  %1312 = vmatpush.bf16.msra.mxu0 %v3852_v43  ;;  %v3836_v5 = vor.u32 %v4828_v7, %v3835_v18 }
  0xfc   : > { %v3831_v25 = vmul.f32 -1.442695, %v1042_v0  ;;  %1325 = vmatpush.bf16.msra.mxu1 %v3856_v9 }
  0xfd   : > { %5110 = vpow2.f32 %v3830_v15  ;;  %v3843_v15 = vld [vmem:[%s7462_s5 + $0x8] sm:$0xf]  ;;  %1338 = vmatpush.bf16.msra.mxu2 %v3860_v63 }
  0xfe   : > { %5112 = vpow2.f32 %v3831_v25  ;;  %v3845_v25 = vld [vmem:[%s7462_s5 + $0x18] sm:$0xf0]  ;;  %v3844_v30 = vor.u32 %v4829_v19, %v3843_v15 }
  0xff   : > { %1351 = vmatpush.bf16.msra.mxu3 %v3864_v12  ;;  %v3848_v37 = vor.u32 %v4827_v22, %v3845_v25  ;;  %1313 = vmatpush.bf16.msra.mxu0 %v3836_v5  ;;  %v406_v5 = vld [vmem:[%s389_s24] sm:$0xff]  ;;  %s3377_s24 = sshll.u32 %s3373_s12, 4  ;;  %s3378_s24 = int_to_ptr.hbm [resolvable:$true] %s3377_s24 }
 0x100   : > { %v1024_v52 = vpop.f32.mrf.mxu2  ;;  %v1000_v58 = vpop.f32.mrf.mxu0  ;;  %1326 = vmatpush.bf16.msra.mxu1 %v3840_v21  ;;  %s5252_s19 = sshra.s32 %s3378_s24, 4  ;;  %s5253_s19 = int_to_ptr.hbm [resolvable:$true] %s5252_s19 }
 0x101   : > { %v1037_v57 = vpop.f32.mrf.mxu3  ;;  %v1013_v4 = vpop.f32.mrf.mxu1  ;;  %1339 = vmatpush.bf16.msra.mxu2 %v3844_v30  ;;  %s5254_s26 = scalar_lea.hbm %s5253_s19, 8  ;;  %p5259_p1 = scmp.lt.s32.totalorder %s5253_s19, %s7465_s8 }
 0x102   : > { %v1044_v0 = vadd.f32 %v1037_v57, %v739_v51  ;;  %v1043_v51 = vadd.f32 %v1024_v52, %v710_v45  ;;  %p5255_p12 = scmp.ne.s32.totalorder %s5253_s19, %s5254_s26  ;;  %p5260_p2 = scmp.lt.s32.totalorder %s5258_s23, %s5254_s26 }
 0x103   : > { %v5111_v27 = vpop.eup %5110  ;;  %1352 = vmatpush.bf16.msra.mxu3 %v3848_v37 }
 0x104   : > { %v3832_v29 = vmul.f32 -1.442695, %v1044_v0  ;;  %v5113_v33 = vpop.eup %5112  ;;  %v1048_v35 = vadd.f32 1.0, %v5111_v27  ;;  %p5256_p13 = pnand %p5255_p12, %p5435_p4  ;;  %p5261_p3 = por %p5260_p2, %p5259_p1 }
 0x105   : > { %v1067_v38 = vadd.f32 1.0, %v5113_v33 }
 0x106   : > { %5114 = vpow2.f32 %v3832_v29  ;;  %v1060_v63 = vand.u32 2147483648, %v1048_v35  ;;  %v1058_v7 = vand.u32 2147483647, %v1048_v35  ;;  %vm1054_vm2 = vweird.f32 %v1048_v35  ;;  %p5257_p0 = pneg %p5256_p13 }
 0x107   : > { %5116 = vrcp.f32 %v1048_v35  ;;  %v1079_v12 = vand.u32 2147483648, %v1067_v38  ;;  %v1077_v17 = vand.u32 2147483647, %v1067_v38  ;;  %vm1073_vm3 = vweird.f32 %v1067_v38 }
 0x108   : > { %5118 = vrcp.f32 %v1067_v38  ;;  %v1026_v41 = vpop.f32.mrf.mxu2  ;;  %v1061_v0 = vor.u32 1.1754944e-38, %v1060_v63  ;;  %vm1059_vm6 = vcmp.eq.f32.partialorder %v1058_v7, 8.507059e+37  ;;  %v4080_v63 = vld [vmem:[%s7462_s5 + $0xf0] sm:$0xf0]  ;;  %p5262_p5 = pnand %p5261_p3, %p5257_p0 }
 0x109   : > { %v1039_v43 = vpop.f32.mrf.mxu3  ;;  %v1080_v13 = vor.u32 1.1754944e-38, %v1079_v12  ;;  %vm1078_vm7 = vcmp.eq.f32.partialorder %v1077_v17, 8.507059e+37  ;;  %v4086_v12 = vld [vmem:[%s7462_s5 + $0xe8] sm:$0xf]  ;;  %v4887_v17 = vld [vmem:[%s7462_s5 + $0xec] sm:$0xf] }
 0x10c   : > { %v5115_v46 = vpop.eup %5114 }
 0x10d   : > { %v5117_v49 = vpop.eup %5116  ;;  %v1087_v9 = vadd.f32 1.0, %v5115_v46 }
 0x10e   : > { %v5119_v54 = vpop.eup %5118  ;;  %v1050_v55 = vmul.f32 %v5117_v49, %v1048_v35  ;;  %vm1055_vm0 = vweird.f32 %v5117_v49 }
 0x10f   : > { %v1069_v56 = vmul.f32 %v5119_v54, %v1067_v38  ;;  %5120 = vrcp.f32 %v1087_v9  ;;  %vm1074_vm1 = vweird.f32 %v5119_v54  ;;  %vm1056_vm4 = vmor %vm1054_vm2, %vm1055_vm0  ;;  %v1099_v41 = vand.u32 2147483648, %v1087_v9 }
 0x110   : > { %v1051_v57 = vsub.f32 1.0, %v1050_v55  ;;  %5122 = vtanh.f32 %v1043_v51  ;;  %vm1075_vm5 = vmor %vm1073_vm3, %vm1074_vm1  ;;  %vm1093_vm9 = vweird.f32 %v1087_v9  ;;  %v1097_v43 = vand.u32 2147483647, %v1087_v9 }
 0x111   : > { %v1070_v58 = vsub.f32 1.0, %v1069_v56  ;;  %v1100_v46 = vor.u32 1.1754944e-38, %v1099_v41  ;;  %v4888_v56 = vld [vmem:[%s7462_s5 + $0xec] sm:$0xf0] }
 0x112   : > { %v1052_v18 = vmul.f32 %v5117_v49, %v1051_v57  ;;  %vm1098_vm11 = vcmp.eq.f32.partialorder %v1097_v43, 8.507059e+37  ;;  %v4886_v57 = vld [vmem:[%s7462_s5 + $0xe4] sm:$0xf]  ;;  %v4048_v43 = vld [vmem:[%s7462_s5 + $0xb0] sm:$0xf0] }
 0x113   : > { %v1071_v10 = vmul.f32 %v5119_v54, %v1070_v58  ;;  %v4083_v7 = vor.u32 %v4886_v57, %v4080_v63  ;;  %v4876_v57 = vld [vmem:[%s7462_s5 + $0x8c] sm:$0xf0] }
 0x114   : > { %v1053_v52 = vadd.f32 %v5117_v49, %v1052_v18  ;;  %v4889_v18 = vld [vmem:[%s7462_s5 + $0xf4] sm:$0xf0] }
 0x115   : > { %v5121_v11 = vpop.eup %5120  ;;  %v1072_v4 = vadd.f32 %v5119_v54, %v1071_v10  ;;  %v4087_v10 = vor.u32 %v4889_v18, %v4086_v12  ;;  %1636 = vmatpush.bf16.msrb.mxu1 %v4083_v7  ;;  %v4032_v12 = vld [vmem:[%s7462_s5 + $0x90] sm:$0xf0]  ;;  %v4038_v18 = vld [vmem:[%s7462_s5 + $0x88] sm:$0xf]  ;;  %v4877_v7 = vld [vmem:[%s7462_s5 + $0x94] sm:$0xf0] }
 0x116   : > { %v1057_v15 = vsel %vm1056_vm4, %v5117_v49, %v1053_v52  ;;  %v1089_v19 = vmul.f32 %v5121_v11, %v1087_v9  ;;  %v5123_v21 = vpop.eup %5122  ;;  %vm1094_vm8 = vweird.f32 %v5121_v11  ;;  %v4078_v9 = vld [vmem:[%s7462_s5 + $0xe0] sm:$0xf]  ;;  %v4088_v52 = vld [vmem:[%s7462_s5 + $0xf8] sm:$0xf0] }
 0x117   : > { %v1062_v22 = vsel %vm1059_vm6, %v1061_v0, %v1057_v15  ;;  %v1076_v25 = vsel %vm1075_vm5, %v5119_v54, %v1072_v4  ;;  %vm1095_vm10 = vmor %vm1093_vm9, %vm1094_vm8  ;;  %v4079_v58 = vor.u32 %v4888_v56, %v4078_v9  ;;  %1649 = vmatpush.bf16.msrb.mxu2 %v4087_v10  ;;  %v4062_v0 = vld [vmem:[%s7462_s5 + $0xc0] sm:$0xf]  ;;  %v4884_v4 = vld [vmem:[%s7462_s5 + $0xcc] sm:$0xf0] }
 0x118   : > { %v1081_v27 = vsel %vm1078_vm7, %v1080_v13, %v1076_v25  ;;  %v1104_v29 = vmul.f32 %v5123_v21, %v1062_v22  ;;  %v1090_v30 = vsub.f32 1.0, %v1089_v19  ;;  %v4063_v13 = vor.u32 %v4884_v4, %v4062_v0  ;;  %v4064_v15 = vld [vmem:[%s7462_s5 + $0xd0] sm:$0xf0]  ;;  %v4070_v19 = vld [vmem:[%s7462_s5 + $0xc8] sm:$0xf] }
 0x119   : > { %v1103_v33 = vmul.f32 %v1081_v27, %v406_v5  ;;  %1623 = vmatpush.bf16.msrb.mxu0 %v4079_v58  ;;  %v4882_v5 = vld [vmem:[%s7462_s5 + $0xc4] sm:$0xf]  ;;  %v4885_v21 = vld [vmem:[%s7462_s5 + $0xd4] sm:$0xf0]  ;;  %v4883_v27 = vld [vmem:[%s7462_s5 + $0xcc] sm:$0xf] }
 0x11a   : > { %v1091_v35 = vmul.f32 %v5121_v11, %v1090_v30  ;;  %v4067_v22 = vor.u32 %v4882_v5, %v4064_v15  ;;  %v4071_v25 = vor.u32 %v4885_v21, %v4070_v19  ;;  %v4030_v56 = vld [vmem:[%s7462_s5 + $0x80] sm:$0xf]  ;;  %v4874_v58 = vld [vmem:[%s7462_s5 + $0x84] sm:$0xf]  ;;  %v4872_v5 = vld [vmem:[%s7462_s5 + $0x6c] sm:$0xf0] }
 0x11b   : > { %v6162_v37 = vadd.f32 %v1104_v29, %v1103_v33  ;;  %v4072_v29 = vld [vmem:[%s7462_s5 + $0xd8] sm:$0xf0]  ;;  %v4046_v33 = vld [vmem:[%s7462_s5 + $0xa0] sm:$0xf]  ;;  %v4031_v63 = vor.u32 %v4876_v57, %v4030_v56  ;;  %v4035_v10 = vor.u32 %v4874_v58, %v4032_v12  ;;  %v4016_v19 = vld [vmem:[%s7462_s5 + $0x70] sm:$0xf0] }
 0x11c   : > { %v1092_v38 = vadd.f32 %v5121_v11, %v1091_v35  ;;  %v4075_v30 = vor.u32 %v4883_v27, %v4072_v29  ;;  %1637 = vmatpush.bf16.msrb.mxu1 %v4067_v22  ;;  %1650 = vmatpush.bf16.msrb.mxu2 %v4071_v25  ;;  %v4880_v35 = vld [vmem:[%s7462_s5 + $0xac] sm:$0xf0]  ;;  %v4014_v4 = vld [vmem:[%s7462_s5 + $0x60] sm:$0xf]  ;;  %v4022_v21 = vld [vmem:[%s7462_s5 + $0x68] sm:$0xf] }
 0x11d   : > { %5124 = vtanh.f32 %v6162_v37  ;;  %1624 = vmatpush.bf16.msrb.mxu0 %v4063_v13  ;;  %v4047_v41 = vor.u32 %v4880_v35, %v4046_v33  ;;  %v4870_v13 = vld [vmem:[%s7462_s5 + $0x64] sm:$0xf]  ;;  %v4015_v15 = vor.u32 %v4872_v5, %v4014_v4  ;;  %v4873_v22 = vld [vmem:[%s7462_s5 + $0x74] sm:$0xf0]  ;;  %v4871_v33 = vld [vmem:[%s7462_s5 + $0x6c] sm:$0xf] }
 0x11e   : > { %v1096_v45 = vsel %vm1095_vm10, %v5121_v11, %v1092_v38  ;;  %v4091_v11 = vor.u32 %v4887_v17, %v4088_v52  ;;  %v4878_v38 = vld [vmem:[%s7462_s5 + $0xa4] sm:$0xf]  ;;  %v4039_v17 = vor.u32 %v4877_v7, %v4038_v18  ;;  %v4875_v52 = vld [vmem:[%s7462_s5 + $0x8c] sm:$0xf]  ;;  %v4019_v29 = vor.u32 %v4870_v13, %v4016_v19  ;;  %v4024_v35 = vld [vmem:[%s7462_s5 + $0x78] sm:$0xf0] }
 0x11f   : > { %v1101_v51 = vsel %vm1098_vm11, %v1100_v46, %v1096_v45  ;;  %v4054_v45 = vld [vmem:[%s7462_s5 + $0xa8] sm:$0xf]  ;;  %v4881_v46 = vld [vmem:[%s7462_s5 + $0xb4] sm:$0xf0]  ;;  %v4867_v57 = vld [vmem:[%s7462_s5 + $0x4c] sm:$0xf] }
 0x120   : > { %1662 = vmatpush.bf16.msrb.mxu3 %v4091_v11  ;;  %v4040_v11 = vld [vmem:[%s7462_s5 + $0x98] sm:$0xf0]  ;;  %v4869_v56 = vld [vmem:[%s7462_s5 + $0x54] sm:$0xf0]  ;;  %v3982_v12 = vld [vmem:[%s7462_s5 + $0x20] sm:$0xf] }
 0x121   : > { %1625 = vmatpush.bf16.msrb.mxu0 %v4047_v41  ;;  %v4043_v0 = vor.u32 %v4875_v52, %v4040_v11  ;;  %v4864_v18 = vld [vmem:[%s7462_s5 + $0x2c] sm:$0xf0]  ;;  %v3984_v52 = vld [vmem:[%s7462_s5 + $0x30] sm:$0xf0]  ;;  %v3990_v11 = vld [vmem:[%s7462_s5 + $0x28] sm:$0xf] }
 0x122   : > { %v4865_v13 = vld [vmem:[%s7462_s5 + $0x34] sm:$0xf0]  ;;  %v3992_v19 = vld [vmem:[%s7462_s5 + $0x38] sm:$0xf0] }
 0x123   : > { %v5125_v49 = vpop.eup %5124 }
 0x124   : > { %v1107_v54 = vmul.f32 %v5125_v49, %v1101_v51  ;;  %1663 = vmatpush.bf16.msrb.mxu3 %v4075_v30  ;;  %v4051_v49 = vor.u32 %v4878_v38, %v4048_v43  ;;  %v4055_v51 = vor.u32 %v4881_v46, %v4054_v45  ;;  %v4023_v30 = vor.u32 %v4873_v22, %v4022_v21  ;;  %v3998_v45 = vld [vmem:[%s7462_s5 + $0x40] sm:$0xf]  ;;  %v4868_v46 = vld [vmem:[%s7462_s5 + $0x4c] sm:$0xf0] }
 0x125   : > { %1626 = vmatpush.bf16.msrb.mxu0 %v4031_v63  ;;  %v4027_v43 = vor.u32 %v4871_v33, %v4024_v35  ;;  %v4008_v63 = vld [vmem:[%s7462_s5 + $0x58] sm:$0xf0]  ;;  %v4860_v33 = vld [vmem:[%s7462_s5 + $0xc] sm:$0xf0]  ;;  %v4858_v35 = vld [vmem:[%s7462_s5 + $0x4] sm:$0xf] }
 0x126   : > { %1108 = vst [vmem:[%s6169_s0] sm:$0xff] %v1107_v54  ;;  %v1113_v55 = vpack.c.bf16 %v1107_v54, %v1107_v54  ;;  %v4879_v54 = vld [vmem:[%s7462_s5 + $0xac] sm:$0xf]  ;;  %1638 = vmatpush.bf16.msrb.mxu1 %v4051_v49  ;;  %1651 = vmatpush.bf16.msrb.mxu2 %v4055_v51  ;;  %v4866_v49 = vld [vmem:[%s7462_s5 + $0x44] sm:$0xf]  ;;  %v4011_v7 = vor.u32 %v4867_v57, %v4008_v63 }
 0x128   : > { %1314 = vmatmul.bf16.vlgmr.msra.gmra.mxu0 %v1113_v55  ;;  %1327 = vmatmul.bf16.vlgmr.msra.gmra.mxu1 %v1113_v55 }
 0x129   : > { %1340 = vmatmul.bf16.vlgmr.msra.gmra.mxu2 %v1113_v55  ;;  %1353 = vmatmul.bf16.vlgmr.msra.gmra.mxu3 %v1113_v55  ;;  %v4056_v55 = vld [vmem:[%s7462_s5 + $0xb8] sm:$0xf0] }
 0x12a   : > { %v4059_v9 = vor.u32 %v4879_v54, %v4056_v55  ;;  %1639 = vmatpush.bf16.msrb.mxu1 %v4035_v10  ;;  %1652 = vmatpush.bf16.msrb.mxu2 %v4039_v17  ;;  %v4000_v54 = vld [vmem:[%s7462_s5 + $0x50] sm:$0xf0]  ;;  %v3983_v10 = vor.u32 %v4864_v18, %v3982_v12  ;;  %v4862_v17 = vld [vmem:[%s7462_s5 + $0x24] sm:$0xf] }
 0x12b   : > { %1627 = vmatpush.bf16.msrb.mxu0 %v4015_v15  ;;  %v4003_v55 = vor.u32 %v4866_v49, %v4000_v54  ;;  %v3987_v5 = vor.u32 %v4862_v17, %v3984_v52  ;;  %v4863_v15 = vld [vmem:[%s7462_s5 + $0x2c] sm:$0xf] }
 0x12c   : > { %1664 = vmatpush.bf16.msrb.mxu3 %v4059_v9  ;;  %v4006_v9 = vld [vmem:[%s7462_s5 + $0x48] sm:$0xf]  ;;  %v4859_v49 = vld [vmem:[%s7462_s5 + $0xc] sm:$0xf] }
 0x12d   : > { %v4007_v58 = vor.u32 %v4869_v56, %v4006_v9 }
 0x12e   : > { %1640 = vmatpush.bf16.msrb.mxu1 %v4019_v29  ;;  %1653 = vmatpush.bf16.msrb.mxu2 %v4023_v30  ;;  %v3995_v29 = vor.u32 %v4863_v15, %v3992_v19  ;;  %v3966_v30 = vld [vmem:[%s7462_s5] sm:$0xf] }
 0x130   : > { %1665 = vmatpush.bf16.msrb.mxu3 %v4043_v0 }
 0x132   : > { %1641 = vmatpush.bf16.msrb.mxu1 %v4003_v55  ;;  %1654 = vmatpush.bf16.msrb.mxu2 %v4007_v58 }
 0x134   : > { %1666 = vmatpush.bf16.msrb.mxu3 %v4027_v43  ;;  %v4861_v43 = vld [vmem:[%s7462_s5 + $0x14] sm:$0xf0] }
 0x136   : > { %1642 = vmatpush.bf16.msrb.mxu1 %v3987_v5 }
 0x138   : > { %1667 = vmatpush.bf16.msrb.mxu3 %v4011_v7 }
 0x13c   : > { %1668 = vmatpush.bf16.msrb.mxu3 %v3995_v29 }
 0x1a5   : > { %v1315_v25 = vpop.f32.mrf.mxu0  ;;  %v1328_v27 = vpop.f32.mrf.mxu1 }
 0x1a6   : > { %v1358_v38 = vadd.f32 %v1315_v25, %v5870_v14  ;;  %v1359_v41 = vadd.f32 %v1328_v27, %v5873_v16  ;;  %v3999_v16 = vor.u32 %v4868_v46, %v3998_v45  ;;  %v3991_v27 = vor.u32 %v4865_v13, %v3990_v11 }
 0x1a8   : > { %v3961_v51 = vmul.f32 -1.442695, %v1358_v38  ;;  %v3962_v14 = vmul.f32 -1.442695, %v1359_v41  ;;  %1628 = vmatpush.bf16.msrb.mxu0 %v3999_v16  ;;  %v3967_v38 = vor.u32 %v4860_v33, %v3966_v30  ;;  %v3974_v41 = vld [vmem:[%s7462_s5 + $0x8] sm:$0xf]  ;;  %1655 = vmatpush.bf16.msrb.mxu2 %v3991_v27 }
 0x1a9   : > { %v3975_v16 = vor.u32 %v4861_v43, %v3974_v41 }
 0x1aa   : > { %5126 = vpow2.f32 %v3961_v51  ;;  %v3976_v51 = vld [vmem:[%s7462_s5 + $0x18] sm:$0xf0] }
 0x1ab   : > { %5128 = vpow2.f32 %v3962_v14  ;;  %v3979_v9 = vor.u32 %v4859_v49, %v3976_v51 }
 0x1ac   : > { %v1341_v0 = vpop.f32.mrf.mxu2  ;;  %v1354_v4 = vpop.f32.mrf.mxu3  ;;  %1629 = vmatpush.bf16.msrb.mxu0 %v3983_v10  ;;  %1656 = vmatpush.bf16.msrb.mxu2 %v3975_v16 }
 0x1ad   : > { %v1361_v21 = vadd.f32 %v1354_v4, %v5883_v23  ;;  %v1317_v22 = vpop.f32.mrf.mxu0  ;;  %v1330_v25 = vpop.f32.mrf.mxu1  ;;  %v3968_v23 = vld [vmem:[%s7462_s5 + $0x10] sm:$0xf0]  ;;  %1669 = vmatpush.bf16.msrb.mxu3 %v3979_v9  ;;  %v1360_v7 = vadd.f32 %v1341_v0, %v5880_v20 }
 0x1ae   : > { %v3971_v46 = vor.u32 %v4858_v35, %v3968_v23 }
 0x1af   : > { %v3963_v45 = vmul.f32 -1.442695, %v1361_v21 }
 0x1b0   : > { %v5127_v14 = vpop.eup %5126  ;;  %1630 = vmatpush.bf16.msrb.mxu0 %v3967_v38  ;;  %1643 = vmatpush.bf16.msrb.mxu1 %v3971_v46 }
 0x1b1   : > { %v5129_v54 = vpop.eup %5128  ;;  %v1365_v55 = vadd.f32 1.0, %v5127_v14  ;;  %5130 = vpow2.f32 %v3963_v45 }
 0x1b2   : > { %v1384_v56 = vadd.f32 1.0, %v5129_v54 }
 0x1b3   : > { %5132 = vrcp.f32 %v1365_v55  ;;  %v1377_v5 = vand.u32 2147483648, %v1365_v55  ;;  %v1375_v19 = vand.u32 2147483647, %v1365_v55  ;;  %vm1371_vm14 = vweird.f32 %v1365_v55 }
 0x1b4   : > { %5134 = vrcp.f32 %v1384_v56  ;;  %v1343_v57 = vpop.f32.mrf.mxu2  ;;  %v1356_v58 = vpop.f32.mrf.mxu3  ;;  %v1396_v13 = vand.u32 2147483648, %v1384_v56  ;;  %v1394_v22 = vand.u32 2147483647, %v1384_v56  ;;  %vm1390_vm15 = vweird.f32 %v1384_v56 }
 0x1b5   : > { %v1378_v20 = vor.u32 1.1754944e-38, %v1377_v5  ;;  %vm1376_vm2 = vcmp.eq.f32.partialorder %v1375_v19, 8.507059e+37  ;;  %v4919_v5 = vld [vmem:[%s7462_s5 + $0xec] sm:$0xf]  ;;  %v4193_v19 = vld [vmem:[%s7462_s5 + $0xc0] sm:$0xf] }
 0x1b6   : > { %v1397_v30 = vor.u32 1.1754944e-38, %v1396_v13  ;;  %vm1395_vm3 = vcmp.eq.f32.partialorder %v1394_v22, 8.507059e+37  ;;  %v4219_v13 = vld [vmem:[%s7462_s5 + $0xf8] sm:$0xf0]  ;;  %v4914_v22 = vld [vmem:[%s7462_s5 + $0xc4] sm:$0xf] }
 0x1b7   : > { %v5131_v63 = vpop.eup %5130 }
 0x1b8   : > { %v1404_v12 = vadd.f32 1.0, %v5131_v63  ;;  %v4209_v63 = vld [vmem:[%s7462_s5 + $0xe0] sm:$0xf] }
 0x1b9   : > { %v5133_v18 = vpop.eup %5132 }
 0x1ba   : > { %v5135_v10 = vpop.eup %5134  ;;  %v1367_v17 = vmul.f32 %v5133_v18, %v1365_v55  ;;  %5136 = vrcp.f32 %v1404_v12  ;;  %vm1372_vm12 = vweird.f32 %v5133_v18  ;;  %v1416_v16 = vand.u32 2147483648, %v1404_v12 }
 0x1bb   : > { %v1386_v52 = vmul.f32 %v5135_v10, %v1384_v56  ;;  %5138 = vtanh.f32 %v1360_v7  ;;  %vm1391_vm13 = vweird.f32 %v5135_v10  ;;  %vm1373_vm0 = vmor %vm1371_vm14, %vm1372_vm12  ;;  %vm1410_vm5 = vweird.f32 %v1404_v12 }
 0x1bc   : > { %v1368_v11 = vsub.f32 1.0, %v1367_v17  ;;  %vm1392_vm1 = vmor %vm1390_vm15, %vm1391_vm13  ;;  %v1414_v54 = vand.u32 2147483647, %v1404_v12  ;;  %v1417_v9 = vor.u32 1.1754944e-38, %v1416_v16  ;;  %v4217_v17 = vld [vmem:[%s7462_s5 + $0xe8] sm:$0xf] }
 0x1bd   : > { %v1387_v4 = vsub.f32 1.0, %v1386_v52  ;;  %v4921_v52 = vld [vmem:[%s7462_s5 + $0xf4] sm:$0xf0] }
 0x1be   : > { %v1369_v15 = vmul.f32 %v5133_v18, %v1368_v11  ;;  %vm1415_vm7 = vcmp.eq.f32.partialorder %v1414_v54, 8.507059e+37 }
 0x1bf   : > { %v1388_v21 = vmul.f32 %v5135_v10, %v1387_v4  ;;  %v4218_v4 = vor.u32 %v4921_v52, %v4217_v17  ;;  %v4907_v52 = vld [vmem:[%s7462_s5 + $0x8c] sm:$0xf] }
 0x1c0   : > { %v5137_v25 = vpop.eup %5136  ;;  %v1370_v27 = vadd.f32 %v5133_v18, %v1369_v15  ;;  %v4222_v15 = vor.u32 %v4919_v5, %v4219_v13  ;;  %v4145_v5 = vld [vmem:[%s7462_s5 + $0x60] sm:$0xf]  ;;  %v4904_v13 = vld [vmem:[%s7462_s5 + $0x6c] sm:$0xf0] }
 0x1c1   : > { %v1389_v0 = vadd.f32 %v5135_v10, %v1388_v21  ;;  %v1406_v29 = vmul.f32 %v5137_v25, %v1404_v12  ;;  %v5139_v35 = vpop.eup %5138  ;;  %vm1411_vm4 = vweird.f32 %v5137_v25  ;;  %v4920_v12 = vld [vmem:[%s7462_s5 + $0xec] sm:$0xf0]  ;;  %1966 = vmatpush.bf16.msra.mxu2 %v4218_v4 }
 0x1c2   : > { %v1374_v33 = vsel %vm1373_vm0, %v5133_v18, %v1370_v27  ;;  %vm1412_vm6 = vmor %vm1410_vm5, %vm1411_vm4  ;;  %v4918_v18 = vld [vmem:[%s7462_s5 + $0xe4] sm:$0xf]  ;;  %v4210_v7 = vor.u32 %v4920_v12, %v4209_v63  ;;  %v4916_v21 = vld [vmem:[%s7462_s5 + $0xcc] sm:$0xf0]  ;;  %1979 = vmatpush.bf16.msra.mxu3 %v4222_v15 }
 0x1c3   : > { %v1379_v38 = vsel %vm1376_vm2, %v1378_v20, %v1374_v33  ;;  %v1393_v23 = vsel %vm1392_vm1, %v5135_v10, %v1389_v0  ;;  %v1407_v41 = vsub.f32 1.0, %v1406_v29  ;;  %v4211_v10 = vld [vmem:[%s7462_s5 + $0xf0] sm:$0xf0]  ;;  %v4201_v20 = vld [vmem:[%s7462_s5 + $0xc8] sm:$0xf] }
 0x1c4   : > { %v1398_v43 = vsel %vm1395_vm3, %v1397_v30, %v1393_v23  ;;  %v1421_v45 = vmul.f32 %v5139_v35, %v1379_v38  ;;  %v4214_v11 = vor.u32 %v4918_v18, %v4211_v10  ;;  %1940 = vmatpush.bf16.msra.mxu0 %v4210_v7  ;;  %v4195_v27 = vld [vmem:[%s7462_s5 + $0xd0] sm:$0xf0]  ;;  %v4917_v0 = vld [vmem:[%s7462_s5 + $0xd4] sm:$0xf0]  ;;  %v4915_v33 = vld [vmem:[%s7462_s5 + $0xcc] sm:$0xf] }
 0x1c5   : > { %v1420_v46 = vmul.f32 %v1398_v43, %v6162_v37  ;;  %v1408_v49 = vmul.f32 %v5137_v25, %v1407_v41  ;;  %v4198_v29 = vor.u32 %v4914_v22, %v4195_v27  ;;  %v4202_v30 = vor.u32 %v4917_v0, %v4201_v20  ;;  %v4203_v35 = vld [vmem:[%s7462_s5 + $0xd8] sm:$0xf0]  ;;  %v4177_v23 = vld [vmem:[%s7462_s5 + $0xa0] sm:$0xf]  ;;  %v4912_v41 = vld [vmem:[%s7462_s5 + $0xac] sm:$0xf0] }
 0x1c6   : > { %1953 = vmatpush.bf16.msra.mxu1 %v4214_v11  ;;  %v4206_v38 = vor.u32 %v4915_v33, %v4203_v35  ;;  %v4910_v43 = vld [vmem:[%s7462_s5 + $0xa4] sm:$0xf]  ;;  %v4163_v12 = vld [vmem:[%s7462_s5 + $0x90] sm:$0xf0]  ;;  %v4169_v18 = vld [vmem:[%s7462_s5 + $0x88] sm:$0xf] }
 0x1c7   : > { %v6369_v51 = vadd.f32 %v1421_v45, %v1420_v46  ;;  %v1409_v14 = vadd.f32 %v5137_v25, %v1408_v49  ;;  %1967 = vmatpush.bf16.msra.mxu2 %v4202_v30  ;;  %v4178_v45 = vor.u32 %v4912_v41, %v4177_v23  ;;  %v4179_v46 = vld [vmem:[%s7462_s5 + $0xb0] sm:$0xf0]  ;;  %v4185_v49 = vld [vmem:[%s7462_s5 + $0xa8] sm:$0xf]  ;;  %v4909_v7 = vld [vmem:[%s7462_s5 + $0x94] sm:$0xf0] }
 0x1c8   : > { %1980 = vmatpush.bf16.msra.mxu3 %v4206_v38  ;;  %v4182_v16 = vor.u32 %v4910_v43, %v4179_v46  ;;  %v4170_v17 = vor.u32 %v4909_v7, %v4169_v18  ;;  %v4171_v11 = vld [vmem:[%s7462_s5 + $0x98] sm:$0xf0]  ;;  %v4902_v15 = vld [vmem:[%s7462_s5 + $0x64] sm:$0xf]  ;;  %v4153_v22 = vld [vmem:[%s7462_s5 + $0x68] sm:$0xf] }
 0x1c9   : > { %5140 = vtanh.f32 %v6369_v51  ;;  %v1413_v55 = vsel %vm1412_vm6, %v5137_v25, %v1409_v14  ;;  %v4194_v25 = vor.u32 %v4916_v21, %v4193_v19  ;;  %v4913_v14 = vld [vmem:[%s7462_s5 + $0xb4] sm:$0xf0]  ;;  %v4174_v4 = vor.u32 %v4907_v52, %v4171_v11  ;;  %v4147_v21 = vld [vmem:[%s7462_s5 + $0x70] sm:$0xf0]  ;;  %v4903_v0 = vld [vmem:[%s7462_s5 + $0x6c] sm:$0xf] }
 0x1ca   : > { %v1418_v57 = vsel %vm1415_vm7, %v1417_v9, %v1413_v55  ;;  %1954 = vmatpush.bf16.msra.mxu1 %v4198_v29  ;;  %v4186_v54 = vor.u32 %v4913_v14, %v4185_v49  ;;  %v4911_v55 = vld [vmem:[%s7462_s5 + $0xac] sm:$0xf]  ;;  %v4187_v9 = vld [vmem:[%s7462_s5 + $0xb8] sm:$0xf0]  ;;  %v4146_v19 = vor.u32 %v4904_v13, %v4145_v5  ;;  %v4150_v27 = vor.u32 %v4902_v15, %v4147_v21  ;;  %v4129_v41 = vld [vmem:[%s7462_s5 + $0x40] sm:$0xf] }
 0x1cb   : > { %1941 = vmatpush.bf16.msra.mxu0 %v4194_v25  ;;  %v4905_v25 = vld [vmem:[%s7462_s5 + $0x74] sm:$0xf0]  ;;  %v4155_v29 = vld [vmem:[%s7462_s5 + $0x78] sm:$0xf0]  ;;  %v4900_v43 = vld [vmem:[%s7462_s5 + $0x4c] sm:$0xf0] }
 0x1cc   : > { %1968 = vmatpush.bf16.msra.mxu2 %v4186_v54  ;;  %v4154_v20 = vor.u32 %v4905_v25, %v4153_v22  ;;  %v4158_v35 = vor.u32 %v4903_v0, %v4155_v29  ;;  %v4130_v46 = vor.u32 %v4900_v43, %v4129_v41  ;;  %v4901_v49 = vld [vmem:[%s7462_s5 + $0x54] sm:$0xf0]  ;;  %v4115_v18 = vld [vmem:[%s7462_s5 + $0x30] sm:$0xf0]  ;;  %v4121_v7 = vld [vmem:[%s7462_s5 + $0x28] sm:$0xf] }
 0x1cd   : > { %v4895_v52 = vld [vmem:[%s7462_s5 + $0x2c] sm:$0xf]  ;;  %v4123_v11 = vld [vmem:[%s7462_s5 + $0x38] sm:$0xf0]  ;;  %v4892_v21 = vld [vmem:[%s7462_s5 + $0xc] sm:$0xf0] }
 0x1ce   : > { %1955 = vmatpush.bf16.msra.mxu1 %v4182_v16  ;;  %v4126_v15 = vor.u32 %v4895_v52, %v4123_v11  ;;  %v4890_v22 = vld [vmem:[%s7462_s5 + $0x4] sm:$0xf]  ;;  %v4099_v29 = vld [vmem:[%s7462_s5 + $0x10] sm:$0xf0] }
 0x1cf   : > { %v5141_v56 = vpop.eup %5140  ;;  %1942 = vmatpush.bf16.msra.mxu0 %v4178_v45  ;;  %v4898_v45 = vld [vmem:[%s7462_s5 + $0x44] sm:$0xf] }
 0x1d0   : > { %v1424_v58 = vmul.f32 %v5141_v56, %v1418_v57  ;;  %v4190_v56 = vor.u32 %v4911_v55, %v4187_v9  ;;  %v4161_v57 = vld [vmem:[%s7462_s5 + $0x80] sm:$0xf]  ;;  %1969 = vmatpush.bf16.msra.mxu2 %v4170_v17  ;;  %v4899_v9 = vld [vmem:[%s7462_s5 + $0x4c] sm:$0xf]  ;;  %v4897_v17 = vld [vmem:[%s7462_s5 + $0x34] sm:$0xf0] }
 0x1d1   : > { %v4122_v13 = vor.u32 %v4897_v17, %v4121_v7 }
 0x1d2   : > { %1425 = vst [vmem:[%s6169_s0 + $0x8] sm:$0xff] %v1424_v58  ;;  %v1430_v37 = vpack.c.bf16 %v1424_v58, %v1424_v58  ;;  %v4908_v58 = vld [vmem:[%s7462_s5 + $0x8c] sm:$0xf0]  ;;  %1981 = vmatpush.bf16.msra.mxu3 %v4190_v56  ;;  %v4139_v56 = vld [vmem:[%s7462_s5 + $0x58] sm:$0xf0] }
 0x1d3   : > { %v4162_v63 = vor.u32 %v4908_v58, %v4161_v57  ;;  %v4113_v57 = vld [vmem:[%s7462_s5 + $0x20] sm:$0xf]  ;;  %v4896_v58 = vld [vmem:[%s7462_s5 + $0x2c] sm:$0xf0] }
 0x1d4   : > { %1631 = vmatmul.bf16.vlgmr.msrb.gmra.mxu0 %v1430_v37  ;;  %1644 = vmatmul.bf16.vlgmr.msrb.gmra.mxu1 %v1430_v37 }
 0x1d5   : > { %1657 = vmatmul.bf16.vlgmr.msrb.gmra.mxu2 %v1430_v37  ;;  %1670 = vmatmul.bf16.vlgmr.msrb.gmra.mxu3 %v1430_v37  ;;  %v4906_v37 = vld [vmem:[%s7462_s5 + $0x84] sm:$0xf] }
 0x1d6   : > { %v4166_v10 = vor.u32 %v4906_v37, %v4163_v12  ;;  %1943 = vmatpush.bf16.msra.mxu0 %v4162_v63  ;;  %1982 = vmatpush.bf16.msra.mxu3 %v4174_v4  ;;  %v4142_v37 = vor.u32 %v4899_v9, %v4139_v56  ;;  %v4114_v63 = vor.u32 %v4896_v58, %v4113_v57  ;;  %v4894_v12 = vld [vmem:[%s7462_s5 + $0x24] sm:$0xf] }
 0x1d7   : > { %1970 = vmatpush.bf16.msra.mxu2 %v4154_v20 }
 0x1d8   : > { %1956 = vmatpush.bf16.msra.mxu1 %v4166_v10  ;;  %v4118_v10 = vor.u32 %v4894_v12, %v4115_v18 }
 0x1da   : > { %1944 = vmatpush.bf16.msra.mxu0 %v4146_v19  ;;  %1983 = vmatpush.bf16.msra.mxu3 %v4158_v35  ;;  %v4097_v19 = vld [vmem:[%s7462_s5] sm:$0xf]  ;;  %v4102_v35 = vor.u32 %v4890_v22, %v4099_v29 }
 0x1db   : > { %v4098_v0 = vor.u32 %v4892_v21, %v4097_v19 }
 0x1dc   : > { %1957 = vmatpush.bf16.msra.mxu1 %v4150_v27 }
 0x1de   : > { %1945 = vmatpush.bf16.msra.mxu0 %v4130_v46  ;;  %1984 = vmatpush.bf16.msra.mxu3 %v4142_v37 }
 0x1e2   : > { %1946 = vmatpush.bf16.msra.mxu0 %v4114_v63  ;;  %1985 = vmatpush.bf16.msra.mxu3 %v4126_v15 }
 0x1e6   : > { %1947 = vmatpush.bf16.msra.mxu0 %v4098_v0 }
 0x251   : > { %v1632_v30 = vpop.f32.mrf.mxu0  ;;  %v1645_v33 = vpop.f32.mrf.mxu1 }
 0x252   : > { %v1675_v38 = vadd.f32 %v1632_v30, %v5886_v24  ;;  %v1676_v23 = vadd.f32 %v1645_v33, %v5889_v26  ;;  %v4131_v24 = vld [vmem:[%s7462_s5 + $0x50] sm:$0xf0]  ;;  %v4137_v26 = vld [vmem:[%s7462_s5 + $0x48] sm:$0xf]  ;;  %v4893_v33 = vld [vmem:[%s7462_s5 + $0x14] sm:$0xf0] }
 0x253   : > { %v4134_v54 = vor.u32 %v4898_v45, %v4131_v24  ;;  %v4138_v55 = vor.u32 %v4901_v49, %v4137_v26  ;;  %v4105_v30 = vld [vmem:[%s7462_s5 + $0x8] sm:$0xf] }
 0x254   : > { %v4092_v14 = vmul.f32 -1.442695, %v1675_v38  ;;  %v4093_v16 = vmul.f32 -1.442695, %v1676_v23  ;;  %v4891_v38 = vld [vmem:[%s7462_s5 + $0xc] sm:$0xf] }
 0x255   : > { %1958 = vmatpush.bf16.msra.mxu1 %v4134_v54  ;;  %1971 = vmatpush.bf16.msra.mxu2 %v4138_v55  ;;  %v4107_v23 = vld [vmem:[%s7462_s5 + $0x18] sm:$0xf0] }
 0x256   : > { %5142 = vpow2.f32 %v4092_v14  ;;  %v4110_v45 = vor.u32 %v4891_v38, %v4107_v23 }
 0x257   : > { %5144 = vpow2.f32 %v4093_v16 }
 0x258   : > { %v1658_v4 = vpop.f32.mrf.mxu2  ;;  %v1671_v5 = vpop.f32.mrf.mxu3  ;;  %1986 = vmatpush.bf16.msra.mxu3 %v4110_v45 }
 0x259   : > { %v1678_v25 = vadd.f32 %v1671_v5, %v5895_v31  ;;  %v1634_v27 = vpop.f32.mrf.mxu0  ;;  %v1647_v20 = vpop.f32.mrf.mxu1  ;;  %1959 = vmatpush.bf16.msra.mxu1 %v4118_v10  ;;  %1972 = vmatpush.bf16.msra.mxu2 %v4122_v13  ;;  %v4106_v31 = vor.u32 %v4893_v33, %v4105_v30  ;;  %v1677_v9 = vadd.f32 %v1658_v4, %v5892_v28 }
 0x25b   : > { %v4094_v41 = vmul.f32 -1.442695, %v1678_v25 }
 0x25c   : > { %v5143_v43 = vpop.eup %5142 }
 0x25d   : > { %v5145_v46 = vpop.eup %5144  ;;  %v1682_v24 = vadd.f32 1.0, %v5143_v43  ;;  %5146 = vpow2.f32 %v4094_v41  ;;  %1960 = vmatpush.bf16.msra.mxu1 %v4102_v35  ;;  %1973 = vmatpush.bf16.msra.mxu2 %v4106_v31 }
 0x25e   : > { %v1701_v26 = vadd.f32 1.0, %v5145_v46 }
 0x25f   : > { %5148 = vrcp.f32 %v1682_v24  ;;  %v1694_v12 = vand.u32 2147483648, %v1682_v24  ;;  %v1692_v10 = vand.u32 2147483647, %v1682_v24  ;;  %vm1688_vm10 = vweird.f32 %v1682_v24 }
 0x260   : > { %5150 = vrcp.f32 %v1701_v26  ;;  %v1660_v49 = vpop.f32.mrf.mxu2  ;;  %v1673_v14 = vpop.f32.mrf.mxu3  ;;  %v1713_v18 = vand.u32 2147483648, %v1701_v26  ;;  %v1711_v52 = vand.u32 2147483647, %v1701_v26  ;;  %vm1707_vm11 = vweird.f32 %v1701_v26 }
 0x261   : > { %v1695_v28 = vor.u32 1.1754944e-38, %v1694_v12  ;;  %vm1693_vm14 = vcmp.eq.f32.partialorder %v1692_v10, 8.507059e+37  ;;  %v4950_v49 = vld [vmem:[%s7462_s5 + $0xe4] sm:$0xf]  ;;  %v4948_v12 = vld [vmem:[%s7462_s5 + $0xcc] sm:$0xf0] }
 0x262   : > { %v1714_v15 = vor.u32 1.1754944e-38, %v1713_v18  ;;  %vm1712_vm15 = vcmp.eq.f32.partialorder %v1711_v52, 8.507059e+37  ;;  %v4946_v18 = vld [vmem:[%s7462_s5 + $0xc4] sm:$0xf]  ;;  %v4326_v10 = vld [vmem:[%s7462_s5 + $0xd0] sm:$0xf0] }
 0x263   : > { %v5147_v16 = vpop.eup %5146  ;;  %v4949_v52 = vld [vmem:[%s7462_s5 + $0xd4] sm:$0xf0] }
 0x264   : > { %v1721_v54 = vadd.f32 1.0, %v5147_v16  ;;  %v4342_v16 = vld [vmem:[%s7462_s5 + $0xf0] sm:$0xf0] }
 0x265   : > { %v5149_v55 = vpop.eup %5148 }
 0x266   : > { %v5151_v56 = vpop.eup %5150  ;;  %v1684_v57 = vmul.f32 %v5149_v55, %v1682_v24  ;;  %5152 = vrcp.f32 %v1721_v54  ;;  %vm1689_vm8 = vweird.f32 %v5149_v55  ;;  %v1733_v31 = vand.u32 2147483648, %v1721_v54  ;;  %v4340_v24 = vld [vmem:[%s7462_s5 + $0xe0] sm:$0xf] }
 0x267   : > { %v1703_v58 = vmul.f32 %v5151_v56, %v1701_v26  ;;  %5154 = vtanh.f32 %v1677_v9  ;;  %vm1708_vm9 = vweird.f32 %v5151_v56  ;;  %vm1690_vm12 = vmor %vm1688_vm10, %vm1689_vm8  ;;  %vm1727_vm1 = vweird.f32 %v1721_v54  ;;  %v4952_v26 = vld [vmem:[%s7462_s5 + $0xec] sm:$0xf0] }
 0x268   : > { %v1685_v37 = vsub.f32 1.0, %v1684_v57  ;;  %vm1709_vm13 = vmor %vm1707_vm11, %vm1708_vm9  ;;  %v1731_v38 = vand.u32 2147483647, %v1721_v54  ;;  %v1734_v41 = vor.u32 1.1754944e-38, %v1733_v31  ;;  %v4341_v14 = vor.u32 %v4952_v26, %v4340_v24  ;;  %v4951_v57 = vld [vmem:[%s7462_s5 + $0xec] sm:$0xf] }
 0x269   : > { %v1704_v63 = vsub.f32 1.0, %v1703_v58  ;;  %v4345_v9 = vor.u32 %v4950_v49, %v4342_v16  ;;  %v4350_v58 = vld [vmem:[%s7462_s5 + $0xf8] sm:$0xf0]  ;;  %v4939_v49 = vld [vmem:[%s7462_s5 + $0x8c] sm:$0xf] }
 0x26a   : > { %v1686_v7 = vmul.f32 %v5149_v55, %v1685_v37  ;;  %vm1732_vm3 = vcmp.eq.f32.partialorder %v1731_v38, 8.507059e+37  ;;  %2257 = vmatpush.bf16.msrb.mxu0 %v4341_v14  ;;  %v4353_v37 = vor.u32 %v4951_v57, %v4350_v58  ;;  %v4292_v38 = vld [vmem:[%s7462_s5 + $0x80] sm:$0xf]  ;;  %v4302_v14 = vld [vmem:[%s7462_s5 + $0x98] sm:$0xf0] }
 0x26b   : > { %v1705_v17 = vmul.f32 %v5151_v56, %v1704_v63  ;;  %2270 = vmatpush.bf16.msrb.mxu1 %v4345_v9  ;;  %v4324_v63 = vld [vmem:[%s7462_s5 + $0xc0] sm:$0xf]  ;;  %v4305_v16 = vor.u32 %v4939_v49, %v4302_v14  ;;  %v4934_v9 = vld [vmem:[%s7462_s5 + $0x64] sm:$0xf]  ;;  %v4278_v57 = vld [vmem:[%s7462_s5 + $0x70] sm:$0xf0] }
 0x26c   : > { %v5153_v11 = vpop.eup %5152  ;;  %v1687_v5 = vadd.f32 %v5149_v55, %v1686_v7  ;;  %2296 = vmatpush.bf16.msrb.mxu3 %v4353_v37  ;;  %v4325_v7 = vor.u32 %v4948_v12, %v4324_v63  ;;  %v4284_v58 = vld [vmem:[%s7462_s5 + $0x68] sm:$0xf]  ;;  %v4937_v37 = vld [vmem:[%s7462_s5 + $0x74] sm:$0xf0]  ;;  %v4281_v63 = vor.u32 %v4934_v9, %v4278_v57 }
 0x26d   : > { %v1706_v4 = vadd.f32 %v5151_v56, %v1705_v17  ;;  %v1723_v13 = vmul.f32 %v5153_v11, %v1721_v54  ;;  %v5155_v21 = vpop.eup %5154  ;;  %vm1728_vm0 = vweird.f32 %v5153_v11  ;;  %v4348_v54 = vld [vmem:[%s7462_s5 + $0xe8] sm:$0xf]  ;;  %v4285_v12 = vor.u32 %v4937_v37, %v4284_v58  ;;  %v4230_v37 = vld [vmem:[%s7462_s5 + $0x10] sm:$0xf0] }
 0x26e   : > { %v1691_v19 = vsel %vm1690_vm12, %v5149_v55, %v1687_v5  ;;  %vm1729_vm2 = vmor %vm1727_vm1, %vm1728_vm0  ;;  %v4953_v55 = vld [vmem:[%s7462_s5 + $0xf4] sm:$0xf0]  ;;  %v4332_v17 = vld [vmem:[%s7462_s5 + $0xc8] sm:$0xf]  ;;  %2258 = vmatpush.bf16.msrb.mxu0 %v4325_v7 }
 0x26f   : > { %v1696_v22 = vsel %vm1693_vm14, %v1695_v28, %v1691_v19  ;;  %v1710_v25 = vsel %vm1709_vm13, %v5151_v56, %v1706_v4  ;;  %v1724_v27 = vsub.f32 1.0, %v1723_v13  ;;  %v4349_v56 = vor.u32 %v4953_v55, %v4348_v54  ;;  %v4947_v28 = vld [vmem:[%s7462_s5 + $0xcc] sm:$0xf]  ;;  %v4334_v4 = vld [vmem:[%s7462_s5 + $0xd8] sm:$0xf0] }
 0x270   : > { %v1715_v20 = vsel %vm1712_vm15, %v1714_v15, %v1710_v25  ;;  %v1738_v0 = vmul.f32 %v5155_v21, %v1696_v22  ;;  %v4333_v5 = vor.u32 %v4949_v52, %v4332_v17  ;;  %v4337_v13 = vor.u32 %v4947_v28, %v4334_v4  ;;  %v4308_v15 = vld [vmem:[%s7462_s5 + $0xa0] sm:$0xf]  ;;  %v4944_v19 = vld [vmem:[%s7462_s5 + $0xac] sm:$0xf0]  ;;  %v4942_v21 = vld [vmem:[%s7462_s5 + $0xa4] sm:$0xf] }
 0x271   : > { %v1737_v29 = vmul.f32 %v1715_v20, %v6369_v51  ;;  %v1725_v30 = vmul.f32 %v5153_v11, %v1724_v27  ;;  %2283 = vmatpush.bf16.msrb.mxu2 %v4349_v56  ;;  %v4309_v22 = vor.u32 %v4944_v19, %v4308_v15  ;;  %v4310_v25 = vld [vmem:[%s7462_s5 + $0xb0] sm:$0xf0]  ;;  %v4316_v27 = vld [vmem:[%s7462_s5 + $0xa8] sm:$0xf]  ;;  %v4945_v20 = vld [vmem:[%s7462_s5 + $0xb4] sm:$0xf0] }
 0x272   : > { %2297 = vmatpush.bf16.msrb.mxu3 %v4337_v13  ;;  %v4276_v54 = vld [vmem:[%s7462_s5 + $0x60] sm:$0xf]  ;;  %v4936_v55 = vld [vmem:[%s7462_s5 + $0x6c] sm:$0xf0]  ;;  %v4286_v7 = vld [vmem:[%s7462_s5 + $0x78] sm:$0xf0] }
 0x273   : > { %v6570_v33 = vadd.f32 %v1738_v0, %v1737_v29  ;;  %v1726_v35 = vadd.f32 %v5153_v11, %v1725_v30  ;;  %v4313_v0 = vor.u32 %v4942_v21, %v4310_v25  ;;  %v4317_v29 = vor.u32 %v4945_v20, %v4316_v27  ;;  %v4943_v30 = vld [vmem:[%s7462_s5 + $0xac] sm:$0xf]  ;;  %2259 = vmatpush.bf16.msrb.mxu0 %v4309_v22  ;;  %v4260_v28 = vld [vmem:[%s7462_s5 + $0x40] sm:$0xf]  ;;  %v4932_v4 = vld [vmem:[%s7462_s5 + $0x4c] sm:$0xf0] }
 0x274   : > { %v4277_v56 = vor.u32 %v4936_v55, %v4276_v54  ;;  %v4930_v13 = vld [vmem:[%s7462_s5 + $0x44] sm:$0xf]  ;;  %v4261_v15 = vor.u32 %v4932_v4, %v4260_v28  ;;  %v4933_v19 = vld [vmem:[%s7462_s5 + $0x54] sm:$0xf0]  ;;  %v4931_v20 = vld [vmem:[%s7462_s5 + $0x4c] sm:$0xf] }
 0x275   : > { %5156 = vtanh.f32 %v6570_v33  ;;  %v1730_v23 = vsel %vm1729_vm2, %v5153_v11, %v1726_v35  ;;  %v4329_v11 = vor.u32 %v4946_v18, %v4326_v10  ;;  %2284 = vmatpush.bf16.msrb.mxu2 %v4333_v5  ;;  %v4318_v35 = vld [vmem:[%s7462_s5 + $0xb8] sm:$0xf0]  ;;  %v4935_v18 = vld [vmem:[%s7462_s5 + $0x6c] sm:$0xf]  ;;  %v4924_v54 = vld [vmem:[%s7462_s5 + $0xc] sm:$0xf0] }
 0x276   : > { %v1735_v45 = vsel %vm1732_vm3, %v1734_v41, %v1730_v23  ;;  %v4321_v31 = vor.u32 %v4943_v30, %v4318_v35  ;;  %v4940_v23 = vld [vmem:[%s7462_s5 + $0x8c] sm:$0xf0]  ;;  %v4938_v41 = vld [vmem:[%s7462_s5 + $0x84] sm:$0xf]  ;;  %v4289_v52 = vor.u32 %v4935_v18, %v4286_v7  ;;  %v4923_v7 = vld [vmem:[%s7462_s5 + $0xc] sm:$0xf] }
 0x277   : > { %2271 = vmatpush.bf16.msrb.mxu1 %v4329_v11  ;;  %v4928_v30 = vld [vmem:[%s7462_s5 + $0x2c] sm:$0xf0]  ;;  %v4922_v55 = vld [vmem:[%s7462_s5 + $0x4] sm:$0xf] }
 0x278   : > { %2298 = vmatpush.bf16.msrb.mxu3 %v4321_v31  ;;  %v4233_v18 = vor.u32 %v4922_v55, %v4230_v37 }
 0x279   : > { %2285 = vmatpush.bf16.msrb.mxu2 %v4317_v29  ;;  %v4244_v29 = vld [vmem:[%s7462_s5 + $0x20] sm:$0xf] }
 0x27a   : > { %v4245_v31 = vor.u32 %v4928_v30, %v4244_v29 }
 0x27b   : > { %v5157_v43 = vpop.eup %5156  ;;  %2272 = vmatpush.bf16.msrb.mxu1 %v4313_v0  ;;  %v4270_v0 = vld [vmem:[%s7462_s5 + $0x58] sm:$0xf0] }
 0x27c   : > { %v1741_v46 = vmul.f32 %v5157_v43, %v1735_v45  ;;  %v4293_v43 = vor.u32 %v4940_v23, %v4292_v38  ;;  %v4294_v45 = vld [vmem:[%s7462_s5 + $0x90] sm:$0xf0]  ;;  %2299 = vmatpush.bf16.msrb.mxu3 %v4305_v16  ;;  %v4273_v35 = vor.u32 %v4931_v20, %v4270_v0  ;;  %v4926_v38 = vld [vmem:[%s7462_s5 + $0x24] sm:$0xf]  ;;  %v4228_v16 = vld [vmem:[%s7462_s5] sm:$0xf] }
 0x27d   : > { %v4297_v24 = vor.u32 %v4938_v41, %v4294_v45  ;;  %v4246_v23 = vld [vmem:[%s7462_s5 + $0x30] sm:$0xf0]  ;;  %v4252_v41 = vld [vmem:[%s7462_s5 + $0x28] sm:$0xf]  ;;  %v4929_v45 = vld [vmem:[%s7462_s5 + $0x34] sm:$0xf0]  ;;  %v4229_v58 = vor.u32 %v4924_v54, %v4228_v16 }
 0x27e   : > { %1742 = vst [vmem:[%s6169_s0 + $0x10] sm:$0xff] %v1741_v46  ;;  %v1747_v51 = vpack.c.bf16 %v1741_v46, %v1741_v46  ;;  %v4300_v46 = vld [vmem:[%s7462_s5 + $0x88] sm:$0xf]  ;;  %2260 = vmatpush.bf16.msrb.mxu0 %v4293_v43  ;;  %v4249_v43 = vor.u32 %v4926_v38, %v4246_v23  ;;  %v4253_v49 = vor.u32 %v4929_v45, %v4252_v41 }
 0x27f   : > { %2273 = vmatpush.bf16.msrb.mxu1 %v4297_v24 }
 0x280   : > { %1948 = vmatmul.bf16.vlgmr.msra.gmra.mxu0 %v1747_v51  ;;  %1961 = vmatmul.bf16.vlgmr.msra.gmra.mxu1 %v1747_v51 }
 0x281   : > { %1974 = vmatmul.bf16.vlgmr.msra.gmra.mxu2 %v1747_v51  ;;  %1987 = vmatmul.bf16.vlgmr.msra.gmra.mxu3 %v1747_v51  ;;  %v4941_v51 = vld [vmem:[%s7462_s5 + $0x94] sm:$0xf0] }
 0x282   : > { %v4301_v26 = vor.u32 %v4941_v51, %v4300_v46  ;;  %2261 = vmatpush.bf16.msrb.mxu0 %v4277_v56  ;;  %2300 = vmatpush.bf16.msrb.mxu3 %v4289_v52  ;;  %v4927_v46 = vld [vmem:[%s7462_s5 + $0x2c] sm:$0xf]  ;;  %v4254_v51 = vld [vmem:[%s7462_s5 + $0x38] sm:$0xf0] }
 0x283   : > { %2274 = vmatpush.bf16.msrb.mxu1 %v4281_v63  ;;  %v4257_v14 = vor.u32 %v4927_v46, %v4254_v51  ;;  %v4236_v63 = vld [vmem:[%s7462_s5 + $0x8] sm:$0xf] }
 0x284   : > { %2286 = vmatpush.bf16.msrb.mxu2 %v4301_v26 }
 0x286   : > { %2262 = vmatpush.bf16.msrb.mxu0 %v4261_v15  ;;  %2301 = vmatpush.bf16.msrb.mxu3 %v4273_v35 }
 0x288   : > { %2287 = vmatpush.bf16.msrb.mxu2 %v4285_v12  ;;  %v4925_v12 = vld [vmem:[%s7462_s5 + $0x14] sm:$0xf0] }
 0x28a   : > { %2263 = vmatpush.bf16.msrb.mxu0 %v4245_v31  ;;  %2302 = vmatpush.bf16.msrb.mxu3 %v4257_v14 }
 0x28e   : > { %2264 = vmatpush.bf16.msrb.mxu0 %v4229_v58 }
 0x2fd   : > { %v1949_v10 = vpop.f32.mrf.mxu0  ;;  %v1962_v17 = vpop.f32.mrf.mxu1 }
 0x2fe   : > { %v1992_v11 = vadd.f32 %v1949_v10, %v5898_v32  ;;  %v1993_v5 = vadd.f32 %v1962_v17, %v5901_v34  ;;  %v4262_v32 = vld [vmem:[%s7462_s5 + $0x50] sm:$0xf0]  ;;  %v4268_v34 = vld [vmem:[%s7462_s5 + $0x48] sm:$0xf]  ;;  %v4238_v10 = vld [vmem:[%s7462_s5 + $0x18] sm:$0xf0] }
 0x2ff   : > { %v4265_v25 = vor.u32 %v4930_v13, %v4262_v32  ;;  %v4269_v27 = vor.u32 %v4933_v19, %v4268_v34 }
 0x300   : > { %v4223_v21 = vmul.f32 -1.442695, %v1992_v11  ;;  %v4224_v22 = vmul.f32 -1.442695, %v1993_v5  ;;  %v4241_v11 = vor.u32 %v4923_v7, %v4238_v10 }
 0x301   : > { %2275 = vmatpush.bf16.msrb.mxu1 %v4265_v25  ;;  %2288 = vmatpush.bf16.msrb.mxu2 %v4269_v27 }
 0x302   : > { %5158 = vpow2.f32 %v4223_v21  ;;  %2303 = vmatpush.bf16.msrb.mxu3 %v4241_v11  ;;  %v4982_v11 = vld [vmem:[%s7462_s5 + $0xe4] sm:$0xf] }
 0x303   : > { %5160 = vpow2.f32 %v4224_v22 }
 0x304   : > { %v1975_v24 = vpop.f32.mrf.mxu2  ;;  %v1988_v26 = vpop.f32.mrf.mxu3 }
 0x305   : > { %v1995_v9 = vadd.f32 %v1988_v26, %v5907_v39  ;;  %v1951_v56 = vpop.f32.mrf.mxu0  ;;  %v1964_v57 = vpop.f32.mrf.mxu1  ;;  %2276 = vmatpush.bf16.msrb.mxu1 %v4249_v43  ;;  %2289 = vmatpush.bf16.msrb.mxu2 %v4253_v49  ;;  %v4237_v39 = vor.u32 %v4925_v12, %v4236_v63  ;;  %v1994_v21 = vadd.f32 %v1975_v24, %v5904_v36 }
 0x307   : > { %v4225_v17 = vmul.f32 -1.442695, %v1995_v9 }
 0x308   : > { %v5159_v52 = vpop.eup %5158 }
 0x309   : > { %v5161_v5 = vpop.eup %5160  ;;  %v1999_v28 = vadd.f32 1.0, %v5159_v52  ;;  %5162 = vpow2.f32 %v4225_v17  ;;  %2277 = vmatpush.bf16.msrb.mxu1 %v4233_v18  ;;  %2290 = vmatpush.bf16.msrb.mxu2 %v4237_v39  ;;  %v4471_v17 = vld [vmem:[%s7462_s5 + $0xe0] sm:$0xf]  ;;  %v4984_v52 = vld [vmem:[%s7462_s5 + $0xec] sm:$0xf0] }
 0x30a   : > { %v2018_v4 = vadd.f32 1.0, %v5161_v5  ;;  %v4472_v5 = vor.u32 %v4984_v52, %v4471_v17  ;;  %v4407_v52 = vld [vmem:[%s7462_s5 + $0x60] sm:$0xf] }
 0x30b   : > { %5164 = vrcp.f32 %v1999_v28  ;;  %v2011_v29 = vand.u32 2147483648, %v1999_v28  ;;  %v2009_v31 = vand.u32 2147483647, %v1999_v28  ;;  %vm2005_vm6 = vweird.f32 %v1999_v28 }
 0x30c   : > { %5166 = vrcp.f32 %v2018_v4  ;;  %v1977_v13 = vpop.f32.mrf.mxu2  ;;  %v1990_v15 = vpop.f32.mrf.mxu3  ;;  %v2030_v30 = vand.u32 2147483648, %v2018_v4  ;;  %v2028_v23 = vand.u32 2147483647, %v2018_v4  ;;  %vm2024_vm7 = vweird.f32 %v2018_v4  ;;  %2574 = vmatpush.bf16.msra.mxu0 %v4472_v5  ;;  %v4966_v5 = vld [vmem:[%s7462_s5 + $0x64] sm:$0xf] }
 0x30d   : > { %v2012_v36 = vor.u32 1.1754944e-38, %v2011_v29  ;;  %vm2010_vm10 = vcmp.eq.f32.partialorder %v2009_v31, 8.507059e+37  ;;  %v4985_v13 = vld [vmem:[%s7462_s5 + $0xf4] sm:$0xf0]  ;;  %v4463_v29 = vld [vmem:[%s7462_s5 + $0xc8] sm:$0xf] }
 0x30e   : > { %v2031_v51 = vor.u32 1.1754944e-38, %v2030_v30  ;;  %vm2029_vm11 = vcmp.eq.f32.partialorder %v2028_v23, 8.507059e+37  ;;  %v4981_v30 = vld [vmem:[%s7462_s5 + $0xd4] sm:$0xf0]  ;;  %v4465_v23 = vld [vmem:[%s7462_s5 + $0xd8] sm:$0xf0] }
 0x30f   : > { %v5163_v32 = vpop.eup %5162  ;;  %v4464_v31 = vor.u32 %v4981_v30, %v4463_v29  ;;  %v4391_v29 = vld [vmem:[%s7462_s5 + $0x40] sm:$0xf]  ;;  %v4964_v30 = vld [vmem:[%s7462_s5 + $0x4c] sm:$0xf0] }
 0x310   : > { %v2038_v34 = vadd.f32 1.0, %v5163_v32 }
 0x311   : > { %v5165_v19 = vpop.eup %5164 }
 0x312   : > { %v5167_v22 = vpop.eup %5166  ;;  %v2001_v25 = vmul.f32 %v5165_v19, %v1999_v28  ;;  %5168 = vrcp.f32 %v2038_v34  ;;  %vm2006_vm4 = vweird.f32 %v5165_v19  ;;  %v2050_v37 = vand.u32 2147483648, %v2038_v34  ;;  %v4473_v28 = vld [vmem:[%s7462_s5 + $0xf0] sm:$0xf0] }
 0x313   : > { %v2020_v27 = vmul.f32 %v5167_v22, %v2018_v4  ;;  %5170 = vtanh.f32 %v1994_v21  ;;  %vm2025_vm5 = vweird.f32 %v5167_v22  ;;  %vm2007_vm8 = vmor %vm2005_vm6, %vm2006_vm4  ;;  %vm2044_vm13 = vweird.f32 %v2038_v34  ;;  %v4479_v4 = vld [vmem:[%s7462_s5 + $0xe8] sm:$0xf] }
 0x314   : > { %v2002_v20 = vsub.f32 1.0, %v2001_v25  ;;  %vm2026_vm9 = vmor %vm2024_vm7, %vm2025_vm5  ;;  %v2048_v63 = vand.u32 2147483647, %v2038_v34  ;;  %v2051_v18 = vor.u32 1.1754944e-38, %v2050_v37  ;;  %v4476_v15 = vor.u32 %v4982_v11, %v4473_v28  ;;  %v4980_v25 = vld [vmem:[%s7462_s5 + $0xcc] sm:$0xf0] }
 0x315   : > { %v2021_v0 = vsub.f32 1.0, %v2020_v27  ;;  %v4480_v32 = vor.u32 %v4985_v13, %v4479_v4  ;;  %v4978_v27 = vld [vmem:[%s7462_s5 + $0xc4] sm:$0xf]  ;;  %v4968_v11 = vld [vmem:[%s7462_s5 + $0x6c] sm:$0xf0] }
 0x316   : > { %v2003_v35 = vmul.f32 %v5165_v19, %v2002_v20  ;;  %vm2049_vm15 = vcmp.eq.f32.partialorder %v2048_v63, 8.507059e+37  ;;  %2587 = vmatpush.bf16.msra.mxu1 %v4476_v15  ;;  %v4425_v63 = vld [vmem:[%s7462_s5 + $0x90] sm:$0xf0]  ;;  %v4408_v28 = vor.u32 %v4968_v11, %v4407_v52  ;;  %v4415_v13 = vld [vmem:[%s7462_s5 + $0x68] sm:$0xf] }
 0x317   : > { %v2022_v38 = vmul.f32 %v5167_v22, %v2021_v0  ;;  %2600 = vmatpush.bf16.msra.mxu2 %v4480_v32  ;;  %v4457_v0 = vld [vmem:[%s7462_s5 + $0xd0] sm:$0xf0]  ;;  %v4969_v15 = vld [vmem:[%s7462_s5 + $0x74] sm:$0xf0] }
 0x318   : > { %v5169_v41 = vpop.eup %5168  ;;  %v2004_v43 = vadd.f32 %v5165_v19, %v2003_v35  ;;  %v4460_v35 = vor.u32 %v4978_v27, %v4457_v0  ;;  %v4409_v4 = vld [vmem:[%s7462_s5 + $0x70] sm:$0xf0] }
 0x319   : > { %v2023_v45 = vadd.f32 %v5167_v22, %v2022_v38  ;;  %v2040_v46 = vmul.f32 %v5169_v41, %v2038_v34  ;;  %v5171_v26 = vpop.eup %5170  ;;  %vm2045_vm12 = vweird.f32 %v5169_v41  ;;  %v4983_v34 = vld [vmem:[%s7462_s5 + $0xec] sm:$0xf]  ;;  %v4412_v32 = vor.u32 %v4966_v5, %v4409_v4  ;;  %v4361_v5 = vld [vmem:[%s7462_s5 + $0x10] sm:$0xf0]  ;;  %v4957_v4 = vld [vmem:[%s7462_s5 + $0x14] sm:$0xf0] }
 0x31a   : > { %v2008_v24 = vsel %vm2007_vm8, %v5165_v19, %v2004_v43  ;;  %vm2046_vm14 = vmor %vm2044_vm13, %vm2045_vm12  ;;  %v4481_v19 = vld [vmem:[%s7462_s5 + $0xf8] sm:$0xf0]  ;;  %v4979_v38 = vld [vmem:[%s7462_s5 + $0xcc] sm:$0xf]  ;;  %2588 = vmatpush.bf16.msra.mxu1 %v4460_v35 }
 0x31b   : > { %v2013_v49 = vsel %vm2010_vm10, %v2012_v36, %v2008_v24  ;;  %v2027_v14 = vsel %vm2026_vm9, %v5167_v22, %v2023_v45  ;;  %v2041_v16 = vsub.f32 1.0, %v2040_v46  ;;  %v4484_v21 = vor.u32 %v4983_v34, %v4481_v19  ;;  %v4455_v22 = vld [vmem:[%s7462_s5 + $0xc0] sm:$0xf]  ;;  %2601 = vmatpush.bf16.msra.mxu2 %v4464_v31  ;;  %v4976_v36 = vld [vmem:[%s7462_s5 + $0xac] sm:$0xf0] }
 0x31c   : > { %v2032_v54 = vsel %vm2029_vm11, %v2031_v51, %v2027_v14  ;;  %v2055_v55 = vmul.f32 %v5171_v26, %v2013_v49  ;;  %v4456_v20 = vor.u32 %v4980_v25, %v4455_v22  ;;  %v4439_v43 = vld [vmem:[%s7462_s5 + $0xa0] sm:$0xf]  ;;  %v4974_v45 = vld [vmem:[%s7462_s5 + $0xa4] sm:$0xf]  ;;  %v4441_v51 = vld [vmem:[%s7462_s5 + $0xb0] sm:$0xf0]  ;;  %v4416_v34 = vor.u32 %v4969_v15, %v4415_v13 }
 0x31d   : > { %v2054_v9 = vmul.f32 %v2032_v54, %v6570_v33  ;;  %v2042_v56 = vmul.f32 %v5169_v41, %v2041_v16  ;;  %2613 = vmatpush.bf16.msra.mxu3 %v4484_v21  ;;  %v4440_v46 = vor.u32 %v4976_v36, %v4439_v43  ;;  %v4447_v24 = vld [vmem:[%s7462_s5 + $0xa8] sm:$0xf]  ;;  %v4977_v26 = vld [vmem:[%s7462_s5 + $0xb4] sm:$0xf0]  ;;  %v4444_v49 = vor.u32 %v4974_v45, %v4441_v51  ;;  %v4975_v16 = vld [vmem:[%s7462_s5 + $0xac] sm:$0xf] }
 0x31e   : > { %2575 = vmatpush.bf16.msra.mxu0 %v4456_v20  ;;  %v4448_v14 = vor.u32 %v4977_v26, %v4447_v24  ;;  %v4449_v54 = vld [vmem:[%s7462_s5 + $0xb8] sm:$0xf0]  ;;  %v4967_v19 = vld [vmem:[%s7462_s5 + $0x6c] sm:$0xf]  ;;  %v4962_v35 = vld [vmem:[%s7462_s5 + $0x44] sm:$0xf]  ;;  %v4392_v31 = vor.u32 %v4964_v30, %v4391_v29 }
 0x31f   : > { %v6771_v57 = vadd.f32 %v2055_v55, %v2054_v9  ;;  %v2043_v58 = vadd.f32 %v5169_v41, %v2042_v56  ;;  %v4452_v55 = vor.u32 %v4975_v16, %v4449_v54  ;;  %2589 = vmatpush.bf16.msra.mxu1 %v4444_v49  ;;  %v4423_v9 = vld [vmem:[%s7462_s5 + $0x80] sm:$0xf]  ;;  %v4972_v56 = vld [vmem:[%s7462_s5 + $0x8c] sm:$0xf0]  ;;  %v4417_v21 = vld [vmem:[%s7462_s5 + $0x78] sm:$0xf0] }
 0x320   : > { %2602 = vmatpush.bf16.msra.mxu2 %v4448_v14  ;;  %v4424_v37 = vor.u32 %v4972_v56, %v4423_v9  ;;  %v4420_v27 = vor.u32 %v4967_v19, %v4417_v21  ;;  %v4963_v45 = vld [vmem:[%s7462_s5 + $0x4c] sm:$0xf]  ;;  %v4375_v51 = vld [vmem:[%s7462_s5 + $0x20] sm:$0xf]  ;;  %v4960_v24 = vld [vmem:[%s7462_s5 + $0x2c] sm:$0xf0] }
 0x321   : > { %5172 = vtanh.f32 %v6771_v57  ;;  %v2047_v12 = vsel %vm2046_vm14, %v5169_v41, %v2043_v58  ;;  %v4468_v41 = vor.u32 %v4979_v38, %v4465_v23  ;;  %v4970_v58 = vld [vmem:[%s7462_s5 + $0x84] sm:$0xf]  ;;  %v4965_v38 = vld [vmem:[%s7462_s5 + $0x54] sm:$0xf0]  ;;  %v4376_v49 = vor.u32 %v4960_v24, %v4375_v51  ;;  %v4377_v16 = vld [vmem:[%s7462_s5 + $0x30] sm:$0xf0] }
 0x322   : > { %v2052_v7 = vsel %vm2049_vm15, %v2051_v18, %v2047_v12  ;;  %2576 = vmatpush.bf16.msra.mxu0 %v4440_v46  ;;  %v4431_v12 = vld [vmem:[%s7462_s5 + $0x88] sm:$0xf]  ;;  %v4973_v18 = vld [vmem:[%s7462_s5 + $0x94] sm:$0xf0]  ;;  %v4401_v46 = vld [vmem:[%s7462_s5 + $0x58] sm:$0xf0] }
 0x323   : > { %2614 = vmatpush.bf16.msra.mxu3 %v4468_v41  ;;  %v4404_v26 = vor.u32 %v4963_v45, %v4401_v46  ;;  %v4958_v14 = vld [vmem:[%s7462_s5 + $0x24] sm:$0xf]  ;;  %v4383_v54 = vld [vmem:[%s7462_s5 + $0x28] sm:$0xf]  ;;  %v4961_v9 = vld [vmem:[%s7462_s5 + $0x34] sm:$0xf0] }
 0x324   : > { %v4959_v56 = vld [vmem:[%s7462_s5 + $0x2c] sm:$0xf] }
 0x325   : > { %v4955_v15 = vld [vmem:[%s7462_s5 + $0xc] sm:$0xf] }
 0x326   : > { %2577 = vmatpush.bf16.msra.mxu0 %v4424_v37 }
 0x327   : > { %v5173_v39 = vpop.eup %5172  ;;  %2615 = vmatpush.bf16.msra.mxu3 %v4452_v55  ;;  %v4380_v55 = vor.u32 %v4958_v14, %v4377_v16 }
 0x328   : > { %v2058_v10 = vmul.f32 %v5173_v39, %v2052_v7  ;;  %v4428_v39 = vor.u32 %v4970_v58, %v4425_v63  ;;  %v4432_v7 = vor.u32 %v4973_v18, %v4431_v12  ;;  %v4385_v58 = vld [vmem:[%s7462_s5 + $0x38] sm:$0xf0]  ;;  %v4384_v12 = vor.u32 %v4961_v9, %v4383_v54 }
 0x329   : > { %v4388_v18 = vor.u32 %v4959_v56, %v4385_v58 }
 0x32a   : > { %2059 = vst [vmem:[%s6169_s0 + $0x18] sm:$0xff] %v2058_v10  ;;  %v2064_v33 = vpack.c.bf16 %v2058_v10, %v2058_v10  ;;  %v4971_v10 = vld [vmem:[%s7462_s5 + $0x8c] sm:$0xf]  ;;  %2590 = vmatpush.bf16.msra.mxu1 %v4428_v39  ;;  %2603 = vmatpush.bf16.msra.mxu2 %v4432_v7  ;;  %v4359_v39 = vld [vmem:[%s7462_s5] sm:$0xf] }
 0x32b   : > { %2578 = vmatpush.bf16.msra.mxu0 %v4408_v28  ;;  %v4956_v7 = vld [vmem:[%s7462_s5 + $0xc] sm:$0xf0]  ;;  %v4367_v28 = vld [vmem:[%s7462_s5 + $0x8] sm:$0xf] }
 0x32c   : > { %2265 = vmatmul.bf16.vlgmr.msrb.gmra.mxu0 %v2064_v33  ;;  %2278 = vmatmul.bf16.vlgmr.msrb.gmra.mxu1 %v2064_v33  ;;  %v4360_v11 = vor.u32 %v4956_v7, %v4359_v39 }
 0x32d   : > { %2291 = vmatmul.bf16.vlgmr.msrb.gmra.mxu2 %v2064_v33  ;;  %2304 = vmatmul.bf16.vlgmr.msrb.gmra.mxu3 %v2064_v33  ;;  %v4433_v33 = vld [vmem:[%s7462_s5 + $0x98] sm:$0xf0] }
 0x32e   : > { %v4436_v17 = vor.u32 %v4971_v10, %v4433_v33  ;;  %2591 = vmatpush.bf16.msra.mxu1 %v4412_v32  ;;  %2604 = vmatpush.bf16.msra.mxu2 %v4416_v34  ;;  %v4954_v10 = vld [vmem:[%s7462_s5 + $0x4] sm:$0xf]  ;;  %v4369_v32 = vld [vmem:[%s7462_s5 + $0x18] sm:$0xf0] }
 0x32f   : > { %2579 = vmatpush.bf16.msra.mxu0 %v4392_v31  ;;  %v4364_v13 = vor.u32 %v4954_v10, %v4361_v5  ;;  %v4372_v21 = vor.u32 %v4955_v15, %v4369_v32  ;;  %v5014_v15 = vld [vmem:[%s7462_s5 + $0xe4] sm:$0xf] }
 0x330   : > { %2616 = vmatpush.bf16.msra.mxu3 %v4436_v17 }
 0x333   : > { %2580 = vmatpush.bf16.msra.mxu0 %v4376_v49 }
 0x334   : > { %2617 = vmatpush.bf16.msra.mxu3 %v4420_v27 }
 0x337   : > { %2581 = vmatpush.bf16.msra.mxu0 %v4360_v11 }
 0x338   : > { %2618 = vmatpush.bf16.msra.mxu3 %v4404_v26 }
 0x33c   : > { %2619 = vmatpush.bf16.msra.mxu3 %v4388_v18 }
 0x340   : > { %2620 = vmatpush.bf16.msra.mxu3 %v4372_v21  ;;  %v5017_v21 = vld [vmem:[%s7462_s5 + $0xf4] sm:$0xf0] }
 0x3a9   : > { %v2266_v22 = vpop.f32.mrf.mxu0  ;;  %v2279_v25 = vpop.f32.mrf.mxu1 }
 0x3aa   : > { %v2309_v20 = vadd.f32 %v2266_v22, %v5910_v40  ;;  %v2310_v0 = vadd.f32 %v2279_v25, %v5913_v42  ;;  %v4393_v40 = vld [vmem:[%s7462_s5 + $0x50] sm:$0xf0]  ;;  %v4399_v42 = vld [vmem:[%s7462_s5 + $0x48] sm:$0xf] }
 0x3ab   : > { %v4396_v43 = vor.u32 %v4962_v35, %v4393_v40  ;;  %v4400_v36 = vor.u32 %v4965_v38, %v4399_v42 }
 0x3ac   : > { %v4354_v23 = vmul.f32 -1.442695, %v2309_v20  ;;  %v4355_v41 = vmul.f32 -1.442695, %v2310_v0 }
 0x3ad   : > { %2592 = vmatpush.bf16.msra.mxu1 %v4396_v43  ;;  %2605 = vmatpush.bf16.msra.mxu2 %v4400_v36 }
 0x3ae   : > { %5174 = vpow2.f32 %v4354_v23 }
 0x3af   : > { %5176 = vpow2.f32 %v4355_v41 }
 0x3b0   : > { %v2292_v37 = vpop.f32.mrf.mxu2  ;;  %v2305_v63 = vpop.f32.mrf.mxu3 }
 0x3b1   : > { %v2312_v33 = vadd.f32 %v2305_v63, %v5919_v47  ;;  %v2268_v17 = vpop.f32.mrf.mxu0  ;;  %v2281_v52 = vpop.f32.mrf.mxu1  ;;  %2593 = vmatpush.bf16.msra.mxu1 %v4380_v55  ;;  %2606 = vmatpush.bf16.msra.mxu2 %v4384_v12  ;;  %v4368_v47 = vor.u32 %v4957_v4, %v4367_v28  ;;  %v2311_v31 = vadd.f32 %v2292_v37, %v5916_v44 }
 0x3b3   : > { %v4356_v34 = vmul.f32 -1.442695, %v2312_v33 }
 0x3b4   : > { %v5175_v19 = vpop.eup %5174 }
 0x3b5   : > { %v5177_v22 = vpop.eup %5176  ;;  %v2316_v25 = vadd.f32 1.0, %v5175_v19  ;;  %5178 = vpow2.f32 %v4356_v34  ;;  %2594 = vmatpush.bf16.msra.mxu1 %v4364_v13  ;;  %2607 = vmatpush.bf16.msra.mxu2 %v4368_v47  ;;  %v4602_v13 = vld [vmem:[%s7462_s5 + $0xe0] sm:$0xf]  ;;  %v5016_v47 = vld [vmem:[%s7462_s5 + $0xec] sm:$0xf0] }
 0x3b6   : > { %v2335_v27 = vadd.f32 1.0, %v5177_v22  ;;  %v4603_v32 = vor.u32 %v5016_v47, %v4602_v13  ;;  %v4604_v34 = vld [vmem:[%s7462_s5 + $0xf0] sm:$0xf0]  ;;  %v4610_v19 = vld [vmem:[%s7462_s5 + $0xe8] sm:$0xf] }
 0x3b7   : > { %5180 = vrcp.f32 %v2316_v25  ;;  %v2328_v43 = vand.u32 2147483648, %v2316_v25  ;;  %v2326_v46 = vand.u32 2147483647, %v2316_v25  ;;  %vm2322_vm2 = vweird.f32 %v2316_v25  ;;  %v4540_v47 = vld [vmem:[%s7462_s5 + $0x70] sm:$0xf0] }
 0x3b8   : > { %5182 = vrcp.f32 %v2335_v27  ;;  %v2294_v20 = vpop.f32.mrf.mxu2  ;;  %v2307_v0 = vpop.f32.mrf.mxu3  ;;  %v2347_v36 = vand.u32 2147483648, %v2335_v27  ;;  %v2345_v24 = vand.u32 2147483647, %v2335_v27  ;;  %vm2341_vm3 = vweird.f32 %v2335_v27  ;;  %2891 = vmatpush.bf16.msrb.mxu0 %v4603_v32  ;;  %v5001_v32 = vld [vmem:[%s7462_s5 + $0x74] sm:$0xf0] }
 0x3b9   : > { %v2329_v44 = vor.u32 1.1754944e-38, %v2328_v43  ;;  %vm2327_vm6 = vcmp.eq.f32.partialorder %v2326_v46, 8.507059e+37  ;;  %v4607_v22 = vor.u32 %v5014_v15, %v4604_v34  ;;  %v4612_v20 = vld [vmem:[%s7462_s5 + $0xf8] sm:$0xf0]  ;;  %v5011_v43 = vld [vmem:[%s7462_s5 + $0xcc] sm:$0xf] }
 0x3ba   : > { %v2348_v54 = vor.u32 1.1754944e-38, %v2347_v36  ;;  %vm2346_vm7 = vcmp.eq.f32.partialorder %v2345_v24, 8.507059e+37  ;;  %v4596_v36 = vld [vmem:[%s7462_s5 + $0xd8] sm:$0xf0]  ;;  %v4570_v46 = vld [vmem:[%s7462_s5 + $0xa0] sm:$0xf] }
 0x3bb   : > { %v5179_v29 = vpop.eup %5178  ;;  %2904 = vmatpush.bf16.msrb.mxu1 %v4607_v22  ;;  %v5006_v24 = vld [vmem:[%s7462_s5 + $0xa4] sm:$0xf]  ;;  %v4546_v15 = vld [vmem:[%s7462_s5 + $0x68] sm:$0xf]  ;;  %v4548_v22 = vld [vmem:[%s7462_s5 + $0x78] sm:$0xf0] }
 0x3bc   : > { %v2355_v30 = vadd.f32 1.0, %v5179_v29  ;;  %v4586_v29 = vld [vmem:[%s7462_s5 + $0xc0] sm:$0xf] }
 0x3bd   : > { %v5181_v35 = vpop.eup %5180 }
 0x3be   : > { %v5183_v40 = vpop.eup %5182  ;;  %v2318_v42 = vmul.f32 %v5181_v35, %v2316_v25  ;;  %5184 = vrcp.f32 %v2355_v30  ;;  %vm2323_vm0 = vweird.f32 %v5181_v35  ;;  %v2367_v33 = vand.u32 2147483648, %v2355_v30 }
 0x3bf   : > { %v2337_v38 = vmul.f32 %v5183_v40, %v2335_v27  ;;  %5186 = vtanh.f32 %v2311_v31  ;;  %vm2342_vm1 = vweird.f32 %v5183_v40  ;;  %vm2324_vm4 = vmor %vm2322_vm2, %vm2323_vm0  ;;  %vm2361_vm9 = vweird.f32 %v2355_v30  ;;  %v5015_v27 = vld [vmem:[%s7462_s5 + $0xec] sm:$0xf] }
 0x3c0   : > { %v2319_v23 = vsub.f32 1.0, %v2318_v42  ;;  %vm2343_vm5 = vmor %vm2341_vm3, %vm2342_vm1  ;;  %v2365_v17 = vand.u32 2147483647, %v2355_v30  ;;  %v2368_v11 = vor.u32 1.1754944e-38, %v2367_v33  ;;  %v4611_v25 = vor.u32 %v5017_v21, %v4610_v19  ;;  %v4594_v42 = vld [vmem:[%s7462_s5 + $0xc8] sm:$0xf] }
 0x3c1   : > { %v2338_v41 = vsub.f32 1.0, %v2337_v38  ;;  %v4615_v0 = vor.u32 %v5015_v27, %v4612_v20  ;;  %v5013_v38 = vld [vmem:[%s7462_s5 + $0xd4] sm:$0xf0]  ;;  %v4547_v19 = vor.u32 %v5001_v32, %v4546_v15  ;;  %v4999_v21 = vld [vmem:[%s7462_s5 + $0x6c] sm:$0xf] }
 0x3c2   : > { %v2320_v45 = vmul.f32 %v5181_v35, %v2319_v23  ;;  %vm2366_vm11 = vcmp.eq.f32.partialorder %v2365_v17, 8.507059e+37  ;;  %2917 = vmatpush.bf16.msrb.mxu2 %v4611_v25  ;;  %v4551_v20 = vor.u32 %v4999_v21, %v4548_v22 }
 0x3c3   : > { %v2339_v51 = vmul.f32 %v5183_v40, %v2338_v41  ;;  %2930 = vmatpush.bf16.msrb.mxu3 %v4615_v0  ;;  %v4595_v41 = vor.u32 %v5013_v38, %v4594_v42  ;;  %v4997_v42 = vld [vmem:[%s7462_s5 + $0x54] sm:$0xf0] }
 0x3c4   : > { %v5185_v26 = vpop.eup %5184  ;;  %v2321_v49 = vadd.f32 %v5181_v35, %v2320_v45  ;;  %v4599_v45 = vor.u32 %v5011_v43, %v4596_v36  ;;  %v4995_v36 = vld [vmem:[%s7462_s5 + $0x4c] sm:$0xf] }
 0x3c5   : > { %v2340_v14 = vadd.f32 %v5183_v40, %v2339_v51  ;;  %v2357_v16 = vmul.f32 %v5185_v26, %v2355_v30  ;;  %v5187_v9 = vpop.eup %5186  ;;  %vm2362_vm8 = vweird.f32 %v5185_v26  ;;  %v5012_v30 = vld [vmem:[%s7462_s5 + $0xcc] sm:$0xf0] }
 0x3c6   : > { %v2325_v55 = vsel %vm2324_vm4, %v5181_v35, %v2321_v49  ;;  %vm2363_vm10 = vmor %vm2361_vm9, %vm2362_vm8  ;;  %v5010_v35 = vld [vmem:[%s7462_s5 + $0xc4] sm:$0xf]  ;;  %v4587_v31 = vor.u32 %v5012_v30, %v4586_v29  ;;  %2918 = vmatpush.bf16.msrb.mxu2 %v4595_v41  ;;  %v5008_v51 = vld [vmem:[%s7462_s5 + $0xac] sm:$0xf0] }
 0x3c7   : > { %v2330_v56 = vsel %vm2327_vm6, %v2329_v44, %v2325_v55  ;;  %v2344_v58 = vsel %vm2343_vm5, %v5183_v40, %v2340_v14  ;;  %v2358_v37 = vsub.f32 1.0, %v2357_v16  ;;  %v4588_v40 = vld [vmem:[%s7462_s5 + $0xd0] sm:$0xf0]  ;;  %2931 = vmatpush.bf16.msrb.mxu3 %v4599_v45  ;;  %v4578_v44 = vld [vmem:[%s7462_s5 + $0xa8] sm:$0xf] }
 0x3c8   : > { %v2349_v63 = vsel %vm2346_vm7, %v2348_v54, %v2344_v58  ;;  %v2372_v12 = vmul.f32 %v5187_v9, %v2330_v56  ;;  %v4591_v23 = vor.u32 %v5010_v35, %v4588_v40  ;;  %2892 = vmatpush.bf16.msrb.mxu0 %v4587_v31  ;;  %v4572_v49 = vld [vmem:[%s7462_s5 + $0xb0] sm:$0xf0]  ;;  %v5009_v14 = vld [vmem:[%s7462_s5 + $0xb4] sm:$0xf0]  ;;  %v5007_v55 = vld [vmem:[%s7462_s5 + $0xac] sm:$0xf] }
 0x3c9   : > { %v2371_v18 = vmul.f32 %v2349_v63, %v6771_v57  ;;  %v2359_v39 = vmul.f32 %v5185_v26, %v2358_v37  ;;  %v4575_v16 = vor.u32 %v5006_v24, %v4572_v49  ;;  %v4579_v54 = vor.u32 %v5009_v14, %v4578_v44  ;;  %v4580_v9 = vld [vmem:[%s7462_s5 + $0xb8] sm:$0xf0]  ;;  %v4554_v58 = vld [vmem:[%s7462_s5 + $0x80] sm:$0xf]  ;;  %v5004_v37 = vld [vmem:[%s7462_s5 + $0x8c] sm:$0xf0] }
 0x3ca   : > { %2905 = vmatpush.bf16.msrb.mxu1 %v4591_v23  ;;  %v4583_v56 = vor.u32 %v5007_v55, %v4580_v9  ;;  %v5002_v63 = vld [vmem:[%s7462_s5 + $0x84] sm:$0xf]  ;;  %v4522_v30 = vld [vmem:[%s7462_s5 + $0x40] sm:$0xf]  ;;  %v4996_v35 = vld [vmem:[%s7462_s5 + $0x4c] sm:$0xf0] }
 0x3cb   : > { %v6972_v7 = vadd.f32 %v2372_v12, %v2371_v18  ;;  %v2360_v10 = vadd.f32 %v5185_v26, %v2359_v39  ;;  %2919 = vmatpush.bf16.msrb.mxu2 %v4579_v54  ;;  %v4555_v12 = vor.u32 %v5004_v37, %v4554_v58  ;;  %v4556_v18 = vld [vmem:[%s7462_s5 + $0x90] sm:$0xf0]  ;;  %v4562_v39 = vld [vmem:[%s7462_s5 + $0x88] sm:$0xf]  ;;  %v4994_v31 = vld [vmem:[%s7462_s5 + $0x44] sm:$0xf]  ;;  %v4523_v40 = vor.u32 %v4996_v35, %v4522_v30 }
 0x3cc   : > { %2932 = vmatpush.bf16.msrb.mxu3 %v4583_v56  ;;  %v4559_v33 = vor.u32 %v5002_v63, %v4556_v18  ;;  %v4532_v45 = vld [vmem:[%s7462_s5 + $0x58] sm:$0xf0]  ;;  %v4990_v49 = vld [vmem:[%s7462_s5 + $0x24] sm:$0xf]  ;;  %v4508_v44 = vld [vmem:[%s7462_s5 + $0x30] sm:$0xf0] }
 0x3cd   : > { %5188 = vtanh.f32 %v6972_v7  ;;  %v2364_v52 = vsel %vm2363_vm10, %v5185_v26, %v2360_v10  ;;  %v4571_v26 = vor.u32 %v5008_v51, %v4570_v46  ;;  %v5005_v10 = vld [vmem:[%s7462_s5 + $0x94] sm:$0xf0]  ;;  %v4506_v46 = vld [vmem:[%s7462_s5 + $0x20] sm:$0xf]  ;;  %v4992_v51 = vld [vmem:[%s7462_s5 + $0x2c] sm:$0xf0]  ;;  %v4535_v24 = vor.u32 %v4995_v36, %v4532_v45 }
 0x3ce   : > { %v2369_v28 = vsel %vm2366_vm11, %v2368_v11, %v2364_v52  ;;  %2906 = vmatpush.bf16.msrb.mxu1 %v4575_v16  ;;  %v4563_v17 = vor.u32 %v5005_v10, %v4562_v39  ;;  %v5003_v52 = vld [vmem:[%s7462_s5 + $0x8c] sm:$0xf]  ;;  %v4564_v11 = vld [vmem:[%s7462_s5 + $0x98] sm:$0xf0]  ;;  %v4514_v14 = vld [vmem:[%s7462_s5 + $0x28] sm:$0xf]  ;;  %v4511_v16 = vor.u32 %v4990_v49, %v4508_v44 }
 0x3cf   : > { %2893 = vmatpush.bf16.msrb.mxu0 %v4571_v26  ;;  %v4507_v26 = vor.u32 %v4992_v51, %v4506_v46  ;;  %v4993_v54 = vld [vmem:[%s7462_s5 + $0x34] sm:$0xf0]  ;;  %v4991_v55 = vld [vmem:[%s7462_s5 + $0x2c] sm:$0xf]  ;;  %v4516_v9 = vld [vmem:[%s7462_s5 + $0x38] sm:$0xf0] }
 0x3d0   : > { %2920 = vmatpush.bf16.msrb.mxu2 %v4563_v17  ;;  %v4515_v37 = vor.u32 %v4993_v54, %v4514_v14  ;;  %v4519_v63 = vor.u32 %v4991_v55, %v4516_v9  ;;  %v4988_v18 = vld [vmem:[%s7462_s5 + $0xc] sm:$0xf0]  ;;  %v4986_v39 = vld [vmem:[%s7462_s5 + $0x4] sm:$0xf] }
 0x3d2   : > { %2907 = vmatpush.bf16.msrb.mxu1 %v4559_v33 }
 0x3d3   : > { %v5189_v5 = vpop.eup %5188  ;;  %2894 = vmatpush.bf16.msrb.mxu0 %v4555_v12  ;;  %v4490_v12 = vld [vmem:[%s7462_s5] sm:$0xf] }
 0x3d4   : > { %v2375_v4 = vmul.f32 %v5189_v5, %v2369_v28  ;;  %v4567_v5 = vor.u32 %v5003_v52, %v4564_v11  ;;  %v4538_v28 = vld [vmem:[%s7462_s5 + $0x60] sm:$0xf]  ;;  %2921 = vmatpush.bf16.msrb.mxu2 %v4547_v19  ;;  %v4491_v52 = vor.u32 %v4988_v18, %v4490_v12  ;;  %v4492_v11 = vld [vmem:[%s7462_s5 + $0x10] sm:$0xf0] }
 0x3d6   : > { %2376 = vst [vmem:[%s6169_s0 + $0x20] sm:$0xff] %v2375_v4  ;;  %v2381_v57 = vpack.c.bf16 %v2375_v4, %v2375_v4  ;;  %v5000_v4 = vld [vmem:[%s7462_s5 + $0x6c] sm:$0xf0]  ;;  %2933 = vmatpush.bf16.msrb.mxu3 %v4567_v5  ;;  %v4498_v5 = vld [vmem:[%s7462_s5 + $0x8] sm:$0xf] }
 0x3d7   : > { %v4539_v13 = vor.u32 %v5000_v4, %v4538_v28  ;;  %v4989_v28 = vld [vmem:[%s7462_s5 + $0x14] sm:$0xf0]  ;;  %v4495_v4 = vor.u32 %v4986_v39, %v4492_v11  ;;  %v5048_v11 = vld [vmem:[%s7462_s5 + $0xec] sm:$0xf0] }
 0x3d8   : > { %2582 = vmatmul.bf16.vlgmr.msra.gmra.mxu0 %v2381_v57  ;;  %2595 = vmatmul.bf16.vlgmr.msra.gmra.mxu1 %v2381_v57 }
 0x3d9   : > { %2608 = vmatmul.bf16.vlgmr.msra.gmra.mxu2 %v2381_v57  ;;  %2621 = vmatmul.bf16.vlgmr.msra.gmra.mxu3 %v2381_v57  ;;  %v4998_v57 = vld [vmem:[%s7462_s5 + $0x64] sm:$0xf] }
 0x3da   : > { %v4543_v34 = vor.u32 %v4998_v57, %v4540_v47  ;;  %2895 = vmatpush.bf16.msrb.mxu0 %v4539_v13  ;;  %2934 = vmatpush.bf16.msrb.mxu3 %v4551_v20  ;;  %v4987_v57 = vld [vmem:[%s7462_s5 + $0xc] sm:$0xf]  ;;  %v4500_v13 = vld [vmem:[%s7462_s5 + $0x18] sm:$0xf0] }
 0x3db   : > { %v4503_v32 = vor.u32 %v4987_v57, %v4500_v13  ;;  %v5049_v57 = vld [vmem:[%s7462_s5 + $0xf4] sm:$0xf0] }
 0x3dc   : > { %2908 = vmatpush.bf16.msrb.mxu1 %v4543_v34 }
 0x3de   : > { %2896 = vmatpush.bf16.msrb.mxu0 %v4523_v40  ;;  %2935 = vmatpush.bf16.msrb.mxu3 %v4535_v24 }
 0x3e2   : > { %2897 = vmatpush.bf16.msrb.mxu0 %v4507_v26  ;;  %2936 = vmatpush.bf16.msrb.mxu3 %v4519_v63 }
 0x3e6   : > { %2898 = vmatpush.bf16.msrb.mxu0 %v4491_v52  ;;  %2937 = vmatpush.bf16.msrb.mxu3 %v4503_v32  ;;  %v4733_v52 = vld [vmem:[%s7462_s5 + $0xe0] sm:$0xf]  ;;  %v4743_v32 = vld [vmem:[%s7462_s5 + $0xf8] sm:$0xf0] }
 0x455   : > { %v2583_v25 = vpop.f32.mrf.mxu0  ;;  %v2596_v27 = vpop.f32.mrf.mxu1 }
 0x456   : > { %v2626_v0 = vadd.f32 %v2583_v25, %v5922_v48  ;;  %v2627_v29 = vadd.f32 %v2596_v27, %v5925_v50  ;;  %v4524_v48 = vld [vmem:[%s7462_s5 + $0x50] sm:$0xf0]  ;;  %v4530_v50 = vld [vmem:[%s7462_s5 + $0x48] sm:$0xf] }
 0x457   : > { %v4527_v41 = vor.u32 %v4994_v31, %v4524_v48  ;;  %v4531_v43 = vor.u32 %v4997_v42, %v4530_v50 }
 0x458   : > { %v4485_v38 = vmul.f32 -1.442695, %v2626_v0  ;;  %v4486_v23 = vmul.f32 -1.442695, %v2627_v29 }
 0x459   : > { %2909 = vmatpush.bf16.msrb.mxu1 %v4527_v41  ;;  %2922 = vmatpush.bf16.msrb.mxu2 %v4531_v43 }
 0x45a   : > { %5190 = vpow2.f32 %v4485_v38 }
 0x45b   : > { %5192 = vpow2.f32 %v4486_v23 }
 0x45c   : > { %v2609_v56 = vpop.f32.mrf.mxu2  ;;  %v2622_v58 = vpop.f32.mrf.mxu3 }
 0x45d   : > { %v2629_v10 = vadd.f32 %v2622_v58, %v5955_v2  ;;  %v2585_v33 = vpop.f32.mrf.mxu0  ;;  %v2598_v17 = vpop.f32.mrf.mxu1  ;;  %2910 = vmatpush.bf16.msrb.mxu1 %v4511_v16  ;;  %2923 = vmatpush.bf16.msrb.mxu2 %v4515_v37  ;;  %v4499_v2 = vor.u32 %v4989_v28, %v4498_v5  ;;  %v2628_v29 = vadd.f32 %v2609_v56, %v5946_v59  ;;  %v5046_v5 = vld [vmem:[%s7462_s5 + $0xe4] sm:$0xf] }
 0x45e   : > { %v4734_v28 = vor.u32 %v5048_v11, %v4733_v52 }
 0x45f   : > { %v4487_v47 = vmul.f32 -1.442695, %v2629_v10 }
 0x460   : > { %v5191_v15 = vpop.eup %5190  ;;  %3208 = vmatpush.bf16.msra.mxu0 %v4734_v28  ;;  %v4679_v28 = vld [vmem:[%s7462_s5 + $0x78] sm:$0xf0] }
 0x461   : > { %v5193_v34 = vpop.eup %5192  ;;  %v2633_v19 = vadd.f32 1.0, %v5191_v15  ;;  %5194 = vpow2.f32 %v4487_v47  ;;  %2911 = vmatpush.bf16.msrb.mxu1 %v4495_v4  ;;  %2924 = vmatpush.bf16.msrb.mxu2 %v4499_v2  ;;  %v4735_v4 = vld [vmem:[%s7462_s5 + $0xf0] sm:$0xf0]  ;;  %v4741_v2 = vld [vmem:[%s7462_s5 + $0xe8] sm:$0xf] }
 0x462   : > { %v2652_v21 = vadd.f32 1.0, %v5193_v34  ;;  %v4738_v13 = vor.u32 %v5046_v5, %v4735_v4  ;;  %v4742_v47 = vor.u32 %v5049_v57, %v4741_v2  ;;  %v5047_v15 = vld [vmem:[%s7462_s5 + $0xec] sm:$0xf] }
 0x463   : > { %5196 = vrcp.f32 %v2633_v19  ;;  %v2645_v50 = vand.u32 2147483648, %v2633_v19  ;;  %v2643_v23 = vand.u32 2147483647, %v2633_v19  ;;  %vm2639_vm14 = vweird.f32 %v2633_v19  ;;  %v5031_v5 = vld [vmem:[%s7462_s5 + $0x6c] sm:$0xf] }
 0x464   : > { %5198 = vrcp.f32 %v2652_v21  ;;  %v2611_v22 = vpop.f32.mrf.mxu2  ;;  %v2624_v25 = vpop.f32.mrf.mxu3  ;;  %v2664_v42 = vand.u32 2147483648, %v2652_v21  ;;  %v2662_v43 = vand.u32 2147483647, %v2652_v21  ;;  %vm2658_vm15 = vweird.f32 %v2652_v21 }
 0x465   : > { %v2646_v59 = vor.u32 1.1754944e-38, %v2645_v50  ;;  %vm2644_vm2 = vcmp.eq.f32.partialorder %v2643_v23, 8.507059e+37  ;;  %v4746_v34 = vor.u32 %v5047_v15, %v4743_v32  ;;  %3221 = vmatpush.bf16.msra.mxu1 %v4738_v13  ;;  %3234 = vmatpush.bf16.msra.mxu2 %v4742_v47  ;;  %v5042_v22 = vld [vmem:[%s7462_s5 + $0xc4] sm:$0xf]  ;;  %v5040_v50 = vld [vmem:[%s7462_s5 + $0xac] sm:$0xf0]  ;;  %v4682_v57 = vor.u32 %v5031_v5, %v4679_v28 }
 0x466   : > { %v2665_v24 = vor.u32 1.1754944e-38, %v2664_v42  ;;  %vm2663_vm3 = vcmp.eq.f32.partialorder %v2662_v43, 8.507059e+37  ;;  %v5038_v42 = vld [vmem:[%s7462_s5 + $0xa4] sm:$0xf]  ;;  %v4703_v23 = vld [vmem:[%s7462_s5 + $0xb0] sm:$0xf0] }
 0x467   : > { %v5195_v27 = vpop.eup %5194  ;;  %3247 = vmatpush.bf16.msra.mxu3 %v4746_v34  ;;  %v5041_v43 = vld [vmem:[%s7462_s5 + $0xb4] sm:$0xf0]  ;;  %v4653_v15 = vld [vmem:[%s7462_s5 + $0x40] sm:$0xf]  ;;  %v5028_v32 = vld [vmem:[%s7462_s5 + $0x4c] sm:$0xf0] }
 0x468   : > { %v2672_v20 = vadd.f32 1.0, %v5195_v27  ;;  %v4719_v27 = vld [vmem:[%s7462_s5 + $0xd0] sm:$0xf0]  ;;  %v5026_v34 = vld [vmem:[%s7462_s5 + $0x44] sm:$0xf] }
 0x469   : > { %v5197_v0 = vpop.eup %5196 }
 0x46a   : > { %v5199_v30 = vpop.eup %5198  ;;  %v2635_v35 = vmul.f32 %v5197_v0, %v2633_v19  ;;  %5200 = vrcp.f32 %v2672_v20  ;;  %vm2640_vm12 = vweird.f32 %v5197_v0  ;;  %v2684_v63 = vand.u32 2147483648, %v2672_v20  ;;  %v4717_v19 = vld [vmem:[%s7462_s5 + $0xc0] sm:$0xf] }
 0x46b   : > { %v2654_v31 = vmul.f32 %v5199_v30, %v2652_v21  ;;  %5202 = vtanh.f32 %v2628_v29  ;;  %vm2659_vm13 = vweird.f32 %v5199_v30  ;;  %vm2641_vm0 = vmor %vm2639_vm14, %vm2640_vm12  ;;  %vm2678_vm5 = vweird.f32 %v2672_v20  ;;  %v5044_v21 = vld [vmem:[%s7462_s5 + $0xcc] sm:$0xf0] }
 0x46c   : > { %v2636_v40 = vsub.f32 1.0, %v2635_v35  ;;  %vm2660_vm1 = vmor %vm2658_vm15, %vm2659_vm13  ;;  %v2682_v12 = vand.u32 2147483647, %v2672_v20  ;;  %v2685_v39 = vor.u32 1.1754944e-38, %v2684_v63  ;;  %v4718_v25 = vor.u32 %v5044_v21, %v4717_v19  ;;  %v5043_v35 = vld [vmem:[%s7462_s5 + $0xcc] sm:$0xf] }
 0x46d   : > { %v2655_v48 = vsub.f32 1.0, %v2654_v31  ;;  %v4722_v29 = vor.u32 %v5042_v22, %v4719_v27  ;;  %v4727_v31 = vld [vmem:[%s7462_s5 + $0xd8] sm:$0xf0]  ;;  %v4654_v19 = vor.u32 %v5028_v32, %v4653_v15  ;;  %v5029_v21 = vld [vmem:[%s7462_s5 + $0x54] sm:$0xf0] }
 0x46e   : > { %v2637_v38 = vmul.f32 %v5197_v0, %v2636_v40  ;;  %vm2683_vm7 = vcmp.eq.f32.partialorder %v2682_v12, 8.507059e+37  ;;  %3209 = vmatpush.bf16.msra.mxu0 %v4718_v25  ;;  %v4730_v40 = vor.u32 %v5043_v35, %v4727_v31  ;;  %v4669_v12 = vld [vmem:[%s7462_s5 + $0x60] sm:$0xf]  ;;  %v5024_v35 = vld [vmem:[%s7462_s5 + $0x2c] sm:$0xf0] }
 0x46f   : > { %v2656_v41 = vmul.f32 %v5199_v30, %v2655_v48  ;;  %3222 = vmatpush.bf16.msra.mxu1 %v4722_v29  ;;  %v4701_v48 = vld [vmem:[%s7462_s5 + $0xa0] sm:$0xf]  ;;  %v4663_v29 = vld [vmem:[%s7462_s5 + $0x58] sm:$0xf0] }
 0x470   : > { %v5201_v36 = vpop.eup %5200  ;;  %v2638_v45 = vadd.f32 %v5197_v0, %v2637_v38  ;;  %3248 = vmatpush.bf16.msra.mxu3 %v4730_v40  ;;  %v4702_v38 = vor.u32 %v5040_v50, %v4701_v48  ;;  %v5022_v48 = vld [vmem:[%s7462_s5 + $0x24] sm:$0xf]  ;;  %v4639_v50 = vld [vmem:[%s7462_s5 + $0x30] sm:$0xf0] }
 0x471   : > { %v2657_v46 = vadd.f32 %v5199_v30, %v2656_v41  ;;  %v2674_v51 = vmul.f32 %v5201_v36, %v2672_v20  ;;  %v5203_v49 = vpop.eup %5202  ;;  %vm2679_vm4 = vweird.f32 %v5201_v36  ;;  %v4725_v20 = vld [vmem:[%s7462_s5 + $0xc8] sm:$0xf] }
 0x472   : > { %v2642_v26 = vsel %vm2641_vm0, %v5197_v0, %v2638_v45  ;;  %vm2680_vm6 = vmor %vm2678_vm5, %vm2679_vm4  ;;  %v5045_v0 = vld [vmem:[%s7462_s5 + $0xd4] sm:$0xf0]  ;;  %v4709_v41 = vld [vmem:[%s7462_s5 + $0xa8] sm:$0xf]  ;;  %3210 = vmatpush.bf16.msra.mxu0 %v4702_v38  ;;  %v4642_v38 = vor.u32 %v5022_v48, %v4639_v50 }
 0x473   : > { %v2647_v44 = vsel %vm2644_vm2, %v2646_v59, %v2642_v26  ;;  %v2661_v14 = vsel %vm2660_vm1, %v5199_v30, %v2657_v46  ;;  %v2675_v16 = vsub.f32 1.0, %v2674_v51  ;;  %v4726_v30 = vor.u32 %v5045_v0, %v4725_v20  ;;  %v5039_v59 = vld [vmem:[%s7462_s5 + $0xac] sm:$0xf]  ;;  %v4711_v46 = vld [vmem:[%s7462_s5 + $0xb8] sm:$0xf0] }
 0x474   : > { %v2666_v54 = vsel %vm2663_vm3, %v2665_v24, %v2661_v14  ;;  %v2689_v55 = vmul.f32 %v5203_v49, %v2647_v44  ;;  %v4710_v45 = vor.u32 %v5041_v43, %v4709_v41  ;;  %v4714_v51 = vor.u32 %v5039_v59, %v4711_v46  ;;  %v4685_v24 = vld [vmem:[%s7462_s5 + $0x80] sm:$0xf]  ;;  %v5036_v26 = vld [vmem:[%s7462_s5 + $0x8c] sm:$0xf0]  ;;  %v5034_v49 = vld [vmem:[%s7462_s5 + $0x84] sm:$0xf] }
 0x475   : > { %v2688_v9 = vmul.f32 %v2666_v54, %v6972_v7  ;;  %v2676_v56 = vmul.f32 %v5201_v36, %v2675_v16  ;;  %3235 = vmatpush.bf16.msra.mxu2 %v4726_v30  ;;  %v4686_v44 = vor.u32 %v5036_v26, %v4685_v24  ;;  %v4687_v14 = vld [vmem:[%s7462_s5 + $0x90] sm:$0xf0]  ;;  %v4693_v16 = vld [vmem:[%s7462_s5 + $0x88] sm:$0xf]  ;;  %v5037_v54 = vld [vmem:[%s7462_s5 + $0x94] sm:$0xf0] }
 0x476   : > { %3249 = vmatpush.bf16.msra.mxu3 %v4714_v51  ;;  %v5027_v0 = vld [vmem:[%s7462_s5 + $0x4c] sm:$0xf]  ;;  %v4637_v30 = vld [vmem:[%s7462_s5 + $0x20] sm:$0xf]  ;;  %v4647_v43 = vld [vmem:[%s7462_s5 + $0x38] sm:$0xf0] }
 0x477   : > { %v7173_v58 = vadd.f32 %v2689_v55, %v2688_v9  ;;  %v2677_v37 = vadd.f32 %v5201_v36, %v2676_v56  ;;  %v4690_v55 = vor.u32 %v5034_v49, %v4687_v14  ;;  %v4694_v9 = vor.u32 %v5037_v54, %v4693_v16  ;;  %v5035_v56 = vld [vmem:[%s7462_s5 + $0x8c] sm:$0xf]  ;;  %3211 = vmatpush.bf16.msra.mxu0 %v4686_v44  ;;  %v4621_v51 = vld [vmem:[%s7462_s5] sm:$0xf]  ;;  %v5020_v24 = vld [vmem:[%s7462_s5 + $0xc] sm:$0xf0] }
 0x478   : > { %v4666_v31 = vor.u32 %v5027_v0, %v4663_v29  ;;  %v4638_v40 = vor.u32 %v5024_v35, %v4637_v30  ;;  %v5023_v41 = vld [vmem:[%s7462_s5 + $0x2c] sm:$0xf]  ;;  %v5018_v26 = vld [vmem:[%s7462_s5 + $0x4] sm:$0xf]  ;;  %v4622_v16 = vor.u32 %v5020_v24, %v4621_v51  ;;  %v4623_v54 = vld [vmem:[%s7462_s5 + $0x10] sm:$0xf0] }
 0x479   : > { %5204 = vtanh.f32 %v7173_v58  ;;  %v2681_v18 = vsel %vm2680_vm6, %v5201_v36, %v2677_v37  ;;  %v4706_v36 = vor.u32 %v5038_v42, %v4703_v23  ;;  %3236 = vmatpush.bf16.msra.mxu2 %v4710_v45  ;;  %v4695_v37 = vld [vmem:[%s7462_s5 + $0x98] sm:$0xf0]  ;;  %v4645_v42 = vld [vmem:[%s7462_s5 + $0x28] sm:$0xf]  ;;  %v5025_v23 = vld [vmem:[%s7462_s5 + $0x34] sm:$0xf0]  ;;  %v4650_v46 = vor.u32 %v5023_v41, %v4647_v43 }
 0x47a   : > { %v2686_v33 = vsel %vm2683_vm7, %v2685_v39, %v2681_v18  ;;  %v4698_v63 = vor.u32 %v5035_v56, %v4695_v37  ;;  %v5032_v18 = vld [vmem:[%s7462_s5 + $0x6c] sm:$0xf0]  ;;  %v5030_v39 = vld [vmem:[%s7462_s5 + $0x64] sm:$0xf]  ;;  %v4646_v59 = vor.u32 %v5025_v23, %v4645_v42  ;;  %v4626_v56 = vor.u32 %v5018_v26, %v4623_v54  ;;  %v5019_v37 = vld [vmem:[%s7462_s5 + $0xc] sm:$0xf] }
 0x47b   : > { %3223 = vmatpush.bf16.msra.mxu1 %v4706_v36 }
 0x47c   : > { %3250 = vmatpush.bf16.msra.mxu3 %v4698_v63  ;;  %v4631_v63 = vld [vmem:[%s7462_s5 + $0x18] sm:$0xf0] }
 0x47d   : > { %3237 = vmatpush.bf16.msra.mxu2 %v4694_v9  ;;  %v5021_v9 = vld [vmem:[%s7462_s5 + $0x14] sm:$0xf0] }
 0x47f   : > { %v5205_v10 = vpop.eup %5204  ;;  %3224 = vmatpush.bf16.msra.mxu1 %v4690_v55  ;;  %v4629_v55 = vld [vmem:[%s7462_s5 + $0x8] sm:$0xf] }
 0x480   : > { %v2692_v17 = vmul.f32 %v5205_v10, %v2686_v33  ;;  %v4670_v10 = vor.u32 %v5032_v18, %v4669_v12  ;;  %v4671_v33 = vld [vmem:[%s7462_s5 + $0x70] sm:$0xf0]  ;;  %3251 = vmatpush.bf16.msra.mxu3 %v4682_v57 }
 0x481   : > { %v4674_v52 = vor.u32 %v5030_v39, %v4671_v33  ;;  %v4634_v39 = vor.u32 %v5019_v37, %v4631_v63 }
 0x482   : > { %2693 = vst [vmem:[%s6169_s0 + $0x28] sm:$0xff] %v2692_v17  ;;  %v2698_v7 = vpack.c.bf16 %v2692_v17, %v2692_v17  ;;  %v4677_v17 = vld [vmem:[%s7462_s5 + $0x68] sm:$0xf]  ;;  %3212 = vmatpush.bf16.msra.mxu0 %v4670_v10 }
 0x483   : > { %3225 = vmatpush.bf16.msra.mxu1 %v4674_v52 }
 0x484   : > { %2899 = vmatmul.bf16.vlgmr.msrb.gmra.mxu0 %v2698_v7  ;;  %2912 = vmatmul.bf16.vlgmr.msrb.gmra.mxu1 %v2698_v7 }
 0x485   : > { %2925 = vmatmul.bf16.vlgmr.msrb.gmra.mxu2 %v2698_v7  ;;  %2938 = vmatmul.bf16.vlgmr.msrb.gmra.mxu3 %v2698_v7  ;;  %v5033_v7 = vld [vmem:[%s7462_s5 + $0x74] sm:$0xf0] }
 0x486   : > { %v4678_v11 = vor.u32 %v5033_v7, %v4677_v17  ;;  %3213 = vmatpush.bf16.msra.mxu0 %v4654_v19  ;;  %3252 = vmatpush.bf16.msra.mxu3 %v4666_v31 }
 0x488   : > { %3238 = vmatpush.bf16.msra.mxu2 %v4678_v11 }
 0x48a   : > { %3214 = vmatpush.bf16.msra.mxu0 %v4638_v40  ;;  %3253 = vmatpush.bf16.msra.mxu3 %v4650_v46 }
 0x48e   : > { %3215 = vmatpush.bf16.msra.mxu0 %v4622_v16  ;;  %3254 = vmatpush.bf16.msra.mxu3 %v4634_v39 }
 0x501   : > { %v2900_v4 = vpop.f32.mrf.mxu0  ;;  %v2913_v2 = vpop.f32.mrf.mxu1 }
 0x502   : > { %v2943_v13 = vadd.f32 %v2900_v4, %v5958_v3  ;;  %v2944_v47 = vadd.f32 %v2913_v2, %v5961_v8  ;;  %v4655_v3 = vld [vmem:[%s7462_s5 + $0x50] sm:$0xf0]  ;;  %v4661_v8 = vld [vmem:[%s7462_s5 + $0x48] sm:$0xf] }
 0x503   : > { %v4658_v27 = vor.u32 %v5026_v34, %v4655_v3  ;;  %v4662_v20 = vor.u32 %v5029_v21, %v4661_v8 }
 0x504   : > { %v4616_v22 = vmul.f32 -1.442695, %v2943_v13  ;;  %v4617_v25 = vmul.f32 -1.442695, %v2944_v47 }
 0x505   : > { %3226 = vmatpush.bf16.msra.mxu1 %v4658_v27  ;;  %3239 = vmatpush.bf16.msra.mxu2 %v4662_v20 }
 0x506   : > { %5206 = vpow2.f32 %v4616_v22 }
 0x507   : > { %5208 = vpow2.f32 %v4617_v25 }
 0x508   : > { %v2926_v36 = vpop.f32.mrf.mxu2  ;;  %v2939_v45 = vpop.f32.mrf.mxu3 }
 0x509   : > { %v2946_v49 = vadd.f32 %v2939_v45, %v6015_v61  ;;  %v2902_v44 = vpop.f32.mrf.mxu0  ;;  %v2915_v14 = vpop.f32.mrf.mxu1  ;;  %3227 = vmatpush.bf16.msra.mxu1 %v4642_v38  ;;  %3240 = vmatpush.bf16.msra.mxu2 %v4646_v59  ;;  %v4630_v61 = vor.u32 %v5021_v9, %v4629_v55  ;;  %v2945_v4 = vadd.f32 %v2926_v36, %v6006_v53 }
 0x50b   : > { %v4618_v12 = vmul.f32 -1.442695, %v2946_v49 }
 0x50c   : > { %v5207_v18 = vpop.eup %5206 }
 0x50d   : > { %v5209_v10 = vpop.eup %5208  ;;  %v2950_v33 = vadd.f32 1.0, %v5207_v18  ;;  %5210 = vpow2.f32 %v4618_v12  ;;  %3228 = vmatpush.bf16.msra.mxu1 %v4626_v56  ;;  %3241 = vmatpush.bf16.msra.mxu2 %v4630_v61 }
 0x50e   : > { %v2969_v17 = vadd.f32 1.0, %v5209_v10 }
 0x50f   : > { %5212 = vrcp.f32 %v2950_v33  ;;  %v2962_v32 = vand.u32 2147483648, %v2950_v33  ;;  %v2960_v3 = vand.u32 2147483647, %v2950_v33  ;;  %vm2956_vm10 = vweird.f32 %v2950_v33 }
 0x510   : > { %5214 = vrcp.f32 %v2969_v17  ;;  %v2928_v7 = vpop.f32.mrf.mxu2  ;;  %v2941_v52 = vpop.f32.mrf.mxu3  ;;  %v2981_v34 = vand.u32 2147483648, %v2969_v17  ;;  %v2979_v21 = vand.u32 2147483647, %v2969_v17  ;;  %vm2975_vm11 = vweird.f32 %v2969_v17 }
 0x511   : > { %v2963_v53 = vor.u32 1.1754944e-38, %v2962_v32  ;;  %vm2961_vm14 = vcmp.eq.f32.partialorder %v2960_v3, 8.507059e+37 }
 0x512   : > { %v2982_v0 = vor.u32 1.1754944e-38, %v2981_v34  ;;  %vm2980_vm15 = vcmp.eq.f32.partialorder %v2979_v21, 8.507059e+37 }
 0x513   : > { %v5211_v11 = vpop.eup %5210 }
 0x514   : > { %v2989_v5 = vadd.f32 1.0, %v5211_v11 }
 0x515   : > { %v5213_v28 = vpop.eup %5212 }
 0x516   : > { %v5215_v2 = vpop.eup %5214  ;;  %v2952_v57 = vmul.f32 %v5213_v28, %v2950_v33  ;;  %5216 = vrcp.f32 %v2989_v5  ;;  %vm2957_vm8 = vweird.f32 %v5213_v28  ;;  %v3001_v43 = vand.u32 2147483648, %v2989_v5 }
 0x517   : > { %v2971_v13 = vmul.f32 %v5215_v2, %v2969_v17  ;;  %5218 = vtanh.f32 %v2945_v4  ;;  %vm2976_vm9 = vweird.f32 %v5215_v2  ;;  %vm2958_vm12 = vmor %vm2956_vm10, %vm2957_vm8  ;;  %vm2995_vm1 = vweird.f32 %v2989_v5 }
 0x518   : > { %v2953_v47 = vsub.f32 1.0, %v2952_v57  ;;  %vm2977_vm13 = vmor %vm2975_vm11, %vm2976_vm9  ;;  %v2999_v36 = vand.u32 2147483647, %v2989_v5  ;;  %v3002_v59 = vor.u32 1.1754944e-38, %v3001_v43 }
 0x519   : > { %v2972_v15 = vsub.f32 1.0, %v2971_v13 }
 0x51a   : > { %v2954_v19 = vmul.f32 %v5213_v28, %v2953_v47  ;;  %vm3000_vm3 = vcmp.eq.f32.partialorder %v2999_v36, 8.507059e+37 }
 0x51b   : > { %v2973_v8 = vmul.f32 %v5215_v2, %v2972_v15 }
 0x51c   : > { %v5217_v22 = vpop.eup %5216  ;;  %v2955_v25 = vadd.f32 %v5213_v28, %v2954_v19 }
 0x51d   : > { %v2974_v27 = vadd.f32 %v5215_v2, %v2973_v8  ;;  %v2991_v20 = vmul.f32 %v5217_v22, %v2989_v5  ;;  %v5219_v30 = vpop.eup %5218  ;;  %vm2996_vm0 = vweird.f32 %v5217_v22 }
 0x51e   : > { %v2959_v29 = vsel %vm2958_vm12, %v5213_v28, %v2955_v25  ;;  %vm2997_vm2 = vmor %vm2995_vm1, %vm2996_vm0 }
 0x51f   : > { %v2964_v35 = vsel %vm2961_vm14, %v2963_v53, %v2959_v29  ;;  %v2978_v31 = vsel %vm2977_vm13, %v5215_v2, %v2974_v27  ;;  %v2992_v40 = vsub.f32 1.0, %v2991_v20 }
 0x520   : > { %v2983_v48 = vsel %vm2980_vm15, %v2982_v0, %v2978_v31  ;;  %v3006_v50 = vmul.f32 %v5219_v30, %v2964_v35 }
 0x521   : > { %v3005_v42 = vmul.f32 %v2983_v48, %v7173_v58  ;;  %v2993_v38 = vmul.f32 %v5217_v22, %v2992_v40 }
 0x523   : > { %v7374_v23 = vadd.f32 %v3006_v50, %v3005_v42  ;;  %v2994_v41 = vadd.f32 %v5217_v22, %v2993_v38 }
 0x525   : > { %5220 = vtanh.f32 %v7374_v23  ;;  %v2998_v45 = vsel %vm2997_vm2, %v5217_v22, %v2994_v41 }
 0x526   : > { %v3003_v51 = vsel %vm3000_vm3, %v3002_v59, %v2998_v45 }
 0x52b   : > { %v5221_v46 = vpop.eup %5220 }
 0x52c   : > { %v3009_v24 = vmul.f32 %v5221_v46, %v3003_v51 }
 0x52e   : > { %3010 = vst [vmem:[%s6169_s0 + $0x30] sm:$0xff] %v3009_v24  ;;  %v3015_v58 = vpack.c.bf16 %v3009_v24, %v3009_v24 }
 0x530   : > { %3216 = vmatmul.bf16.vlgmr.msra.gmra.mxu0 %v3015_v58  ;;  %3229 = vmatmul.bf16.vlgmr.msra.gmra.mxu1 %v3015_v58 }
 0x531   : > { %3242 = vmatmul.bf16.vlgmr.msra.gmra.mxu2 %v3015_v58  ;;  %3255 = vmatmul.bf16.vlgmr.msra.gmra.mxu3 %v3015_v58 }
 0x5ad   : > { %v3217_v26 = vpop.f32.mrf.mxu0  ;;  %v3230_v49 = vpop.f32.mrf.mxu1 }
 0x5ae   : > { %v3260_v44 = vadd.f32 %v3217_v26, %v6018_v62  ;;  %v3261_v14 = vadd.f32 %v3230_v49, %v6021_v1 }
 0x5b0   : > { %v4747_v16 = vmul.f32 -1.442695, %v3260_v44  ;;  %v4748_v54 = vmul.f32 -1.442695, %v3261_v14 }
 0x5b2   : > { %5222 = vpow2.f32 %v4747_v16 }
 0x5b3   : > { %5224 = vpow2.f32 %v4748_v54 }
 0x5b4   : > { %v3243_v55 = vpop.f32.mrf.mxu2  ;;  %v3256_v9 = vpop.f32.mrf.mxu3 }
 0x5b5   : > { %v3263_v56 = vadd.f32 %v3256_v9, %v6079_v60  ;;  %v3219_v61 = vpop.f32.mrf.mxu0  ;;  %v3232_v37 = vpop.f32.mrf.mxu1  ;;  %v3262_v60 = vadd.f32 %v3243_v55, %v6070_v6 }
 0x5b7   : > { %v4749_v63 = vmul.f32 -1.442695, %v3263_v56 }
 0x5b8   : > { %v5223_v12 = vpop.eup %5222 }
 0x5b9   : > { %v5225_v18 = vpop.eup %5224  ;;  %v3267_v39 = vadd.f32 1.0, %v5223_v12  ;;  %5226 = vpow2.f32 %v4749_v63 }
 0x5ba   : > { %v3286_v10 = vadd.f32 1.0, %v5225_v18 }
 0x5bb   : > { %5228 = vrcp.f32 %v3267_v39  ;;  %v3279_v2 = vand.u32 2147483648, %v3267_v39  ;;  %v3277_v47 = vand.u32 2147483647, %v3267_v39  ;;  %vm3273_vm6 = vweird.f32 %v3267_v39 }
 0x5bc   : > { %5230 = vrcp.f32 %v3286_v10  ;;  %v3245_v62 = vpop.f32.mrf.mxu2  ;;  %v3258_v1 = vpop.f32.mrf.mxu3  ;;  %v3298_v57 = vand.u32 2147483648, %v3286_v10  ;;  %v3296_v6 = vand.u32 2147483647, %v3286_v10  ;;  %vm3292_vm7 = vweird.f32 %v3286_v10 }
 0x5bd   : > { %v3280_v19 = vor.u32 1.1754944e-38, %v3279_v2  ;;  %vm3278_vm10 = vcmp.eq.f32.partialorder %v3277_v47, 8.507059e+37 }
 0x5be   : > { %v3299_v21 = vor.u32 1.1754944e-38, %v3298_v57  ;;  %vm3297_vm11 = vcmp.eq.f32.partialorder %v3296_v6, 8.507059e+37 }
 0x5bf   : > { %v5227_v33 = vpop.eup %5226 }
 0x5c0   : > { %v7381_v17 = vadd.f32 1.0, %v5227_v33 }
 0x5c1   : > { %v5229_v7 = vpop.eup %5228 }
 0x5c2   : > { %v5231_v52 = vpop.eup %5230  ;;  %v3269_v11 = vmul.f32 %v5229_v7, %v3267_v39  ;;  %5232 = vrcp.f32 %v7381_v17  ;;  %vm3274_vm4 = vweird.f32 %v5229_v7  ;;  %v3318_v48 = vand.u32 2147483648, %v7381_v17 }
 0x5c3   : > { %v3288_v5 = vmul.f32 %v5231_v52, %v3286_v10  ;;  %5234 = vtanh.f32 %v3262_v60  ;;  %vm3293_vm5 = vweird.f32 %v5231_v52  ;;  %vm3275_vm8 = vmor %vm3273_vm6, %vm3274_vm4  ;;  %vm3312_vm13 = vweird.f32 %v7381_v17 }
 0x5c4   : > { %v3270_v28 = vsub.f32 1.0, %v3269_v11  ;;  %vm3294_vm9 = vmor %vm3292_vm7, %vm3293_vm5  ;;  %v3316_v50 = vand.u32 2147483647, %v7381_v17 }
 0x5c5   : > { %v3289_v4 = vsub.f32 1.0, %v3288_v5 }
 0x5c6   : > { %v3271_v13 = vmul.f32 %v5229_v7, %v3270_v28 }
 0x5c7   : > { %v3290_v15 = vmul.f32 %v5231_v52, %v3289_v4 }
 0x5c8   : > { %v5233_v32 = vpop.eup %5232  ;;  %v3272_v34 = vadd.f32 %v5229_v7, %v3271_v13 }
 0x5c9   : > { %v3291_v3 = vadd.f32 %v5231_v52, %v3290_v15  ;;  %v3308_v8 = vmul.f32 %v5233_v32, %v7381_v17  ;;  %v5235_v25 = vpop.eup %5234  ;;  %vm3313_vm12 = vweird.f32 %v5233_v32 }
 0x5ca   : > { %v3276_v22 = vsel %vm3275_vm8, %v5229_v7, %v3272_v34 }
 0x5cb   : > { %v3281_v53 = vsel %vm3278_vm10, %v3280_v19, %v3276_v22  ;;  %v3295_v27 = vsel %vm3294_vm9, %v5231_v52, %v3291_v3  ;;  %v3309_v20 = vsub.f32 1.0, %v3308_v8 }
 0x5cc   : > { %v3300_v0 = vsel %vm3297_vm11, %v3299_v21, %v3295_v27  ;;  %v3323_v29 = vmul.f32 %v5235_v25, %v3281_v53 }
 0x5cd   : > { %v3322_v30 = vmul.f32 %v3300_v0, %v7374_v23  ;;  %v3310_v35 = vmul.f32 %v5233_v32, %v3309_v20 }
 0x5cf   : > { %v3324_v31 = vadd.f32 %v3323_v29, %v3322_v30  ;;  %v3311_v40 = vadd.f32 %v5233_v32, %v3310_v35 }
 0x5d1   : > { %5236 = vtanh.f32 %v3324_v31  ;;  %3329 = vst [vmem:[%s371_s14] sm:$0xff] %v3324_v31 }
 0x5d2   : > { %5265 = shalt.err (!%p5262_p5)
}
 0x5d3   : > { %5051 = dma.vmem_to_hbm [thread:$0]  (%p5435_p4), %s3376_s16, 128, %s3378_s24, %s3345_s25   ;;  %vm3314_vm14 = vmor %vm3312_vm13, %vm3313_vm12  ;;  %v3319_v38 = vor.u32 1.1754944e-38, %v3318_v48  ;;  %vm3317_vm15 = vcmp.eq.f32.partialorder %v3316_v50, 8.507059e+37 }
 0x5d4   : > { %s3359_s19 = scalar_lea.hbm %s7464_s7, %s4752_s13  ;;  %v3315_v42 = vsel %vm3314_vm14, %v5233_v32, %v3311_v40  ;;  %s364_s26 = scalar_lea.vmem [#allocation3], %s3550_s21 }
 0x5d5   : > { %s3361_s23 = sshll.u32 %s364_s26, 4  ;;  %s3363_s12 = sshll.u32 %s3359_s19, 4  ;;  %v3320_v41 = vsel %vm3317_vm15, %v3319_v38, %v3315_v42  ;;  %s3362_s23 = int_to_ptr.vmem [resolvable:$true] %s3361_s23  ;;  %s3364_s12 = int_to_ptr.hbm [resolvable:$true] %s3363_s12 }
 0x5d6   : > { %s3340_s30 = scalar_lea.sflag [#allocation4], %s7386_s11  ;;  %s5280_s16 = sshra.s32 %s3364_s12, 4  ;;  %s5281_s16 = int_to_ptr.hbm [resolvable:$true] %s5280_s16 }
 0x5d7   : > { %v5237_v23 = vpop.eup %5236  ;;  %s5282_s24 = scalar_lea.hbm %s5281_s16, 8  ;;  %s5286_s21 = scalar_lea.hbm %s7464_s7, 16 }
 0x5d8   : > { %v3326_v43 = vmul.f32 %v5237_v23, %v3320_v41  ;;  %p5283_p6 = scmp.ne.s32.totalorder %s5281_s16, %s5282_s24  ;;  %p5287_p10 = scmp.lt.s32.totalorder %s5281_s16, %s7464_s7 }
 0x5d9   : > { %p5288_p11 = scmp.lt.s32.totalorder %s5286_s21, %s5282_s24 }
 0x5da   : > { %3327 = vst [vmem:[%s6169_s0 + $0x38] sm:$0xff] %v3326_v43  ;;  %p5284_p7 = pnand %p5283_p6, %p5435_p4 }
 0x5db   : > { %3328 = vst [vmem:[%s364_s26] sm:$0xff] %v3326_v43  ;;  %p5289_p12 = por %p5288_p11, %p5287_p10 }
 0x5dc   : > { %p5285_p9 = pneg %p5284_p7 }
 0x5de   : > { %p5290_p13 = pnand %p5289_p12, %p5285_p9 }
 0x5e0   : > { %5293 = shalt.err (!%p5290_p13)
}
 0x5e1   : > { %5050 = dma.vmem_to_hbm [thread:$0]  (%p5435_p4), %s3362_s23, 128, %s3364_s12, %s3340_s30  }
 0x5e2 PF: > { %p5061_p0 = scmp.ge.s32.totalorder %s5348_s10, 2  ;;  %s3401_s0 = sand.u32 1, %s5328_s27  }
 0x5e3   : > { %s3402_s11 = scalar_lea.sflag [#allocation4], %s3401_s0 }
 0x5e4   : > { %p5055_p1 = pnand %p5061_p0, %p5442_p8 }
 0x5e6   : > { %p5056_p2 = pneg %p5055_p1 }
 0x5e8   : > { %5319 = dma.done.wait (%p5056_p2), %s3402_s11, 128  }
 0x5e9   : > { %5321 = vsyncadd (%p5056_p2), %s3402_s11, 4294967168  ;;  %s3412_s22 = scalar_lea.sflag [#allocation6], %s3401_s0 }
 0x5ea   : > { %5323 = dma.done.wait (%p5056_p2), %s3412_s22, 128  }
 0x5eb   : > { %5325 = vsyncadd (%p5056_p2), %s3412_s22, 4294967168  ;;  %s25_s10 = sadd.s32 1, %s5348_s10   ;;  %s7472_s15 = sld [smem:[#allocation9_spill]] }
 0x5ec   : > { %p22_p3 = scmp.ge.s32.totalorder %s25_s10, 4   ;;  %s7473_s27 = smov %s5332_s28 }
 0x5ed   : > { %s7474_s28 = smov %s5336_s29  ;;  %s7475_s29 = smov %s5448_s18 }
 0x5ee   : > { %s7476_s30 = smov %s5344_s9  ;;  %24 = sbr.rel (!%p22_p3) target bundleno = 8 (0x8), region = 118 }
 0x5f1   : > { %s7477_s9 = smov %s7472_s15 }
 0x5f3   :  { %3418 = vsyncpa [#allocation4], 1 }
 0x5f4   :  { %3420 = vsyncpa [#allocation4 + $0x1], 1 }
 0x5f5   :  { %3421 = vsyncpa [#allocation6], 1 }
 0x5f6   :  { %3423 = vsyncpa [#allocation6 + $0x1], 1 }

</bundles_post_ra>
